<compile_context>
chip_gen: v7x
topology: tpu7x:2x2x1
jax: 0.10.0
libtpu: 0.0.40
codegen_flags: <defaults>
</compile_context>

<pallas_src>
import functools
import math

import jax
import jax.numpy as jnp
from jax.experimental import pallas as pl
from jax.experimental.pallas import tpu as pltpu

MAX_LANE_TILE = 2048                 # max spatial (lane) tile for channel kernels
LANE_TILE_CHOICES = (512, 1024, 2048)
MODE_TILE = 512                      # lane tile for the spectral mode-mix kernel


def _spatial_tiling(n, batch):
    """Pick (padded_n, lane_tile) for the flattened spatial axis of length n."""
    if n <= MAX_LANE_TILE:
        # Single block covering the whole axis is always legal (block == full dim).
        # If batch==1, split spatially so v7x's 2 TensorCores both get grid steps.
        if batch == 1 and n >= 256 and n % 256 == 0:
            return n, n // 2
        return n, n
    best = None
    for t in LANE_TILE_CHOICES:
        n_pad = -(-n // t) * t
        if best is None or n_pad < best[0] or (n_pad == best[0] and t > best[1]):
            best = (n_pad, t)
    return best


def _pad_lanes(x3, n, n_pad):
    if n_pad == n:
        return x3
    return jnp.pad(x3, ((0, 0), (0, 0), (0, n_pad - n)))


# ----------------------------------------------------------------------------- #
# In-kernel elementwise helpers (exact-GELU via polynomial erf; f32 VPU math)     #
# ----------------------------------------------------------------------------- #
def _erf(x):
    # Abramowitz & Stegun 7.1.26, |err| < 1.5e-7. Divide goes to the EUP slot.
    a1, a2, a3, a4, a5 = 0.254829592, -0.284496736, 1.421413741, -1.453152027, 1.061405429
    p = 0.3275911
    s = jnp.where(x >= 0.0, 1.0, -1.0)
    ax = jnp.abs(x)
    t = pl.reciprocal(1.0 + p * ax, approx=True)
    poly = ((((a5 * t + a4) * t + a3) * t + a2) * t + a1) * t
    return s * (1.0 - poly * jnp.exp(-ax * ax))


def _gelu(x):
    # torch.nn.functional.gelu (approximate='none', erf based); f32 VPU math (v5e-safe).
    return 0.5 * x * (1.0 + _erf(x * 0.7071067811865476))


def _wdot(w_ref, x):
    """MXU matmul with bf16 inputs and f32 accumulation."""
    return jnp.dot(w_ref[...], x.astype(w_ref.dtype), preferred_element_type=jnp.float32)


# ------------------------------------------------------------------ #
# Pallas kernel 1: plain 1x1 conv (skip connections)                  #
#   y[cout, n] = Wt[cout, cin] @ x[cin, n]                            #
# ------------------------------------------------------------------ #
def _lin_kernel(x_ref, wt_ref, o_ref):
    y = jnp.dot(wt_ref[...], x_ref[0], preferred_element_type=jnp.float32)
    o_ref[0] = y.astype(o_ref.dtype)


def conv1x1(x, wt):
    """Pointwise (1x1, no-bias) conv over NCHW tensor; bf16 storage, f32 accumulation."""
    b, cin, h, w = x.shape
    cout = wt.shape[0]
    n = h * w
    n_pad, tile = _spatial_tiling(n, b)
    x3 = _pad_lanes(x.reshape(b, cin, n).astype(jnp.bfloat16), n, n_pad)
    out = pl.pallas_call(
        _lin_kernel,
        out_shape=jax.ShapeDtypeStruct((b, cout, n_pad), jnp.bfloat16),
        grid=(b, n_pad // tile),
        in_specs=[
            pl.BlockSpec((1, cin, tile), lambda i, j: (i, 0, j)),
            pl.BlockSpec((cout, cin), lambda i, j: (0, 0)),
        ],
        out_specs=pl.BlockSpec((1, cout, tile), lambda i, j: (i, 0, j)),
        compiler_params=pltpu.CompilerParams(dimension_semantics=("parallel", "parallel")),
    )(x3, wt.astype(jnp.bfloat16))
    return out[:, :, :n].reshape(b, cout, h, w)


# ------------------------------------------------------------------ #
# Pallas kernel 2: fused 2-layer ChannelMLP (lifting / projection)    #
#   y = W2t @ gelu(W1t @ x + b1) + b2                                 #
# ------------------------------------------------------------------ #
def _mlp_kernel(x_ref, w1t_ref, b1_ref, w2t_ref, b2_ref, o_ref):
    x = x_ref[0]                                                   # (Cin, T) bf16
    h = _wdot(w1t_ref, x) + b1_ref[...]
    h = _gelu(h)
    y = _wdot(w2t_ref, h) + b2_ref[...]
    o_ref[0] = y.astype(o_ref.dtype)


def channel_mlp(x, p, out_dtype=jnp.bfloat16):
    b, cin, h, w = x.shape
    chid = p["w1t"].shape[0]
    cout = p["w2t"].shape[0]
    n = h * w
    n_pad, tile = _spatial_tiling(n, b)
    x3 = _pad_lanes(x.reshape(b, cin, n).astype(jnp.bfloat16), n, n_pad)
    out = pl.pallas_call(
        _mlp_kernel,
        out_shape=jax.ShapeDtypeStruct((b, cout, n_pad), out_dtype),
        grid=(b, n_pad // tile),
        in_specs=[
            pl.BlockSpec((1, cin, tile), lambda i, j: (i, 0, j)),
            pl.BlockSpec((chid, cin), lambda i, j: (0, 0)),
            pl.BlockSpec((chid, 1), lambda i, j: (0, 0)),
            pl.BlockSpec((cout, chid), lambda i, j: (0, 0)),
            pl.BlockSpec((cout, 1), lambda i, j: (0, 0)),
        ],
        out_specs=pl.BlockSpec((1, cout, tile), lambda i, j: (i, 0, j)),
        compiler_params=pltpu.CompilerParams(dimension_semantics=("parallel", "parallel")),
    )(x3, p["w1t"], p["b1"].reshape(chid, 1), p["w2t"], p["b2"].reshape(cout, 1))
    return out[:, :, :n].reshape(b, cout, h, w)


# ------------------------------------------------------------------ #
# Pallas kernel 3a: fully-fused FNO-block tail (no resolution change) #
#   xs_fno = Wfsk @ x ; xs_c = Wcsk @ x          (skips in-kernel)    #
#   h  = gelu(x_fno + sc_bias + xs_fno)                               #
#   y  = W2t @ gelu(W1t @ h + b1) + b2 + xs_c                         #
# ------------------------------------------------------------------ #
def _tail_fused_kernel(x_ref, xf_ref, fsk_ref, csk_ref, scb_ref,
                       w1t_ref, b1_ref, w2t_ref, b2_ref, o_ref):
    x = x_ref[0]                                                   # (Cin, T) bf16
    xs_fno = jnp.dot(fsk_ref[...], x, preferred_element_type=jnp.float32)
    xs_c = jnp.dot(csk_ref[...], x, preferred_element_type=jnp.float32)
    h = xf_ref[0] + scb_ref[...] + xs_fno
    h = _gelu(h)
    h = _wdot(w1t_ref, h) + b1_ref[...]
    h = _gelu(h)
    y = _wdot(w2t_ref, h) + b2_ref[...]
    o_ref[0] = (y + xs_c).astype(o_ref.dtype)


def fused_block_tail(x, x_fno, bp):
    b, cin, h, w = x.shape
    cout = bp["fsk_wt"].shape[0]
    p = bp["cmlp"]
    chid = p["w1t"].shape[0]
    n = h * w
    n_pad, tile = _spatial_tiling(n, b)
    x3 = _pad_lanes(x.reshape(b, cin, n).astype(jnp.bfloat16), n, n_pad)
    xf3 = _pad_lanes(x_fno.reshape(b, cout, n).astype(jnp.float32), n, n_pad)
    out = pl.pallas_call(
        _tail_fused_kernel,
        out_shape=jax.ShapeDtypeStruct((b, cout, n_pad), jnp.bfloat16),
        grid=(b, n_pad // tile),
        in_specs=[
            pl.BlockSpec((1, cin, tile), lambda i, j: (i, 0, j)),
            pl.BlockSpec((1, cout, tile), lambda i, j: (i, 0, j)),
            pl.BlockSpec((cout, cin), lambda i, j: (0, 0)),
            pl.BlockSpec((cout, cin), lambda i, j: (0, 0)),
            pl.BlockSpec((cout, 1), lambda i, j: (0, 0)),
            pl.BlockSpec((chid, cout), lambda i, j: (0, 0)),
            pl.BlockSpec((chid, 1), lambda i, j: (0, 0)),
            pl.BlockSpec((cout, chid), lambda i, j: (0, 0)),
            pl.BlockSpec((cout, 1), lambda i, j: (0, 0)),
        ],
        out_specs=pl.BlockSpec((1, cout, tile), lambda i, j: (i, 0, j)),
        compiler_params=pltpu.CompilerParams(dimension_semantics=("parallel", "parallel")),
    )(x3, xf3, bp["fsk_wt"], bp["csk_wt"], bp["sc_bias"].reshape(cout, 1),
      p["w1t"], p["b1"].reshape(chid, 1), p["w2t"], p["b2"].reshape(cout, 1))
    return out[:, :, :n].reshape(b, cout, h, w)


# ------------------------------------------------------------------ #
# Pallas kernel 3b: FNO-block tail with precomputed (resampled) skips #
# ------------------------------------------------------------------ #
def _tail3_kernel(xf_ref, xsf_ref, xsc_ref, scb_ref, w1t_ref, b1_ref, w2t_ref, b2_ref, o_ref):
    h = xf_ref[0] + scb_ref[...] + xsf_ref[0]
    h = _gelu(h)
    h = _wdot(w1t_ref, h) + b1_ref[...]
    h = _gelu(h)
    y = _wdot(w2t_ref, h) + b2_ref[...]
    o_ref[0] = (y + xsc_ref[0]).astype(o_ref.dtype)


def block_tail3(x_fno, xs_fno, xs_c, bp):
    b, cout, h, w = x_fno.shape
    p = bp["cmlp"]
    chid = p["w1t"].shape[0]
    n = h * w
    n_pad, tile = _spatial_tiling(n, b)

    def flat(t):
        return _pad_lanes(t.reshape(b, cout, n).astype(jnp.float32), n, n_pad)

    out = pl.pallas_call(
        _tail3_kernel,
        out_shape=jax.ShapeDtypeStruct((b, cout, n_pad), jnp.bfloat16),
        grid=(b, n_pad // tile),
        in_specs=[
            pl.BlockSpec((1, cout, tile), lambda i, j: (i, 0, j)),
            pl.BlockSpec((1, cout, tile), lambda i, j: (i, 0, j)),
            pl.BlockSpec((1, cout, tile), lambda i, j: (i, 0, j)),
            pl.BlockSpec((cout, 1), lambda i, j: (0, 0)),
            pl.BlockSpec((chid, cout), lambda i, j: (0, 0)),
            pl.BlockSpec((chid, 1), lambda i, j: (0, 0)),
            pl.BlockSpec((cout, chid), lambda i, j: (0, 0)),
            pl.BlockSpec((cout, 1), lambda i, j: (0, 0)),
        ],
        out_specs=pl.BlockSpec((1, cout, tile), lambda i, j: (i, 0, j)),
        compiler_params=pltpu.CompilerParams(dimension_semantics=("parallel", "parallel")),
    )(flat(x_fno), flat(xs_fno), flat(xs_c), bp["sc_bias"].reshape(cout, 1),
      p["w1t"], p["b1"].reshape(chid, 1), p["w2t"], p["b2"].reshape(cout, 1))
    return out[:, :, :n].reshape(b, cout, h, w)


# ------------------------------------------------------------------------- #
# Pallas kernel 4: SpectralConv mode mixing, lane-dense over the mode axis   #
#   y[b,o,m] = sum_i x[b,i,m] * w[o,i,m]   (complex, 4-product form)          #
# ------------------------------------------------------------------------- #
def _cmix_kernel(xr_ref, xi_ref, wr_ref, wi_ref, yr_ref, yi_ref):
    xr = xr_ref[...]                                               # (B, Cin, Mt)
    xi = xi_ref[...]
    wr = wr_ref[...]                                               # (Cout, Cin, Mt)
    wi = wi_ref[...]
    b, cin, mt = xr.shape
    cout = wr.shape[0]
    yr = jnp.zeros((b, cout, mt), jnp.float32)
    yi = jnp.zeros((b, cout, mt), jnp.float32)
    for i in range(cin):                      # small Cin -> unrolled VPU FMAs
        xri = xr[:, i, :][:, None, :]         # (B, 1, Mt)
        xii = xi[:, i, :][:, None, :]
        wri = wr[:, i, :][None, :, :]         # (1, Cout, Mt)
        wii = wi[:, i, :][None, :, :]
        yr = yr + xri * wri - xii * wii
        yi = yi + xri * wii + xii * wri
    yr_ref[...] = yr
    yi_ref[...] = yi


def pallas_mode_mix(xk, wr, wi):
    """xk: complex64 (B, Cin, m1, m2f); wr/wi: f32 (Cout, Cin, M), M = m1*m2f."""
    b, cin, m1, m2 = xk.shape
    cout = wr.shape[0]
    mtot = m1 * m2
    xr = jnp.real(xk).reshape(b, cin, mtot).astype(jnp.float32)
    xi = jnp.imag(xk).reshape(b, cin, mtot).astype(jnp.float32)
    if mtot <= MODE_TILE:
        tile, m_pad = mtot, mtot
    else:
        tile = MODE_TILE
        m_pad = -(-mtot // tile) * tile
    if m_pad != mtot:
        pad = ((0, 0), (0, 0), (0, m_pad - mtot))
        xr, xi = jnp.pad(xr, pad), jnp.pad(xi, pad)
        wr, wi = jnp.pad(wr, pad), jnp.pad(wi, pad)
    yr, yi = pl.pallas_call(
        _cmix_kernel,
        out_shape=(jax.ShapeDtypeStruct((b, cout, m_pad), jnp.float32),
                   jax.ShapeDtypeStruct((b, cout, m_pad), jnp.float32)),
        grid=(m_pad // tile,),
        in_specs=[
            pl.BlockSpec((b, cin, tile), lambda j: (0, 0, j)),
            pl.BlockSpec((b, cin, tile), lambda j: (0, 0, j)),
            pl.BlockSpec((cout, cin, tile), lambda j: (0, 0, j)),
            pl.BlockSpec((cout, cin, tile), lambda j: (0, 0, j)),
        ],
        out_specs=(
            pl.BlockSpec((b, cout, tile), lambda j: (0, 0, j)),
            pl.BlockSpec((b, cout, tile), lambda j: (0, 0, j)),
        ),
        compiler_params=pltpu.CompilerParams(dimension_semantics=("parallel",)),
    )(xr, xi, wr, wi)
    yk = (yr[:, :, :mtot] + 1j * yi[:, :, :mtot]).astype(jnp.complex64)
    return yk.reshape(b, cout, m1, m2)


# ------------------------------------------------------------------ #
# FFT-based glue (no Pallas primitive for FFT; kept in plain JAX/XLA) #
# ------------------------------------------------------------------ #
# TODO(synk): FFT / iFFT / Fourier resampling have no Pallas primitive; XLA FFT is used.
def fourier_resample_2d(x, out_hw):
    """neuralop.layers.resample semantics for 2D (norm='forward'), corner-mode placement."""
    h, w = x.shape[-2], x.shape[-1]
    hn, wn = int(out_hw[0]), int(out_hw[1])
    if (hn, wn) == (h, w):
        return x
    x = x.astype(jnp.float32)
    bsz, c = x.shape[0], x.shape[1]
    xf = jnp.fft.rfft2(x, norm="forward")
    wfn = wn // 2 + 1
    out = jnp.zeros((bsz, c, hn, wfn), dtype=xf.dtype)
    hk = min(hn, h)
    wk = min(wfn, w // 2 + 1)
    hk_lo = hk // 2
    hk_hi = hk - hk_lo
    out = out.at[:, :, :hk_lo, :wk].set(xf[:, :, :hk_lo, :wk])
    out = out.at[:, :, hn - hk_hi:, :wk].set(xf[:, :, h - hk_hi:, :wk])
    return jnp.fft.irfftn(out, s=(hn, wn), axes=(-2, -1), norm="forward")


def spectral_conv(x, wr, wi, n_modes, out_hw):
    """Dense (non-separable) SpectralConv forward, fft_norm='forward', 2D.

    Retained modes are corner slices (classic FNO ordering); the mixed modes are
    placed directly at the corners of the OUTPUT-resolution spectrum, so no
    fftshift/ifftshift passes are needed. Bias is added downstream (fused tail).
    """
    x = x.astype(jnp.float32)
    bsz, cin, h, w = x.shape
    cout = wr.shape[0]
    m1 = n_modes[0]
    m2 = n_modes[1] // 2 + 1
    wf = w // 2 + 1
    out_h, out_w = int(out_hw[0]), int(out_hw[1])
    out_wf = out_w // 2 + 1
    assert h >= m1 and wf >= m2 and out_h >= m1 and out_wf >= m2, \
        "spatial resolution must hold the requested modes"
    m1_pos = m1 - m1 // 2
    m1_neg = m1 // 2
    # TODO(synk): corner-slice mode ordering (classic FNO); self-consistent with this
    # init's flattened weight ordering, may differ from other neuralop versions for
    # ported checkpoints.
    xf = jnp.fft.rfft2(x, norm="forward")
    xk = jnp.concatenate([xf[:, :, :m1_pos, :m2], xf[:, :, h - m1_neg:, :m2]], axis=2)
    yk = pallas_mode_mix(xk, wr, wi)                 # (B, Cout, m1, m2)
    out_fft = jnp.zeros((bsz, cout, out_h, out_wf), dtype=jnp.complex64)
    out_fft = out_fft.at[:, :, :m1_pos, :m2].set(yk[:, :, :m1_pos])
    out_fft = out_fft.at[:, :, out_h - m1_neg:, :m2].set(yk[:, :, m1_pos:])
    return jnp.fft.irfftn(out_fft, s=(out_h, out_w), axes=(-2, -1), norm="forward")


# ------------------------------------------------------------------ #
# UNO building blocks                                                  #
# ------------------------------------------------------------------ #
def fno_block_apply(x, bp, n_modes, scaling, output_shape=None):
    """FNOBlocks (n_layers=1, postactivation, norm=None, channel MLP present)."""
    b, cin, h, w = x.shape
    cout = bp["fsk_wt"].shape[0]
    if output_shape is not None:
        out_hw = (int(output_shape[0]), int(output_shape[1]))
    else:
        out_hw = (int(round(h * scaling[0])), int(round(w * scaling[1])))

    x_fno = spectral_conv(x, bp["sc_wr"], bp["sc_wi"], n_modes, out_hw)   # (B,Cout,H',W') f32

    if out_hw == (h, w):
        # Fully-fused path: both skip branches (fno skip + channel-MLP skip, incl.
        # soft-gating as a diagonal 1x1) and the spectral bias are computed inside
        # the tail kernel -> single read of x, single read of x_fno, single write.
        return fused_block_tail(x, x_fno, bp)

    # Resampling path: one stacked conv produces both skips, one Fourier resample
    # moves both to the output resolution, then the 3-stream tail kernel.
    xs2 = conv1x1(x, bp["skip2_wt"])                  # (B, 2*Cout, H, W) bf16
    xs2 = fourier_resample_2d(xs2, out_hw)            # (B, 2*Cout, H', W') f32
    xs_fno = xs2[:, :cout]
    xs_c = xs2[:, cout:]
    return block_tail3(x_fno, xs_fno, xs_c, bp)


def uno_forward(params, x, cfg):
    n_layers = cfg["n_layers"]
    skips_map = cfg["skips_map"]
    bsz, _, h, w = x.shape

    # GridEmbeddingND ('grid', boundaries [[0,1],[0,1]]): append linspace(0,1,n+1)[:-1] grids
    gx = jnp.arange(h, dtype=jnp.float32) / h
    gy = jnp.arange(w, dtype=jnp.float32) / w
    grid_x = jnp.broadcast_to(gx[:, None], (h, w))
    grid_y = jnp.broadcast_to(gy[None, :], (h, w))
    pos = jnp.broadcast_to(jnp.stack([grid_x, grid_y])[None], (bsz, 2, h, w))
    x = jnp.concatenate([x.astype(jnp.float32), pos], axis=1)

    # lifting ChannelMLP (fused Pallas kernel), bf16 activation storage
    x = channel_mlp(x, params["lifting"], out_dtype=jnp.bfloat16)

    e2e = cfg["end_to_end_scaling"]
    output_shape = [int(round(h * e2e[0])), int(round(w * e2e[1]))]

    skip_outputs = {}
    for layer_idx in range(n_layers):
        if layer_idx in skips_map:
            skip_val = skip_outputs[skips_map[layer_idx]]
            factors = [x.shape[-2] / skip_val.shape[-2], x.shape[-1] / skip_val.shape[-1]]
            new_hw = (int(round(skip_val.shape[-2] * factors[0])),
                      int(round(skip_val.shape[-1] * factors[1])))
            t = fourier_resample_2d(skip_val, new_hw).astype(jnp.bfloat16)
            x = jnp.concatenate([x, t], axis=1)
        cur_output = output_shape if layer_idx == n_layers - 1 else None
        x = fno_block_apply(
            x,
            params["blocks"][layer_idx],
            cfg["uno_n_modes"][layer_idx],
            cfg["uno_scalings"][layer_idx],
            cur_output,
        )
        if layer_idx in cfg["skip_src_layers"]:
            skip_outputs[layer_idx] = conv1x1(x, params["hskips"][layer_idx])

    # projection ChannelMLP (fused Pallas kernel), final output in f32
    x = channel_mlp(x, params["projection"], out_dtype=jnp.float32)
    return x


# ------------------------------------------------------------------ #
# Deterministic synthetic parameter initialization                    #
# (weights stored pre-transposed / pre-flattened for the kernels;     #
#  matmul weights in bf16, biases & spectral weights in f32)          #
# ------------------------------------------------------------------ #
def init_uno_params(key, cfg):
    in_ch = cfg["in_channels"] + 2  # +2 grid-embedding channels (n_dim = 2)
    hid = cfg["hidden_channels"]
    lift = cfg["lifting_channels"]
    proj = cfg["projection_channels"]
    out_ch = cfg["out_channels"]
    n_layers = cfg["n_layers"]
    uno_out = cfg["uno_out_channels"]
    n_modes = cfg["uno_n_modes"]
    skips_map = cfg["skips_map"]

    keys = jax.random.split(key, 128)
    kidx = iter(range(128))

    def nk():
        return keys[next(kidx)]

    def lin_t(cin, cout):
        # stored as (cout, cin): kernels compute Wt @ X directly (lane-dense output)
        w = jax.random.normal(nk(), (cout, cin), jnp.float32) * (1.0 / math.sqrt(cin))
        return w.astype(jnp.bfloat16)

    def vec(c):
        return jax.random.normal(nk(), (c,), jnp.float32) * (1.0 / math.sqrt(c))

    def mlp(cin, chid, cout):
        return dict(w1t=lin_t(cin, chid), b1=vec(chid), w2t=lin_t(chid, cout), b2=vec(cout))

    params = {"lifting": mlp(in_ch, lift, hid)}

    blocks = []
    hskips = {}
    skip_srcs = set(skips_map.values())
    prev = hid
    for i in range(n_layers):
        cin = prev + (uno_out[skips_map[i]] if i in skips_map else 0)
        cout = uno_out[i]
        m1 = n_modes[i][0]
        m2 = n_modes[i][1] // 2 + 1
        std = math.sqrt(2.0 / (cin + cout))
        fsk = lin_t(cin, cout)
        if cin == cout:
            # SoftGating (ones init, no bias) expressed as a diagonal 1x1 so it fuses
            # into the tail kernel / stacked skip conv (no standalone XLA elementwise).
            csk = jnp.eye(cout, dtype=jnp.bfloat16)
        else:
            # TODO(synk): reference defaults channel_mlp_skip='soft-gating', which requires
            # in_channels == out_channels; for U-shaped blocks with concatenated skips we
            # substitute a linear 1x1 skip (no bias).
            csk = lin_t(cin, cout)
        bp = {
            # spectral weights pre-flattened to (cout, cin, modes): lane-dense mode axis
            "sc_wr": jax.random.normal(nk(), (cout, cin, m1 * m2), jnp.float32) * std,
            "sc_wi": jax.random.normal(nk(), (cout, cin, m1 * m2), jnp.float32) * std,
            "sc_bias": jax.random.normal(nk(), (cout,), jnp.float32) * std,
            "fsk_wt": fsk,
            "csk_wt": csk,
            "skip2_wt": jnp.concatenate([fsk, csk], axis=0),    # (2*cout, cin) stacked skips
            "cmlp": mlp(cout, int(round(cout * cfg["channel_mlp_expansion"])), cout),
        }
        blocks.append(bp)
        if i in skip_srcs:
            hskips[i] = lin_t(cout, cout)
        prev = cout

    params["blocks"] = blocks
    params["hskips"] = hskips
    params["projection"] = mlp(prev, proj, out_ch)
    return params


# ------------------------------------------------------------------ #
if __name__ == "__main__":
    cfg = dict(
        in_channels=3,
        out_channels=1,
        hidden_channels=8,
        lifting_channels=16,
        projection_channels=16,
        n_layers=4,
        uno_out_channels=[8, 8, 8, 8],
        uno_n_modes=[[4, 4], [4, 4], [4, 4], [4, 4]],
        uno_scalings=[[1.0, 1.0], [0.5, 0.5], [1.0, 1.0], [2.0, 2.0]],
        channel_mlp_expansion=0.5,
    )
    n_layers = cfg["n_layers"]
    # default horizontal skip map: {n_layers-i-1: i} for i in range(n_layers//2)  -> {3:0, 2:1}
    skips_map = {n_layers - i - 1: i for i in range(n_layers // 2)}
    cfg["skips_map"] = skips_map
    cfg["skip_src_layers"] = set(skips_map.values())
    e2e = [1.0, 1.0]
    for s in cfg["uno_scalings"]:
        e2e = [a * b for a, b in zip(e2e, s)]
    cfg["end_to_end_scaling"] = e2e

    key = jax.random.PRNGKey(0)
    pkey, xkey = jax.random.split(key)
    params = init_uno_params(pkey, cfg)

    x = jax.random.normal(xkey, (2, 3, 16, 16), jnp.float32)  # NCHW, like PyTorch

    fwd = jax.jit(functools.partial(uno_forward, cfg=cfg))
    y = fwd(params, x)
    y = jax.block_until_ready(y)

    assert y.shape == (2, 1, 16, 16), f"unexpected output shape {y.shape}"
    assert bool(jnp.all(jnp.isfinite(y))), "non-finite values in output"
    print("KERNEL_OK")
</pallas_src>

<mosaic_0001>
module attributes {stable_mosaic.version = 11 : i64} {
  func.func @_mlp_kernel(%arg0: i32, %arg1: i32, %arg2: memref<1x5x256xbf16, #tpu.memory_space<vmem>>, %arg3: memref<16x5xbf16, #tpu.memory_space<vmem>>, %arg4: memref<16x1xf32, #tpu.memory_space<vmem>>, %arg5: memref<8x16xbf16, #tpu.memory_space<vmem>>, %arg6: memref<8x1xf32, #tpu.memory_space<vmem>>, %arg7: memref<1x8x256xbf16, #tpu.memory_space<vmem>>) attributes {dimension_semantics = [#tpu.dimension_semantics<parallel>, #tpu.dimension_semantics<parallel>], iteration_bounds = array<i64: 2, 1>, scalar_prefetch = 0 : i64, scratch_operands = 0 : i64, tpu.core_type = #tpu.core_type<tc>, window_params = [{transform_indices = @transform_0, window_bounds = array<i64: 1, 5, 256>}, {pipeline_mode = #tpu.pipeline_mode<synchronous>, transform_indices = @transform_1, window_bounds = array<i64: 16, 5>}, {pipeline_mode = #tpu.pipeline_mode<synchronous>, transform_indices = @transform_2, window_bounds = array<i64: 16, 1>}, {pipeline_mode = #tpu.pipeline_mode<synchronous>, transform_indices = @transform_3, window_bounds = array<i64: 8, 16>}, {pipeline_mode = #tpu.pipeline_mode<synchronous>, transform_indices = @transform_4, window_bounds = array<i64: 8, 1>}, {transform_indices = @transform_5, window_bounds = array<i64: 1, 8, 256>}]} {
    %c0 = arith.constant 0 : index
    %c0_0 = arith.constant 0 : index
    %c0_1 = arith.constant 0 : index
    %0 = vector.load %arg2[%c0, %c0_0, %c0_1] : memref<1x5x256xbf16, #tpu.memory_space<vmem>>, vector<1x5x256xbf16>
    %1 = vector.shape_cast %0 : vector<1x5x256xbf16> to vector<5x256xbf16>
    %c0_2 = arith.constant 0 : index
    %c0_3 = arith.constant 0 : index
    %2 = vector.load %arg3[%c0_2, %c0_3] : memref<16x5xbf16, #tpu.memory_space<vmem>>, vector<16x5xbf16>
    %cst = arith.constant dense<0.000000e+00> : vector<16x256xf32>
    %3 = tpu.matmul %2, %1, %cst {dimension_numbers = #tpu.dot_dimension_numbers<[1], [0], [0], [1], [0, 0, 1, 1], [], []>} : vector<16x5xbf16>, vector<5x256xbf16>, vector<16x256xf32> -> vector<16x256xf32>
    %c0_4 = arith.constant 0 : index
    %c0_5 = arith.constant 0 : index
    %4 = vector.load %arg4[%c0_4, %c0_5] : memref<16x1xf32, #tpu.memory_space<vmem>>, vector<16x1xf32>
    %5 = vector.broadcast %4 : vector<16x1xf32> to vector<16x256xf32>
    %6 = arith.addf %3, %5 : vector<16x256xf32>
    %cst_6 = arith.constant 5.000000e-01 : f32
    %7 = vector.broadcast %cst_6 : f32 to vector<16x256xf32>
    %8 = arith.mulf %7, %6 : vector<16x256xf32>
    %cst_7 = arith.constant 0.707106769 : f32
    %9 = vector.broadcast %cst_7 : f32 to vector<16x256xf32>
    %10 = arith.mulf %6, %9 : vector<16x256xf32>
    %cst_8 = arith.constant 0.000000e+00 : f32
    %11 = vector.broadcast %cst_8 : f32 to vector<16x256xf32>
    %12 = arith.cmpf oge, %10, %11 : vector<16x256xf32>
    %cst_9 = arith.constant 1.000000e+00 : f32
    %cst_10 = arith.constant -1.000000e+00 : f32
    %13 = vector.broadcast %cst_9 : f32 to vector<16x256xf32>
    %14 = vector.broadcast %cst_10 : f32 to vector<16x256xf32>
    %15 = arith.select %12, %13, %14 : vector<16x256xi1>, vector<16x256xf32>
    %16 = math.absf %10 : vector<16x256xf32>
    %cst_11 = arith.constant 0.327591091 : f32
    %17 = vector.broadcast %cst_11 : f32 to vector<16x256xf32>
    %18 = arith.mulf %17, %16 : vector<16x256xf32>
    %cst_12 = arith.constant 1.000000e+00 : f32
    %19 = vector.broadcast %cst_12 : f32 to vector<16x256xf32>
    %20 = arith.addf %19, %18 : vector<16x256xf32>
    %21 = tpu.reciprocal %20 {approx = true} : vector<16x256xf32> -> vector<16x256xf32>
    %cst_13 = arith.constant 1.06140542 : f32
    %22 = vector.broadcast %cst_13 : f32 to vector<16x256xf32>
    %23 = arith.mulf %22, %21 : vector<16x256xf32>
    %cst_14 = arith.constant -1.45315206 : f32
    %24 = vector.broadcast %cst_14 : f32 to vector<16x256xf32>
    %25 = arith.addf %23, %24 : vector<16x256xf32>
    %26 = arith.mulf %25, %21 : vector<16x256xf32>
    %cst_15 = arith.constant 1.42141378 : f32
    %27 = vector.broadcast %cst_15 : f32 to vector<16x256xf32>
    %28 = arith.addf %26, %27 : vector<16x256xf32>
    %29 = arith.mulf %28, %21 : vector<16x256xf32>
    %cst_16 = arith.constant -0.284496725 : f32
    %30 = vector.broadcast %cst_16 : f32 to vector<16x256xf32>
    %31 = arith.addf %29, %30 : vector<16x256xf32>
    %32 = arith.mulf %31, %21 : vector<16x256xf32>
    %cst_17 = arith.constant 0.254829586 : f32
    %33 = vector.broadcast %cst_17 : f32 to vector<16x256xf32>
    %34 = arith.addf %32, %33 : vector<16x256xf32>
    %35 = arith.mulf %34, %21 : vector<16x256xf32>
    %cst_18 = arith.constant 0.000000e+00 : f32
    %36 = vector.broadcast %cst_18 : f32 to vector<16x256xf32>
    %37 = arith.subf %36, %16 : vector<16x256xf32>
    %38 = arith.mulf %37, %16 : vector<16x256xf32>
    %39 = math.exp %38 : vector<16x256xf32>
    %40 = arith.mulf %35, %39 : vector<16x256xf32>
    %cst_19 = arith.constant 1.000000e+00 : f32
    %41 = vector.broadcast %cst_19 : f32 to vector<16x256xf32>
    %42 = arith.subf %41, %40 : vector<16x256xf32>
    %43 = arith.mulf %15, %42 : vector<16x256xf32>
    %cst_20 = arith.constant 1.000000e+00 : f32
    %44 = vector.broadcast %cst_20 : f32 to vector<16x256xf32>
    %45 = arith.addf %44, %43 : vector<16x256xf32>
    %46 = arith.mulf %8, %45 : vector<16x256xf32>
    %c0_21 = arith.constant 0 : index
    %c0_22 = arith.constant 0 : index
    %47 = vector.load %arg5[%c0_21, %c0_22] : memref<8x16xbf16, #tpu.memory_space<vmem>>, vector<8x16xbf16>
    %48 = arith.truncf %46 : vector<16x256xf32> to vector<16x256xbf16>
    %cst_23 = arith.constant dense<0.000000e+00> : vector<8x256xf32>
    %49 = tpu.matmul %47, %48, %cst_23 {dimension_numbers = #tpu.dot_dimension_numbers<[1], [0], [0], [1], [0, 0, 1, 1], [], []>} : vector<8x16xbf16>, vector<16x256xbf16>, vector<8x256xf32> -> vector<8x256xf32>
    %c0_24 = arith.constant 0 : index
    %c0_25 = arith.constant 0 : index
    %50 = vector.load %arg6[%c0_24, %c0_25] : memref<8x1xf32, #tpu.memory_space<vmem>>, vector<8x1xf32>
    %51 = vector.broadcast %50 : vector<8x1xf32> to vector<8x256xf32>
    %52 = arith.addf %49, %51 : vector<8x256xf32>
    %53 = arith.truncf %52 : vector<8x256xf32> to vector<8x256xbf16>
    %c0_26 = arith.constant 0 : index
    %c0_27 = arith.constant 0 : index
    %c0_28 = arith.constant 0 : index
    %54 = vector.load %arg7[%c0_26, %c0_27, %c0_28] : memref<1x8x256xbf16, #tpu.memory_space<vmem>>, vector<1x8x256xbf16>
    %55 = vector.shape_cast %54 : vector<1x8x256xbf16> to vector<8x256xbf16>
    %56 = vector.shape_cast %53 : vector<8x256xbf16> to vector<1x8x256xbf16>
    tpu.vector_store %arg7[%c0_26, %c0_27, %c0_28], %56 {strides = array<i32>} : memref<1x8x256xbf16, #tpu.memory_space<vmem>>, vector<1x8x256xbf16>,
    return
  }
  func.func @transform_0(%arg0: i32, %arg1: i32) -> (i32, i32, i32) {
    %c0_i32 = arith.constant 0 : i32
    %c0_i32_0 = arith.constant 0 : i32
    return %arg0, %c0_i32, %arg1 : i32, i32, i32
  }
  func.func @transform_1(%arg0: i32, %arg1: i32) -> (i32, i32) {
    %c0_i32 = arith.constant 0 : i32
    %c0_i32_0 = arith.constant 0 : i32
    %c0_i32_1 = arith.constant 0 : i32
    return %c0_i32, %c0_i32_0 : i32, i32
  }
  func.func @transform_2(%arg0: i32, %arg1: i32) -> (i32, i32) {
    %c0_i32 = arith.constant 0 : i32
    %c0_i32_0 = arith.constant 0 : i32
    %c0_i32_1 = arith.constant 0 : i32
    return %c0_i32, %c0_i32_0 : i32, i32
  }
  func.func @transform_3(%arg0: i32, %arg1: i32) -> (i32, i32) {
    %c0_i32 = arith.constant 0 : i32
    %c0_i32_0 = arith.constant 0 : i32
    %c0_i32_1 = arith.constant 0 : i32
    return %c0_i32, %c0_i32_0 : i32, i32
  }
  func.func @transform_4(%arg0: i32, %arg1: i32) -> (i32, i32) {
    %c0_i32 = arith.constant 0 : i32
    %c0_i32_0 = arith.constant 0 : i32
    %c0_i32_1 = arith.constant 0 : i32
    return %c0_i32, %c0_i32_0 : i32, i32
  }
  func.func @transform_5(%arg0: i32, %arg1: i32) -> (i32, i32, i32) {
    %c0_i32 = arith.constant 0 : i32
    %c0_i32_0 = arith.constant 0 : i32
    return %arg0, %c0_i32, %arg1 : i32, i32, i32
  }
}

module attributes {stable_mosaic.version = 11 : i64} {
  func.func @_cmix_kernel(%arg0: i32, %arg1: memref<2x8x12xf32, #tpu.memory_space<vmem>>, %arg2: memref<2x8x12xf32, #tpu.memory_space<vmem>>, %arg3: memref<8x8x12xf32, #tpu.memory_space<vmem>>, %arg4: memref<8x8x12xf32, #tpu.memory_space<vmem>>, %arg5: memref<2x8x12xf32, #tpu.memory_space<vmem>>, %arg6: memref<2x8x12xf32, #tpu.memory_space<vmem>>) attributes {dimension_semantics = [#tpu.dimension_semantics<parallel>], iteration_bounds = array<i64: 1>, scalar_prefetch = 0 : i64, scratch_operands = 0 : i64, tpu.core_type = #tpu.core_type<tc>, window_params = [{transform_indices = @transform_0, window_bounds = array<i64: 2, 8, 12>}, {transform_indices = @transform_1, window_bounds = array<i64: 2, 8, 12>}, {transform_indices = @transform_2, window_bounds = array<i64: 8, 8, 12>}, {transform_indices = @transform_3, window_bounds = array<i64: 8, 8, 12>}, {transform_indices = @transform_4, window_bounds = array<i64: 2, 8, 12>}, {transform_indices = @transform_5, window_bounds = array<i64: 2, 8, 12>}]} {
    %c0 = arith.constant 0 : index
    %c0_0 = arith.constant 0 : index
    %c0_1 = arith.constant 0 : index
    %0 = vector.load %arg1[%c0, %c0_0, %c0_1] : memref<2x8x12xf32, #tpu.memory_space<vmem>>, vector<2x8x12xf32>
    %c0_2 = arith.constant 0 : index
    %c0_3 = arith.constant 0 : index
    %c0_4 = arith.constant 0 : index
    %1 = vector.load %arg2[%c0_2, %c0_3, %c0_4] : memref<2x8x12xf32, #tpu.memory_space<vmem>>, vector<2x8x12xf32>
    %c0_5 = arith.constant 0 : index
    %c0_6 = arith.constant 0 : index
    %c0_7 = arith.constant 0 : index
    %2 = vector.load %arg3[%c0_5, %c0_6, %c0_7] : memref<8x8x12xf32, #tpu.memory_space<vmem>>, vector<8x8x12xf32>
    %c0_8 = arith.constant 0 : index
    %c0_9 = arith.constant 0 : index
    %c0_10 = arith.constant 0 : index
    %3 = vector.load %arg4[%c0_8, %c0_9, %c0_10] : memref<8x8x12xf32, #tpu.memory_space<vmem>>, vector<8x8x12xf32>
    %cst = arith.constant 0.000000e+00 : f32
    %4 = vector.broadcast %cst : f32 to vector<2x8x12xf32>
    %cst_11 = arith.constant 0.000000e+00 : f32
    %5 = vector.broadcast %cst_11 : f32 to vector<2x8x12xf32>
    %6 = vector.extract_strided_slice %0 {offsets = [0, 0, 0], sizes = [2, 1, 12], strides = [1, 1, 1]} : vector<2x8x12xf32> to vector<2x1x12xf32>
    %7 = vector.shape_cast %6 : vector<2x1x12xf32> to vector<2x12xf32>
    %8 = vector.shape_cast %7 : vector<2x12xf32> to vector<2x1x12xf32>
    %9 = vector.extract_strided_slice %1 {offsets = [0, 0, 0], sizes = [2, 1, 12], strides = [1, 1, 1]} : vector<2x8x12xf32> to vector<2x1x12xf32>
    %10 = vector.shape_cast %9 : vector<2x1x12xf32> to vector<2x12xf32>
    %11 = vector.shape_cast %10 : vector<2x12xf32> to vector<2x1x12xf32>
    %12 = vector.extract_strided_slice %2 {offsets = [0, 0, 0], sizes = [8, 1, 12], strides = [1, 1, 1]} : vector<8x8x12xf32> to vector<8x1x12xf32>
    %13 = vector.shape_cast %12 : vector<8x1x12xf32> to vector<8x12xf32>
    %14 = vector.shape_cast %13 : vector<8x12xf32> to vector<1x8x12xf32>
    %15 = vector.extract_strided_slice %3 {offsets = [0, 0, 0], sizes = [8, 1, 12], strides = [1, 1, 1]} : vector<8x8x12xf32> to vector<8x1x12xf32>
    %16 = vector.shape_cast %15 : vector<8x1x12xf32> to vector<8x12xf32>
    %17 = vector.shape_cast %16 : vector<8x12xf32> to vector<1x8x12xf32>
    %18 = vector.broadcast %8 : vector<2x1x12xf32> to vector<2x8x12xf32>
    %19 = vector.broadcast %14 : vector<1x8x12xf32> to vector<2x8x12xf32>
    %20 = arith.mulf %18, %19 : vector<2x8x12xf32>
    %21 = arith.addf %4, %20 : vector<2x8x12xf32>
    %22 = vector.broadcast %11 : vector<2x1x12xf32> to vector<2x8x12xf32>
    %23 = vector.broadcast %17 : vector<1x8x12xf32> to vector<2x8x12xf32>
    %24 = arith.mulf %22, %23 : vector<2x8x12xf32>
    %25 = arith.subf %21, %24 : vector<2x8x12xf32>
    %26 = vector.broadcast %8 : vector<2x1x12xf32> to vector<2x8x12xf32>
    %27 = vector.broadcast %17 : vector<1x8x12xf32> to vector<2x8x12xf32>
    %28 = arith.mulf %26, %27 : vector<2x8x12xf32>
    %29 = arith.addf %5, %28 : vector<2x8x12xf32>
    %30 = vector.broadcast %11 : vector<2x1x12xf32> to vector<2x8x12xf32>
    %31 = vector.broadcast %14 : vector<1x8x12xf32> to vector<2x8x12xf32>
    %32 = arith.mulf %30, %31 : vector<2x8x12xf32>
    %33 = arith.addf %29, %32 : vector<2x8x12xf32>
    %34 = vector.extract_strided_slice %0 {offsets = [0, 1, 0], sizes = [2, 1, 12], strides = [1, 1, 1]} : vector<2x8x12xf32> to vector<2x1x12xf32>
    %35 = vector.shape_cast %34 : vector<2x1x12xf32> to vector<2x12xf32>
    %36 = vector.shape_cast %35 : vector<2x12xf32> to vector<2x1x12xf32>
    %37 = vector.extract_strided_slice %1 {offsets = [0, 1, 0], sizes = [2, 1, 12], strides = [1, 1, 1]} : vector<2x8x12xf32> to vector<2x1x12xf32>
    %38 = vector.shape_cast %37 : vector<2x1x12xf32> to vector<2x12xf32>
    %39 = vector.shape_cast %38 : vector<2x12xf32> to vector<2x1x12xf32>
    %40 = vector.extract_strided_slice %2 {offsets = [0, 1, 0], sizes = [8, 1, 12], strides = [1, 1, 1]} : vector<8x8x12xf32> to vector<8x1x12xf32>
    %41 = vector.shape_cast %40 : vector<8x1x12xf32> to vector<8x12xf32>
    %42 = vector.shape_cast %41 : vector<8x12xf32> to vector<1x8x12xf32>
    %43 = vector.extract_strided_slice %3 {offsets = [0, 1, 0], sizes = [8, 1, 12], strides = [1, 1, 1]} : vector<8x8x12xf32> to vector<8x1x12xf32>
    %44 = vector.shape_cast %43 : vector<8x1x12xf32> to vector<8x12xf32>
    %45 = vector.shape_cast %44 : vector<8x12xf32> to vector<1x8x12xf32>
    %46 = vector.broadcast %36 : vector<2x1x12xf32> to vector<2x8x12xf32>
    %47 = vector.broadcast %42 : vector<1x8x12xf32> to vector<2x8x12xf32>
    %48 = arith.mulf %46, %47 : vector<2x8x12xf32>
    %49 = arith.addf %25, %48 : vector<2x8x12xf32>
    %50 = vector.broadcast %39 : vector<2x1x12xf32> to vector<2x8x12xf32>
    %51 = vector.broadcast %45 : vector<1x8x12xf32> to vector<2x8x12xf32>
    %52 = arith.mulf %50, %51 : vector<2x8x12xf32>
    %53 = arith.subf %49, %52 : vector<2x8x12xf32>
    %54 = vector.broadcast %36 : vector<2x1x12xf32> to vector<2x8x12xf32>
    %55 = vector.broadcast %45 : vector<1x8x12xf32> to vector<2x8x12xf32>
    %56 = arith.mulf %54, %55 : vector<2x8x12xf32>
    %57 = arith.addf %33, %56 : vector<2x8x12xf32>
    %58 = vector.broadcast %39 : vector<2x1x12xf32> to vector<2x8x12xf32>
    %59 = vector.broadcast %42 : vector<1x8x12xf32> to vector<2x8x12xf32>
    %60 = arith.mulf %58, %59 : vector<2x8x12xf32>
    %61 = arith.addf %57, %60 : vector<2x8x12xf32>
    %62 = vector.extract_strided_slice %0 {offsets = [0, 2, 0], sizes = [2, 1, 12], strides = [1, 1, 1]} : vector<2x8x12xf32> to vector<2x1x12xf32>
    %63 = vector.shape_cast %62 : vector<2x1x12xf32> to vector<2x12xf32>
    %64 = vector.shape_cast %63 : vector<2x12xf32> to vector<2x1x12xf32>
    %65 = vector.extract_strided_slice %1 {offsets = [0, 2, 0], sizes = [2, 1, 12], strides = [1, 1, 1]} : vector<2x8x12xf32> to vector<2x1x12xf32>
    %66 = vector.shape_cast %65 : vector<2x1x12xf32> to vector<2x12xf32>
    %67 = vector.shape_cast %66 : vector<2x12xf32> to vector<2x1x12xf32>
    %68 = vector.extract_strided_slice %2 {offsets = [0, 2, 0], sizes = [8, 1, 12], strides = [1, 1, 1]} : vector<8x8x12xf32> to vector<8x1x12xf32>
    %69 = vector.shape_cast %68 : vector<8x1x12xf32> to vector<8x12xf32>
    %70 = vector.shape_cast %69 : vector<8x12xf32> to vector<1x8x12xf32>
    %71 = vector.extract_strided_slice %3 {offsets = [0, 2, 0], sizes = [8, 1, 12], strides = [1, 1, 1]} : vector<8x8x12xf32> to vector<8x1x12xf32>
    %72 = vector.shape_cast %71 : vector<8x1x12xf32> to vector<8x12xf32>
    %73 = vector.shape_cast %72 : vector<8x12xf32> to vector<1x8x12xf32>
    %74 = vector.broadcast %64 : vector<2x1x12xf32> to vector<2x8x12xf32>
    %75 = vector.broadcast %70 : vector<1x8x12xf32> to vector<2x8x12xf32>
    %76 = arith.mulf %74, %75 : vector<2x8x12xf32>
    %77 = arith.addf %53, %76 : vector<2x8x12xf32>
    %78 = vector.broadcast %67 : vector<2x1x12xf32> to vector<2x8x12xf32>
    %79 = vector.broadcast %73 : vector<1x8x12xf32> to vector<2x8x12xf32>
    %80 = arith.mulf %78, %79 : vector<2x8x12xf32>
    %81 = arith.subf %77, %80 : vector<2x8x12xf32>
    %82 = vector.broadcast %64 : vector<2x1x12xf32> to vector<2x8x12xf32>
    %83 = vector.broadcast %73 : vector<1x8x12xf32> to vector<2x8x12xf32>
    %84 = arith.mulf %82, %83 : vector<2x8x12xf32>
    %85 = arith.addf %61, %84 : vector<2x8x12xf32>
    %86 = vector.broadcast %67 : vector<2x1x12xf32> to vector<2x8x12xf32>
    %87 = vector.broadcast %70 : vector<1x8x12xf32> to vector<2x8x12xf32>
    %88 = arith.mulf %86, %87 : vector<2x8x12xf32>
    %89 = arith.addf %85, %88 : vector<2x8x12xf32>
    %90 = vector.extract_strided_slice %0 {offsets = [0, 3, 0], sizes = [2, 1, 12], strides = [1, 1, 1]} : vector<2x8x12xf32> to vector<2x1x12xf32>
    %91 = vector.shape_cast %90 : vector<2x1x12xf32> to vector<2x12xf32>
    %92 = vector.shape_cast %91 : vector<2x12xf32> to vector<2x1x12xf32>
    %93 = vector.extract_strided_slice %1 {offsets = [0, 3, 0], sizes = [2, 1, 12], strides = [1, 1, 1]} : vector<2x8x12xf32> to vector<2x1x12xf32>
    %94 = vector.shape_cast %93 : vector<2x1x12xf32> to vector<2x12xf32>
    %95 = vector.shape_cast %94 : vector<2x12xf32> to vector<2x1x12xf32>
    %96 = vector.extract_strided_slice %2 {offsets = [0, 3, 0], sizes = [8, 1, 12], strides = [1, 1, 1]} : vector<8x8x12xf32> to vector<8x1x12xf32>
    %97 = vector.shape_cast %96 : vector<8x1x12xf32> to vector<8x12xf32>
    %98 = vector.shape_cast %97 : vector<8x12xf32> to vector<1x8x12xf32>
    %99 = vector.extract_strided_slice %3 {offsets = [0, 3, 0], sizes = [8, 1, 12], strides = [1, 1, 1]} : vector<8x8x12xf32> to vector<8x1x12xf32>
    %100 = vector.shape_cast %99 : vector<8x1x12xf32> to vector<8x12xf32>
    %101 = vector.shape_cast %100 : vector<8x12xf32> to vector<1x8x12xf32>
    %102 = vector.broadcast %92 : vector<2x1x12xf32> to vector<2x8x12xf32>
    %103 = vector.broadcast %98 : vector<1x8x12xf32> to vector<2x8x12xf32>
    %104 = arith.mulf %102, %103 : vector<2x8x12xf32>
    %105 = arith.addf %81, %104 : vector<2x8x12xf32>
    %106 = vector.broadcast %95 : vector<2x1x12xf32> to vector<2x8x12xf32>
    %107 = vector.broadcast %101 : vector<1x8x12xf32> to vector<2x8x12xf32>
    %108 = arith.mulf %106, %107 : vector<2x8x12xf32>
    %109 = arith.subf %105, %108 : vector<2x8x12xf32>
    %110 = vector.broadcast %92 : vector<2x1x12xf32> to vector<2x8x12xf32>
    %111 = vector.broadcast %101 : vector<1x8x12xf32> to vector<2x8x12xf32>
    %112 = arith.mulf %110, %111 : vector<2x8x12xf32>
    %113 = arith.addf %89, %112 : vector<2x8x12xf32>
    %114 = vector.broadcast %95 : vector<2x1x12xf32> to vector<2x8x12xf32>
    %115 = vector.broadcast %98 : vector<1x8x12xf32> to vector<2x8x12xf32>
    %116 = arith.mulf %114, %115 : vector<2x8x12xf32>
    %117 = arith.addf %113, %116 : vector<2x8x12xf32>
    %118 = vector.extract_strided_slice %0 {offsets = [0, 4, 0], sizes = [2, 1, 12], strides = [1, 1, 1]} : vector<2x8x12xf32> to vector<2x1x12xf32>
    %119 = vector.shape_cast %118 : vector<2x1x12xf32> to vector<2x12xf32>
    %120 = vector.shape_cast %119 : vector<2x12xf32> to vector<2x1x12xf32>
    %121 = vector.extract_strided_slice %1 {offsets = [0, 4, 0], sizes = [2, 1, 12], strides = [1, 1, 1]} : vector<2x8x12xf32> to vector<2x1x12xf32>
    %122 = vector.shape_cast %121 : vector<2x1x12xf32> to vector<2x12xf32>
    %123 = vector.shape_cast %122 : vector<2x12xf32> to vector<2x1x12xf32>
    %124 = vector.extract_strided_slice %2 {offsets = [0, 4, 0], sizes = [8, 1, 12], strides = [1, 1, 1]} : vector<8x8x12xf32> to vector<8x1x12xf32>
    %125 = vector.shape_cast %124 : vector<8x1x12xf32> to vector<8x12xf32>
    %126 = vector.shape_cast %125 : vector<8x12xf32> to vector<1x8x12xf32>
    %127 = vector.extract_strided_slice %3 {offsets = [0, 4, 0], sizes = [8, 1, 12], strides = [1, 1, 1]} : vector<8x8x12xf32> to vector<8x1x12xf32>
    %128 = vector.shape_cast %127 : vector<8x1x12xf32> to vector<8x12xf32>
    %129 = vector.shape_cast %128 : vector<8x12xf32> to vector<1x8x12xf32>
    %130 = vector.broadcast %120 : vector<2x1x12xf32> to vector<2x8x12xf32>
    %131 = vector.broadcast %126 : vector<1x8x12xf32> to vector<2x8x12xf32>
    %132 = arith.mulf %130, %131 : vector<2x8x12xf32>
    %133 = arith.addf %109, %132 : vector<2x8x12xf32>
    %134 = vector.broadcast %123 : vector<2x1x12xf32> to vector<2x8x12xf32>
    %135 = vector.broadcast %129 : vector<1x8x12xf32> to vector<2x8x12xf32>
    %136 = arith.mulf %134, %135 : vector<2x8x12xf32>
    %137 = arith.subf %133, %136 : vector<2x8x12xf32>
    %138 = vector.broadcast %120 : vector<2x1x12xf32> to vector<2x8x12xf32>
    %139 = vector.broadcast %129 : vector<1x8x12xf32> to vector<2x8x12xf32>
    %140 = arith.mulf %138, %139 : vector<2x8x12xf32>
    %141 = arith.addf %117, %140 : vector<2x8x12xf32>
    %142 = vector.broadcast %123 : vector<2x1x12xf32> to vector<2x8x12xf32>
    %143 = vector.broadcast %126 : vector<1x8x12xf32> to vector<2x8x12xf32>
    %144 = arith.mulf %142, %143 : vector<2x8x12xf32>
    %145 = arith.addf %141, %144 : vector<2x8x12xf32>
    %146 = vector.extract_strided_slice %0 {offsets = [0, 5, 0], sizes = [2, 1, 12], strides = [1, 1, 1]} : vector<2x8x12xf32> to vector<2x1x12xf32>
    %147 = vector.shape_cast %146 : vector<2x1x12xf32> to vector<2x12xf32>
    %148 = vector.shape_cast %147 : vector<2x12xf32> to vector<2x1x12xf32>
    %149 = vector.extract_strided_slice %1 {offsets = [0, 5, 0], sizes = [2, 1, 12], strides = [1, 1, 1]} : vector<2x8x12xf32> to vector<2x1x12xf32>
    %150 = vector.shape_cast %149 : vector<2x1x12xf32> to vector<2x12xf32>
    %151 = vector.shape_cast %150 : vector<2x12xf32> to vector<2x1x12xf32>
    %152 = vector.extract_strided_slice %2 {offsets = [0, 5, 0], sizes = [8, 1, 12], strides = [1, 1, 1]} : vector<8x8x12xf32> to vector<8x1x12xf32>
    %153 = vector.shape_cast %152 : vector<8x1x12xf32> to vector<8x12xf32>
    %154 = vector.shape_cast %153 : vector<8x12xf32> to vector<1x8x12xf32>
    %155 = vector.extract_strided_slice %3 {offsets = [0, 5, 0], sizes = [8, 1, 12], strides = [1, 1, 1]} : vector<8x8x12xf32> to vector<8x1x12xf32>
    %156 = vector.shape_cast %155 : vector<8x1x12xf32> to vector<8x12xf32>
    %157 = vector.shape_cast %156 : vector<8x12xf32> to vector<1x8x12xf32>
    %158 = vector.broadcast %148 : vector<2x1x12xf32> to vector<2x8x12xf32>
    %159 = vector.broadcast %154 : vector<1x8x12xf32> to vector<2x8x12xf32>
    %160 = arith.mulf %158, %159 : vector<2x8x12xf32>
    %161 = arith.addf %137, %160 : vector<2x8x12xf32>
    %162 = vector.broadcast %151 : vector<2x1x12xf32> to vector<2x8x12xf32>
    %163 = vector.broadcast %157 : vector<1x8x12xf32> to vector<2x8x12xf32>
    %164 = arith.mulf %162, %163 : vector<2x8x12xf32>
    %165 = arith.subf %161, %164 : vector<2x8x12xf32>
    %166 = vector.broadcast %148 : vector<2x1x12xf32> to vector<2x8x12xf32>
    %167 = vector.broadcast %157 : vector<1x8x12xf32> to vector<2x8x12xf32>
    %168 = arith.mulf %166, %167 : vector<2x8x12xf32>
    %169 = arith.addf %145, %168 : vector<2x8x12xf32>
    %170 = vector.broadcast %151 : vector<2x1x12xf32> to vector<2x8x12xf32>
    %171 = vector.broadcast %154 : vector<1x8x12xf32> to vector<2x8x12xf32>
    %172 = arith.mulf %170, %171 : vector<2x8x12xf32>
    %173 = arith.addf %169, %172 : vector<2x8x12xf32>
    %174 = vector.extract_strided_slice %0 {offsets = [0, 6, 0], sizes = [2, 1, 12], strides = [1, 1, 1]} : vector<2x8x12xf32> to vector<2x1x12xf32>
    %175 = vector.shape_cast %174 : vector<2x1x12xf32> to vector<2x12xf32>
    %176 = vector.shape_cast %175 : vector<2x12xf32> to vector<2x1x12xf32>
    %177 = vector.extract_strided_slice %1 {offsets = [0, 6, 0], sizes = [2, 1, 12], strides = [1, 1, 1]} : vector<2x8x12xf32> to vector<2x1x12xf32>
    %178 = vector.shape_cast %177 : vector<2x1x12xf32> to vector<2x12xf32>
    %179 = vector.shape_cast %178 : vector<2x12xf32> to vector<2x1x12xf32>
    %180 = vector.extract_strided_slice %2 {offsets = [0, 6, 0], sizes = [8, 1, 12], strides = [1, 1, 1]} : vector<8x8x12xf32> to vector<8x1x12xf32>
    %181 = vector.shape_cast %180 : vector<8x1x12xf32> to vector<8x12xf32>
    %182 = vector.shape_cast %181 : vector<8x12xf32> to vector<1x8x12xf32>
    %183 = vector.extract_strided_slice %3 {offsets = [0, 6, 0], sizes = [8, 1, 12], strides = [1, 1, 1]} : vector<8x8x12xf32> to vector<8x1x12xf32>
    %184 = vector.shape_cast %183 : vector<8x1x12xf32> to vector<8x12xf32>
    %185 = vector.shape_cast %184 : vector<8x12xf32> to vector<1x8x12xf32>
    %186 = vector.broadcast %176 : vector<2x1x12xf32> to vector<2x8x12xf32>
    %187 = vector.broadcast %182 : vector<1x8x12xf32> to vector<2x8x12xf32>
    %188 = arith.mulf %186, %187 : vector<2x8x12xf32>
    %189 = arith.addf %165, %188 : vector<2x8x12xf32>
    %190 = vector.broadcast %179 : vector<2x1x12xf32> to vector<2x8x12xf32>
    %191 = vector.broadcast %185 : vector<1x8x12xf32> to vector<2x8x12xf32>
    %192 = arith.mulf %190, %191 : vector<2x8x12xf32>
    %193 = arith.subf %189, %192 : vector<2x8x12xf32>
    %194 = vector.broadcast %176 : vector<2x1x12xf32> to vector<2x8x12xf32>
    %195 = vector.broadcast %185 : vector<1x8x12xf32> to vector<2x8x12xf32>
    %196 = arith.mulf %194, %195 : vector<2x8x12xf32>
    %197 = arith.addf %173, %196 : vector<2x8x12xf32>
    %198 = vector.broadcast %179 : vector<2x1x12xf32> to vector<2x8x12xf32>
    %199 = vector.broadcast %182 : vector<1x8x12xf32> to vector<2x8x12xf32>
    %200 = arith.mulf %198, %199 : vector<2x8x12xf32>
    %201 = arith.addf %197, %200 : vector<2x8x12xf32>
    %202 = vector.extract_strided_slice %0 {offsets = [0, 7, 0], sizes = [2, 1, 12], strides = [1, 1, 1]} : vector<2x8x12xf32> to vector<2x1x12xf32>
    %203 = vector.shape_cast %202 : vector<2x1x12xf32> to vector<2x12xf32>
    %204 = vector.shape_cast %203 : vector<2x12xf32> to vector<2x1x12xf32>
    %205 = vector.extract_strided_slice %1 {offsets = [0, 7, 0], sizes = [2, 1, 12], strides = [1, 1, 1]} : vector<2x8x12xf32> to vector<2x1x12xf32>
    %206 = vector.shape_cast %205 : vector<2x1x12xf32> to vector<2x12xf32>
    %207 = vector.shape_cast %206 : vector<2x12xf32> to vector<2x1x12xf32>
    %208 = vector.extract_strided_slice %2 {offsets = [0, 7, 0], sizes = [8, 1, 12], strides = [1, 1, 1]} : vector<8x8x12xf32> to vector<8x1x12xf32>
    %209 = vector.shape_cast %208 : vector<8x1x12xf32> to vector<8x12xf32>
    %210 = vector.shape_cast %209 : vector<8x12xf32> to vector<1x8x12xf32>
    %211 = vector.extract_strided_slice %3 {offsets = [0, 7, 0], sizes = [8, 1, 12], strides = [1, 1, 1]} : vector<8x8x12xf32> to vector<8x1x12xf32>
    %212 = vector.shape_cast %211 : vector<8x1x12xf32> to vector<8x12xf32>
    %213 = vector.shape_cast %212 : vector<8x12xf32> to vector<1x8x12xf32>
    %214 = vector.broadcast %204 : vector<2x1x12xf32> to vector<2x8x12xf32>
    %215 = vector.broadcast %210 : vector<1x8x12xf32> to vector<2x8x12xf32>
    %216 = arith.mulf %214, %215 : vector<2x8x12xf32>
    %217 = arith.addf %193, %216 : vector<2x8x12xf32>
    %218 = vector.broadcast %207 : vector<2x1x12xf32> to vector<2x8x12xf32>
    %219 = vector.broadcast %213 : vector<1x8x12xf32> to vector<2x8x12xf32>
    %220 = arith.mulf %218, %219 : vector<2x8x12xf32>
    %221 = arith.subf %217, %220 : vector<2x8x12xf32>
    %222 = vector.broadcast %204 : vector<2x1x12xf32> to vector<2x8x12xf32>
    %223 = vector.broadcast %213 : vector<1x8x12xf32> to vector<2x8x12xf32>
    %224 = arith.mulf %222, %223 : vector<2x8x12xf32>
    %225 = arith.addf %201, %224 : vector<2x8x12xf32>
    %226 = vector.broadcast %207 : vector<2x1x12xf32> to vector<2x8x12xf32>
    %227 = vector.broadcast %210 : vector<1x8x12xf32> to vector<2x8x12xf32>
    %228 = arith.mulf %226, %227 : vector<2x8x12xf32>
    %229 = arith.addf %225, %228 : vector<2x8x12xf32>
    %c0_12 = arith.constant 0 : index
    %c0_13 = arith.constant 0 : index
    %c0_14 = arith.constant 0 : index
    %230 = vector.load %arg5[%c0_12, %c0_13, %c0_14] : memref<2x8x12xf32, #tpu.memory_space<vmem>>, vector<2x8x12xf32>
    tpu.vector_store %arg5[%c0_12, %c0_13, %c0_14], %221 {strides = array<i32>} : memref<2x8x12xf32, #tpu.memory_space<vmem>>, vector<2x8x12xf32>,
    %c0_15 = arith.constant 0 : index
    %c0_16 = arith.constant 0 : index
    %c0_17 = arith.constant 0 : index
    %231 = vector.load %arg6[%c0_15, %c0_16, %c0_17] : memref<2x8x12xf32, #tpu.memory_space<vmem>>, vector<2x8x12xf32>
    tpu.vector_store %arg6[%c0_15, %c0_16, %c0_17], %229 {strides = array<i32>} : memref<2x8x12xf32, #tpu.memory_space<vmem>>, vector<2x8x12xf32>,
    return
  }
  func.func @transform_0(%arg0: i32) -> (i32, i32, i32) {
    %c0_i32 = arith.constant 0 : i32
    %c0_i32_0 = arith.constant 0 : i32
    %c0_i32_1 = arith.constant 0 : i32
    return %c0_i32, %c0_i32_0, %arg0 : i32, i32, i32
  }
  func.func @transform_1(%arg0: i32) -> (i32, i32, i32) {
    %c0_i32 = arith.constant 0 : i32
    %c0_i32_0 = arith.constant 0 : i32
    %c0_i32_1 = arith.constant 0 : i32
    return %c0_i32, %c0_i32_0, %arg0 : i32, i32, i32
  }
  func.func @transform_2(%arg0: i32) -> (i32, i32, i32) {
    %c0_i32 = arith.constant 0 : i32
    %c0_i32_0 = arith.constant 0 : i32
    %c0_i32_1 = arith.constant 0 : i32
    return %c0_i32, %c0_i32_0, %arg0 : i32, i32, i32
  }
  func.func @transform_3(%arg0: i32) -> (i32, i32, i32) {
    %c0_i32 = arith.constant 0 : i32
    %c0_i32_0 = arith.constant 0 : i32
    %c0_i32_1 = arith.constant 0 : i32
    return %c0_i32, %c0_i32_0, %arg0 : i32, i32, i32
  }
  func.func @transform_4(%arg0: i32) -> (i32, i32, i32) {
    %c0_i32 = arith.constant 0 : i32
    %c0_i32_0 = arith.constant 0 : i32
    %c0_i32_1 = arith.constant 0 : i32
    return %c0_i32, %c0_i32_0, %arg0 : i32, i32, i32
  }
  func.func @transform_5(%arg0: i32) -> (i32, i32, i32) {
    %c0_i32 = arith.constant 0 : i32
    %c0_i32_0 = arith.constant 0 : i32
    %c0_i32_1 = arith.constant 0 : i32
    return %c0_i32, %c0_i32_0, %arg0 : i32, i32, i32
  }
}

module attributes {stable_mosaic.version = 11 : i64} {
  func.func @_lin_kernel(%arg0: i32, %arg1: i32, %arg2: memref<1x8x256xbf16, #tpu.memory_space<vmem>>, %arg3: memref<8x8xbf16, #tpu.memory_space<vmem>>, %arg4: memref<1x8x256xbf16, #tpu.memory_space<vmem>>) attributes {dimension_semantics = [#tpu.dimension_semantics<parallel>, #tpu.dimension_semantics<parallel>], iteration_bounds = array<i64: 2, 1>, scalar_prefetch = 0 : i64, scratch_operands = 0 : i64, tpu.core_type = #tpu.core_type<tc>, window_params = [{transform_indices = @transform_0, window_bounds = array<i64: 1, 8, 256>}, {pipeline_mode = #tpu.pipeline_mode<synchronous>, transform_indices = @transform_1, window_bounds = array<i64: 8, 8>}, {transform_indices = @transform_2, window_bounds = array<i64: 1, 8, 256>}]} {
    %c0 = arith.constant 0 : index
    %c0_0 = arith.constant 0 : index
    %0 = vector.load %arg3[%c0, %c0_0] : memref<8x8xbf16, #tpu.memory_space<vmem>>, vector<8x8xbf16>
    %c0_1 = arith.constant 0 : index
    %c0_2 = arith.constant 0 : index
    %c0_3 = arith.constant 0 : index
    %1 = vector.load %arg2[%c0_1, %c0_2, %c0_3] : memref<1x8x256xbf16, #tpu.memory_space<vmem>>, vector<1x8x256xbf16>
    %2 = vector.shape_cast %1 : vector<1x8x256xbf16> to vector<8x256xbf16>
    %cst = arith.constant dense<0.000000e+00> : vector<8x256xf32>
    %3 = tpu.matmul %0, %2, %cst {dimension_numbers = #tpu.dot_dimension_numbers<[1], [0], [0], [1], [0, 0, 1, 1], [], []>} : vector<8x8xbf16>, vector<8x256xbf16>, vector<8x256xf32> -> vector<8x256xf32>
    %4 = arith.truncf %3 : vector<8x256xf32> to vector<8x256xbf16>
    %c0_4 = arith.constant 0 : index
    %c0_5 = arith.constant 0 : index
    %c0_6 = arith.constant 0 : index
    %5 = vector.load %arg4[%c0_4, %c0_5, %c0_6] : memref<1x8x256xbf16, #tpu.memory_space<vmem>>, vector<1x8x256xbf16>
    %6 = vector.shape_cast %5 : vector<1x8x256xbf16> to vector<8x256xbf16>
    %7 = vector.shape_cast %4 : vector<8x256xbf16> to vector<1x8x256xbf16>
    tpu.vector_store %arg4[%c0_4, %c0_5, %c0_6], %7 {strides = array<i32>} : memref<1x8x256xbf16, #tpu.memory_space<vmem>>, vector<1x8x256xbf16>,
    return
  }
  func.func @transform_0(%arg0: i32, %arg1: i32) -> (i32, i32, i32) {
    %c0_i32 = arith.constant 0 : i32
    %c0_i32_0 = arith.constant 0 : i32
    return %arg0, %c0_i32, %arg1 : i32, i32, i32
  }
  func.func @transform_1(%arg0: i32, %arg1: i32) -> (i32, i32) {
    %c0_i32 = arith.constant 0 : i32
    %c0_i32_0 = arith.constant 0 : i32
    %c0_i32_1 = arith.constant 0 : i32
    return %c0_i32, %c0_i32_0 : i32, i32
  }
  func.func @transform_2(%arg0: i32, %arg1: i32) -> (i32, i32, i32) {
    %c0_i32 = arith.constant 0 : i32
    %c0_i32_0 = arith.constant 0 : i32
    return %arg0, %c0_i32, %arg1 : i32, i32, i32
  }
}

module attributes {stable_mosaic.version = 11 : i64} {
  func.func @_tail_fused_kernel(%arg0: i32, %arg1: i32, %arg2: memref<1x8x256xbf16, #tpu.memory_space<vmem>>, %arg3: memref<1x8x256xf32, #tpu.memory_space<vmem>>, %arg4: memref<8x8xbf16, #tpu.memory_space<vmem>>, %arg5: memref<8x8xbf16, #tpu.memory_space<vmem>>, %arg6: memref<8x1xf32, #tpu.memory_space<vmem>>, %arg7: memref<4x8xbf16, #tpu.memory_space<vmem>>, %arg8: memref<4x1xf32, #tpu.memory_space<vmem>>, %arg9: memref<8x4xbf16, #tpu.memory_space<vmem>>, %arg10: memref<8x1xf32, #tpu.memory_space<vmem>>, %arg11: memref<1x8x256xbf16, #tpu.memory_space<vmem>>) attributes {dimension_semantics = [#tpu.dimension_semantics<parallel>, #tpu.dimension_semantics<parallel>], iteration_bounds = array<i64: 2, 1>, scalar_prefetch = 0 : i64, scratch_operands = 0 : i64, tpu.core_type = #tpu.core_type<tc>, window_params = [{transform_indices = @transform_0, window_bounds = array<i64: 1, 8, 256>}, {transform_indices = @transform_1, window_bounds = array<i64: 1, 8, 256>}, {pipeline_mode = #tpu.pipeline_mode<synchronous>, transform_indices = @transform_2, window_bounds = array<i64: 8, 8>}, {pipeline_mode = #tpu.pipeline_mode<synchronous>, transform_indices = @transform_3, window_bounds = array<i64: 8, 8>}, {pipeline_mode = #tpu.pipeline_mode<synchronous>, transform_indices = @transform_4, window_bounds = array<i64: 8, 1>}, {pipeline_mode = #tpu.pipeline_mode<synchronous>, transform_indices = @transform_5, window_bounds = array<i64: 4, 8>}, {pipeline_mode = #tpu.pipeline_mode<synchronous>, transform_indices = @transform_6, window_bounds = array<i64: 4, 1>}, {pipeline_mode = #tpu.pipeline_mode<synchronous>, transform_indices = @transform_7, window_bounds = array<i64: 8, 4>}, {pipeline_mode = #tpu.pipeline_mode<synchronous>, transform_indices = @transform_8, window_bounds = array<i64: 8, 1>}, {transform_indices = @transform_9, window_bounds = array<i64: 1, 8, 256>}]} {
    %c0 = arith.constant 0 : index
    %c0_0 = arith.constant 0 : index
    %c0_1 = arith.constant 0 : index
    %0 = vector.load %arg2[%c0, %c0_0, %c0_1] : memref<1x8x256xbf16, #tpu.memory_space<vmem>>, vector<1x8x256xbf16>
    %1 = vector.shape_cast %0 : vector<1x8x256xbf16> to vector<8x256xbf16>
    %c0_2 = arith.constant 0 : index
    %c0_3 = arith.constant 0 : index
    %2 = vector.load %arg4[%c0_2, %c0_3] : memref<8x8xbf16, #tpu.memory_space<vmem>>, vector<8x8xbf16>
    %cst = arith.constant dense<0.000000e+00> : vector<8x256xf32>
    %3 = tpu.matmul %2, %1, %cst {dimension_numbers = #tpu.dot_dimension_numbers<[1], [0], [0], [1], [0, 0, 1, 1], [], []>} : vector<8x8xbf16>, vector<8x256xbf16>, vector<8x256xf32> -> vector<8x256xf32>
    %c0_4 = arith.constant 0 : index
    %c0_5 = arith.constant 0 : index
    %4 = vector.load %arg5[%c0_4, %c0_5] : memref<8x8xbf16, #tpu.memory_space<vmem>>, vector<8x8xbf16>
    %cst_6 = arith.constant dense<0.000000e+00> : vector<8x256xf32>
    %5 = tpu.matmul %4, %1, %cst_6 {dimension_numbers = #tpu.dot_dimension_numbers<[1], [0], [0], [1], [0, 0, 1, 1], [], []>} : vector<8x8xbf16>, vector<8x256xbf16>, vector<8x256xf32> -> vector<8x256xf32>
    %c0_7 = arith.constant 0 : index
    %c0_8 = arith.constant 0 : index
    %c0_9 = arith.constant 0 : index
    %6 = vector.load %arg3[%c0_7, %c0_8, %c0_9] : memref<1x8x256xf32, #tpu.memory_space<vmem>>, vector<1x8x256xf32>
    %7 = vector.shape_cast %6 : vector<1x8x256xf32> to vector<8x256xf32>
    %c0_10 = arith.constant 0 : index
    %c0_11 = arith.constant 0 : index
    %8 = vector.load %arg6[%c0_10, %c0_11] : memref<8x1xf32, #tpu.memory_space<vmem>>, vector<8x1xf32>
    %9 = vector.broadcast %8 : vector<8x1xf32> to vector<8x256xf32>
    %10 = arith.addf %7, %9 : vector<8x256xf32>
    %11 = arith.addf %10, %3 : vector<8x256xf32>
    %cst_12 = arith.constant 5.000000e-01 : f32
    %12 = vector.broadcast %cst_12 : f32 to vector<8x256xf32>
    %13 = arith.mulf %12, %11 : vector<8x256xf32>
    %cst_13 = arith.constant 0.707106769 : f32
    %14 = vector.broadcast %cst_13 : f32 to vector<8x256xf32>
    %15 = arith.mulf %11, %14 : vector<8x256xf32>
    %cst_14 = arith.constant 0.000000e+00 : f32
    %16 = vector.broadcast %cst_14 : f32 to vector<8x256xf32>
    %17 = arith.cmpf oge, %15, %16 : vector<8x256xf32>
    %cst_15 = arith.constant 1.000000e+00 : f32
    %cst_16 = arith.constant -1.000000e+00 : f32
    %18 = vector.broadcast %cst_15 : f32 to vector<8x256xf32>
    %19 = vector.broadcast %cst_16 : f32 to vector<8x256xf32>
    %20 = arith.select %17, %18, %19 : vector<8x256xi1>, vector<8x256xf32>
    %21 = math.absf %15 : vector<8x256xf32>
    %cst_17 = arith.constant 0.327591091 : f32
    %22 = vector.broadcast %cst_17 : f32 to vector<8x256xf32>
    %23 = arith.mulf %22, %21 : vector<8x256xf32>
    %cst_18 = arith.constant 1.000000e+00 : f32
    %24 = vector.broadcast %cst_18 : f32 to vector<8x256xf32>
    %25 = arith.addf %24, %23 : vector<8x256xf32>
    %26 = tpu.reciprocal %25 {approx = true} : vector<8x256xf32> -> vector<8x256xf32>
    %cst_19 = arith.constant 1.06140542 : f32
    %27 = vector.broadcast %cst_19 : f32 to vector<8x256xf32>
    %28 = arith.mulf %27, %26 : vector<8x256xf32>
    %cst_20 = arith.constant -1.45315206 : f32
    %29 = vector.broadcast %cst_20 : f32 to vector<8x256xf32>
    %30 = arith.addf %28, %29 : vector<8x256xf32>
    %31 = arith.mulf %30, %26 : vector<8x256xf32>
    %cst_21 = arith.constant 1.42141378 : f32
    %32 = vector.broadcast %cst_21 : f32 to vector<8x256xf32>
    %33 = arith.addf %31, %32 : vector<8x256xf32>
    %34 = arith.mulf %33, %26 : vector<8x256xf32>
    %cst_22 = arith.constant -0.284496725 : f32
    %35 = vector.broadcast %cst_22 : f32 to vector<8x256xf32>
    %36 = arith.addf %34, %35 : vector<8x256xf32>
    %37 = arith.mulf %36, %26 : vector<8x256xf32>
    %cst_23 = arith.constant 0.254829586 : f32
    %38 = vector.broadcast %cst_23 : f32 to vector<8x256xf32>
    %39 = arith.addf %37, %38 : vector<8x256xf32>
    %40 = arith.mulf %39, %26 : vector<8x256xf32>
    %cst_24 = arith.constant 0.000000e+00 : f32
    %41 = vector.broadcast %cst_24 : f32 to vector<8x256xf32>
    %42 = arith.subf %41, %21 : vector<8x256xf32>
    %43 = arith.mulf %42, %21 : vector<8x256xf32>
    %44 = math.exp %43 : vector<8x256xf32>
    %45 = arith.mulf %40, %44 : vector<8x256xf32>
    %cst_25 = arith.constant 1.000000e+00 : f32
    %46 = vector.broadcast %cst_25 : f32 to vector<8x256xf32>
    %47 = arith.subf %46, %45 : vector<8x256xf32>
    %48 = arith.mulf %20, %47 : vector<8x256xf32>
    %cst_26 = arith.constant 1.000000e+00 : f32
    %49 = vector.broadcast %cst_26 : f32 to vector<8x256xf32>
    %50 = arith.addf %49, %48 : vector<8x256xf32>
    %51 = arith.mulf %13, %50 : vector<8x256xf32>
    %c0_27 = arith.constant 0 : index
    %c0_28 = arith.constant 0 : index
    %52 = vector.load %arg7[%c0_27, %c0_28] : memref<4x8xbf16, #tpu.memory_space<vmem>>, vector<4x8xbf16>
    %53 = arith.truncf %51 : vector<8x256xf32> to vector<8x256xbf16>
    %cst_29 = arith.constant dense<0.000000e+00> : vector<4x256xf32>
    %54 = tpu.matmul %52, %53, %cst_29 {dimension_numbers = #tpu.dot_dimension_numbers<[1], [0], [0], [1], [0, 0, 1, 1], [], []>} : vector<4x8xbf16>, vector<8x256xbf16>, vector<4x256xf32> -> vector<4x256xf32>
    %c0_30 = arith.constant 0 : index
    %c0_31 = arith.constant 0 : index
    %55 = vector.load %arg8[%c0_30, %c0_31] : memref<4x1xf32, #tpu.memory_space<vmem>>, vector<4x1xf32>
    %56 = vector.broadcast %55 : vector<4x1xf32> to vector<4x256xf32>
    %57 = arith.addf %54, %56 : vector<4x256xf32>
    %cst_32 = arith.constant 5.000000e-01 : f32
    %58 = vector.broadcast %cst_32 : f32 to vector<4x256xf32>
    %59 = arith.mulf %58, %57 : vector<4x256xf32>
    %cst_33 = arith.constant 0.707106769 : f32
    %60 = vector.broadcast %cst_33 : f32 to vector<4x256xf32>
    %61 = arith.mulf %57, %60 : vector<4x256xf32>
    %cst_34 = arith.constant 0.000000e+00 : f32
    %62 = vector.broadcast %cst_34 : f32 to vector<4x256xf32>
    %63 = arith.cmpf oge, %61, %62 : vector<4x256xf32>
    %cst_35 = arith.constant 1.000000e+00 : f32
    %cst_36 = arith.constant -1.000000e+00 : f32
    %64 = vector.broadcast %cst_35 : f32 to vector<4x256xf32>
    %65 = vector.broadcast %cst_36 : f32 to vector<4x256xf32>
    %66 = arith.select %63, %64, %65 : vector<4x256xi1>, vector<4x256xf32>
    %67 = math.absf %61 : vector<4x256xf32>
    %cst_37 = arith.constant 0.327591091 : f32
    %68 = vector.broadcast %cst_37 : f32 to vector<4x256xf32>
    %69 = arith.mulf %68, %67 : vector<4x256xf32>
    %cst_38 = arith.constant 1.000000e+00 : f32
    %70 = vector.broadcast %cst_38 : f32 to vector<4x256xf32>
    %71 = arith.addf %70, %69 : vector<4x256xf32>
    %72 = tpu.reciprocal %71 {approx = true} : vector<4x256xf32> -> vector<4x256xf32>
    %cst_39 = arith.constant 1.06140542 : f32
    %73 = vector.broadcast %cst_39 : f32 to vector<4x256xf32>
    %74 = arith.mulf %73, %72 : vector<4x256xf32>
    %cst_40 = arith.constant -1.45315206 : f32
    %75 = vector.broadcast %cst_40 : f32 to vector<4x256xf32>
    %76 = arith.addf %74, %75 : vector<4x256xf32>
    %77 = arith.mulf %76, %72 : vector<4x256xf32>
    %cst_41 = arith.constant 1.42141378 : f32
    %78 = vector.broadcast %cst_41 : f32 to vector<4x256xf32>
    %79 = arith.addf %77, %78 : vector<4x256xf32>
    %80 = arith.mulf %79, %72 : vector<4x256xf32>
    %cst_42 = arith.constant -0.284496725 : f32
    %81 = vector.broadcast %cst_42 : f32 to vector<4x256xf32>
    %82 = arith.addf %80, %81 : vector<4x256xf32>
    %83 = arith.mulf %82, %72 : vector<4x256xf32>
    %cst_43 = arith.constant 0.254829586 : f32
    %84 = vector.broadcast %cst_43 : f32 to vector<4x256xf32>
    %85 = arith.addf %83, %84 : vector<4x256xf32>
    %86 = arith.mulf %85, %72 : vector<4x256xf32>
    %cst_44 = arith.constant 0.000000e+00 : f32
    %87 = vector.broadcast %cst_44 : f32 to vector<4x256xf32>
    %88 = arith.subf %87, %67 : vector<4x256xf32>
    %89 = arith.mulf %88, %67 : vector<4x256xf32>
    %90 = math.exp %89 : vector<4x256xf32>
    %91 = arith.mulf %86, %90 : vector<4x256xf32>
    %cst_45 = arith.constant 1.000000e+00 : f32
    %92 = vector.broadcast %cst_45 : f32 to vector<4x256xf32>
    %93 = arith.subf %92, %91 : vector<4x256xf32>
    %94 = arith.mulf %66, %93 : vector<4x256xf32>
    %cst_46 = arith.constant 1.000000e+00 : f32
    %95 = vector.broadcast %cst_46 : f32 to vector<4x256xf32>
    %96 = arith.addf %95, %94 : vector<4x256xf32>
    %97 = arith.mulf %59, %96 : vector<4x256xf32>
    %c0_47 = arith.constant 0 : index
    %c0_48 = arith.constant 0 : index
    %98 = vector.load %arg9[%c0_47, %c0_48] : memref<8x4xbf16, #tpu.memory_space<vmem>>, vector<8x4xbf16>
    %99 = arith.truncf %97 : vector<4x256xf32> to vector<4x256xbf16>
    %cst_49 = arith.constant dense<0.000000e+00> : vector<8x256xf32>
    %100 = tpu.matmul %98, %99, %cst_49 {dimension_numbers = #tpu.dot_dimension_numbers<[1], [0], [0], [1], [0, 0, 1, 1], [], []>} : vector<8x4xbf16>, vector<4x256xbf16>, vector<8x256xf32> -> vector<8x256xf32>
    %c0_50 = arith.constant 0 : index
    %c0_51 = arith.constant 0 : index
    %101 = vector.load %arg10[%c0_50, %c0_51] : memref<8x1xf32, #tpu.memory_space<vmem>>, vector<8x1xf32>
    %102 = vector.broadcast %101 : vector<8x1xf32> to vector<8x256xf32>
    %103 = arith.addf %100, %102 : vector<8x256xf32>
    %104 = arith.addf %103, %5 : vector<8x256xf32>
    %105 = arith.truncf %104 : vector<8x256xf32> to vector<8x256xbf16>
    %c0_52 = arith.constant 0 : index
    %c0_53 = arith.constant 0 : index
    %c0_54 = arith.constant 0 : index
    %106 = vector.load %arg11[%c0_52, %c0_53, %c0_54] : memref<1x8x256xbf16, #tpu.memory_space<vmem>>, vector<1x8x256xbf16>
    %107 = vector.shape_cast %106 : vector<1x8x256xbf16> to vector<8x256xbf16>
    %108 = vector.shape_cast %105 : vector<8x256xbf16> to vector<1x8x256xbf16>
    tpu.vector_store %arg11[%c0_52, %c0_53, %c0_54], %108 {strides = array<i32>} : memref<1x8x256xbf16, #tpu.memory_space<vmem>>, vector<1x8x256xbf16>,
    return
  }
  func.func @transform_0(%arg0: i32, %arg1: i32) -> (i32, i32, i32) {
    %c0_i32 = arith.constant 0 : i32
    %c0_i32_0 = arith.constant 0 : i32
    return %arg0, %c0_i32, %arg1 : i32, i32, i32
  }
  func.func @transform_1(%arg0: i32, %arg1: i32) -> (i32, i32, i32) {
    %c0_i32 = arith.constant 0 : i32
    %c0_i32_0 = arith.constant 0 : i32
    return %arg0, %c0_i32, %arg1 : i32, i32, i32
  }
  func.func @transform_2(%arg0: i32, %arg1: i32) -> (i32, i32) {
    %c0_i32 = arith.constant 0 : i32
    %c0_i32_0 = arith.constant 0 : i32
    %c0_i32_1 = arith.constant 0 : i32
    return %c0_i32, %c0_i32_0 : i32, i32
  }
  func.func @transform_3(%arg0: i32, %arg1: i32) -> (i32, i32) {
    %c0_i32 = arith.constant 0 : i32
    %c0_i32_0 = arith.constant 0 : i32
    %c0_i32_1 = arith.constant 0 : i32
    return %c0_i32, %c0_i32_0 : i32, i32
  }
  func.func @transform_4(%arg0: i32, %arg1: i32) -> (i32, i32) {
    %c0_i32 = arith.constant 0 : i32
    %c0_i32_0 = arith.constant 0 : i32
    %c0_i32_1 = arith.constant 0 : i32
    return %c0_i32, %c0_i32_0 : i32, i32
  }
  func.func @transform_5(%arg0: i32, %arg1: i32) -> (i32, i32) {
    %c0_i32 = arith.constant 0 : i32
    %c0_i32_0 = arith.constant 0 : i32
    %c0_i32_1 = arith.constant 0 : i32
    return %c0_i32, %c0_i32_0 : i32, i32
  }
  func.func @transform_6(%arg0: i32, %arg1: i32) -> (i32, i32) {
    %c0_i32 = arith.constant 0 : i32
    %c0_i32_0 = arith.constant 0 : i32
    %c0_i32_1 = arith.constant 0 : i32
    return %c0_i32, %c0_i32_0 : i32, i32
  }
  func.func @transform_7(%arg0: i32, %arg1: i32) -> (i32, i32) {
    %c0_i32 = arith.constant 0 : i32
    %c0_i32_0 = arith.constant 0 : i32
    %c0_i32_1 = arith.constant 0 : i32
    return %c0_i32, %c0_i32_0 : i32, i32
  }
  func.func @transform_8(%arg0: i32, %arg1: i32) -> (i32, i32) {
    %c0_i32 = arith.constant 0 : i32
    %c0_i32_0 = arith.constant 0 : i32
    %c0_i32_1 = arith.constant 0 : i32
    return %c0_i32, %c0_i32_0 : i32, i32
  }
  func.func @transform_9(%arg0: i32, %arg1: i32) -> (i32, i32, i32) {
    %c0_i32 = arith.constant 0 : i32
    %c0_i32_0 = arith.constant 0 : i32
    return %arg0, %c0_i32, %arg1 : i32, i32, i32
  }
}

module attributes {stable_mosaic.version = 11 : i64} {
  func.func @_lin_kernel(%arg0: i32, %arg1: i32, %arg2: memref<1x8x256xbf16, #tpu.memory_space<vmem>>, %arg3: memref<16x8xbf16, #tpu.memory_space<vmem>>, %arg4: memref<1x16x256xbf16, #tpu.memory_space<vmem>>) attributes {dimension_semantics = [#tpu.dimension_semantics<parallel>, #tpu.dimension_semantics<parallel>], iteration_bounds = array<i64: 2, 1>, scalar_prefetch = 0 : i64, scratch_operands = 0 : i64, tpu.core_type = #tpu.core_type<tc>, window_params = [{transform_indices = @transform_0, window_bounds = array<i64: 1, 8, 256>}, {pipeline_mode = #tpu.pipeline_mode<synchronous>, transform_indices = @transform_1, window_bounds = array<i64: 16, 8>}, {transform_indices = @transform_2, window_bounds = array<i64: 1, 16, 256>}]} {
    %c0 = arith.constant 0 : index
    %c0_0 = arith.constant 0 : index
    %0 = vector.load %arg3[%c0, %c0_0] : memref<16x8xbf16, #tpu.memory_space<vmem>>, vector<16x8xbf16>
    %c0_1 = arith.constant 0 : index
    %c0_2 = arith.constant 0 : index
    %c0_3 = arith.constant 0 : index
    %1 = vector.load %arg2[%c0_1, %c0_2, %c0_3] : memref<1x8x256xbf16, #tpu.memory_space<vmem>>, vector<1x8x256xbf16>
    %2 = vector.shape_cast %1 : vector<1x8x256xbf16> to vector<8x256xbf16>
    %cst = arith.constant dense<0.000000e+00> : vector<16x256xf32>
    %3 = tpu.matmul %0, %2, %cst {dimension_numbers = #tpu.dot_dimension_numbers<[1], [0], [0], [1], [0, 0, 1, 1], [], []>} : vector<16x8xbf16>, vector<8x256xbf16>, vector<16x256xf32> -> vector<16x256xf32>
    %4 = arith.truncf %3 : vector<16x256xf32> to vector<16x256xbf16>
    %c0_4 = arith.constant 0 : index
    %c0_5 = arith.constant 0 : index
    %c0_6 = arith.constant 0 : index
    %5 = vector.load %arg4[%c0_4, %c0_5, %c0_6] : memref<1x16x256xbf16, #tpu.memory_space<vmem>>, vector<1x16x256xbf16>
    %6 = vector.shape_cast %5 : vector<1x16x256xbf16> to vector<16x256xbf16>
    %7 = vector.shape_cast %4 : vector<16x256xbf16> to vector<1x16x256xbf16>
    tpu.vector_store %arg4[%c0_4, %c0_5, %c0_6], %7 {strides = array<i32>} : memref<1x16x256xbf16, #tpu.memory_space<vmem>>, vector<1x16x256xbf16>,
    return
  }
  func.func @transform_0(%arg0: i32, %arg1: i32) -> (i32, i32, i32) {
    %c0_i32 = arith.constant 0 : i32
    %c0_i32_0 = arith.constant 0 : i32
    return %arg0, %c0_i32, %arg1 : i32, i32, i32
  }
  func.func @transform_1(%arg0: i32, %arg1: i32) -> (i32, i32) {
    %c0_i32 = arith.constant 0 : i32
    %c0_i32_0 = arith.constant 0 : i32
    %c0_i32_1 = arith.constant 0 : i32
    return %c0_i32, %c0_i32_0 : i32, i32
  }
  func.func @transform_2(%arg0: i32, %arg1: i32) -> (i32, i32, i32) {
    %c0_i32 = arith.constant 0 : i32
    %c0_i32_0 = arith.constant 0 : i32
    return %arg0, %c0_i32, %arg1 : i32, i32, i32
  }
}

module attributes {stable_mosaic.version = 11 : i64} {
  func.func @_lin_kernel(%arg0: i32, %arg1: i32, %arg2: memref<1x8x64xbf16, #tpu.memory_space<vmem>>, %arg3: memref<8x8xbf16, #tpu.memory_space<vmem>>, %arg4: memref<1x8x64xbf16, #tpu.memory_space<vmem>>) attributes {dimension_semantics = [#tpu.dimension_semantics<parallel>, #tpu.dimension_semantics<parallel>], iteration_bounds = array<i64: 2, 1>, scalar_prefetch = 0 : i64, scratch_operands = 0 : i64, tpu.core_type = #tpu.core_type<tc>, window_params = [{transform_indices = @transform_0, window_bounds = array<i64: 1, 8, 64>}, {pipeline_mode = #tpu.pipeline_mode<synchronous>, transform_indices = @transform_1, window_bounds = array<i64: 8, 8>}, {transform_indices = @transform_2, window_bounds = array<i64: 1, 8, 64>}]} {
    %c0 = arith.constant 0 : index
    %c0_0 = arith.constant 0 : index
    %0 = vector.load %arg3[%c0, %c0_0] : memref<8x8xbf16, #tpu.memory_space<vmem>>, vector<8x8xbf16>
    %c0_1 = arith.constant 0 : index
    %c0_2 = arith.constant 0 : index
    %c0_3 = arith.constant 0 : index
    %1 = vector.load %arg2[%c0_1, %c0_2, %c0_3] : memref<1x8x64xbf16, #tpu.memory_space<vmem>>, vector<1x8x64xbf16>
    %2 = vector.shape_cast %1 : vector<1x8x64xbf16> to vector<8x64xbf16>
    %cst = arith.constant dense<0.000000e+00> : vector<8x64xf32>
    %3 = tpu.matmul %0, %2, %cst {dimension_numbers = #tpu.dot_dimension_numbers<[1], [0], [0], [1], [0, 0, 1, 1], [], []>} : vector<8x8xbf16>, vector<8x64xbf16>, vector<8x64xf32> -> vector<8x64xf32>
    %4 = arith.truncf %3 : vector<8x64xf32> to vector<8x64xbf16>
    %c0_4 = arith.constant 0 : index
    %c0_5 = arith.constant 0 : index
    %c0_6 = arith.constant 0 : index
    %5 = vector.load %arg4[%c0_4, %c0_5, %c0_6] : memref<1x8x64xbf16, #tpu.memory_space<vmem>>, vector<1x8x64xbf16>
    %6 = vector.shape_cast %5 : vector<1x8x64xbf16> to vector<8x64xbf16>
    %7 = vector.shape_cast %4 : vector<8x64xbf16> to vector<1x8x64xbf16>
    tpu.vector_store %arg4[%c0_4, %c0_5, %c0_6], %7 {strides = array<i32>} : memref<1x8x64xbf16, #tpu.memory_space<vmem>>, vector<1x8x64xbf16>,
    return
  }
  func.func @transform_0(%arg0: i32, %arg1: i32) -> (i32, i32, i32) {
    %c0_i32 = arith.constant 0 : i32
    %c0_i32_0 = arith.constant 0 : i32
    return %arg0, %c0_i32, %arg1 : i32, i32, i32
  }
  func.func @transform_1(%arg0: i32, %arg1: i32) -> (i32, i32) {
    %c0_i32 = arith.constant 0 : i32
    %c0_i32_0 = arith.constant 0 : i32
    %c0_i32_1 = arith.constant 0 : i32
    return %c0_i32, %c0_i32_0 : i32, i32
  }
  func.func @transform_2(%arg0: i32, %arg1: i32) -> (i32, i32, i32) {
    %c0_i32 = arith.constant 0 : i32
    %c0_i32_0 = arith.constant 0 : i32
    return %arg0, %c0_i32, %arg1 : i32, i32, i32
  }
}

module attributes {stable_mosaic.version = 11 : i64} {
  func.func @_tail3_kernel(%arg0: i32, %arg1: i32, %arg2: memref<1x8x64xf32, #tpu.memory_space<vmem>>, %arg3: memref<1x8x64xf32, #tpu.memory_space<vmem>>, %arg4: memref<1x8x64xf32, #tpu.memory_space<vmem>>, %arg5: memref<8x1xf32, #tpu.memory_space<vmem>>, %arg6: memref<4x8xbf16, #tpu.memory_space<vmem>>, %arg7: memref<4x1xf32, #tpu.memory_space<vmem>>, %arg8: memref<8x4xbf16, #tpu.memory_space<vmem>>, %arg9: memref<8x1xf32, #tpu.memory_space<vmem>>, %arg10: memref<1x8x64xbf16, #tpu.memory_space<vmem>>) attributes {dimension_semantics = [#tpu.dimension_semantics<parallel>, #tpu.dimension_semantics<parallel>], iteration_bounds = array<i64: 2, 1>, scalar_prefetch = 0 : i64, scratch_operands = 0 : i64, tpu.core_type = #tpu.core_type<tc>, window_params = [{transform_indices = @transform_0, window_bounds = array<i64: 1, 8, 64>}, {transform_indices = @transform_1, window_bounds = array<i64: 1, 8, 64>}, {transform_indices = @transform_2, window_bounds = array<i64: 1, 8, 64>}, {pipeline_mode = #tpu.pipeline_mode<synchronous>, transform_indices = @transform_3, window_bounds = array<i64: 8, 1>}, {pipeline_mode = #tpu.pipeline_mode<synchronous>, transform_indices = @transform_4, window_bounds = array<i64: 4, 8>}, {pipeline_mode = #tpu.pipeline_mode<synchronous>, transform_indices = @transform_5, window_bounds = array<i64: 4, 1>}, {pipeline_mode = #tpu.pipeline_mode<synchronous>, transform_indices = @transform_6, window_bounds = array<i64: 8, 4>}, {pipeline_mode = #tpu.pipeline_mode<synchronous>, transform_indices = @transform_7, window_bounds = array<i64: 8, 1>}, {transform_indices = @transform_8, window_bounds = array<i64: 1, 8, 64>}]} {
    %c0 = arith.constant 0 : index
    %c0_0 = arith.constant 0 : index
    %c0_1 = arith.constant 0 : index
    %0 = vector.load %arg2[%c0, %c0_0, %c0_1] : memref<1x8x64xf32, #tpu.memory_space<vmem>>, vector<1x8x64xf32>
    %1 = vector.shape_cast %0 : vector<1x8x64xf32> to vector<8x64xf32>
    %c0_2 = arith.constant 0 : index
    %c0_3 = arith.constant 0 : index
    %2 = vector.load %arg5[%c0_2, %c0_3] : memref<8x1xf32, #tpu.memory_space<vmem>>, vector<8x1xf32>
    %3 = vector.broadcast %2 : vector<8x1xf32> to vector<8x64xf32>
    %4 = arith.addf %1, %3 : vector<8x64xf32>
    %c0_4 = arith.constant 0 : index
    %c0_5 = arith.constant 0 : index
    %c0_6 = arith.constant 0 : index
    %5 = vector.load %arg3[%c0_4, %c0_5, %c0_6] : memref<1x8x64xf32, #tpu.memory_space<vmem>>, vector<1x8x64xf32>
    %6 = vector.shape_cast %5 : vector<1x8x64xf32> to vector<8x64xf32>
    %7 = arith.addf %4, %6 : vector<8x64xf32>
    %cst = arith.constant 5.000000e-01 : f32
    %8 = vector.broadcast %cst : f32 to vector<8x64xf32>
    %9 = arith.mulf %8, %7 : vector<8x64xf32>
    %cst_7 = arith.constant 0.707106769 : f32
    %10 = vector.broadcast %cst_7 : f32 to vector<8x64xf32>
    %11 = arith.mulf %7, %10 : vector<8x64xf32>
    %cst_8 = arith.constant 0.000000e+00 : f32
    %12 = vector.broadcast %cst_8 : f32 to vector<8x64xf32>
    %13 = arith.cmpf oge, %11, %12 : vector<8x64xf32>
    %cst_9 = arith.constant 1.000000e+00 : f32
    %cst_10 = arith.constant -1.000000e+00 : f32
    %14 = vector.broadcast %cst_9 : f32 to vector<8x64xf32>
    %15 = vector.broadcast %cst_10 : f32 to vector<8x64xf32>
    %16 = arith.select %13, %14, %15 : vector<8x64xi1>, vector<8x64xf32>
    %17 = math.absf %11 : vector<8x64xf32>
    %cst_11 = arith.constant 0.327591091 : f32
    %18 = vector.broadcast %cst_11 : f32 to vector<8x64xf32>
    %19 = arith.mulf %18, %17 : vector<8x64xf32>
    %cst_12 = arith.constant 1.000000e+00 : f32
    %20 = vector.broadcast %cst_12 : f32 to vector<8x64xf32>
    %21 = arith.addf %20, %19 : vector<8x64xf32>
    %22 = tpu.reciprocal %21 {approx = true} : vector<8x64xf32> -> vector<8x64xf32>
    %cst_13 = arith.constant 1.06140542 : f32
    %23 = vector.broadcast %cst_13 : f32 to vector<8x64xf32>
    %24 = arith.mulf %23, %22 : vector<8x64xf32>
    %cst_14 = arith.constant -1.45315206 : f32
    %25 = vector.broadcast %cst_14 : f32 to vector<8x64xf32>
    %26 = arith.addf %24, %25 : vector<8x64xf32>
    %27 = arith.mulf %26, %22 : vector<8x64xf32>
    %cst_15 = arith.constant 1.42141378 : f32
    %28 = vector.broadcast %cst_15 : f32 to vector<8x64xf32>
    %29 = arith.addf %27, %28 : vector<8x64xf32>
    %30 = arith.mulf %29, %22 : vector<8x64xf32>
    %cst_16 = arith.constant -0.284496725 : f32
    %31 = vector.broadcast %cst_16 : f32 to vector<8x64xf32>
    %32 = arith.addf %30, %31 : vector<8x64xf32>
    %33 = arith.mulf %32, %22 : vector<8x64xf32>
    %cst_17 = arith.constant 0.254829586 : f32
    %34 = vector.broadcast %cst_17 : f32 to vector<8x64xf32>
    %35 = arith.addf %33, %34 : vector<8x64xf32>
    %36 = arith.mulf %35, %22 : vector<8x64xf32>
    %cst_18 = arith.constant 0.000000e+00 : f32
    %37 = vector.broadcast %cst_18 : f32 to vector<8x64xf32>
    %38 = arith.subf %37, %17 : vector<8x64xf32>
    %39 = arith.mulf %38, %17 : vector<8x64xf32>
    %40 = math.exp %39 : vector<8x64xf32>
    %41 = arith.mulf %36, %40 : vector<8x64xf32>
    %cst_19 = arith.constant 1.000000e+00 : f32
    %42 = vector.broadcast %cst_19 : f32 to vector<8x64xf32>
    %43 = arith.subf %42, %41 : vector<8x64xf32>
    %44 = arith.mulf %16, %43 : vector<8x64xf32>
    %cst_20 = arith.constant 1.000000e+00 : f32
    %45 = vector.broadcast %cst_20 : f32 to vector<8x64xf32>
    %46 = arith.addf %45, %44 : vector<8x64xf32>
    %47 = arith.mulf %9, %46 : vector<8x64xf32>
    %c0_21 = arith.constant 0 : index
    %c0_22 = arith.constant 0 : index
    %48 = vector.load %arg6[%c0_21, %c0_22] : memref<4x8xbf16, #tpu.memory_space<vmem>>, vector<4x8xbf16>
    %49 = arith.truncf %47 : vector<8x64xf32> to vector<8x64xbf16>
    %cst_23 = arith.constant dense<0.000000e+00> : vector<4x64xf32>
    %50 = tpu.matmul %48, %49, %cst_23 {dimension_numbers = #tpu.dot_dimension_numbers<[1], [0], [0], [1], [0, 0, 1, 1], [], []>} : vector<4x8xbf16>, vector<8x64xbf16>, vector<4x64xf32> -> vector<4x64xf32>
    %c0_24 = arith.constant 0 : index
    %c0_25 = arith.constant 0 : index
    %51 = vector.load %arg7[%c0_24, %c0_25] : memref<4x1xf32, #tpu.memory_space<vmem>>, vector<4x1xf32>
    %52 = vector.broadcast %51 : vector<4x1xf32> to vector<4x64xf32>
    %53 = arith.addf %50, %52 : vector<4x64xf32>
    %cst_26 = arith.constant 5.000000e-01 : f32
    %54 = vector.broadcast %cst_26 : f32 to vector<4x64xf32>
    %55 = arith.mulf %54, %53 : vector<4x64xf32>
    %cst_27 = arith.constant 0.707106769 : f32
    %56 = vector.broadcast %cst_27 : f32 to vector<4x64xf32>
    %57 = arith.mulf %53, %56 : vector<4x64xf32>
    %cst_28 = arith.constant 0.000000e+00 : f32
    %58 = vector.broadcast %cst_28 : f32 to vector<4x64xf32>
    %59 = arith.cmpf oge, %57, %58 : vector<4x64xf32>
    %cst_29 = arith.constant 1.000000e+00 : f32
    %cst_30 = arith.constant -1.000000e+00 : f32
    %60 = vector.broadcast %cst_29 : f32 to vector<4x64xf32>
    %61 = vector.broadcast %cst_30 : f32 to vector<4x64xf32>
    %62 = arith.select %59, %60, %61 : vector<4x64xi1>, vector<4x64xf32>
    %63 = math.absf %57 : vector<4x64xf32>
    %cst_31 = arith.constant 0.327591091 : f32
    %64 = vector.broadcast %cst_31 : f32 to vector<4x64xf32>
    %65 = arith.mulf %64, %63 : vector<4x64xf32>
    %cst_32 = arith.constant 1.000000e+00 : f32
    %66 = vector.broadcast %cst_32 : f32 to vector<4x64xf32>
    %67 = arith.addf %66, %65 : vector<4x64xf32>
    %68 = tpu.reciprocal %67 {approx = true} : vector<4x64xf32> -> vector<4x64xf32>
    %cst_33 = arith.constant 1.06140542 : f32
    %69 = vector.broadcast %cst_33 : f32 to vector<4x64xf32>
    %70 = arith.mulf %69, %68 : vector<4x64xf32>
    %cst_34 = arith.constant -1.45315206 : f32
    %71 = vector.broadcast %cst_34 : f32 to vector<4x64xf32>
    %72 = arith.addf %70, %71 : vector<4x64xf32>
    %73 = arith.mulf %72, %68 : vector<4x64xf32>
    %cst_35 = arith.constant 1.42141378 : f32
    %74 = vector.broadcast %cst_35 : f32 to vector<4x64xf32>
    %75 = arith.addf %73, %74 : vector<4x64xf32>
    %76 = arith.mulf %75, %68 : vector<4x64xf32>
    %cst_36 = arith.constant -0.284496725 : f32
    %77 = vector.broadcast %cst_36 : f32 to vector<4x64xf32>
    %78 = arith.addf %76, %77 : vector<4x64xf32>
    %79 = arith.mulf %78, %68 : vector<4x64xf32>
    %cst_37 = arith.constant 0.254829586 : f32
    %80 = vector.broadcast %cst_37 : f32 to vector<4x64xf32>
    %81 = arith.addf %79, %80 : vector<4x64xf32>
    %82 = arith.mulf %81, %68 : vector<4x64xf32>
    %cst_38 = arith.constant 0.000000e+00 : f32
    %83 = vector.broadcast %cst_38 : f32 to vector<4x64xf32>
    %84 = arith.subf %83, %63 : vector<4x64xf32>
    %85 = arith.mulf %84, %63 : vector<4x64xf32>
    %86 = math.exp %85 : vector<4x64xf32>
    %87 = arith.mulf %82, %86 : vector<4x64xf32>
    %cst_39 = arith.constant 1.000000e+00 : f32
    %88 = vector.broadcast %cst_39 : f32 to vector<4x64xf32>
    %89 = arith.subf %88, %87 : vector<4x64xf32>
    %90 = arith.mulf %62, %89 : vector<4x64xf32>
    %cst_40 = arith.constant 1.000000e+00 : f32
    %91 = vector.broadcast %cst_40 : f32 to vector<4x64xf32>
    %92 = arith.addf %91, %90 : vector<4x64xf32>
    %93 = arith.mulf %55, %92 : vector<4x64xf32>
    %c0_41 = arith.constant 0 : index
    %c0_42 = arith.constant 0 : index
    %94 = vector.load %arg8[%c0_41, %c0_42] : memref<8x4xbf16, #tpu.memory_space<vmem>>, vector<8x4xbf16>
    %95 = arith.truncf %93 : vector<4x64xf32> to vector<4x64xbf16>
    %cst_43 = arith.constant dense<0.000000e+00> : vector<8x64xf32>
    %96 = tpu.matmul %94, %95, %cst_43 {dimension_numbers = #tpu.dot_dimension_numbers<[1], [0], [0], [1], [0, 0, 1, 1], [], []>} : vector<8x4xbf16>, vector<4x64xbf16>, vector<8x64xf32> -> vector<8x64xf32>
    %c0_44 = arith.constant 0 : index
    %c0_45 = arith.constant 0 : index
    %97 = vector.load %arg9[%c0_44, %c0_45] : memref<8x1xf32, #tpu.memory_space<vmem>>, vector<8x1xf32>
    %98 = vector.broadcast %97 : vector<8x1xf32> to vector<8x64xf32>
    %99 = arith.addf %96, %98 : vector<8x64xf32>
    %c0_46 = arith.constant 0 : index
    %c0_47 = arith.constant 0 : index
    %c0_48 = arith.constant 0 : index
    %100 = vector.load %arg4[%c0_46, %c0_47, %c0_48] : memref<1x8x64xf32, #tpu.memory_space<vmem>>, vector<1x8x64xf32>
    %101 = vector.shape_cast %100 : vector<1x8x64xf32> to vector<8x64xf32>
    %102 = arith.addf %99, %101 : vector<8x64xf32>
    %103 = arith.truncf %102 : vector<8x64xf32> to vector<8x64xbf16>
    %c0_49 = arith.constant 0 : index
    %c0_50 = arith.constant 0 : index
    %c0_51 = arith.constant 0 : index
    %104 = vector.load %arg10[%c0_49, %c0_50, %c0_51] : memref<1x8x64xbf16, #tpu.memory_space<vmem>>, vector<1x8x64xbf16>
    %105 = vector.shape_cast %104 : vector<1x8x64xbf16> to vector<8x64xbf16>
    %106 = vector.shape_cast %103 : vector<8x64xbf16> to vector<1x8x64xbf16>
    tpu.vector_store %arg10[%c0_49, %c0_50, %c0_51], %106 {strides = array<i32>} : memref<1x8x64xbf16, #tpu.memory_space<vmem>>, vector<1x8x64xbf16>,
    return
  }
  func.func @transform_0(%arg0: i32, %arg1: i32) -> (i32, i32, i32) {
    %c0_i32 = arith.constant 0 : i32
    %c0_i32_0 = arith.constant 0 : i32
    return %arg0, %c0_i32, %arg1 : i32, i32, i32
  }
  func.func @transform_1(%arg0: i32, %arg1: i32) -> (i32, i32, i32) {
    %c0_i32 = arith.constant 0 : i32
    %c0_i32_0 = arith.constant 0 : i32
    return %arg0, %c0_i32, %arg1 : i32, i32, i32
  }
  func.func @transform_2(%arg0: i32, %arg1: i32) -> (i32, i32, i32) {
    %c0_i32 = arith.constant 0 : i32
    %c0_i32_0 = arith.constant 0 : i32
    return %arg0, %c0_i32, %arg1 : i32, i32, i32
  }
  func.func @transform_3(%arg0: i32, %arg1: i32) -> (i32, i32) {
    %c0_i32 = arith.constant 0 : i32
    %c0_i32_0 = arith.constant 0 : i32
    %c0_i32_1 = arith.constant 0 : i32
    return %c0_i32, %c0_i32_0 : i32, i32
  }
  func.func @transform_4(%arg0: i32, %arg1: i32) -> (i32, i32) {
    %c0_i32 = arith.constant 0 : i32
    %c0_i32_0 = arith.constant 0 : i32
    %c0_i32_1 = arith.constant 0 : i32
    return %c0_i32, %c0_i32_0 : i32, i32
  }
  func.func @transform_5(%arg0: i32, %arg1: i32) -> (i32, i32) {
    %c0_i32 = arith.constant 0 : i32
    %c0_i32_0 = arith.constant 0 : i32
    %c0_i32_1 = arith.constant 0 : i32
    return %c0_i32, %c0_i32_0 : i32, i32
  }
  func.func @transform_6(%arg0: i32, %arg1: i32) -> (i32, i32) {
    %c0_i32 = arith.constant 0 : i32
    %c0_i32_0 = arith.constant 0 : i32
    %c0_i32_1 = arith.constant 0 : i32
    return %c0_i32, %c0_i32_0 : i32, i32
  }
  func.func @transform_7(%arg0: i32, %arg1: i32) -> (i32, i32) {
    %c0_i32 = arith.constant 0 : i32
    %c0_i32_0 = arith.constant 0 : i32
    %c0_i32_1 = arith.constant 0 : i32
    return %c0_i32, %c0_i32_0 : i32, i32
  }
  func.func @transform_8(%arg0: i32, %arg1: i32) -> (i32, i32, i32) {
    %c0_i32 = arith.constant 0 : i32
    %c0_i32_0 = arith.constant 0 : i32
    return %arg0, %c0_i32, %arg1 : i32, i32, i32
  }
}

module attributes {stable_mosaic.version = 11 : i64} {
  func.func @_lin_kernel(%arg0: i32, %arg1: i32, %arg2: memref<1x16x64xbf16, #tpu.memory_space<vmem>>, %arg3: memref<16x16xbf16, #tpu.memory_space<vmem>>, %arg4: memref<1x16x64xbf16, #tpu.memory_space<vmem>>) attributes {dimension_semantics = [#tpu.dimension_semantics<parallel>, #tpu.dimension_semantics<parallel>], iteration_bounds = array<i64: 2, 1>, scalar_prefetch = 0 : i64, scratch_operands = 0 : i64, tpu.core_type = #tpu.core_type<tc>, window_params = [{transform_indices = @transform_0, window_bounds = array<i64: 1, 16, 64>}, {pipeline_mode = #tpu.pipeline_mode<synchronous>, transform_indices = @transform_1, window_bounds = array<i64: 16, 16>}, {transform_indices = @transform_2, window_bounds = array<i64: 1, 16, 64>}]} {
    %c0 = arith.constant 0 : index
    %c0_0 = arith.constant 0 : index
    %0 = vector.load %arg3[%c0, %c0_0] : memref<16x16xbf16, #tpu.memory_space<vmem>>, vector<16x16xbf16>
    %c0_1 = arith.constant 0 : index
    %c0_2 = arith.constant 0 : index
    %c0_3 = arith.constant 0 : index
    %1 = vector.load %arg2[%c0_1, %c0_2, %c0_3] : memref<1x16x64xbf16, #tpu.memory_space<vmem>>, vector<1x16x64xbf16>
    %2 = vector.shape_cast %1 : vector<1x16x64xbf16> to vector<16x64xbf16>
    %cst = arith.constant dense<0.000000e+00> : vector<16x64xf32>
    %3 = tpu.matmul %0, %2, %cst {dimension_numbers = #tpu.dot_dimension_numbers<[1], [0], [0], [1], [0, 0, 1, 1], [], []>} : vector<16x16xbf16>, vector<16x64xbf16>, vector<16x64xf32> -> vector<16x64xf32>
    %4 = arith.truncf %3 : vector<16x64xf32> to vector<16x64xbf16>
    %c0_4 = arith.constant 0 : index
    %c0_5 = arith.constant 0 : index
    %c0_6 = arith.constant 0 : index
    %5 = vector.load %arg4[%c0_4, %c0_5, %c0_6] : memref<1x16x64xbf16, #tpu.memory_space<vmem>>, vector<1x16x64xbf16>
    %6 = vector.shape_cast %5 : vector<1x16x64xbf16> to vector<16x64xbf16>
    %7 = vector.shape_cast %4 : vector<16x64xbf16> to vector<1x16x64xbf16>
    tpu.vector_store %arg4[%c0_4, %c0_5, %c0_6], %7 {strides = array<i32>} : memref<1x16x64xbf16, #tpu.memory_space<vmem>>, vector<1x16x64xbf16>,
    return
  }
  func.func @transform_0(%arg0: i32, %arg1: i32) -> (i32, i32, i32) {
    %c0_i32 = arith.constant 0 : i32
    %c0_i32_0 = arith.constant 0 : i32
    return %arg0, %c0_i32, %arg1 : i32, i32, i32
  }
  func.func @transform_1(%arg0: i32, %arg1: i32) -> (i32, i32) {
    %c0_i32 = arith.constant 0 : i32
    %c0_i32_0 = arith.constant 0 : i32
    %c0_i32_1 = arith.constant 0 : i32
    return %c0_i32, %c0_i32_0 : i32, i32
  }
  func.func @transform_2(%arg0: i32, %arg1: i32) -> (i32, i32, i32) {
    %c0_i32 = arith.constant 0 : i32
    %c0_i32_0 = arith.constant 0 : i32
    return %arg0, %c0_i32, %arg1 : i32, i32, i32
  }
}

module attributes {stable_mosaic.version = 11 : i64} {
  func.func @_cmix_kernel(%arg0: i32, %arg1: memref<2x16x12xf32, #tpu.memory_space<vmem>>, %arg2: memref<2x16x12xf32, #tpu.memory_space<vmem>>, %arg3: memref<8x16x12xf32, #tpu.memory_space<vmem>>, %arg4: memref<8x16x12xf32, #tpu.memory_space<vmem>>, %arg5: memref<2x8x12xf32, #tpu.memory_space<vmem>>, %arg6: memref<2x8x12xf32, #tpu.memory_space<vmem>>) attributes {dimension_semantics = [#tpu.dimension_semantics<parallel>], iteration_bounds = array<i64: 1>, scalar_prefetch = 0 : i64, scratch_operands = 0 : i64, tpu.core_type = #tpu.core_type<tc>, window_params = [{transform_indices = @transform_0, window_bounds = array<i64: 2, 16, 12>}, {transform_indices = @transform_1, window_bounds = array<i64: 2, 16, 12>}, {transform_indices = @transform_2, window_bounds = array<i64: 8, 16, 12>}, {transform_indices = @transform_3, window_bounds = array<i64: 8, 16, 12>}, {transform_indices = @transform_4, window_bounds = array<i64: 2, 8, 12>}, {transform_indices = @transform_5, window_bounds = array<i64: 2, 8, 12>}]} {
    %c0 = arith.constant 0 : index
    %c0_0 = arith.constant 0 : index
    %c0_1 = arith.constant 0 : index
    %0 = vector.load %arg1[%c0, %c0_0, %c0_1] : memref<2x16x12xf32, #tpu.memory_space<vmem>>, vector<2x16x12xf32>
    %c0_2 = arith.constant 0 : index
    %c0_3 = arith.constant 0 : index
    %c0_4 = arith.constant 0 : index
    %1 = vector.load %arg2[%c0_2, %c0_3, %c0_4] : memref<2x16x12xf32, #tpu.memory_space<vmem>>, vector<2x16x12xf32>
    %c0_5 = arith.constant 0 : index
    %c0_6 = arith.constant 0 : index
    %c0_7 = arith.constant 0 : index
    %2 = vector.load %arg3[%c0_5, %c0_6, %c0_7] : memref<8x16x12xf32, #tpu.memory_space<vmem>>, vector<8x16x12xf32>
    %c0_8 = arith.constant 0 : index
    %c0_9 = arith.constant 0 : index
    %c0_10 = arith.constant 0 : index
    %3 = vector.load %arg4[%c0_8, %c0_9, %c0_10] : memref<8x16x12xf32, #tpu.memory_space<vmem>>, vector<8x16x12xf32>
    %cst = arith.constant 0.000000e+00 : f32
    %4 = vector.broadcast %cst : f32 to vector<2x8x12xf32>
    %cst_11 = arith.constant 0.000000e+00 : f32
    %5 = vector.broadcast %cst_11 : f32 to vector<2x8x12xf32>
    %6 = vector.extract_strided_slice %0 {offsets = [0, 0, 0], sizes = [2, 1, 12], strides = [1, 1, 1]} : vector<2x16x12xf32> to vector<2x1x12xf32>
    %7 = vector.shape_cast %6 : vector<2x1x12xf32> to vector<2x12xf32>
    %8 = vector.shape_cast %7 : vector<2x12xf32> to vector<2x1x12xf32>
    %9 = vector.extract_strided_slice %1 {offsets = [0, 0, 0], sizes = [2, 1, 12], strides = [1, 1, 1]} : vector<2x16x12xf32> to vector<2x1x12xf32>
    %10 = vector.shape_cast %9 : vector<2x1x12xf32> to vector<2x12xf32>
    %11 = vector.shape_cast %10 : vector<2x12xf32> to vector<2x1x12xf32>
    %12 = vector.extract_strided_slice %2 {offsets = [0, 0, 0], sizes = [8, 1, 12], strides = [1, 1, 1]} : vector<8x16x12xf32> to vector<8x1x12xf32>
    %13 = vector.shape_cast %12 : vector<8x1x12xf32> to vector<8x12xf32>
    %14 = vector.shape_cast %13 : vector<8x12xf32> to vector<1x8x12xf32>
    %15 = vector.extract_strided_slice %3 {offsets = [0, 0, 0], sizes = [8, 1, 12], strides = [1, 1, 1]} : vector<8x16x12xf32> to vector<8x1x12xf32>
    %16 = vector.shape_cast %15 : vector<8x1x12xf32> to vector<8x12xf32>
    %17 = vector.shape_cast %16 : vector<8x12xf32> to vector<1x8x12xf32>
    %18 = vector.broadcast %8 : vector<2x1x12xf32> to vector<2x8x12xf32>
    %19 = vector.broadcast %14 : vector<1x8x12xf32> to vector<2x8x12xf32>
    %20 = arith.mulf %18, %19 : vector<2x8x12xf32>
    %21 = arith.addf %4, %20 : vector<2x8x12xf32>
    %22 = vector.broadcast %11 : vector<2x1x12xf32> to vector<2x8x12xf32>
    %23 = vector.broadcast %17 : vector<1x8x12xf32> to vector<2x8x12xf32>
    %24 = arith.mulf %22, %23 : vector<2x8x12xf32>
    %25 = arith.subf %21, %24 : vector<2x8x12xf32>
    %26 = vector.broadcast %8 : vector<2x1x12xf32> to vector<2x8x12xf32>
    %27 = vector.broadcast %17 : vector<1x8x12xf32> to vector<2x8x12xf32>
    %28 = arith.mulf %26, %27 : vector<2x8x12xf32>
    %29 = arith.addf %5, %28 : vector<2x8x12xf32>
    %30 = vector.broadcast %11 : vector<2x1x12xf32> to vector<2x8x12xf32>
    %31 = vector.broadcast %14 : vector<1x8x12xf32> to vector<2x8x12xf32>
    %32 = arith.mulf %30, %31 : vector<2x8x12xf32>
    %33 = arith.addf %29, %32 : vector<2x8x12xf32>
    %34 = vector.extract_strided_slice %0 {offsets = [0, 1, 0], sizes = [2, 1, 12], strides = [1, 1, 1]} : vector<2x16x12xf32> to vector<2x1x12xf32>
    %35 = vector.shape_cast %34 : vector<2x1x12xf32> to vector<2x12xf32>
    %36 = vector.shape_cast %35 : vector<2x12xf32> to vector<2x1x12xf32>
    %37 = vector.extract_strided_slice %1 {offsets = [0, 1, 0], sizes = [2, 1, 12], strides = [1, 1, 1]} : vector<2x16x12xf32> to vector<2x1x12xf32>
    %38 = vector.shape_cast %37 : vector<2x1x12xf32> to vector<2x12xf32>
    %39 = vector.shape_cast %38 : vector<2x12xf32> to vector<2x1x12xf32>
    %40 = vector.extract_strided_slice %2 {offsets = [0, 1, 0], sizes = [8, 1, 12], strides = [1, 1, 1]} : vector<8x16x12xf32> to vector<8x1x12xf32>
    %41 = vector.shape_cast %40 : vector<8x1x12xf32> to vector<8x12xf32>
    %42 = vector.shape_cast %41 : vector<8x12xf32> to vector<1x8x12xf32>
    %43 = vector.extract_strided_slice %3 {offsets = [0, 1, 0], sizes = [8, 1, 12], strides = [1, 1, 1]} : vector<8x16x12xf32> to vector<8x1x12xf32>
    %44 = vector.shape_cast %43 : vector<8x1x12xf32> to vector<8x12xf32>
    %45 = vector.shape_cast %44 : vector<8x12xf32> to vector<1x8x12xf32>
    %46 = vector.broadcast %36 : vector<2x1x12xf32> to vector<2x8x12xf32>
    %47 = vector.broadcast %42 : vector<1x8x12xf32> to vector<2x8x12xf32>
    %48 = arith.mulf %46, %47 : vector<2x8x12xf32>
    %49 = arith.addf %25, %48 : vector<2x8x12xf32>
    %50 = vector.broadcast %39 : vector<2x1x12xf32> to vector<2x8x12xf32>
    %51 = vector.broadcast %45 : vector<1x8x12xf32> to vector<2x8x12xf32>
    %52 = arith.mulf %50, %51 : vector<2x8x12xf32>
    %53 = arith.subf %49, %52 : vector<2x8x12xf32>
    %54 = vector.broadcast %36 : vector<2x1x12xf32> to vector<2x8x12xf32>
    %55 = vector.broadcast %45 : vector<1x8x12xf32> to vector<2x8x12xf32>
    %56 = arith.mulf %54, %55 : vector<2x8x12xf32>
    %57 = arith.addf %33, %56 : vector<2x8x12xf32>
    %58 = vector.broadcast %39 : vector<2x1x12xf32> to vector<2x8x12xf32>
    %59 = vector.broadcast %42 : vector<1x8x12xf32> to vector<2x8x12xf32>
    %60 = arith.mulf %58, %59 : vector<2x8x12xf32>
    %61 = arith.addf %57, %60 : vector<2x8x12xf32>
    %62 = vector.extract_strided_slice %0 {offsets = [0, 2, 0], sizes = [2, 1, 12], strides = [1, 1, 1]} : vector<2x16x12xf32> to vector<2x1x12xf32>
    %63 = vector.shape_cast %62 : vector<2x1x12xf32> to vector<2x12xf32>
    %64 = vector.shape_cast %63 : vector<2x12xf32> to vector<2x1x12xf32>
    %65 = vector.extract_strided_slice %1 {offsets = [0, 2, 0], sizes = [2, 1, 12], strides = [1, 1, 1]} : vector<2x16x12xf32> to vector<2x1x12xf32>
    %66 = vector.shape_cast %65 : vector<2x1x12xf32> to vector<2x12xf32>
    %67 = vector.shape_cast %66 : vector<2x12xf32> to vector<2x1x12xf32>
    %68 = vector.extract_strided_slice %2 {offsets = [0, 2, 0], sizes = [8, 1, 12], strides = [1, 1, 1]} : vector<8x16x12xf32> to vector<8x1x12xf32>
    %69 = vector.shape_cast %68 : vector<8x1x12xf32> to vector<8x12xf32>
    %70 = vector.shape_cast %69 : vector<8x12xf32> to vector<1x8x12xf32>
    %71 = vector.extract_strided_slice %3 {offsets = [0, 2, 0], sizes = [8, 1, 12], strides = [1, 1, 1]} : vector<8x16x12xf32> to vector<8x1x12xf32>
    %72 = vector.shape_cast %71 : vector<8x1x12xf32> to vector<8x12xf32>
    %73 = vector.shape_cast %72 : vector<8x12xf32> to vector<1x8x12xf32>
    %74 = vector.broadcast %64 : vector<2x1x12xf32> to vector<2x8x12xf32>
    %75 = vector.broadcast %70 : vector<1x8x12xf32> to vector<2x8x12xf32>
    %76 = arith.mulf %74, %75 : vector<2x8x12xf32>
    %77 = arith.addf %53, %76 : vector<2x8x12xf32>
    %78 = vector.broadcast %67 : vector<2x1x12xf32> to vector<2x8x12xf32>
    %79 = vector.broadcast %73 : vector<1x8x12xf32> to vector<2x8x12xf32>
    %80 = arith.mulf %78, %79 : vector<2x8x12xf32>
    %81 = arith.subf %77, %80 : vector<2x8x12xf32>
    %82 = vector.broadcast %64 : vector<2x1x12xf32> to vector<2x8x12xf32>
    %83 = vector.broadcast %73 : vector<1x8x12xf32> to vector<2x8x12xf32>
    %84 = arith.mulf %82, %83 : vector<2x8x12xf32>
    %85 = arith.addf %61, %84 : vector<2x8x12xf32>
    %86 = vector.broadcast %67 : vector<2x1x12xf32> to vector<2x8x12xf32>
    %87 = vector.broadcast %70 : vector<1x8x12xf32> to vector<2x8x12xf32>
    %88 = arith.mulf %86, %87 : vector<2x8x12xf32>
    %89 = arith.addf %85, %88 : vector<2x8x12xf32>
    %90 = vector.extract_strided_slice %0 {offsets = [0, 3, 0], sizes = [2, 1, 12], strides = [1, 1, 1]} : vector<2x16x12xf32> to vector<2x1x12xf32>
    %91 = vector.shape_cast %90 : vector<2x1x12xf32> to vector<2x12xf32>
    %92 = vector.shape_cast %91 : vector<2x12xf32> to vector<2x1x12xf32>
    %93 = vector.extract_strided_slice %1 {offsets = [0, 3, 0], sizes = [2, 1, 12], strides = [1, 1, 1]} : vector<2x16x12xf32> to vector<2x1x12xf32>
    %94 = vector.shape_cast %93 : vector<2x1x12xf32> to vector<2x12xf32>
    %95 = vector.shape_cast %94 : vector<2x12xf32> to vector<2x1x12xf32>
    %96 = vector.extract_strided_slice %2 {offsets = [0, 3, 0], sizes = [8, 1, 12], strides = [1, 1, 1]} : vector<8x16x12xf32> to vector<8x1x12xf32>
    %97 = vector.shape_cast %96 : vector<8x1x12xf32> to vector<8x12xf32>
    %98 = vector.shape_cast %97 : vector<8x12xf32> to vector<1x8x12xf32>
    %99 = vector.extract_strided_slice %3 {offsets = [0, 3, 0], sizes = [8, 1, 12], strides = [1, 1, 1]} : vector<8x16x12xf32> to vector<8x1x12xf32>
    %100 = vector.shape_cast %99 : vector<8x1x12xf32> to vector<8x12xf32>
    %101 = vector.shape_cast %100 : vector<8x12xf32> to vector<1x8x12xf32>
    %102 = vector.broadcast %92 : vector<2x1x12xf32> to vector<2x8x12xf32>
    %103 = vector.broadcast %98 : vector<1x8x12xf32> to vector<2x8x12xf32>
    %104 = arith.mulf %102, %103 : vector<2x8x12xf32>
    %105 = arith.addf %81, %104 : vector<2x8x12xf32>
    %106 = vector.broadcast %95 : vector<2x1x12xf32> to vector<2x8x12xf32>
    %107 = vector.broadcast %101 : vector<1x8x12xf32> to vector<2x8x12xf32>
    %108 = arith.mulf %106, %107 : vector<2x8x12xf32>
    %109 = arith.subf %105, %108 : vector<2x8x12xf32>
    %110 = vector.broadcast %92 : vector<2x1x12xf32> to vector<2x8x12xf32>
    %111 = vector.broadcast %101 : vector<1x8x12xf32> to vector<2x8x12xf32>
    %112 = arith.mulf %110, %111 : vector<2x8x12xf32>
    %113 = arith.addf %89, %112 : vector<2x8x12xf32>
    %114 = vector.broadcast %95 : vector<2x1x12xf32> to vector<2x8x12xf32>
    %115 = vector.broadcast %98 : vector<1x8x12xf32> to vector<2x8x12xf32>
    %116 = arith.mulf %114, %115 : vector<2x8x12xf32>
    %117 = arith.addf %113, %116 : vector<2x8x12xf32>
    %118 = vector.extract_strided_slice %0 {offsets = [0, 4, 0], sizes = [2, 1, 12], strides = [1, 1, 1]} : vector<2x16x12xf32> to vector<2x1x12xf32>
    %119 = vector.shape_cast %118 : vector<2x1x12xf32> to vector<2x12xf32>
    %120 = vector.shape_cast %119 : vector<2x12xf32> to vector<2x1x12xf32>
    %121 = vector.extract_strided_slice %1 {offsets = [0, 4, 0], sizes = [2, 1, 12], strides = [1, 1, 1]} : vector<2x16x12xf32> to vector<2x1x12xf32>
    %122 = vector.shape_cast %121 : vector<2x1x12xf32> to vector<2x12xf32>
    %123 = vector.shape_cast %122 : vector<2x12xf32> to vector<2x1x12xf32>
    %124 = vector.extract_strided_slice %2 {offsets = [0, 4, 0], sizes = [8, 1, 12], strides = [1, 1, 1]} : vector<8x16x12xf32> to vector<8x1x12xf32>
    %125 = vector.shape_cast %124 : vector<8x1x12xf32> to vector<8x12xf32>
    %126 = vector.shape_cast %125 : vector<8x12xf32> to vector<1x8x12xf32>
    %127 = vector.extract_strided_slice %3 {offsets = [0, 4, 0], sizes = [8, 1, 12], strides = [1, 1, 1]} : vector<8x16x12xf32> to vector<8x1x12xf32>
    %128 = vector.shape_cast %127 : vector<8x1x12xf32> to vector<8x12xf32>
    %129 = vector.shape_cast %128 : vector<8x12xf32> to vector<1x8x12xf32>
    %130 = vector.broadcast %120 : vector<2x1x12xf32> to vector<2x8x12xf32>
    %131 = vector.broadcast %126 : vector<1x8x12xf32> to vector<2x8x12xf32>
    %132 = arith.mulf %130, %131 : vector<2x8x12xf32>
    %133 = arith.addf %109, %132 : vector<2x8x12xf32>
    %134 = vector.broadcast %123 : vector<2x1x12xf32> to vector<2x8x12xf32>
    %135 = vector.broadcast %129 : vector<1x8x12xf32> to vector<2x8x12xf32>
    %136 = arith.mulf %134, %135 : vector<2x8x12xf32>
    %137 = arith.subf %133, %136 : vector<2x8x12xf32>
    %138 = vector.broadcast %120 : vector<2x1x12xf32> to vector<2x8x12xf32>
    %139 = vector.broadcast %129 : vector<1x8x12xf32> to vector<2x8x12xf32>
    %140 = arith.mulf %138, %139 : vector<2x8x12xf32>
    %141 = arith.addf %117, %140 : vector<2x8x12xf32>
    %142 = vector.broadcast %123 : vector<2x1x12xf32> to vector<2x8x12xf32>
    %143 = vector.broadcast %126 : vector<1x8x12xf32> to vector<2x8x12xf32>
    %144 = arith.mulf %142, %143 : vector<2x8x12xf32>
    %145 = arith.addf %141, %144 : vector<2x8x12xf32>
    %146 = vector.extract_strided_slice %0 {offsets = [0, 5, 0], sizes = [2, 1, 12], strides = [1, 1, 1]} : vector<2x16x12xf32> to vector<2x1x12xf32>
    %147 = vector.shape_cast %146 : vector<2x1x12xf32> to vector<2x12xf32>
    %148 = vector.shape_cast %147 : vector<2x12xf32> to vector<2x1x12xf32>
    %149 = vector.extract_strided_slice %1 {offsets = [0, 5, 0], sizes = [2, 1, 12], strides = [1, 1, 1]} : vector<2x16x12xf32> to vector<2x1x12xf32>
    %150 = vector.shape_cast %149 : vector<2x1x12xf32> to vector<2x12xf32>
    %151 = vector.shape_cast %150 : vector<2x12xf32> to vector<2x1x12xf32>
    %152 = vector.extract_strided_slice %2 {offsets = [0, 5, 0], sizes = [8, 1, 12], strides = [1, 1, 1]} : vector<8x16x12xf32> to vector<8x1x12xf32>
    %153 = vector.shape_cast %152 : vector<8x1x12xf32> to vector<8x12xf32>
    %154 = vector.shape_cast %153 : vector<8x12xf32> to vector<1x8x12xf32>
    %155 = vector.extract_strided_slice %3 {offsets = [0, 5, 0], sizes = [8, 1, 12], strides = [1, 1, 1]} : vector<8x16x12xf32> to vector<8x1x12xf32>
    %156 = vector.shape_cast %155 : vector<8x1x12xf32> to vector<8x12xf32>
    %157 = vector.shape_cast %156 : vector<8x12xf32> to vector<1x8x12xf32>
    %158 = vector.broadcast %148 : vector<2x1x12xf32> to vector<2x8x12xf32>
    %159 = vector.broadcast %154 : vector<1x8x12xf32> to vector<2x8x12xf32>
    %160 = arith.mulf %158, %159 : vector<2x8x12xf32>
    %161 = arith.addf %137, %160 : vector<2x8x12xf32>
    %162 = vector.broadcast %151 : vector<2x1x12xf32> to vector<2x8x12xf32>
    %163 = vector.broadcast %157 : vector<1x8x12xf32> to vector<2x8x12xf32>
    %164 = arith.mulf %162, %163 : vector<2x8x12xf32>
    %165 = arith.subf %161, %164 : vector<2x8x12xf32>
    %166 = vector.broadcast %148 : vector<2x1x12xf32> to vector<2x8x12xf32>
    %167 = vector.broadcast %157 : vector<1x8x12xf32> to vector<2x8x12xf32>
    %168 = arith.mulf %166, %167 : vector<2x8x12xf32>
    %169 = arith.addf %145, %168 : vector<2x8x12xf32>
    %170 = vector.broadcast %151 : vector<2x1x12xf32> to vector<2x8x12xf32>
    %171 = vector.broadcast %154 : vector<1x8x12xf32> to vector<2x8x12xf32>
    %172 = arith.mulf %170, %171 : vector<2x8x12xf32>
    %173 = arith.addf %169, %172 : vector<2x8x12xf32>
    %174 = vector.extract_strided_slice %0 {offsets = [0, 6, 0], sizes = [2, 1, 12], strides = [1, 1, 1]} : vector<2x16x12xf32> to vector<2x1x12xf32>
    %175 = vector.shape_cast %174 : vector<2x1x12xf32> to vector<2x12xf32>
    %176 = vector.shape_cast %175 : vector<2x12xf32> to vector<2x1x12xf32>
    %177 = vector.extract_strided_slice %1 {offsets = [0, 6, 0], sizes = [2, 1, 12], strides = [1, 1, 1]} : vector<2x16x12xf32> to vector<2x1x12xf32>
    %178 = vector.shape_cast %177 : vector<2x1x12xf32> to vector<2x12xf32>
    %179 = vector.shape_cast %178 : vector<2x12xf32> to vector<2x1x12xf32>
    %180 = vector.extract_strided_slice %2 {offsets = [0, 6, 0], sizes = [8, 1, 12], strides = [1, 1, 1]} : vector<8x16x12xf32> to vector<8x1x12xf32>
    %181 = vector.shape_cast %180 : vector<8x1x12xf32> to vector<8x12xf32>
    %182 = vector.shape_cast %181 : vector<8x12xf32> to vector<1x8x12xf32>
    %183 = vector.extract_strided_slice %3 {offsets = [0, 6, 0], sizes = [8, 1, 12], strides = [1, 1, 1]} : vector<8x16x12xf32> to vector<8x1x12xf32>
    %184 = vector.shape_cast %183 : vector<8x1x12xf32> to vector<8x12xf32>
    %185 = vector.shape_cast %184 : vector<8x12xf32> to vector<1x8x12xf32>
    %186 = vector.broadcast %176 : vector<2x1x12xf32> to vector<2x8x12xf32>
    %187 = vector.broadcast %182 : vector<1x8x12xf32> to vector<2x8x12xf32>
    %188 = arith.mulf %186, %187 : vector<2x8x12xf32>
    %189 = arith.addf %165, %188 : vector<2x8x12xf32>
    %190 = vector.broadcast %179 : vector<2x1x12xf32> to vector<2x8x12xf32>
    %191 = vector.broadcast %185 : vector<1x8x12xf32> to vector<2x8x12xf32>
    %192 = arith.mulf %190, %191 : vector<2x8x12xf32>
    %193 = arith.subf %189, %192 : vector<2x8x12xf32>
    %194 = vector.broadcast %176 : vector<2x1x12xf32> to vector<2x8x12xf32>
    %195 = vector.broadcast %185 : vector<1x8x12xf32> to vector<2x8x12xf32>
    %196 = arith.mulf %194, %195 : vector<2x8x12xf32>
    %197 = arith.addf %173, %196 : vector<2x8x12xf32>
    %198 = vector.broadcast %179 : vector<2x1x12xf32> to vector<2x8x12xf32>
    %199 = vector.broadcast %182 : vector<1x8x12xf32> to vector<2x8x12xf32>
    %200 = arith.mulf %198, %199 : vector<2x8x12xf32>
    %201 = arith.addf %197, %200 : vector<2x8x12xf32>
    %202 = vector.extract_strided_slice %0 {offsets = [0, 7, 0], sizes = [2, 1, 12], strides = [1, 1, 1]} : vector<2x16x12xf32> to vector<2x1x12xf32>
    %203 = vector.shape_cast %202 : vector<2x1x12xf32> to vector<2x12xf32>
    %204 = vector.shape_cast %203 : vector<2x12xf32> to vector<2x1x12xf32>
    %205 = vector.extract_strided_slice %1 {offsets = [0, 7, 0], sizes = [2, 1, 12], strides = [1, 1, 1]} : vector<2x16x12xf32> to vector<2x1x12xf32>
    %206 = vector.shape_cast %205 : vector<2x1x12xf32> to vector<2x12xf32>
    %207 = vector.shape_cast %206 : vector<2x12xf32> to vector<2x1x12xf32>
    %208 = vector.extract_strided_slice %2 {offsets = [0, 7, 0], sizes = [8, 1, 12], strides = [1, 1, 1]} : vector<8x16x12xf32> to vector<8x1x12xf32>
    %209 = vector.shape_cast %208 : vector<8x1x12xf32> to vector<8x12xf32>
    %210 = vector.shape_cast %209 : vector<8x12xf32> to vector<1x8x12xf32>
    %211 = vector.extract_strided_slice %3 {offsets = [0, 7, 0], sizes = [8, 1, 12], strides = [1, 1, 1]} : vector<8x16x12xf32> to vector<8x1x12xf32>
    %212 = vector.shape_cast %211 : vector<8x1x12xf32> to vector<8x12xf32>
    %213 = vector.shape_cast %212 : vector<8x12xf32> to vector<1x8x12xf32>
    %214 = vector.broadcast %204 : vector<2x1x12xf32> to vector<2x8x12xf32>
    %215 = vector.broadcast %210 : vector<1x8x12xf32> to vector<2x8x12xf32>
    %216 = arith.mulf %214, %215 : vector<2x8x12xf32>
    %217 = arith.addf %193, %216 : vector<2x8x12xf32>
    %218 = vector.broadcast %207 : vector<2x1x12xf32> to vector<2x8x12xf32>
    %219 = vector.broadcast %213 : vector<1x8x12xf32> to vector<2x8x12xf32>
    %220 = arith.mulf %218, %219 : vector<2x8x12xf32>
    %221 = arith.subf %217, %220 : vector<2x8x12xf32>
    %222 = vector.broadcast %204 : vector<2x1x12xf32> to vector<2x8x12xf32>
    %223 = vector.broadcast %213 : vector<1x8x12xf32> to vector<2x8x12xf32>
    %224 = arith.mulf %222, %223 : vector<2x8x12xf32>
    %225 = arith.addf %201, %224 : vector<2x8x12xf32>
    %226 = vector.broadcast %207 : vector<2x1x12xf32> to vector<2x8x12xf32>
    %227 = vector.broadcast %210 : vector<1x8x12xf32> to vector<2x8x12xf32>
    %228 = arith.mulf %226, %227 : vector<2x8x12xf32>
    %229 = arith.addf %225, %228 : vector<2x8x12xf32>
    %230 = vector.extract_strided_slice %0 {offsets = [0, 8, 0], sizes = [2, 1, 12], strides = [1, 1, 1]} : vector<2x16x12xf32> to vector<2x1x12xf32>
    %231 = vector.shape_cast %230 : vector<2x1x12xf32> to vector<2x12xf32>
    %232 = vector.shape_cast %231 : vector<2x12xf32> to vector<2x1x12xf32>
    %233 = vector.extract_strided_slice %1 {offsets = [0, 8, 0], sizes = [2, 1, 12], strides = [1, 1, 1]} : vector<2x16x12xf32> to vector<2x1x12xf32>
    %234 = vector.shape_cast %233 : vector<2x1x12xf32> to vector<2x12xf32>
    %235 = vector.shape_cast %234 : vector<2x12xf32> to vector<2x1x12xf32>
    %236 = vector.extract_strided_slice %2 {offsets = [0, 8, 0], sizes = [8, 1, 12], strides = [1, 1, 1]} : vector<8x16x12xf32> to vector<8x1x12xf32>
    %237 = vector.shape_cast %236 : vector<8x1x12xf32> to vector<8x12xf32>
    %238 = vector.shape_cast %237 : vector<8x12xf32> to vector<1x8x12xf32>
    %239 = vector.extract_strided_slice %3 {offsets = [0, 8, 0], sizes = [8, 1, 12], strides = [1, 1, 1]} : vector<8x16x12xf32> to vector<8x1x12xf32>
    %240 = vector.shape_cast %239 : vector<8x1x12xf32> to vector<8x12xf32>
    %241 = vector.shape_cast %240 : vector<8x12xf32> to vector<1x8x12xf32>
    %242 = vector.broadcast %232 : vector<2x1x12xf32> to vector<2x8x12xf32>
    %243 = vector.broadcast %238 : vector<1x8x12xf32> to vector<2x8x12xf32>
    %244 = arith.mulf %242, %243 : vector<2x8x12xf32>
    %245 = arith.addf %221, %244 : vector<2x8x12xf32>
    %246 = vector.broadcast %235 : vector<2x1x12xf32> to vector<2x8x12xf32>
    %247 = vector.broadcast %241 : vector<1x8x12xf32> to vector<2x8x12xf32>
    %248 = arith.mulf %246, %247 : vector<2x8x12xf32>
    %249 = arith.subf %245, %248 : vector<2x8x12xf32>
    %250 = vector.broadcast %232 : vector<2x1x12xf32> to vector<2x8x12xf32>
    %251 = vector.broadcast %241 : vector<1x8x12xf32> to vector<2x8x12xf32>
    %252 = arith.mulf %250, %251 : vector<2x8x12xf32>
    %253 = arith.addf %229, %252 : vector<2x8x12xf32>
    %254 = vector.broadcast %235 : vector<2x1x12xf32> to vector<2x8x12xf32>
    %255 = vector.broadcast %238 : vector<1x8x12xf32> to vector<2x8x12xf32>
    %256 = arith.mulf %254, %255 : vector<2x8x12xf32>
    %257 = arith.addf %253, %256 : vector<2x8x12xf32>
    %258 = vector.extract_strided_slice %0 {offsets = [0, 9, 0], sizes = [2, 1, 12], strides = [1, 1, 1]} : vector<2x16x12xf32> to vector<2x1x12xf32>
    %259 = vector.shape_cast %258 : vector<2x1x12xf32> to vector<2x12xf32>
    %260 = vector.shape_cast %259 : vector<2x12xf32> to vector<2x1x12xf32>
    %261 = vector.extract_strided_slice %1 {offsets = [0, 9, 0], sizes = [2, 1, 12], strides = [1, 1, 1]} : vector<2x16x12xf32> to vector<2x1x12xf32>
    %262 = vector.shape_cast %261 : vector<2x1x12xf32> to vector<2x12xf32>
    %263 = vector.shape_cast %262 : vector<2x12xf32> to vector<2x1x12xf32>
    %264 = vector.extract_strided_slice %2 {offsets = [0, 9, 0], sizes = [8, 1, 12], strides = [1, 1, 1]} : vector<8x16x12xf32> to vector<8x1x12xf32>
    %265 = vector.shape_cast %264 : vector<8x1x12xf32> to vector<8x12xf32>
    %266 = vector.shape_cast %265 : vector<8x12xf32> to vector<1x8x12xf32>
    %267 = vector.extract_strided_slice %3 {offsets = [0, 9, 0], sizes = [8, 1, 12], strides = [1, 1, 1]} : vector<8x16x12xf32> to vector<8x1x12xf32>
    %268 = vector.shape_cast %267 : vector<8x1x12xf32> to vector<8x12xf32>
    %269 = vector.shape_cast %268 : vector<8x12xf32> to vector<1x8x12xf32>
    %270 = vector.broadcast %260 : vector<2x1x12xf32> to vector<2x8x12xf32>
    %271 = vector.broadcast %266 : vector<1x8x12xf32> to vector<2x8x12xf32>
    %272 = arith.mulf %270, %271 : vector<2x8x12xf32>
    %273 = arith.addf %249, %272 : vector<2x8x12xf32>
    %274 = vector.broadcast %263 : vector<2x1x12xf32> to vector<2x8x12xf32>
    %275 = vector.broadcast %269 : vector<1x8x12xf32> to vector<2x8x12xf32>
    %276 = arith.mulf %274, %275 : vector<2x8x12xf32>
    %277 = arith.subf %273, %276 : vector<2x8x12xf32>
    %278 = vector.broadcast %260 : vector<2x1x12xf32> to vector<2x8x12xf32>
    %279 = vector.broadcast %269 : vector<1x8x12xf32> to vector<2x8x12xf32>
    %280 = arith.mulf %278, %279 : vector<2x8x12xf32>
    %281 = arith.addf %257, %280 : vector<2x8x12xf32>
    %282 = vector.broadcast %263 : vector<2x1x12xf32> to vector<2x8x12xf32>
    %283 = vector.broadcast %266 : vector<1x8x12xf32> to vector<2x8x12xf32>
    %284 = arith.mulf %282, %283 : vector<2x8x12xf32>
    %285 = arith.addf %281, %284 : vector<2x8x12xf32>
    %286 = vector.extract_strided_slice %0 {offsets = [0, 10, 0], sizes = [2, 1, 12], strides = [1, 1, 1]} : vector<2x16x12xf32> to vector<2x1x12xf32>
    %287 = vector.shape_cast %286 : vector<2x1x12xf32> to vector<2x12xf32>
    %288 = vector.shape_cast %287 : vector<2x12xf32> to vector<2x1x12xf32>
    %289 = vector.extract_strided_slice %1 {offsets = [0, 10, 0], sizes = [2, 1, 12], strides = [1, 1, 1]} : vector<2x16x12xf32> to vector<2x1x12xf32>
    %290 = vector.shape_cast %289 : vector<2x1x12xf32> to vector<2x12xf32>
    %291 = vector.shape_cast %290 : vector<2x12xf32> to vector<2x1x12xf32>
    %292 = vector.extract_strided_slice %2 {offsets = [0, 10, 0], sizes = [8, 1, 12], strides = [1, 1, 1]} : vector<8x16x12xf32> to vector<8x1x12xf32>
    %293 = vector.shape_cast %292 : vector<8x1x12xf32> to vector<8x12xf32>
    %294 = vector.shape_cast %293 : vector<8x12xf32> to vector<1x8x12xf32>
    %295 = vector.extract_strided_slice %3 {offsets = [0, 10, 0], sizes = [8, 1, 12], strides = [1, 1, 1]} : vector<8x16x12xf32> to vector<8x1x12xf32>
    %296 = vector.shape_cast %295 : vector<8x1x12xf32> to vector<8x12xf32>
    %297 = vector.shape_cast %296 : vector<8x12xf32> to vector<1x8x12xf32>
    %298 = vector.broadcast %288 : vector<2x1x12xf32> to vector<2x8x12xf32>
    %299 = vector.broadcast %294 : vector<1x8x12xf32> to vector<2x8x12xf32>
    %300 = arith.mulf %298, %299 : vector<2x8x12xf32>
    %301 = arith.addf %277, %300 : vector<2x8x12xf32>
    %302 = vector.broadcast %291 : vector<2x1x12xf32> to vector<2x8x12xf32>
    %303 = vector.broadcast %297 : vector<1x8x12xf32> to vector<2x8x12xf32>
    %304 = arith.mulf %302, %303 : vector<2x8x12xf32>
    %305 = arith.subf %301, %304 : vector<2x8x12xf32>
    %306 = vector.broadcast %288 : vector<2x1x12xf32> to vector<2x8x12xf32>
    %307 = vector.broadcast %297 : vector<1x8x12xf32> to vector<2x8x12xf32>
    %308 = arith.mulf %306, %307 : vector<2x8x12xf32>
    %309 = arith.addf %285, %308 : vector<2x8x12xf32>
    %310 = vector.broadcast %291 : vector<2x1x12xf32> to vector<2x8x12xf32>
    %311 = vector.broadcast %294 : vector<1x8x12xf32> to vector<2x8x12xf32>
    %312 = arith.mulf %310, %311 : vector<2x8x12xf32>
    %313 = arith.addf %309, %312 : vector<2x8x12xf32>
    %314 = vector.extract_strided_slice %0 {offsets = [0, 11, 0], sizes = [2, 1, 12], strides = [1, 1, 1]} : vector<2x16x12xf32> to vector<2x1x12xf32>
    %315 = vector.shape_cast %314 : vector<2x1x12xf32> to vector<2x12xf32>
    %316 = vector.shape_cast %315 : vector<2x12xf32> to vector<2x1x12xf32>
    %317 = vector.extract_strided_slice %1 {offsets = [0, 11, 0], sizes = [2, 1, 12], strides = [1, 1, 1]} : vector<2x16x12xf32> to vector<2x1x12xf32>
    %318 = vector.shape_cast %317 : vector<2x1x12xf32> to vector<2x12xf32>
    %319 = vector.shape_cast %318 : vector<2x12xf32> to vector<2x1x12xf32>
    %320 = vector.extract_strided_slice %2 {offsets = [0, 11, 0], sizes = [8, 1, 12], strides = [1, 1, 1]} : vector<8x16x12xf32> to vector<8x1x12xf32>
    %321 = vector.shape_cast %320 : vector<8x1x12xf32> to vector<8x12xf32>
    %322 = vector.shape_cast %321 : vector<8x12xf32> to vector<1x8x12xf32>
    %323 = vector.extract_strided_slice %3 {offsets = [0, 11, 0], sizes = [8, 1, 12], strides = [1, 1, 1]} : vector<8x16x12xf32> to vector<8x1x12xf32>
    %324 = vector.shape_cast %323 : vector<8x1x12xf32> to vector<8x12xf32>
    %325 = vector.shape_cast %324 : vector<8x12xf32> to vector<1x8x12xf32>
    %326 = vector.broadcast %316 : vector<2x1x12xf32> to vector<2x8x12xf32>
    %327 = vector.broadcast %322 : vector<1x8x12xf32> to vector<2x8x12xf32>
    %328 = arith.mulf %326, %327 : vector<2x8x12xf32>
    %329 = arith.addf %305, %328 : vector<2x8x12xf32>
    %330 = vector.broadcast %319 : vector<2x1x12xf32> to vector<2x8x12xf32>
    %331 = vector.broadcast %325 : vector<1x8x12xf32> to vector<2x8x12xf32>
    %332 = arith.mulf %330, %331 : vector<2x8x12xf32>
    %333 = arith.subf %329, %332 : vector<2x8x12xf32>
    %334 = vector.broadcast %316 : vector<2x1x12xf32> to vector<2x8x12xf32>
    %335 = vector.broadcast %325 : vector<1x8x12xf32> to vector<2x8x12xf32>
    %336 = arith.mulf %334, %335 : vector<2x8x12xf32>
    %337 = arith.addf %313, %336 : vector<2x8x12xf32>
    %338 = vector.broadcast %319 : vector<2x1x12xf32> to vector<2x8x12xf32>
    %339 = vector.broadcast %322 : vector<1x8x12xf32> to vector<2x8x12xf32>
    %340 = arith.mulf %338, %339 : vector<2x8x12xf32>
    %341 = arith.addf %337, %340 : vector<2x8x12xf32>
    %342 = vector.extract_strided_slice %0 {offsets = [0, 12, 0], sizes = [2, 1, 12], strides = [1, 1, 1]} : vector<2x16x12xf32> to vector<2x1x12xf32>
    %343 = vector.shape_cast %342 : vector<2x1x12xf32> to vector<2x12xf32>
    %344 = vector.shape_cast %343 : vector<2x12xf32> to vector<2x1x12xf32>
    %345 = vector.extract_strided_slice %1 {offsets = [0, 12, 0], sizes = [2, 1, 12], strides = [1, 1, 1]} : vector<2x16x12xf32> to vector<2x1x12xf32>
    %346 = vector.shape_cast %345 : vector<2x1x12xf32> to vector<2x12xf32>
    %347 = vector.shape_cast %346 : vector<2x12xf32> to vector<2x1x12xf32>
    %348 = vector.extract_strided_slice %2 {offsets = [0, 12, 0], sizes = [8, 1, 12], strides = [1, 1, 1]} : vector<8x16x12xf32> to vector<8x1x12xf32>
    %349 = vector.shape_cast %348 : vector<8x1x12xf32> to vector<8x12xf32>
    %350 = vector.shape_cast %349 : vector<8x12xf32> to vector<1x8x12xf32>
    %351 = vector.extract_strided_slice %3 {offsets = [0, 12, 0], sizes = [8, 1, 12], strides = [1, 1, 1]} : vector<8x16x12xf32> to vector<8x1x12xf32>
    %352 = vector.shape_cast %351 : vector<8x1x12xf32> to vector<8x12xf32>
    %353 = vector.shape_cast %352 : vector<8x12xf32> to vector<1x8x12xf32>
    %354 = vector.broadcast %344 : vector<2x1x12xf32> to vector<2x8x12xf32>
    %355 = vector.broadcast %350 : vector<1x8x12xf32> to vector<2x8x12xf32>
    %356 = arith.mulf %354, %355 : vector<2x8x12xf32>
    %357 = arith.addf %333, %356 : vector<2x8x12xf32>
    %358 = vector.broadcast %347 : vector<2x1x12xf32> to vector<2x8x12xf32>
    %359 = vector.broadcast %353 : vector<1x8x12xf32> to vector<2x8x12xf32>
    %360 = arith.mulf %358, %359 : vector<2x8x12xf32>
    %361 = arith.subf %357, %360 : vector<2x8x12xf32>
    %362 = vector.broadcast %344 : vector<2x1x12xf32> to vector<2x8x12xf32>
    %363 = vector.broadcast %353 : vector<1x8x12xf32> to vector<2x8x12xf32>
    %364 = arith.mulf %362, %363 : vector<2x8x12xf32>
    %365 = arith.addf %341, %364 : vector<2x8x12xf32>
    %366 = vector.broadcast %347 : vector<2x1x12xf32> to vector<2x8x12xf32>
    %367 = vector.broadcast %350 : vector<1x8x12xf32> to vector<2x8x12xf32>
    %368 = arith.mulf %366, %367 : vector<2x8x12xf32>
    %369 = arith.addf %365, %368 : vector<2x8x12xf32>
    %370 = vector.extract_strided_slice %0 {offsets = [0, 13, 0], sizes = [2, 1, 12], strides = [1, 1, 1]} : vector<2x16x12xf32> to vector<2x1x12xf32>
    %371 = vector.shape_cast %370 : vector<2x1x12xf32> to vector<2x12xf32>
    %372 = vector.shape_cast %371 : vector<2x12xf32> to vector<2x1x12xf32>
    %373 = vector.extract_strided_slice %1 {offsets = [0, 13, 0], sizes = [2, 1, 12], strides = [1, 1, 1]} : vector<2x16x12xf32> to vector<2x1x12xf32>
    %374 = vector.shape_cast %373 : vector<2x1x12xf32> to vector<2x12xf32>
    %375 = vector.shape_cast %374 : vector<2x12xf32> to vector<2x1x12xf32>
    %376 = vector.extract_strided_slice %2 {offsets = [0, 13, 0], sizes = [8, 1, 12], strides = [1, 1, 1]} : vector<8x16x12xf32> to vector<8x1x12xf32>
    %377 = vector.shape_cast %376 : vector<8x1x12xf32> to vector<8x12xf32>
    %378 = vector.shape_cast %377 : vector<8x12xf32> to vector<1x8x12xf32>
    %379 = vector.extract_strided_slice %3 {offsets = [0, 13, 0], sizes = [8, 1, 12], strides = [1, 1, 1]} : vector<8x16x12xf32> to vector<8x1x12xf32>
    %380 = vector.shape_cast %379 : vector<8x1x12xf32> to vector<8x12xf32>
    %381 = vector.shape_cast %380 : vector<8x12xf32> to vector<1x8x12xf32>
    %382 = vector.broadcast %372 : vector<2x1x12xf32> to vector<2x8x12xf32>
    %383 = vector.broadcast %378 : vector<1x8x12xf32> to vector<2x8x12xf32>
    %384 = arith.mulf %382, %383 : vector<2x8x12xf32>
    %385 = arith.addf %361, %384 : vector<2x8x12xf32>
    %386 = vector.broadcast %375 : vector<2x1x12xf32> to vector<2x8x12xf32>
    %387 = vector.broadcast %381 : vector<1x8x12xf32> to vector<2x8x12xf32>
    %388 = arith.mulf %386, %387 : vector<2x8x12xf32>
    %389 = arith.subf %385, %388 : vector<2x8x12xf32>
    %390 = vector.broadcast %372 : vector<2x1x12xf32> to vector<2x8x12xf32>
    %391 = vector.broadcast %381 : vector<1x8x12xf32> to vector<2x8x12xf32>
    %392 = arith.mulf %390, %391 : vector<2x8x12xf32>
    %393 = arith.addf %369, %392 : vector<2x8x12xf32>
    %394 = vector.broadcast %375 : vector<2x1x12xf32> to vector<2x8x12xf32>
    %395 = vector.broadcast %378 : vector<1x8x12xf32> to vector<2x8x12xf32>
    %396 = arith.mulf %394, %395 : vector<2x8x12xf32>
    %397 = arith.addf %393, %396 : vector<2x8x12xf32>
    %398 = vector.extract_strided_slice %0 {offsets = [0, 14, 0], sizes = [2, 1, 12], strides = [1, 1, 1]} : vector<2x16x12xf32> to vector<2x1x12xf32>
    %399 = vector.shape_cast %398 : vector<2x1x12xf32> to vector<2x12xf32>
    %400 = vector.shape_cast %399 : vector<2x12xf32> to vector<2x1x12xf32>
    %401 = vector.extract_strided_slice %1 {offsets = [0, 14, 0], sizes = [2, 1, 12], strides = [1, 1, 1]} : vector<2x16x12xf32> to vector<2x1x12xf32>
    %402 = vector.shape_cast %401 : vector<2x1x12xf32> to vector<2x12xf32>
    %403 = vector.shape_cast %402 : vector<2x12xf32> to vector<2x1x12xf32>
    %404 = vector.extract_strided_slice %2 {offsets = [0, 14, 0], sizes = [8, 1, 12], strides = [1, 1, 1]} : vector<8x16x12xf32> to vector<8x1x12xf32>
    %405 = vector.shape_cast %404 : vector<8x1x12xf32> to vector<8x12xf32>
    %406 = vector.shape_cast %405 : vector<8x12xf32> to vector<1x8x12xf32>
    %407 = vector.extract_strided_slice %3 {offsets = [0, 14, 0], sizes = [8, 1, 12], strides = [1, 1, 1]} : vector<8x16x12xf32> to vector<8x1x12xf32>
    %408 = vector.shape_cast %407 : vector<8x1x12xf32> to vector<8x12xf32>
    %409 = vector.shape_cast %408 : vector<8x12xf32> to vector<1x8x12xf32>
    %410 = vector.broadcast %400 : vector<2x1x12xf32> to vector<2x8x12xf32>
    %411 = vector.broadcast %406 : vector<1x8x12xf32> to vector<2x8x12xf32>
    %412 = arith.mulf %410, %411 : vector<2x8x12xf32>
    %413 = arith.addf %389, %412 : vector<2x8x12xf32>
    %414 = vector.broadcast %403 : vector<2x1x12xf32> to vector<2x8x12xf32>
    %415 = vector.broadcast %409 : vector<1x8x12xf32> to vector<2x8x12xf32>
    %416 = arith.mulf %414, %415 : vector<2x8x12xf32>
    %417 = arith.subf %413, %416 : vector<2x8x12xf32>
    %418 = vector.broadcast %400 : vector<2x1x12xf32> to vector<2x8x12xf32>
    %419 = vector.broadcast %409 : vector<1x8x12xf32> to vector<2x8x12xf32>
    %420 = arith.mulf %418, %419 : vector<2x8x12xf32>
    %421 = arith.addf %397, %420 : vector<2x8x12xf32>
    %422 = vector.broadcast %403 : vector<2x1x12xf32> to vector<2x8x12xf32>
    %423 = vector.broadcast %406 : vector<1x8x12xf32> to vector<2x8x12xf32>
    %424 = arith.mulf %422, %423 : vector<2x8x12xf32>
    %425 = arith.addf %421, %424 : vector<2x8x12xf32>
    %426 = vector.extract_strided_slice %0 {offsets = [0, 15, 0], sizes = [2, 1, 12], strides = [1, 1, 1]} : vector<2x16x12xf32> to vector<2x1x12xf32>
    %427 = vector.shape_cast %426 : vector<2x1x12xf32> to vector<2x12xf32>
    %428 = vector.shape_cast %427 : vector<2x12xf32> to vector<2x1x12xf32>
    %429 = vector.extract_strided_slice %1 {offsets = [0, 15, 0], sizes = [2, 1, 12], strides = [1, 1, 1]} : vector<2x16x12xf32> to vector<2x1x12xf32>
    %430 = vector.shape_cast %429 : vector<2x1x12xf32> to vector<2x12xf32>
    %431 = vector.shape_cast %430 : vector<2x12xf32> to vector<2x1x12xf32>
    %432 = vector.extract_strided_slice %2 {offsets = [0, 15, 0], sizes = [8, 1, 12], strides = [1, 1, 1]} : vector<8x16x12xf32> to vector<8x1x12xf32>
    %433 = vector.shape_cast %432 : vector<8x1x12xf32> to vector<8x12xf32>
    %434 = vector.shape_cast %433 : vector<8x12xf32> to vector<1x8x12xf32>
    %435 = vector.extract_strided_slice %3 {offsets = [0, 15, 0], sizes = [8, 1, 12], strides = [1, 1, 1]} : vector<8x16x12xf32> to vector<8x1x12xf32>
    %436 = vector.shape_cast %435 : vector<8x1x12xf32> to vector<8x12xf32>
    %437 = vector.shape_cast %436 : vector<8x12xf32> to vector<1x8x12xf32>
    %438 = vector.broadcast %428 : vector<2x1x12xf32> to vector<2x8x12xf32>
    %439 = vector.broadcast %434 : vector<1x8x12xf32> to vector<2x8x12xf32>
    %440 = arith.mulf %438, %439 : vector<2x8x12xf32>
    %441 = arith.addf %417, %440 : vector<2x8x12xf32>
    %442 = vector.broadcast %431 : vector<2x1x12xf32> to vector<2x8x12xf32>
    %443 = vector.broadcast %437 : vector<1x8x12xf32> to vector<2x8x12xf32>
    %444 = arith.mulf %442, %443 : vector<2x8x12xf32>
    %445 = arith.subf %441, %444 : vector<2x8x12xf32>
    %446 = vector.broadcast %428 : vector<2x1x12xf32> to vector<2x8x12xf32>
    %447 = vector.broadcast %437 : vector<1x8x12xf32> to vector<2x8x12xf32>
    %448 = arith.mulf %446, %447 : vector<2x8x12xf32>
    %449 = arith.addf %425, %448 : vector<2x8x12xf32>
    %450 = vector.broadcast %431 : vector<2x1x12xf32> to vector<2x8x12xf32>
    %451 = vector.broadcast %434 : vector<1x8x12xf32> to vector<2x8x12xf32>
    %452 = arith.mulf %450, %451 : vector<2x8x12xf32>
    %453 = arith.addf %449, %452 : vector<2x8x12xf32>
    %c0_12 = arith.constant 0 : index
    %c0_13 = arith.constant 0 : index
    %c0_14 = arith.constant 0 : index
    %454 = vector.load %arg5[%c0_12, %c0_13, %c0_14] : memref<2x8x12xf32, #tpu.memory_space<vmem>>, vector<2x8x12xf32>
    tpu.vector_store %arg5[%c0_12, %c0_13, %c0_14], %445 {strides = array<i32>} : memref<2x8x12xf32, #tpu.memory_space<vmem>>, vector<2x8x12xf32>,
    %c0_15 = arith.constant 0 : index
    %c0_16 = arith.constant 0 : index
    %c0_17 = arith.constant 0 : index
    %455 = vector.load %arg6[%c0_15, %c0_16, %c0_17] : memref<2x8x12xf32, #tpu.memory_space<vmem>>, vector<2x8x12xf32>
    tpu.vector_store %arg6[%c0_15, %c0_16, %c0_17], %453 {strides = array<i32>} : memref<2x8x12xf32, #tpu.memory_space<vmem>>, vector<2x8x12xf32>,
    return
  }
  func.func @transform_0(%arg0: i32) -> (i32, i32, i32) {
    %c0_i32 = arith.constant 0 : i32
    %c0_i32_0 = arith.constant 0 : i32
    %c0_i32_1 = arith.constant 0 : i32
    return %c0_i32, %c0_i32_0, %arg0 : i32, i32, i32
  }
  func.func @transform_1(%arg0: i32) -> (i32, i32, i32) {
    %c0_i32 = arith.constant 0 : i32
    %c0_i32_0 = arith.constant 0 : i32
    %c0_i32_1 = arith.constant 0 : i32
    return %c0_i32, %c0_i32_0, %arg0 : i32, i32, i32
  }
  func.func @transform_2(%arg0: i32) -> (i32, i32, i32) {
    %c0_i32 = arith.constant 0 : i32
    %c0_i32_0 = arith.constant 0 : i32
    %c0_i32_1 = arith.constant 0 : i32
    return %c0_i32, %c0_i32_0, %arg0 : i32, i32, i32
  }
  func.func @transform_3(%arg0: i32) -> (i32, i32, i32) {
    %c0_i32 = arith.constant 0 : i32
    %c0_i32_0 = arith.constant 0 : i32
    %c0_i32_1 = arith.constant 0 : i32
    return %c0_i32, %c0_i32_0, %arg0 : i32, i32, i32
  }
  func.func @transform_4(%arg0: i32) -> (i32, i32, i32) {
    %c0_i32 = arith.constant 0 : i32
    %c0_i32_0 = arith.constant 0 : i32
    %c0_i32_1 = arith.constant 0 : i32
    return %c0_i32, %c0_i32_0, %arg0 : i32, i32, i32
  }
  func.func @transform_5(%arg0: i32) -> (i32, i32, i32) {
    %c0_i32 = arith.constant 0 : i32
    %c0_i32_0 = arith.constant 0 : i32
    %c0_i32_1 = arith.constant 0 : i32
    return %c0_i32, %c0_i32_0, %arg0 : i32, i32, i32
  }
}

module attributes {stable_mosaic.version = 11 : i64} {
  func.func @_tail_fused_kernel(%arg0: i32, %arg1: i32, %arg2: memref<1x16x64xbf16, #tpu.memory_space<vmem>>, %arg3: memref<1x8x64xf32, #tpu.memory_space<vmem>>, %arg4: memref<8x16xbf16, #tpu.memory_space<vmem>>, %arg5: memref<8x16xbf16, #tpu.memory_space<vmem>>, %arg6: memref<8x1xf32, #tpu.memory_space<vmem>>, %arg7: memref<4x8xbf16, #tpu.memory_space<vmem>>, %arg8: memref<4x1xf32, #tpu.memory_space<vmem>>, %arg9: memref<8x4xbf16, #tpu.memory_space<vmem>>, %arg10: memref<8x1xf32, #tpu.memory_space<vmem>>, %arg11: memref<1x8x64xbf16, #tpu.memory_space<vmem>>) attributes {dimension_semantics = [#tpu.dimension_semantics<parallel>, #tpu.dimension_semantics<parallel>], iteration_bounds = array<i64: 2, 1>, scalar_prefetch = 0 : i64, scratch_operands = 0 : i64, tpu.core_type = #tpu.core_type<tc>, window_params = [{transform_indices = @transform_0, window_bounds = array<i64: 1, 16, 64>}, {transform_indices = @transform_1, window_bounds = array<i64: 1, 8, 64>}, {pipeline_mode = #tpu.pipeline_mode<synchronous>, transform_indices = @transform_2, window_bounds = array<i64: 8, 16>}, {pipeline_mode = #tpu.pipeline_mode<synchronous>, transform_indices = @transform_3, window_bounds = array<i64: 8, 16>}, {pipeline_mode = #tpu.pipeline_mode<synchronous>, transform_indices = @transform_4, window_bounds = array<i64: 8, 1>}, {pipeline_mode = #tpu.pipeline_mode<synchronous>, transform_indices = @transform_5, window_bounds = array<i64: 4, 8>}, {pipeline_mode = #tpu.pipeline_mode<synchronous>, transform_indices = @transform_6, window_bounds = array<i64: 4, 1>}, {pipeline_mode = #tpu.pipeline_mode<synchronous>, transform_indices = @transform_7, window_bounds = array<i64: 8, 4>}, {pipeline_mode = #tpu.pipeline_mode<synchronous>, transform_indices = @transform_8, window_bounds = array<i64: 8, 1>}, {transform_indices = @transform_9, window_bounds = array<i64: 1, 8, 64>}]} {
    %c0 = arith.constant 0 : index
    %c0_0 = arith.constant 0 : index
    %c0_1 = arith.constant 0 : index
    %0 = vector.load %arg2[%c0, %c0_0, %c0_1] : memref<1x16x64xbf16, #tpu.memory_space<vmem>>, vector<1x16x64xbf16>
    %1 = vector.shape_cast %0 : vector<1x16x64xbf16> to vector<16x64xbf16>
    %c0_2 = arith.constant 0 : index
    %c0_3 = arith.constant 0 : index
    %2 = vector.load %arg4[%c0_2, %c0_3] : memref<8x16xbf16, #tpu.memory_space<vmem>>, vector<8x16xbf16>
    %cst = arith.constant dense<0.000000e+00> : vector<8x64xf32>
    %3 = tpu.matmul %2, %1, %cst {dimension_numbers = #tpu.dot_dimension_numbers<[1], [0], [0], [1], [0, 0, 1, 1], [], []>} : vector<8x16xbf16>, vector<16x64xbf16>, vector<8x64xf32> -> vector<8x64xf32>
    %c0_4 = arith.constant 0 : index
    %c0_5 = arith.constant 0 : index
    %4 = vector.load %arg5[%c0_4, %c0_5] : memref<8x16xbf16, #tpu.memory_space<vmem>>, vector<8x16xbf16>
    %cst_6 = arith.constant dense<0.000000e+00> : vector<8x64xf32>
    %5 = tpu.matmul %4, %1, %cst_6 {dimension_numbers = #tpu.dot_dimension_numbers<[1], [0], [0], [1], [0, 0, 1, 1], [], []>} : vector<8x16xbf16>, vector<16x64xbf16>, vector<8x64xf32> -> vector<8x64xf32>
    %c0_7 = arith.constant 0 : index
    %c0_8 = arith.constant 0 : index
    %c0_9 = arith.constant 0 : index
    %6 = vector.load %arg3[%c0_7, %c0_8, %c0_9] : memref<1x8x64xf32, #tpu.memory_space<vmem>>, vector<1x8x64xf32>
    %7 = vector.shape_cast %6 : vector<1x8x64xf32> to vector<8x64xf32>
    %c0_10 = arith.constant 0 : index
    %c0_11 = arith.constant 0 : index
    %8 = vector.load %arg6[%c0_10, %c0_11] : memref<8x1xf32, #tpu.memory_space<vmem>>, vector<8x1xf32>
    %9 = vector.broadcast %8 : vector<8x1xf32> to vector<8x64xf32>
    %10 = arith.addf %7, %9 : vector<8x64xf32>
    %11 = arith.addf %10, %3 : vector<8x64xf32>
    %cst_12 = arith.constant 5.000000e-01 : f32
    %12 = vector.broadcast %cst_12 : f32 to vector<8x64xf32>
    %13 = arith.mulf %12, %11 : vector<8x64xf32>
    %cst_13 = arith.constant 0.707106769 : f32
    %14 = vector.broadcast %cst_13 : f32 to vector<8x64xf32>
    %15 = arith.mulf %11, %14 : vector<8x64xf32>
    %cst_14 = arith.constant 0.000000e+00 : f32
    %16 = vector.broadcast %cst_14 : f32 to vector<8x64xf32>
    %17 = arith.cmpf oge, %15, %16 : vector<8x64xf32>
    %cst_15 = arith.constant 1.000000e+00 : f32
    %cst_16 = arith.constant -1.000000e+00 : f32
    %18 = vector.broadcast %cst_15 : f32 to vector<8x64xf32>
    %19 = vector.broadcast %cst_16 : f32 to vector<8x64xf32>
    %20 = arith.select %17, %18, %19 : vector<8x64xi1>, vector<8x64xf32>
    %21 = math.absf %15 : vector<8x64xf32>
    %cst_17 = arith.constant 0.327591091 : f32
    %22 = vector.broadcast %cst_17 : f32 to vector<8x64xf32>
    %23 = arith.mulf %22, %21 : vector<8x64xf32>
    %cst_18 = arith.constant 1.000000e+00 : f32
    %24 = vector.broadcast %cst_18 : f32 to vector<8x64xf32>
    %25 = arith.addf %24, %23 : vector<8x64xf32>
    %26 = tpu.reciprocal %25 {approx = true} : vector<8x64xf32> -> vector<8x64xf32>
    %cst_19 = arith.constant 1.06140542 : f32
    %27 = vector.broadcast %cst_19 : f32 to vector<8x64xf32>
    %28 = arith.mulf %27, %26 : vector<8x64xf32>
    %cst_20 = arith.constant -1.45315206 : f32
    %29 = vector.broadcast %cst_20 : f32 to vector<8x64xf32>
    %30 = arith.addf %28, %29 : vector<8x64xf32>
    %31 = arith.mulf %30, %26 : vector<8x64xf32>
    %cst_21 = arith.constant 1.42141378 : f32
    %32 = vector.broadcast %cst_21 : f32 to vector<8x64xf32>
    %33 = arith.addf %31, %32 : vector<8x64xf32>
    %34 = arith.mulf %33, %26 : vector<8x64xf32>
    %cst_22 = arith.constant -0.284496725 : f32
    %35 = vector.broadcast %cst_22 : f32 to vector<8x64xf32>
    %36 = arith.addf %34, %35 : vector<8x64xf32>
    %37 = arith.mulf %36, %26 : vector<8x64xf32>
    %cst_23 = arith.constant 0.254829586 : f32
    %38 = vector.broadcast %cst_23 : f32 to vector<8x64xf32>
    %39 = arith.addf %37, %38 : vector<8x64xf32>
    %40 = arith.mulf %39, %26 : vector<8x64xf32>
    %cst_24 = arith.constant 0.000000e+00 : f32
    %41 = vector.broadcast %cst_24 : f32 to vector<8x64xf32>
    %42 = arith.subf %41, %21 : vector<8x64xf32>
    %43 = arith.mulf %42, %21 : vector<8x64xf32>
    %44 = math.exp %43 : vector<8x64xf32>
    %45 = arith.mulf %40, %44 : vector<8x64xf32>
    %cst_25 = arith.constant 1.000000e+00 : f32
    %46 = vector.broadcast %cst_25 : f32 to vector<8x64xf32>
    %47 = arith.subf %46, %45 : vector<8x64xf32>
    %48 = arith.mulf %20, %47 : vector<8x64xf32>
    %cst_26 = arith.constant 1.000000e+00 : f32
    %49 = vector.broadcast %cst_26 : f32 to vector<8x64xf32>
    %50 = arith.addf %49, %48 : vector<8x64xf32>
    %51 = arith.mulf %13, %50 : vector<8x64xf32>
    %c0_27 = arith.constant 0 : index
    %c0_28 = arith.constant 0 : index
    %52 = vector.load %arg7[%c0_27, %c0_28] : memref<4x8xbf16, #tpu.memory_space<vmem>>, vector<4x8xbf16>
    %53 = arith.truncf %51 : vector<8x64xf32> to vector<8x64xbf16>
    %cst_29 = arith.constant dense<0.000000e+00> : vector<4x64xf32>
    %54 = tpu.matmul %52, %53, %cst_29 {dimension_numbers = #tpu.dot_dimension_numbers<[1], [0], [0], [1], [0, 0, 1, 1], [], []>} : vector<4x8xbf16>, vector<8x64xbf16>, vector<4x64xf32> -> vector<4x64xf32>
    %c0_30 = arith.constant 0 : index
    %c0_31 = arith.constant 0 : index
    %55 = vector.load %arg8[%c0_30, %c0_31] : memref<4x1xf32, #tpu.memory_space<vmem>>, vector<4x1xf32>
    %56 = vector.broadcast %55 : vector<4x1xf32> to vector<4x64xf32>
    %57 = arith.addf %54, %56 : vector<4x64xf32>
    %cst_32 = arith.constant 5.000000e-01 : f32
    %58 = vector.broadcast %cst_32 : f32 to vector<4x64xf32>
    %59 = arith.mulf %58, %57 : vector<4x64xf32>
    %cst_33 = arith.constant 0.707106769 : f32
    %60 = vector.broadcast %cst_33 : f32 to vector<4x64xf32>
    %61 = arith.mulf %57, %60 : vector<4x64xf32>
    %cst_34 = arith.constant 0.000000e+00 : f32
    %62 = vector.broadcast %cst_34 : f32 to vector<4x64xf32>
    %63 = arith.cmpf oge, %61, %62 : vector<4x64xf32>
    %cst_35 = arith.constant 1.000000e+00 : f32
    %cst_36 = arith.constant -1.000000e+00 : f32
    %64 = vector.broadcast %cst_35 : f32 to vector<4x64xf32>
    %65 = vector.broadcast %cst_36 : f32 to vector<4x64xf32>
    %66 = arith.select %63, %64, %65 : vector<4x64xi1>, vector<4x64xf32>
    %67 = math.absf %61 : vector<4x64xf32>
    %cst_37 = arith.constant 0.327591091 : f32
    %68 = vector.broadcast %cst_37 : f32 to vector<4x64xf32>
    %69 = arith.mulf %68, %67 : vector<4x64xf32>
    %cst_38 = arith.constant 1.000000e+00 : f32
    %70 = vector.broadcast %cst_38 : f32 to vector<4x64xf32>
    %71 = arith.addf %70, %69 : vector<4x64xf32>
    %72 = tpu.reciprocal %71 {approx = true} : vector<4x64xf32> -> vector<4x64xf32>
    %cst_39 = arith.constant 1.06140542 : f32
    %73 = vector.broadcast %cst_39 : f32 to vector<4x64xf32>
    %74 = arith.mulf %73, %72 : vector<4x64xf32>
    %cst_40 = arith.constant -1.45315206 : f32
    %75 = vector.broadcast %cst_40 : f32 to vector<4x64xf32>
    %76 = arith.addf %74, %75 : vector<4x64xf32>
    %77 = arith.mulf %76, %72 : vector<4x64xf32>
    %cst_41 = arith.constant 1.42141378 : f32
    %78 = vector.broadcast %cst_41 : f32 to vector<4x64xf32>
    %79 = arith.addf %77, %78 : vector<4x64xf32>
    %80 = arith.mulf %79, %72 : vector<4x64xf32>
    %cst_42 = arith.constant -0.284496725 : f32
    %81 = vector.broadcast %cst_42 : f32 to vector<4x64xf32>
    %82 = arith.addf %80, %81 : vector<4x64xf32>
    %83 = arith.mulf %82, %72 : vector<4x64xf32>
    %cst_43 = arith.constant 0.254829586 : f32
    %84 = vector.broadcast %cst_43 : f32 to vector<4x64xf32>
    %85 = arith.addf %83, %84 : vector<4x64xf32>
    %86 = arith.mulf %85, %72 : vector<4x64xf32>
    %cst_44 = arith.constant 0.000000e+00 : f32
    %87 = vector.broadcast %cst_44 : f32 to vector<4x64xf32>
    %88 = arith.subf %87, %67 : vector<4x64xf32>
    %89 = arith.mulf %88, %67 : vector<4x64xf32>
    %90 = math.exp %89 : vector<4x64xf32>
    %91 = arith.mulf %86, %90 : vector<4x64xf32>
    %cst_45 = arith.constant 1.000000e+00 : f32
    %92 = vector.broadcast %cst_45 : f32 to vector<4x64xf32>
    %93 = arith.subf %92, %91 : vector<4x64xf32>
    %94 = arith.mulf %66, %93 : vector<4x64xf32>
    %cst_46 = arith.constant 1.000000e+00 : f32
    %95 = vector.broadcast %cst_46 : f32 to vector<4x64xf32>
    %96 = arith.addf %95, %94 : vector<4x64xf32>
    %97 = arith.mulf %59, %96 : vector<4x64xf32>
    %c0_47 = arith.constant 0 : index
    %c0_48 = arith.constant 0 : index
    %98 = vector.load %arg9[%c0_47, %c0_48] : memref<8x4xbf16, #tpu.memory_space<vmem>>, vector<8x4xbf16>
    %99 = arith.truncf %97 : vector<4x64xf32> to vector<4x64xbf16>
    %cst_49 = arith.constant dense<0.000000e+00> : vector<8x64xf32>
    %100 = tpu.matmul %98, %99, %cst_49 {dimension_numbers = #tpu.dot_dimension_numbers<[1], [0], [0], [1], [0, 0, 1, 1], [], []>} : vector<8x4xbf16>, vector<4x64xbf16>, vector<8x64xf32> -> vector<8x64xf32>
    %c0_50 = arith.constant 0 : index
    %c0_51 = arith.constant 0 : index
    %101 = vector.load %arg10[%c0_50, %c0_51] : memref<8x1xf32, #tpu.memory_space<vmem>>, vector<8x1xf32>
    %102 = vector.broadcast %101 : vector<8x1xf32> to vector<8x64xf32>
    %103 = arith.addf %100, %102 : vector<8x64xf32>
    %104 = arith.addf %103, %5 : vector<8x64xf32>
    %105 = arith.truncf %104 : vector<8x64xf32> to vector<8x64xbf16>
    %c0_52 = arith.constant 0 : index
    %c0_53 = arith.constant 0 : index
    %c0_54 = arith.constant 0 : index
    %106 = vector.load %arg11[%c0_52, %c0_53, %c0_54] : memref<1x8x64xbf16, #tpu.memory_space<vmem>>, vector<1x8x64xbf16>
    %107 = vector.shape_cast %106 : vector<1x8x64xbf16> to vector<8x64xbf16>
    %108 = vector.shape_cast %105 : vector<8x64xbf16> to vector<1x8x64xbf16>
    tpu.vector_store %arg11[%c0_52, %c0_53, %c0_54], %108 {strides = array<i32>} : memref<1x8x64xbf16, #tpu.memory_space<vmem>>, vector<1x8x64xbf16>,
    return
  }
  func.func @transform_0(%arg0: i32, %arg1: i32) -> (i32, i32, i32) {
    %c0_i32 = arith.constant 0 : i32
    %c0_i32_0 = arith.constant 0 : i32
    return %arg0, %c0_i32, %arg1 : i32, i32, i32
  }
  func.func @transform_1(%arg0: i32, %arg1: i32) -> (i32, i32, i32) {
    %c0_i32 = arith.constant 0 : i32
    %c0_i32_0 = arith.constant 0 : i32
    return %arg0, %c0_i32, %arg1 : i32, i32, i32
  }
  func.func @transform_2(%arg0: i32, %arg1: i32) -> (i32, i32) {
    %c0_i32 = arith.constant 0 : i32
    %c0_i32_0 = arith.constant 0 : i32
    %c0_i32_1 = arith.constant 0 : i32
    return %c0_i32, %c0_i32_0 : i32, i32
  }
  func.func @transform_3(%arg0: i32, %arg1: i32) -> (i32, i32) {
    %c0_i32 = arith.constant 0 : i32
    %c0_i32_0 = arith.constant 0 : i32
    %c0_i32_1 = arith.constant 0 : i32
    return %c0_i32, %c0_i32_0 : i32, i32
  }
  func.func @transform_4(%arg0: i32, %arg1: i32) -> (i32, i32) {
    %c0_i32 = arith.constant 0 : i32
    %c0_i32_0 = arith.constant 0 : i32
    %c0_i32_1 = arith.constant 0 : i32
    return %c0_i32, %c0_i32_0 : i32, i32
  }
  func.func @transform_5(%arg0: i32, %arg1: i32) -> (i32, i32) {
    %c0_i32 = arith.constant 0 : i32
    %c0_i32_0 = arith.constant 0 : i32
    %c0_i32_1 = arith.constant 0 : i32
    return %c0_i32, %c0_i32_0 : i32, i32
  }
  func.func @transform_6(%arg0: i32, %arg1: i32) -> (i32, i32) {
    %c0_i32 = arith.constant 0 : i32
    %c0_i32_0 = arith.constant 0 : i32
    %c0_i32_1 = arith.constant 0 : i32
    return %c0_i32, %c0_i32_0 : i32, i32
  }
  func.func @transform_7(%arg0: i32, %arg1: i32) -> (i32, i32) {
    %c0_i32 = arith.constant 0 : i32
    %c0_i32_0 = arith.constant 0 : i32
    %c0_i32_1 = arith.constant 0 : i32
    return %c0_i32, %c0_i32_0 : i32, i32
  }
  func.func @transform_8(%arg0: i32, %arg1: i32) -> (i32, i32) {
    %c0_i32 = arith.constant 0 : i32
    %c0_i32_0 = arith.constant 0 : i32
    %c0_i32_1 = arith.constant 0 : i32
    return %c0_i32, %c0_i32_0 : i32, i32
  }
  func.func @transform_9(%arg0: i32, %arg1: i32) -> (i32, i32, i32) {
    %c0_i32 = arith.constant 0 : i32
    %c0_i32_0 = arith.constant 0 : i32
    return %arg0, %c0_i32, %arg1 : i32, i32, i32
  }
}

module attributes {stable_mosaic.version = 11 : i64} {
  func.func @_tail3_kernel(%arg0: i32, %arg1: i32, %arg2: memref<1x8x256xf32, #tpu.memory_space<vmem>>, %arg3: memref<1x8x256xf32, #tpu.memory_space<vmem>>, %arg4: memref<1x8x256xf32, #tpu.memory_space<vmem>>, %arg5: memref<8x1xf32, #tpu.memory_space<vmem>>, %arg6: memref<4x8xbf16, #tpu.memory_space<vmem>>, %arg7: memref<4x1xf32, #tpu.memory_space<vmem>>, %arg8: memref<8x4xbf16, #tpu.memory_space<vmem>>, %arg9: memref<8x1xf32, #tpu.memory_space<vmem>>, %arg10: memref<1x8x256xbf16, #tpu.memory_space<vmem>>) attributes {dimension_semantics = [#tpu.dimension_semantics<parallel>, #tpu.dimension_semantics<parallel>], iteration_bounds = array<i64: 2, 1>, scalar_prefetch = 0 : i64, scratch_operands = 0 : i64, tpu.core_type = #tpu.core_type<tc>, window_params = [{transform_indices = @transform_0, window_bounds = array<i64: 1, 8, 256>}, {transform_indices = @transform_1, window_bounds = array<i64: 1, 8, 256>}, {transform_indices = @transform_2, window_bounds = array<i64: 1, 8, 256>}, {pipeline_mode = #tpu.pipeline_mode<synchronous>, transform_indices = @transform_3, window_bounds = array<i64: 8, 1>}, {pipeline_mode = #tpu.pipeline_mode<synchronous>, transform_indices = @transform_4, window_bounds = array<i64: 4, 8>}, {pipeline_mode = #tpu.pipeline_mode<synchronous>, transform_indices = @transform_5, window_bounds = array<i64: 4, 1>}, {pipeline_mode = #tpu.pipeline_mode<synchronous>, transform_indices = @transform_6, window_bounds = array<i64: 8, 4>}, {pipeline_mode = #tpu.pipeline_mode<synchronous>, transform_indices = @transform_7, window_bounds = array<i64: 8, 1>}, {transform_indices = @transform_8, window_bounds = array<i64: 1, 8, 256>}]} {
    %c0 = arith.constant 0 : index
    %c0_0 = arith.constant 0 : index
    %c0_1 = arith.constant 0 : index
    %0 = vector.load %arg2[%c0, %c0_0, %c0_1] : memref<1x8x256xf32, #tpu.memory_space<vmem>>, vector<1x8x256xf32>
    %1 = vector.shape_cast %0 : vector<1x8x256xf32> to vector<8x256xf32>
    %c0_2 = arith.constant 0 : index
    %c0_3 = arith.constant 0 : index
    %2 = vector.load %arg5[%c0_2, %c0_3] : memref<8x1xf32, #tpu.memory_space<vmem>>, vector<8x1xf32>
    %3 = vector.broadcast %2 : vector<8x1xf32> to vector<8x256xf32>
    %4 = arith.addf %1, %3 : vector<8x256xf32>
    %c0_4 = arith.constant 0 : index
    %c0_5 = arith.constant 0 : index
    %c0_6 = arith.constant 0 : index
    %5 = vector.load %arg3[%c0_4, %c0_5, %c0_6] : memref<1x8x256xf32, #tpu.memory_space<vmem>>, vector<1x8x256xf32>
    %6 = vector.shape_cast %5 : vector<1x8x256xf32> to vector<8x256xf32>
    %7 = arith.addf %4, %6 : vector<8x256xf32>
    %cst = arith.constant 5.000000e-01 : f32
    %8 = vector.broadcast %cst : f32 to vector<8x256xf32>
    %9 = arith.mulf %8, %7 : vector<8x256xf32>
    %cst_7 = arith.constant 0.707106769 : f32
    %10 = vector.broadcast %cst_7 : f32 to vector<8x256xf32>
    %11 = arith.mulf %7, %10 : vector<8x256xf32>
    %cst_8 = arith.constant 0.000000e+00 : f32
    %12 = vector.broadcast %cst_8 : f32 to vector<8x256xf32>
    %13 = arith.cmpf oge, %11, %12 : vector<8x256xf32>
    %cst_9 = arith.constant 1.000000e+00 : f32
    %cst_10 = arith.constant -1.000000e+00 : f32
    %14 = vector.broadcast %cst_9 : f32 to vector<8x256xf32>
    %15 = vector.broadcast %cst_10 : f32 to vector<8x256xf32>
    %16 = arith.select %13, %14, %15 : vector<8x256xi1>, vector<8x256xf32>
    %17 = math.absf %11 : vector<8x256xf32>
    %cst_11 = arith.constant 0.327591091 : f32
    %18 = vector.broadcast %cst_11 : f32 to vector<8x256xf32>
    %19 = arith.mulf %18, %17 : vector<8x256xf32>
    %cst_12 = arith.constant 1.000000e+00 : f32
    %20 = vector.broadcast %cst_12 : f32 to vector<8x256xf32>
    %21 = arith.addf %20, %19 : vector<8x256xf32>
    %22 = tpu.reciprocal %21 {approx = true} : vector<8x256xf32> -> vector<8x256xf32>
    %cst_13 = arith.constant 1.06140542 : f32
    %23 = vector.broadcast %cst_13 : f32 to vector<8x256xf32>
    %24 = arith.mulf %23, %22 : vector<8x256xf32>
    %cst_14 = arith.constant -1.45315206 : f32
    %25 = vector.broadcast %cst_14 : f32 to vector<8x256xf32>
    %26 = arith.addf %24, %25 : vector<8x256xf32>
    %27 = arith.mulf %26, %22 : vector<8x256xf32>
    %cst_15 = arith.constant 1.42141378 : f32
    %28 = vector.broadcast %cst_15 : f32 to vector<8x256xf32>
    %29 = arith.addf %27, %28 : vector<8x256xf32>
    %30 = arith.mulf %29, %22 : vector<8x256xf32>
    %cst_16 = arith.constant -0.284496725 : f32
    %31 = vector.broadcast %cst_16 : f32 to vector<8x256xf32>
    %32 = arith.addf %30, %31 : vector<8x256xf32>
    %33 = arith.mulf %32, %22 : vector<8x256xf32>
    %cst_17 = arith.constant 0.254829586 : f32
    %34 = vector.broadcast %cst_17 : f32 to vector<8x256xf32>
    %35 = arith.addf %33, %34 : vector<8x256xf32>
    %36 = arith.mulf %35, %22 : vector<8x256xf32>
    %cst_18 = arith.constant 0.000000e+00 : f32
    %37 = vector.broadcast %cst_18 : f32 to vector<8x256xf32>
    %38 = arith.subf %37, %17 : vector<8x256xf32>
    %39 = arith.mulf %38, %17 : vector<8x256xf32>
    %40 = math.exp %39 : vector<8x256xf32>
    %41 = arith.mulf %36, %40 : vector<8x256xf32>
    %cst_19 = arith.constant 1.000000e+00 : f32
    %42 = vector.broadcast %cst_19 : f32 to vector<8x256xf32>
    %43 = arith.subf %42, %41 : vector<8x256xf32>
    %44 = arith.mulf %16, %43 : vector<8x256xf32>
    %cst_20 = arith.constant 1.000000e+00 : f32
    %45 = vector.broadcast %cst_20 : f32 to vector<8x256xf32>
    %46 = arith.addf %45, %44 : vector<8x256xf32>
    %47 = arith.mulf %9, %46 : vector<8x256xf32>
    %c0_21 = arith.constant 0 : index
    %c0_22 = arith.constant 0 : index
    %48 = vector.load %arg6[%c0_21, %c0_22] : memref<4x8xbf16, #tpu.memory_space<vmem>>, vector<4x8xbf16>
    %49 = arith.truncf %47 : vector<8x256xf32> to vector<8x256xbf16>
    %cst_23 = arith.constant dense<0.000000e+00> : vector<4x256xf32>
    %50 = tpu.matmul %48, %49, %cst_23 {dimension_numbers = #tpu.dot_dimension_numbers<[1], [0], [0], [1], [0, 0, 1, 1], [], []>} : vector<4x8xbf16>, vector<8x256xbf16>, vector<4x256xf32> -> vector<4x256xf32>
    %c0_24 = arith.constant 0 : index
    %c0_25 = arith.constant 0 : index
    %51 = vector.load %arg7[%c0_24, %c0_25] : memref<4x1xf32, #tpu.memory_space<vmem>>, vector<4x1xf32>
    %52 = vector.broadcast %51 : vector<4x1xf32> to vector<4x256xf32>
    %53 = arith.addf %50, %52 : vector<4x256xf32>
    %cst_26 = arith.constant 5.000000e-01 : f32
    %54 = vector.broadcast %cst_26 : f32 to vector<4x256xf32>
    %55 = arith.mulf %54, %53 : vector<4x256xf32>
    %cst_27 = arith.constant 0.707106769 : f32
    %56 = vector.broadcast %cst_27 : f32 to vector<4x256xf32>
    %57 = arith.mulf %53, %56 : vector<4x256xf32>
    %cst_28 = arith.constant 0.000000e+00 : f32
    %58 = vector.broadcast %cst_28 : f32 to vector<4x256xf32>
    %59 = arith.cmpf oge, %57, %58 : vector<4x256xf32>
    %cst_29 = arith.constant 1.000000e+00 : f32
    %cst_30 = arith.constant -1.000000e+00 : f32
    %60 = vector.broadcast %cst_29 : f32 to vector<4x256xf32>
    %61 = vector.broadcast %cst_30 : f32 to vector<4x256xf32>
    %62 = arith.select %59, %60, %61 : vector<4x256xi1>, vector<4x256xf32>
    %63 = math.absf %57 : vector<4x256xf32>
    %cst_31 = arith.constant 0.327591091 : f32
    %64 = vector.broadcast %cst_31 : f32 to vector<4x256xf32>
    %65 = arith.mulf %64, %63 : vector<4x256xf32>
    %cst_32 = arith.constant 1.000000e+00 : f32
    %66 = vector.broadcast %cst_32 : f32 to vector<4x256xf32>
    %67 = arith.addf %66, %65 : vector<4x256xf32>
    %68 = tpu.reciprocal %67 {approx = true} : vector<4x256xf32> -> vector<4x256xf32>
    %cst_33 = arith.constant 1.06140542 : f32
    %69 = vector.broadcast %cst_33 : f32 to vector<4x256xf32>
    %70 = arith.mulf %69, %68 : vector<4x256xf32>
    %cst_34 = arith.constant -1.45315206 : f32
    %71 = vector.broadcast %cst_34 : f32 to vector<4x256xf32>
    %72 = arith.addf %70, %71 : vector<4x256xf32>
    %73 = arith.mulf %72, %68 : vector<4x256xf32>
    %cst_35 = arith.constant 1.42141378 : f32
    %74 = vector.broadcast %cst_35 : f32 to vector<4x256xf32>
    %75 = arith.addf %73, %74 : vector<4x256xf32>
    %76 = arith.mulf %75, %68 : vector<4x256xf32>
    %cst_36 = arith.constant -0.284496725 : f32
    %77 = vector.broadcast %cst_36 : f32 to vector<4x256xf32>
    %78 = arith.addf %76, %77 : vector<4x256xf32>
    %79 = arith.mulf %78, %68 : vector<4x256xf32>
    %cst_37 = arith.constant 0.254829586 : f32
    %80 = vector.broadcast %cst_37 : f32 to vector<4x256xf32>
    %81 = arith.addf %79, %80 : vector<4x256xf32>
    %82 = arith.mulf %81, %68 : vector<4x256xf32>
    %cst_38 = arith.constant 0.000000e+00 : f32
    %83 = vector.broadcast %cst_38 : f32 to vector<4x256xf32>
    %84 = arith.subf %83, %63 : vector<4x256xf32>
    %85 = arith.mulf %84, %63 : vector<4x256xf32>
    %86 = math.exp %85 : vector<4x256xf32>
    %87 = arith.mulf %82, %86 : vector<4x256xf32>
    %cst_39 = arith.constant 1.000000e+00 : f32
    %88 = vector.broadcast %cst_39 : f32 to vector<4x256xf32>
    %89 = arith.subf %88, %87 : vector<4x256xf32>
    %90 = arith.mulf %62, %89 : vector<4x256xf32>
    %cst_40 = arith.constant 1.000000e+00 : f32
    %91 = vector.broadcast %cst_40 : f32 to vector<4x256xf32>
    %92 = arith.addf %91, %90 : vector<4x256xf32>
    %93 = arith.mulf %55, %92 : vector<4x256xf32>
    %c0_41 = arith.constant 0 : index
    %c0_42 = arith.constant 0 : index
    %94 = vector.load %arg8[%c0_41, %c0_42] : memref<8x4xbf16, #tpu.memory_space<vmem>>, vector<8x4xbf16>
    %95 = arith.truncf %93 : vector<4x256xf32> to vector<4x256xbf16>
    %cst_43 = arith.constant dense<0.000000e+00> : vector<8x256xf32>
    %96 = tpu.matmul %94, %95, %cst_43 {dimension_numbers = #tpu.dot_dimension_numbers<[1], [0], [0], [1], [0, 0, 1, 1], [], []>} : vector<8x4xbf16>, vector<4x256xbf16>, vector<8x256xf32> -> vector<8x256xf32>
    %c0_44 = arith.constant 0 : index
    %c0_45 = arith.constant 0 : index
    %97 = vector.load %arg9[%c0_44, %c0_45] : memref<8x1xf32, #tpu.memory_space<vmem>>, vector<8x1xf32>
    %98 = vector.broadcast %97 : vector<8x1xf32> to vector<8x256xf32>
    %99 = arith.addf %96, %98 : vector<8x256xf32>
    %c0_46 = arith.constant 0 : index
    %c0_47 = arith.constant 0 : index
    %c0_48 = arith.constant 0 : index
    %100 = vector.load %arg4[%c0_46, %c0_47, %c0_48] : memref<1x8x256xf32, #tpu.memory_space<vmem>>, vector<1x8x256xf32>
    %101 = vector.shape_cast %100 : vector<1x8x256xf32> to vector<8x256xf32>
    %102 = arith.addf %99, %101 : vector<8x256xf32>
    %103 = arith.truncf %102 : vector<8x256xf32> to vector<8x256xbf16>
    %c0_49 = arith.constant 0 : index
    %c0_50 = arith.constant 0 : index
    %c0_51 = arith.constant 0 : index
    %104 = vector.load %arg10[%c0_49, %c0_50, %c0_51] : memref<1x8x256xbf16, #tpu.memory_space<vmem>>, vector<1x8x256xbf16>
    %105 = vector.shape_cast %104 : vector<1x8x256xbf16> to vector<8x256xbf16>
    %106 = vector.shape_cast %103 : vector<8x256xbf16> to vector<1x8x256xbf16>
    tpu.vector_store %arg10[%c0_49, %c0_50, %c0_51], %106 {strides = array<i32>} : memref<1x8x256xbf16, #tpu.memory_space<vmem>>, vector<1x8x256xbf16>,
    return
  }
  func.func @transform_0(%arg0: i32, %arg1: i32) -> (i32, i32, i32) {
    %c0_i32 = arith.constant 0 : i32
    %c0_i32_0 = arith.constant 0 : i32
    return %arg0, %c0_i32, %arg1 : i32, i32, i32
  }
  func.func @transform_1(%arg0: i32, %arg1: i32) -> (i32, i32, i32) {
    %c0_i32 = arith.constant 0 : i32
    %c0_i32_0 = arith.constant 0 : i32
    return %arg0, %c0_i32, %arg1 : i32, i32, i32
  }
  func.func @transform_2(%arg0: i32, %arg1: i32) -> (i32, i32, i32) {
    %c0_i32 = arith.constant 0 : i32
    %c0_i32_0 = arith.constant 0 : i32
    return %arg0, %c0_i32, %arg1 : i32, i32, i32
  }
  func.func @transform_3(%arg0: i32, %arg1: i32) -> (i32, i32) {
    %c0_i32 = arith.constant 0 : i32
    %c0_i32_0 = arith.constant 0 : i32
    %c0_i32_1 = arith.constant 0 : i32
    return %c0_i32, %c0_i32_0 : i32, i32
  }
  func.func @transform_4(%arg0: i32, %arg1: i32) -> (i32, i32) {
    %c0_i32 = arith.constant 0 : i32
    %c0_i32_0 = arith.constant 0 : i32
    %c0_i32_1 = arith.constant 0 : i32
    return %c0_i32, %c0_i32_0 : i32, i32
  }
  func.func @transform_5(%arg0: i32, %arg1: i32) -> (i32, i32) {
    %c0_i32 = arith.constant 0 : i32
    %c0_i32_0 = arith.constant 0 : i32
    %c0_i32_1 = arith.constant 0 : i32
    return %c0_i32, %c0_i32_0 : i32, i32
  }
  func.func @transform_6(%arg0: i32, %arg1: i32) -> (i32, i32) {
    %c0_i32 = arith.constant 0 : i32
    %c0_i32_0 = arith.constant 0 : i32
    %c0_i32_1 = arith.constant 0 : i32
    return %c0_i32, %c0_i32_0 : i32, i32
  }
  func.func @transform_7(%arg0: i32, %arg1: i32) -> (i32, i32) {
    %c0_i32 = arith.constant 0 : i32
    %c0_i32_0 = arith.constant 0 : i32
    %c0_i32_1 = arith.constant 0 : i32
    return %c0_i32, %c0_i32_0 : i32, i32
  }
  func.func @transform_8(%arg0: i32, %arg1: i32) -> (i32, i32, i32) {
    %c0_i32 = arith.constant 0 : i32
    %c0_i32_0 = arith.constant 0 : i32
    return %arg0, %c0_i32, %arg1 : i32, i32, i32
  }
}

module attributes {stable_mosaic.version = 11 : i64} {
  func.func @_mlp_kernel(%arg0: i32, %arg1: i32, %arg2: memref<1x8x256xbf16, #tpu.memory_space<vmem>>, %arg3: memref<16x8xbf16, #tpu.memory_space<vmem>>, %arg4: memref<16x1xf32, #tpu.memory_space<vmem>>, %arg5: memref<1x16xbf16, #tpu.memory_space<vmem>>, %arg6: memref<1x1xf32, #tpu.memory_space<vmem>>, %arg7: memref<1x1x256xf32, #tpu.memory_space<vmem>>) attributes {dimension_semantics = [#tpu.dimension_semantics<parallel>, #tpu.dimension_semantics<parallel>], iteration_bounds = array<i64: 2, 1>, scalar_prefetch = 0 : i64, scratch_operands = 0 : i64, tpu.core_type = #tpu.core_type<tc>, window_params = [{transform_indices = @transform_0, window_bounds = array<i64: 1, 8, 256>}, {pipeline_mode = #tpu.pipeline_mode<synchronous>, transform_indices = @transform_1, window_bounds = array<i64: 16, 8>}, {pipeline_mode = #tpu.pipeline_mode<synchronous>, transform_indices = @transform_2, window_bounds = array<i64: 16, 1>}, {pipeline_mode = #tpu.pipeline_mode<synchronous>, transform_indices = @transform_3, window_bounds = array<i64: 1, 16>}, {pipeline_mode = #tpu.pipeline_mode<synchronous>, transform_indices = @transform_4, window_bounds = array<i64: 1, 1>}, {transform_indices = @transform_5, window_bounds = array<i64: 1, 1, 256>}]} {
    %c0 = arith.constant 0 : index
    %c0_0 = arith.constant 0 : index
    %c0_1 = arith.constant 0 : index
    %0 = vector.load %arg2[%c0, %c0_0, %c0_1] : memref<1x8x256xbf16, #tpu.memory_space<vmem>>, vector<1x8x256xbf16>
    %1 = vector.shape_cast %0 : vector<1x8x256xbf16> to vector<8x256xbf16>
    %c0_2 = arith.constant 0 : index
    %c0_3 = arith.constant 0 : index
    %2 = vector.load %arg3[%c0_2, %c0_3] : memref<16x8xbf16, #tpu.memory_space<vmem>>, vector<16x8xbf16>
    %cst = arith.constant dense<0.000000e+00> : vector<16x256xf32>
    %3 = tpu.matmul %2, %1, %cst {dimension_numbers = #tpu.dot_dimension_numbers<[1], [0], [0], [1], [0, 0, 1, 1], [], []>} : vector<16x8xbf16>, vector<8x256xbf16>, vector<16x256xf32> -> vector<16x256xf32>
    %c0_4 = arith.constant 0 : index
    %c0_5 = arith.constant 0 : index
    %4 = vector.load %arg4[%c0_4, %c0_5] : memref<16x1xf32, #tpu.memory_space<vmem>>, vector<16x1xf32>
    %5 = vector.broadcast %4 : vector<16x1xf32> to vector<16x256xf32>
    %6 = arith.addf %3, %5 : vector<16x256xf32>
    %cst_6 = arith.constant 5.000000e-01 : f32
    %7 = vector.broadcast %cst_6 : f32 to vector<16x256xf32>
    %8 = arith.mulf %7, %6 : vector<16x256xf32>
    %cst_7 = arith.constant 0.707106769 : f32
    %9 = vector.broadcast %cst_7 : f32 to vector<16x256xf32>
    %10 = arith.mulf %6, %9 : vector<16x256xf32>
    %cst_8 = arith.constant 0.000000e+00 : f32
    %11 = vector.broadcast %cst_8 : f32 to vector<16x256xf32>
    %12 = arith.cmpf oge, %10, %11 : vector<16x256xf32>
    %cst_9 = arith.constant 1.000000e+00 : f32
    %cst_10 = arith.constant -1.000000e+00 : f32
    %13 = vector.broadcast %cst_9 : f32 to vector<16x256xf32>
    %14 = vector.broadcast %cst_10 : f32 to vector<16x256xf32>
    %15 = arith.select %12, %13, %14 : vector<16x256xi1>, vector<16x256xf32>
    %16 = math.absf %10 : vector<16x256xf32>
    %cst_11 = arith.constant 0.327591091 : f32
    %17 = vector.broadcast %cst_11 : f32 to vector<16x256xf32>
    %18 = arith.mulf %17, %16 : vector<16x256xf32>
    %cst_12 = arith.constant 1.000000e+00 : f32
    %19 = vector.broadcast %cst_12 : f32 to vector<16x256xf32>
    %20 = arith.addf %19, %18 : vector<16x256xf32>
    %21 = tpu.reciprocal %20 {approx = true} : vector<16x256xf32> -> vector<16x256xf32>
    %cst_13 = arith.constant 1.06140542 : f32
    %22 = vector.broadcast %cst_13 : f32 to vector<16x256xf32>
    %23 = arith.mulf %22, %21 : vector<16x256xf32>
    %cst_14 = arith.constant -1.45315206 : f32
    %24 = vector.broadcast %cst_14 : f32 to vector<16x256xf32>
    %25 = arith.addf %23, %24 : vector<16x256xf32>
    %26 = arith.mulf %25, %21 : vector<16x256xf32>
    %cst_15 = arith.constant 1.42141378 : f32
    %27 = vector.broadcast %cst_15 : f32 to vector<16x256xf32>
    %28 = arith.addf %26, %27 : vector<16x256xf32>
    %29 = arith.mulf %28, %21 : vector<16x256xf32>
    %cst_16 = arith.constant -0.284496725 : f32
    %30 = vector.broadcast %cst_16 : f32 to vector<16x256xf32>
    %31 = arith.addf %29, %30 : vector<16x256xf32>
    %32 = arith.mulf %31, %21 : vector<16x256xf32>
    %cst_17 = arith.constant 0.254829586 : f32
    %33 = vector.broadcast %cst_17 : f32 to vector<16x256xf32>
    %34 = arith.addf %32, %33 : vector<16x256xf32>
    %35 = arith.mulf %34, %21 : vector<16x256xf32>
    %cst_18 = arith.constant 0.000000e+00 : f32
    %36 = vector.broadcast %cst_18 : f32 to vector<16x256xf32>
    %37 = arith.subf %36, %16 : vector<16x256xf32>
    %38 = arith.mulf %37, %16 : vector<16x256xf32>
    %39 = math.exp %38 : vector<16x256xf32>
    %40 = arith.mulf %35, %39 : vector<16x256xf32>
    %cst_19 = arith.constant 1.000000e+00 : f32
    %41 = vector.broadcast %cst_19 : f32 to vector<16x256xf32>
    %42 = arith.subf %41, %40 : vector<16x256xf32>
    %43 = arith.mulf %15, %42 : vector<16x256xf32>
    %cst_20 = arith.constant 1.000000e+00 : f32
    %44 = vector.broadcast %cst_20 : f32 to vector<16x256xf32>
    %45 = arith.addf %44, %43 : vector<16x256xf32>
    %46 = arith.mulf %8, %45 : vector<16x256xf32>
    %c0_21 = arith.constant 0 : index
    %c0_22 = arith.constant 0 : index
    %47 = vector.load %arg5[%c0_21, %c0_22] : memref<1x16xbf16, #tpu.memory_space<vmem>>, vector<1x16xbf16>
    %48 = arith.truncf %46 : vector<16x256xf32> to vector<16x256xbf16>
    %cst_23 = arith.constant dense<0.000000e+00> : vector<1x256xf32>
    %49 = tpu.matmul %47, %48, %cst_23 {dimension_numbers = #tpu.dot_dimension_numbers<[1], [0], [0], [1], [0, 0, 1, 1], [], []>} : vector<1x16xbf16>, vector<16x256xbf16>, vector<1x256xf32> -> vector<1x256xf32>
    %c0_24 = arith.constant 0 : index
    %c0_25 = arith.constant 0 : index
    %50 = vector.load %arg6[%c0_24, %c0_25] : memref<1x1xf32, #tpu.memory_space<vmem>>, vector<1x1xf32>
    %51 = vector.broadcast %50 : vector<1x1xf32> to vector<1x256xf32>
    %52 = arith.addf %49, %51 : vector<1x256xf32>
    %c0_26 = arith.constant 0 : index
    %c0_27 = arith.constant 0 : index
    %c0_28 = arith.constant 0 : index
    %53 = vector.load %arg7[%c0_26, %c0_27, %c0_28] : memref<1x1x256xf32, #tpu.memory_space<vmem>>, vector<1x1x256xf32>
    %54 = vector.shape_cast %53 : vector<1x1x256xf32> to vector<1x256xf32>
    %55 = vector.shape_cast %52 : vector<1x256xf32> to vector<1x1x256xf32>
    tpu.vector_store %arg7[%c0_26, %c0_27, %c0_28], %55 {strides = array<i32>} : memref<1x1x256xf32, #tpu.memory_space<vmem>>, vector<1x1x256xf32>,
    return
  }
  func.func @transform_0(%arg0: i32, %arg1: i32) -> (i32, i32, i32) {
    %c0_i32 = arith.constant 0 : i32
    %c0_i32_0 = arith.constant 0 : i32
    return %arg0, %c0_i32, %arg1 : i32, i32, i32
  }
  func.func @transform_1(%arg0: i32, %arg1: i32) -> (i32, i32) {
    %c0_i32 = arith.constant 0 : i32
    %c0_i32_0 = arith.constant 0 : i32
    %c0_i32_1 = arith.constant 0 : i32
    return %c0_i32, %c0_i32_0 : i32, i32
  }
  func.func @transform_2(%arg0: i32, %arg1: i32) -> (i32, i32) {
    %c0_i32 = arith.constant 0 : i32
    %c0_i32_0 = arith.constant 0 : i32
    %c0_i32_1 = arith.constant 0 : i32
    return %c0_i32, %c0_i32_0 : i32, i32
  }
  func.func @transform_3(%arg0: i32, %arg1: i32) -> (i32, i32) {
    %c0_i32 = arith.constant 0 : i32
    %c0_i32_0 = arith.constant 0 : i32
    %c0_i32_1 = arith.constant 0 : i32
    return %c0_i32, %c0_i32_0 : i32, i32
  }
  func.func @transform_4(%arg0: i32, %arg1: i32) -> (i32, i32) {
    %c0_i32 = arith.constant 0 : i32
    %c0_i32_0 = arith.constant 0 : i32
    %c0_i32_1 = arith.constant 0 : i32
    return %c0_i32, %c0_i32_0 : i32, i32
  }
  func.func @transform_5(%arg0: i32, %arg1: i32) -> (i32, i32, i32) {
    %c0_i32 = arith.constant 0 : i32
    %c0_i32_0 = arith.constant 0 : i32
    return %arg0, %c0_i32, %arg1 : i32, i32, i32
  }
}

</mosaic_0001>

<bundles_post_ra>
// kernel: uno_forward.14
= control target key start
LH: loop header
LB: loop body
LE: loop exit
PB: predicated region body
PF: predicated region fallthrough
CT: control target
= control target key end

     0   :  { %s726_s18 = smov 0   ;;  %s728_s19 = smov 0   ;;  %s813_s0 = inlined_call_operand.vmem [shape: bf16[2,5,256], index: 0, kind: input, shape index: {}]   ;;  %s814_s1 = inlined_call_operand.vmem [shape: bf16[16,5], index: 1, kind: input, shape index: {}]   ;;  %s815_s2 = inlined_call_operand.vmem [shape: f32[16,1], index: 2, kind: input, shape index: {}]   ;;  %s816_s3 = inlined_call_operand.vmem [shape: bf16[8,16], index: 3, kind: input, shape index: {}]   ;;  %s817_s4 = inlined_call_operand.vmem [shape: f32[8,1], index: 4, kind: input, shape index: {}]   ;;  %s818_s5 = inlined_call_operand.vmem [shape: bf16[2,8,256], index: 5, kind: output, shape index: {}]  }
   0x1   :  { %s730_s20 = smov 0  }
   0x2 LB: > { %s27_s21 = sadd.s32 1, %s687_s19  ;;  %p605_p0 = scmp.ge.s32.totalorder %s691_s20, 1  ;;  %s691_s20 = sphi %s730_s20, %s15_s20   ;;  %s687_s19 = sphi %s728_s19, %s820_s19   ;;  %s683_s18 = sphi %s726_s18, %s819_s18  }
   0x3   : > { %p29_p1 = scmp.ge.s32.totalorder %s27_s21, 2  ;;  %p208_p2 = scmp.lt.s32.totalorder %s691_s20, 3 }
   0x5   : > { %s822_s21 = smov (%p29_p1, %s27_s21), 0  ;;  %p209_p3 = pnand %p605_p0, %p208_p2 }
   0x6   : > { %p245_p4 = scmp.lt.s32.totalorder (!%p209_p3), %s683_s18, 1  ;;  %vm294_vm0 = vcmask (!%p209_p3), 1041408   ;;  %v693_v0 = vmov (!%p209_p3), 0   ;;  %v268_v1 = vld [vmem:[%s815_s2] sm:$0xff] (!%p209_p3)  ;;  %vm295_vm1 = vcmask (!%p209_p3), 1042432   ;;  %v694_v2 = vmov (!%p209_p3), 65535  }
   0x7   : > { %212 = sbr.rel (%p209_p3) target bundleno = 514 (0x202), region = 40  ;;  %336 = vmatprep.mubr.bf16.mxu0 (!%p209_p3), %v693_v0  ;;  %648 = vset.pattern.permute.xlu0 (!%p209_p3), %v693_v0  ;;  %v296_v3 = vsel (!%p209_p3), %vm294_vm0, 4294967295, %v694_v2  ;;  %v269_v4 = vld [vmem:[%s815_s2 + $0x8] sm:$0xff] (!%p209_p3)  ;;  %v652_v11 = vld [vmem:[%s814_s1] sm:$0xff] (!%p209_p3)   ;;  %vm290_vm2 = vcmask (!%p209_p3), 39936   ;;  %vm460_vm7 = vcmask (!%p209_p3), 130048  }
   0x8   : > { %496 = vmatprep.mubr.bf16.mxu1 (!%p209_p3), %v693_v0  ;;  %649 = vset.pattern.permute.xlu1 (!%p209_p3), %v693_v0  ;;  %v297_v6 = vsel (!%p209_p3), %vm295_vm1, %v296_v3, 0  ;;  %v454_v12 = vld [vmem:[%s817_s4] sm:$0xff] (!%p209_p3) }
   0x9   : > { %272 = vperm.xlu0 (!%p209_p3), %648, %v268_v1   ;;  %457 = vperm.xlu1 (!%p209_p3), %649, %v454_v12  }
   0xd   : > { %277 = vperm.xlu0 (!%p209_p3), %648, %v269_v4  }
   0xe   : > { %s824_s18 = smov (!%p245_p4, %s683_s18), 1 }
   0xf   : > { %s618_s24 = sshll.u32 %s824_s18, 3 }
  0x10   : > { %s252_s29 = scalar_lea.vmem %s813_s0, %s618_s24  ;;  %s262_s13 = scalar_lea.vmem %s818_s5, %s618_s24 }
  0x11   : > { %v265_v5 = vld [vmem:[%s252_s29] sm:$0x77] }
  0x12   : > { %v612_v7 = vcombine.high %v265_v5, %v265_v5  ;;  %v611_v8 = vcombine.low %v265_v5, %v265_v5 }
  0x14   : > { %v302_v9 = vand.u32 %v612_v7, %v297_v6  ;;  %v299_v10 = vand.u32 %v611_v8, %v297_v6 }
  0x16   : > { %304 = vmatprep.subr.bf16.mxu0 %v302_v9 }
  0x17   : > { %305 = vmatpush1.bf16.msra.mxu0 %v299_v10 }
  0x1a   : > { %613 = vmatmul.mubr.msk.bf16.vlgmr.msra.gmra.mrb[0].mxu0 %vm290_vm2, %v652_v11 }
  0x88   : > { %v273_v13 = vpop.permute.xlu0 %272 }
  0x8c   : > { %v278_v17 = vpop.permute.xlu0 %277 }
  0xed   : > { %v338_v14 = vpop.f32.mrb[0].mxu0 }
  0xee   : > { %v764_v15 = vadd.f32 %v338_v14, %v273_v13  ;;  %v340_v16 = vpop.f32.mrb[1].mxu0 }
  0xef   : > { %v766_v18 = vadd.f32 %v340_v16, %v273_v13  ;;  %v342_v19 = vpop.f32.mrb[2].mxu0 }
  0xf0   : > { %v769_v20 = vmul.f32 0.70710677, %v764_v15  ;;  %v771_v21 = vadd.f32 %v342_v19, %v278_v17  ;;  %v344_v22 = vpop.f32.mrb[3].mxu0 }
  0xf1   : > { %v774_v23 = vmul.f32 0.70710677, %v766_v18  ;;  %v776_v24 = vadd.f32 %v344_v22, %v278_v17 }
  0xf2   : > { %v363_v25 = vand.u32 2147483647, %v769_v20  ;;  %v780_v26 = vmul.f32 0.70710677, %v771_v21  ;;  %vm355_vm3 = vcmp.ge.f32.partialorder %v769_v20, 0.0 }
  0xf3   : > { %v364_v27 = vand.u32 2147483647, %v774_v23  ;;  %v785_v31 = vmul.f32 0.70710677, %v776_v24  ;;  %vm356_vm4 = vcmp.ge.f32.partialorder %v774_v23, 0.0 }
  0xf4   : > { %v367_v28 = vmul.f32 0.3275911, %v363_v25  ;;  %v365_v29 = vand.u32 2147483647, %v780_v26  ;;  %v415_v39 = vsub.f32 0.0, %v363_v25  ;;  %vm357_vm5 = vcmp.ge.f32.partialorder %v780_v26, 0.0 }
  0xf5   : > { %v368_v30 = vmul.f32 0.3275911, %v364_v27  ;;  %v366_v35 = vand.u32 2147483647, %v785_v31  ;;  %v416_v40 = vsub.f32 0.0, %v364_v27  ;;  %vm358_vm6 = vcmp.ge.f32.partialorder %v785_v31, 0.0 }
  0xf6   : > { %v371_v32 = vadd.f32 1.0, %v367_v28  ;;  %v369_v33 = vmul.f32 0.3275911, %v365_v29  ;;  %v419_v42 = vmul.f32 %v415_v39, %v363_v25  ;;  %v417_v43 = vsub.f32 0.0, %v365_v29 }
  0xf7   : > { %v372_v34 = vadd.f32 1.0, %v368_v30  ;;  %v370_v37 = vmul.f32 0.3275911, %v366_v35  ;;  %v420_v45 = vmul.f32 %v416_v40, %v364_v27  ;;  %v418_v47 = vsub.f32 0.0, %v366_v35 }
  0xf8   : > { %653 = vrcp.f32 %v371_v32  ;;  %v373_v36 = vadd.f32 1.0, %v369_v33  ;;  %v423_v51 = vmul.f32 1.442695, %v419_v42  ;;  %v421_v52 = vmul.f32 %v417_v43, %v365_v29 }
  0xf9   : > { %655 = vrcp.f32 %v372_v34  ;;  %v374_v38 = vadd.f32 1.0, %v370_v37  ;;  %v425_v54 = vmul.f32 1.442695, %v420_v45  ;;  %v422_v58 = vmul.f32 %v418_v47, %v366_v35 }
  0xfa   : > { %657 = vrcp.f32 %v373_v36  ;;  %v427_v63 = vmul.f32 1.442695, %v421_v52  ;;  %v695_v40 = vmov -1.0  }
  0xfb   : > { %659 = vrcp.f32 %v374_v38  ;;  %v429_v4 = vmul.f32 1.442695, %v422_v58  ;;  %v359_v42 = vsel %vm355_vm3, 1.0, %v695_v40  ;;  %v360_v20 = vsel %vm356_vm4, 1.0, %v695_v40 }
  0xfc   : > { %661 = vpow2.f32 %v423_v51  ;;  %v361_v23 = vsel %vm357_vm5, 1.0, %v695_v40  ;;  %v348_v58 = vmul.f32 0.5, %v766_v18 }
  0xfd   : > { %663 = vpow2.f32 %v425_v54  ;;  %v362_v54 = vsel %vm358_vm6, 1.0, %v695_v40 }
  0xfe   : > { %665 = vpow2.f32 %v427_v63 }
  0xff   : > { %667 = vpow2.f32 %v429_v4 }
 0x102   : > { %v654_v41 = vpop.eup %653 }
 0x103   : > { %v656_v44 = vpop.eup %655  ;;  %v379_v46 = vmul.f32 1.0614054, %v654_v41 }
 0x104   : > { %v380_v48 = vmul.f32 1.0614054, %v656_v44  ;;  %v658_v50 = vpop.eup %657 }
 0x105   : > { %v383_v49 = vadd.f32 -1.4531521, %v379_v46  ;;  %v381_v55 = vmul.f32 1.0614054, %v658_v50  ;;  %v660_v57 = vpop.eup %659 }
 0x106   : > { %v384_v53 = vadd.f32 -1.4531521, %v380_v48  ;;  %v382_v60 = vmul.f32 1.0614054, %v660_v57  ;;  %v662_v28 = vpop.eup %661 }
 0x107   : > { %v387_v56 = vmul.f32 %v654_v41, %v383_v49  ;;  %v385_v61 = vadd.f32 -1.4531521, %v381_v55  ;;  %v664_v30 = vpop.eup %663  ;;  %v349_v55 = vmul.f32 0.5, %v771_v21  ;;  %v458_v21 = vpop.permute.xlu1 %457 }
 0x108   : > { %v388_v59 = vmul.f32 %v656_v44, %v384_v53  ;;  %v386_v1 = vadd.f32 -1.4531521, %v382_v60  ;;  %v666_v39 = vpop.eup %665  ;;  %v347_v53 = vmul.f32 0.5, %v764_v15  ;;  %v451_v15 = vld [vmem:[%s816_s3] sm:$0xf] }
 0x109   : > { %v391_v62 = vadd.f32 1.4214138, %v387_v56  ;;  %v389_v2 = vmul.f32 %v658_v50, %v385_v61  ;;  %v668_v46 = vpop.eup %667 }
 0x10a   : > { %v392_v0 = vadd.f32 1.4214138, %v388_v59  ;;  %v390_v6 = vmul.f32 %v660_v57, %v386_v1  ;;  %v350_v59 = vmul.f32 0.5, %v776_v24 }
 0x10b   : > { %v395_v3 = vmul.f32 %v654_v41, %v391_v62  ;;  %v393_v7 = vadd.f32 1.4214138, %v389_v2 }
 0x10c   : > { %v396_v5 = vmul.f32 %v656_v44, %v392_v0  ;;  %v394_v10 = vadd.f32 1.4214138, %v390_v6 }
 0x10d   : > { %v399_v8 = vadd.f32 -0.28449672, %v395_v3  ;;  %v397_v11 = vmul.f32 %v658_v50, %v393_v7 }
 0x10e   : > { %v400_v9 = vadd.f32 -0.28449672, %v396_v5  ;;  %v398_v14 = vmul.f32 %v660_v57, %v394_v10 }
 0x10f   : > { %v403_v12 = vmul.f32 %v654_v41, %v399_v8  ;;  %v401_v16 = vadd.f32 -0.28449672, %v397_v11 }
 0x110   : > { %v404_v13 = vmul.f32 %v656_v44, %v400_v9  ;;  %v402_v22 = vadd.f32 -0.28449672, %v398_v14 }
 0x111   : > { %v407_v17 = vadd.f32 0.2548296, %v403_v12  ;;  %v405_v25 = vmul.f32 %v658_v50, %v401_v16 }
 0x112   : > { %v408_v19 = vadd.f32 0.2548296, %v404_v13  ;;  %v406_v32 = vmul.f32 %v660_v57, %v402_v22 }
 0x113   : > { %v411_v27 = vmul.f32 %v654_v41, %v407_v17  ;;  %v409_v33 = vadd.f32 0.2548296, %v405_v25 }
 0x114   : > { %v412_v29 = vmul.f32 %v656_v44, %v408_v19  ;;  %v410_v36 = vadd.f32 0.2548296, %v406_v32 }
 0x115   : > { %v431_v34 = vmul.f32 %v662_v28, %v411_v27  ;;  %v413_v37 = vmul.f32 %v658_v50, %v409_v33 }
 0x116   : > { %v432_v35 = vmul.f32 %v664_v30, %v412_v29  ;;  %v414_v41 = vmul.f32 %v660_v57, %v410_v36 }
 0x117   : > { %v435_v38 = vsub.f32 1.0, %v431_v34  ;;  %v433_v44 = vmul.f32 %v666_v39, %v413_v37 }
 0x118   : > { %v436_v43 = vsub.f32 1.0, %v432_v35  ;;  %v434_v47 = vmul.f32 %v668_v46, %v414_v41 }
 0x119   : > { %v439_v45 = vmul.f32 %v435_v38, %v359_v42  ;;  %v437_v49 = vsub.f32 1.0, %v433_v44 }
 0x11a   : > { %v440_v48 = vmul.f32 %v436_v43, %v360_v20  ;;  %v438_v51 = vsub.f32 1.0, %v434_v47 }
 0x11b   : > { %v441_v50 = vmul.f32 %v437_v49, %v361_v23  ;;  %v443_v52 = vadd.f32 1.0, %v439_v45 }
 0x11c   : > { %v442_v26 = vmul.f32 %v438_v51, %v362_v54  ;;  %v444_v56 = vadd.f32 1.0, %v440_v48 }
 0x11d   : > { %v445_v57 = vadd.f32 1.0, %v441_v50  ;;  %v447_v60 = vmul.f32 %v443_v52, %v347_v53 }
 0x11e   : > { %v446_v31 = vadd.f32 1.0, %v442_v26  ;;  %v448_v62 = vmul.f32 %v444_v56, %v348_v58 }
 0x11f   : > { %v449_v61 = vmul.f32 %v445_v57, %v349_v55 }
 0x120   : > { %v450_v63 = vmul.f32 %v446_v31, %v350_v59 }
 0x121   : > { %v452_v0 = vpack.c.bf16 %v449_v61, %v447_v60 }
 0x122   : > { %v453_v1 = vpack.c.bf16 %v450_v63, %v448_v62 }
 0x124   : > { %464 = vmatprep.subr.bf16.mxu1 %v453_v1 }
 0x125   : > { %465 = vmatpush1.bf16.msra.mxu1 %v452_v0 }
 0x128   : > { %614 = vmatmul.mubr.msk.bf16.vlgmr.msra.gmra.mrb[0].mxu1 %vm460_vm7, %v451_v15 }
 0x1fb   : > { %v498_v18 = vpop.f32.mrb[0].mxu1 }
 0x1fc   : > { %v499_v2 = vadd.f32 %v498_v18, %v458_v21  ;;  %v500_v24 = vpop.f32.mrb[1].mxu1 }
 0x1fd   : > { %v501_v3 = vadd.f32 %v500_v24, %v458_v21  ;;  %v502_v4 = vpop.f32.mrb[2].mxu1 }
 0x1fe   : > { %v503_v5 = vpop.f32.mrb[3].mxu1 }
 0x1ff   : > { %v620_v6 = vpack.c.bf16 %v501_v3, %v499_v2 }
 0x201   : > { %513 = vst [vmem:[%s262_s13] sm:$0xff] %v620_v6 }
 0x202 PF: > { %s15_s20 = sadd.s32 1, %s691_s20   ;;  %s819_s18 = smov %s687_s19 }
 0x203   : > { %p12_p5 = scmp.ge.s32.totalorder %s15_s20, 4   ;;  %s820_s19 = smov %s822_s21 }
 0x205   :  { %14 = sbr.rel (!%p12_p5) target bundleno = 2 (0x2), region = 70 }

// kernel: uno_forward.15
= control target key start
LH: loop header
LB: loop body
LE: loop exit
PB: predicated region body
PF: predicated region fallthrough
CT: control target
= control target key end

     0   :  { %v39_v0 = vlaneseq  ;;  %vm56_vm0 = vcmask 1041409   ;;  %vm59_vm1 = vcmask 1042434   ;;  %vm62_vm2 = vcmask 1043459   ;;  %s995_s0 = inlined_call_operand.vmem [shape: f32[2,8,12], index: 0, kind: input, shape index: {}]   ;;  %s996_s1 = inlined_call_operand.vmem [shape: f32[2,8,12], index: 1, kind: input, shape index: {}]   ;;  %s997_s2 = inlined_call_operand.vmem [shape: f32[8,8,12], index: 2, kind: input, shape index: {}]   ;;  %s998_s3 = inlined_call_operand.vmem [shape: f32[8,8,12], index: 3, kind: input, shape index: {}]   ;;  %s999_s4 = inlined_call_operand.vmem [shape: f32[2,8,12], index: 4, kind: output, shape index: {0}]   ;;  %s1000_s5 = inlined_call_operand.vmem [shape: f32[2,8,12], index: 5, kind: output, shape index: {1}]  }
   0x1   :  { %v604_v1 = vld [vmem:[%s995_s0] sm:$0xff]  ;;  %v609_v2 = vld [vmem:[%s995_s0 + $0x8] sm:$0xff]  ;;  %vm65_vm3 = vcmask 1044484   ;;  %vm68_vm4 = vcmask 1045509   ;;  %vm71_vm5 = vcmask 1046534   ;;  %v636_v8 = vld [vmem:[%s997_s2 + $0x10] sm:$0xff] }
   0x2   :  { %v614_v3 = vld [vmem:[%s996_s1] sm:$0xff]  ;;  %v619_v4 = vld [vmem:[%s996_s1 + $0x8] sm:$0xff]  ;;  %v631_v7 = vshrl.u32 %v39_v0, 7  ;;  %v641_v9 = vld [vmem:[%s997_s2 + $0x18] sm:$0xff]  ;;  %vm74_vm6 = vcmask 1047559   ;;  %v58_v17 = vrot.slane %v636_v8, 6 }
   0x3   :  { %v624_v5 = vld [vmem:[%s997_s2] sm:$0xff]  ;;  %v629_v6 = vld [vmem:[%s997_s2 + $0x8] sm:$0xff]  ;;  %v658_v14 = vld [vmem:[%s997_s2 + $0x30] sm:$0xff]  ;;  %v61_v18 = vrot.slane %v641_v9, 5  ;;  %v134_v54 = vrot.slane %v636_v8, 7  ;;  %v136_v0 = vrot.slane %v641_v9, 6 }
   0x4   :  { %v646_v10 = vld [vmem:[%s997_s2 + $0x20] sm:$0xff]  ;;  %v55_v11 = vrot.slane %v629_v6, 7  ;;  %v132_v12 = vrot.slane %v624_v5, 1  ;;  %v653_v13 = vld [vmem:[%s997_s2 + $0x28] sm:$0xff]  ;;  %v663_v15 = vld [vmem:[%s997_s2 + $0x38] sm:$0xff]  ;;  %v41_v16 = vsub.s32 0, %v631_v7 }
   0x5   :  { %v671_v19 = vld [vmem:[%s998_s3] sm:$0xff]  ;;  %v676_v20 = vld [vmem:[%s998_s3 + $0x8] sm:$0xff]  ;;  %v681_v21 = vld [vmem:[%s998_s3 + $0x10] sm:$0xff]  ;;  %v64_v23 = vrot.slane %v646_v10, 4  ;;  %v67_v24 = vrot.slane %v653_v13, 3  ;;  %v70_v25 = vrot.slane %v658_v14, 2 }
   0x6   :  { %v57_v22 = vsel %vm56_vm0, %v55_v11, %v624_v5  ;;  %v691_v26 = vld [vmem:[%s998_s3 + $0x18] sm:$0xff]  ;;  %v696_v27 = vld [vmem:[%s998_s3 + $0x20] sm:$0xff]  ;;  %v701_v28 = vld [vmem:[%s998_s3 + $0x28] sm:$0xff]  ;;  %v42_v29 = vrot.slane %v604_v1, %v41_v16  ;;  %v46_v30 = vrot.slane %v609_v2, %v41_v16  ;;  %v73_v32 = vrot.slane %v663_v15, 1 }
   0x7   :  { %v60_v31 = vsel %vm59_vm1, %v58_v17, %v57_v22  ;;  %v710_v33 = vld [vmem:[%s998_s3 + $0x30] sm:$0xff]  ;;  %v715_v34 = vld [vmem:[%s998_s3 + $0x38] sm:$0xff]  ;;  %v84_v36 = vrot.slane %v614_v3, %v41_v16  ;;  %v88_v37 = vrot.slane %v619_v4, %v41_v16  ;;  %v97_v38 = vrot.slane %v676_v20, 7 }
   0x8   :  { %v63_v35 = vsel %vm62_vm2, %v61_v18, %v60_v31  ;;  %v99_v40 = vrot.slane %v681_v21, 6  ;;  %v101_v41 = vrot.slane %v691_v26, 5  ;;  %v103_v42 = vrot.slane %v696_v27, 4 }
   0x9   :  { %v66_v39 = vsel %vm65_vm3, %v64_v23, %v63_v35  ;;  %v98_v44 = vsel %vm56_vm0, %v97_v38, %v671_v19  ;;  %v105_v45 = vrot.slane %v701_v28, 3  ;;  %v107_v46 = vrot.slane %v710_v33, 2 }
   0xa   :  { %v69_v43 = vsel %vm68_vm4, %v67_v24, %v66_v39  ;;  %v100_v48 = vsel %vm59_vm1, %v99_v40, %v98_v44  ;;  %v109_v49 = vrot.slane %v715_v34, 1  ;;  %v126_v50 = vsub.s32 1, %v631_v7 }
   0xb   :  { %v72_v47 = vsel %vm71_vm5, %v70_v25, %v69_v43  ;;  %v102_v52 = vsel %vm62_vm2, %v101_v41, %v100_v48  ;;  %v133_v53 = vsel %vm56_vm0, %v629_v6, %v132_v12  ;;  %v194_v56 = vrot.slane %v624_v5, 2 }
   0xc   :  { %v75_v51 = vsel %vm74_vm6, %v73_v32, %v72_v47  ;;  %v104_v55 = vsel %vm65_vm3, %v103_v42, %v102_v52  ;;  %v135_v63 = vsel %vm59_vm1, %v134_v54, %v133_v53  ;;  %v127_v12 = vrot.slane %v604_v1, %v126_v50 }
   0xd   :  { %v77_v57 = vmul.f32 %v75_v51, %v42_v29  ;;  %v78_v58 = vmul.f32 %v75_v51, %v46_v30  ;;  %v106_v59 = vsel %vm68_vm4, %v105_v45, %v104_v55  ;;  %v120_v60 = vmul.f32 %v84_v36, %v75_v51 }
   0xe   :  { %v108_v61 = vsel %vm71_vm5, %v107_v46, %v106_v59  ;;  %v121_v62 = vmul.f32 %v88_v37, %v75_v51  ;;  %v131_v16 = vrot.slane %v609_v2, %v126_v50  ;;  %v138_v17 = vrot.slane %v646_v10, 5 }
   0xf   :  { %v110_v11 = vsel %vm74_vm6, %v109_v49, %v108_v61  ;;  %v140_v23 = vrot.slane %v653_v13, 4  ;;  %v142_v24 = vrot.slane %v658_v14, 3  ;;  %v137_v31 = vsel %vm62_vm2, %v136_v0, %v135_v63 }
  0x10   :  { %v112_v18 = vmul.f32 %v110_v11, %v84_v36  ;;  %v113_v22 = vmul.f32 %v110_v11, %v88_v37  ;;  %v116_v25 = vmul.f32 %v110_v11, %v42_v29  ;;  %v144_v32 = vrot.slane %v663_v15, 2 }
  0x11   :  { %v159_v35 = vrot.slane %v671_v19, 1  ;;  %v117_v39 = vmul.f32 %v110_v11, %v46_v30  ;;  %v154_v40 = vrot.slane %v614_v3, %v126_v50  ;;  %v158_v41 = vrot.slane %v619_v4, %v126_v50 }
  0x12   :  { %v114_v38 = vsub.f32 %v77_v57, %v112_v18  ;;  %v139_v36 = vsel %vm65_vm3, %v138_v17, %v137_v31  ;;  %v161_v42 = vrot.slane %v681_v21, 7  ;;  %v163_v29 = vrot.slane %v691_v26, 6 }
  0x13   :  { %v160_v37 = vsel %vm56_vm0, %v676_v20, %v159_v35  ;;  %v115_v43 = vsub.f32 %v78_v58, %v113_v22  ;;  %v141_v44 = vsel %vm68_vm4, %v140_v23, %v139_v36  ;;  %v165_v45 = vrot.slane %v696_v27, 5 }
  0x14   :  { %v167_v30 = vrot.slane %v701_v28, 4  ;;  %v122_v46 = vadd.f32 %v120_v60, %v116_v25  ;;  %v143_v47 = vsel %vm71_vm5, %v142_v24, %v141_v44  ;;  %v162_v48 = vsel %vm59_vm1, %v161_v42, %v160_v37 }
  0x15   :  { %v169_v49 = vrot.slane %v710_v33, 3  ;;  %v145_v50 = vsel %vm74_vm6, %v144_v32, %v143_v47  ;;  %v164_v51 = vsel %vm62_vm2, %v163_v29, %v162_v48  ;;  %v171_v52 = vrot.slane %v715_v34, 2 }
  0x16   :  { %v195_v53 = vrot.slane %v629_v6, 1  ;;  %v123_v54 = vadd.f32 %v121_v62, %v117_v39  ;;  %v147_v55 = vmul.f32 %v145_v50, %v127_v12  ;;  %v148_v57 = vmul.f32 %v145_v50, %v131_v16 }
  0x17   :  { %v166_v58 = vsel %vm65_vm3, %v165_v45, %v164_v51  ;;  %v182_v60 = vmul.f32 %v154_v40, %v145_v50  ;;  %v188_v61 = vsub.s32 2, %v631_v7  ;;  %v198_v63 = vrot.slane %v641_v9, 7 }
  0x18   :  { %v168_v59 = vsel %vm68_vm4, %v167_v30, %v166_v58  ;;  %v149_v0 = vadd.f32 %v147_v55, %v114_v38  ;;  %v150_v11 = vadd.f32 %v148_v57, %v115_v43  ;;  %v196_v18 = vsel %vm56_vm0, %v195_v53, %v194_v56 }
  0x19   :  { %v170_v17 = vsel %vm71_vm5, %v169_v49, %v168_v59  ;;  %v197_v62 = vsel %vm59_vm1, %v636_v8, %v196_v18  ;;  %v200_v23 = vrot.slane %v646_v10, 6  ;;  %v202_v24 = vrot.slane %v653_v13, 5 }
  0x1a   :  { %v172_v22 = vsel %vm74_vm6, %v171_v52, %v170_v17  ;;  %v183_v39 = vmul.f32 %v158_v41, %v145_v50  ;;  %v189_v38 = vrot.slane %v604_v1, %v188_v61  ;;  %v199_v36 = vsel %vm62_vm2, %v198_v63, %v197_v62 }
  0x1b   :  { %v174_v25 = vmul.f32 %v172_v22, %v154_v40  ;;  %v175_v31 = vmul.f32 %v172_v22, %v158_v41  ;;  %v178_v32 = vmul.f32 %v172_v22, %v127_v12  ;;  %v179_v35 = vmul.f32 %v172_v22, %v131_v16 }
  0x1c   :  { %v204_v56 = vrot.slane %v658_v14, 4  ;;  %v193_v42 = vrot.slane %v609_v2, %v188_v61  ;;  %v206_v29 = vrot.slane %v663_v15, 3  ;;  %v216_v43 = vrot.slane %v614_v3, %v188_v61 }
  0x1d   :  { %v176_v37 = vsub.f32 %v149_v0, %v174_v25  ;;  %v177_v44 = vsub.f32 %v150_v11, %v175_v31  ;;  %v201_v40 = vsel %vm65_vm3, %v200_v23, %v199_v36  ;;  %v221_v12 = vrot.slane %v671_v19, 2 }
  0x1e   :  { %v222_v16 = vrot.slane %v676_v20, 1  ;;  %v180_v41 = vadd.f32 %v178_v32, %v122_v46  ;;  %v181_v45 = vadd.f32 %v179_v35, %v123_v54  ;;  %v203_v30 = vsel %vm68_vm4, %v202_v24, %v201_v40 }
  0x1f   :  { %v225_v47 = vrot.slane %v691_v26, 7  ;;  %v205_v48 = vsel %vm71_vm5, %v204_v56, %v203_v30  ;;  %v227_v50 = vrot.slane %v696_v27, 6  ;;  %v229_v51 = vrot.slane %v701_v28, 5 }
  0x20   :  { %v223_v49 = vsel %vm56_vm0, %v222_v16, %v221_v12  ;;  %v207_v52 = vsel %vm74_vm6, %v206_v29, %v205_v48  ;;  %v220_v53 = vrot.slane %v619_v4, %v188_v61  ;;  %v231_v54 = vrot.slane %v710_v33, 4 }
  0x21   :  { %v224_v46 = vsel %vm59_vm1, %v681_v21, %v223_v49  ;;  %v209_v55 = vmul.f32 %v207_v52, %v189_v38  ;;  %v210_v57 = vmul.f32 %v207_v52, %v193_v42  ;;  %v233_v59 = vrot.slane %v715_v34, 3 }
  0x22   :  { %v226_v58 = vsel %vm62_vm2, %v225_v47, %v224_v46  ;;  %v184_v63 = vadd.f32 %v182_v60, %v180_v41  ;;  %v256_v11 = vrot.slane %v624_v5, 3  ;;  %v185_v17 = vadd.f32 %v183_v39, %v181_v45 }
  0x23   :  { %v228_v0 = vsel %vm65_vm3, %v227_v50, %v226_v58  ;;  %v250_v61 = vsub.s32 3, %v631_v7  ;;  %v257_v22 = vrot.slane %v629_v6, 2  ;;  %v244_v23 = vmul.f32 %v216_v43, %v207_v52 }
  0x24   :  { %v230_v18 = vsel %vm68_vm4, %v229_v51, %v228_v0  ;;  %v245_v24 = vmul.f32 %v220_v53, %v207_v52  ;;  %v259_v25 = vrot.slane %v636_v8, 1  ;;  %v211_v31 = vadd.f32 %v209_v55, %v176_v37 }
  0x25   :  { %v232_v62 = vsel %vm71_vm5, %v231_v54, %v230_v18  ;;  %v212_v32 = vadd.f32 %v210_v57, %v177_v44  ;;  %v258_v35 = vsel %vm56_vm0, %v257_v22, %v256_v11  ;;  %v262_v29 = vrot.slane %v646_v10, 7 }
  0x26   :  { %v234_v60 = vsel %vm74_vm6, %v233_v59, %v232_v62  ;;  %v251_v40 = vrot.slane %v604_v1, %v250_v61  ;;  %v255_v12 = vrot.slane %v609_v2, %v250_v61  ;;  %v260_v16 = vsel %vm59_vm1, %v259_v25, %v258_v35 }
  0x27   :  { %v236_v36 = vmul.f32 %v234_v60, %v216_v43  ;;  %v240_v39 = vmul.f32 %v234_v60, %v189_v38  ;;  %v241_v56 = vmul.f32 %v234_v60, %v193_v42  ;;  %v264_v41 = vrot.slane %v653_v13, 6 }
  0x28   :  { %v237_v45 = vmul.f32 %v234_v60, %v220_v53  ;;  %v266_v37 = vrot.slane %v658_v14, 5  ;;  %v268_v44 = vrot.slane %v663_v15, 4  ;;  %v278_v30 = vrot.slane %v614_v3, %v250_v61 }
  0x29   :  { %v238_v43 = vsub.f32 %v211_v31, %v236_v36  ;;  %v261_v38 = vsel %vm62_vm2, %v641_v9, %v260_v16  ;;  %v283_v42 = vrot.slane %v671_v19, 3  ;;  %v284_v47 = vrot.slane %v676_v20, 2 }
  0x2a   :  { %v242_v48 = vadd.f32 %v240_v39, %v184_v63  ;;  %v243_v49 = vadd.f32 %v241_v56, %v185_v17  ;;  %v263_v50 = vsel %vm65_vm3, %v262_v29, %v261_v38  ;;  %v286_v51 = vrot.slane %v681_v21, 1 }
  0x2b   :  { %v265_v52 = vsel %vm68_vm4, %v264_v41, %v263_v50  ;;  %v285_v53 = vsel %vm56_vm0, %v284_v47, %v283_v42  ;;  %v289_v46 = vrot.slane %v696_v27, 7  ;;  %v291_v54 = vrot.slane %v701_v28, 6 }
  0x2c   :  { %v267_v55 = vsel %vm71_vm5, %v266_v37, %v265_v52  ;;  %v282_v57 = vrot.slane %v619_v4, %v250_v61  ;;  %v287_v58 = vsel %vm59_vm1, %v286_v51, %v285_v53  ;;  %v293_v59 = vrot.slane %v710_v33, 5 }
  0x2d   :  { %v239_v63 = vsub.f32 %v212_v32, %v237_v45  ;;  %v269_v0 = vsel %vm74_vm6, %v268_v44, %v267_v55  ;;  %v288_v11 = vsel %vm62_vm2, %v691_v26, %v287_v58  ;;  %v295_v17 = vrot.slane %v715_v34, 4 }
  0x2e   :  { %v246_v18 = vadd.f32 %v244_v23, %v242_v48  ;;  %v271_v22 = vmul.f32 %v269_v0, %v251_v40  ;;  %v272_v62 = vmul.f32 %v269_v0, %v255_v12  ;;  %v290_v25 = vsel %vm65_vm3, %v289_v46, %v288_v11 }
  0x2f   :  { %v247_v31 = vadd.f32 %v245_v24, %v243_v49  ;;  %v292_v61 = vsel %vm68_vm4, %v291_v54, %v290_v25  ;;  %v312_v60 = vsub.s32 4, %v631_v7  ;;  %v318_v35 = vrot.slane %v624_v5, 4 }
  0x30   :  { %v294_v32 = vsel %vm71_vm5, %v293_v59, %v292_v61  ;;  %v306_v36 = vmul.f32 %v278_v30, %v269_v0  ;;  %v307_v39 = vmul.f32 %v282_v57, %v269_v0  ;;  %v319_v56 = vrot.slane %v629_v6, 3 }
  0x31   :  { %v273_v29 = vadd.f32 %v271_v22, %v238_v43  ;;  %v274_v16 = vadd.f32 %v272_v62, %v239_v63  ;;  %v296_v23 = vsel %vm74_vm6, %v295_v17, %v294_v32  ;;  %v321_v41 = vrot.slane %v636_v8, 2 }
  0x32   :  { %v298_v45 = vmul.f32 %v296_v23, %v278_v30  ;;  %v299_v24 = vmul.f32 %v296_v23, %v282_v57  ;;  %v302_v37 = vmul.f32 %v296_v23, %v251_v40  ;;  %v323_v44 = vrot.slane %v641_v9, 1 }
  0x33   :  { %v313_v38 = vrot.slane %v604_v1, %v312_v60  ;;  %v317_v42 = vrot.slane %v609_v2, %v312_v60  ;;  %v320_v47 = vsel %vm56_vm0, %v319_v56, %v318_v35  ;;  %v326_v48 = vrot.slane %v653_v13, 7 }
  0x34   :  { %v303_v49 = vmul.f32 %v296_v23, %v255_v12  ;;  %v328_v43 = vrot.slane %v658_v14, 6  ;;  %v330_v50 = vrot.slane %v663_v15, 5  ;;  %v340_v51 = vrot.slane %v614_v3, %v312_v60 }
  0x35   :  { %v300_v30 = vsub.f32 %v273_v29, %v298_v45  ;;  %v322_v40 = vsel %vm59_vm1, %v321_v41, %v320_v47  ;;  %v345_v52 = vrot.slane %v671_v19, 4  ;;  %v346_v53 = vrot.slane %v676_v20, 3 }
  0x36   :  { %v301_v46 = vsub.f32 %v274_v16, %v299_v24  ;;  %v304_v54 = vadd.f32 %v302_v37, %v246_v18  ;;  %v324_v55 = vsel %vm62_vm2, %v323_v44, %v322_v40  ;;  %v348_v57 = vrot.slane %v681_v21, 2 }
  0x37   :  { %v325_v12 = vsel %vm65_vm3, %v646_v10, %v324_v55  ;;  %v347_v58 = vsel %vm56_vm0, %v346_v53, %v345_v52  ;;  %v350_v59 = vrot.slane %v691_v26, 1  ;;  %v353_v63 = vrot.slane %v701_v28, 7 }
  0x38   :  { %v305_v0 = vadd.f32 %v303_v49, %v247_v31  ;;  %v327_v11 = vsel %vm68_vm4, %v326_v48, %v325_v12  ;;  %v349_v17 = vsel %vm59_vm1, %v348_v57, %v347_v58  ;;  %v355_v18 = vrot.slane %v710_v33, 6 }
  0x39   :  { %v329_v22 = vsel %vm71_vm5, %v328_v43, %v327_v11  ;;  %v351_v62 = vsel %vm62_vm2, %v350_v59, %v349_v17  ;;  %v357_v25 = vrot.slane %v715_v34, 5  ;;  %v380_v61 = vrot.slane %v624_v5, 5 }
  0x3a   :  { %v331_v35 = vsel %vm74_vm6, %v330_v50, %v329_v22  ;;  %v344_v32 = vrot.slane %v619_v4, %v312_v60  ;;  %v352_v31 = vsel %vm65_vm3, %v696_v27, %v351_v62  ;;  %v381_v56 = vrot.slane %v629_v6, 4 }
  0x3b   :  { %v333_v29 = vmul.f32 %v331_v35, %v313_v38  ;;  %v334_v16 = vmul.f32 %v331_v35, %v317_v42  ;;  %v354_v23 = vsel %vm68_vm4, %v353_v63, %v352_v31  ;;  %v383_v41 = vrot.slane %v636_v8, 3 }
  0x3c   :  { %v308_v45 = vadd.f32 %v306_v36, %v304_v54  ;;  %v309_v24 = vadd.f32 %v307_v39, %v305_v0  ;;  %v356_v37 = vsel %vm71_vm5, %v355_v18, %v354_v23  ;;  %v374_v44 = vsub.s32 5, %v631_v7 }
  0x3d   :  { %v335_v47 = vadd.f32 %v333_v29, %v300_v30  ;;  %v336_v48 = vadd.f32 %v334_v16, %v301_v46  ;;  %v358_v60 = vsel %vm74_vm6, %v357_v25, %v356_v37  ;;  %v382_v49 = vsel %vm56_vm0, %v381_v56, %v380_v61 }
  0x3e   :  { %v360_v43 = vmul.f32 %v358_v60, %v340_v51  ;;  %v361_v50 = vmul.f32 %v358_v60, %v344_v32  ;;  %v364_v40 = vmul.f32 %v358_v60, %v313_v38  ;;  %v365_v52 = vmul.f32 %v358_v60, %v317_v42 }
  0x3f   :  { %v368_v53 = vmul.f32 %v340_v51, %v331_v35  ;;  %v384_v55 = vsel %vm59_vm1, %v383_v41, %v382_v49  ;;  %v385_v36 = vrot.slane %v641_v9, 2  ;;  %v387_v39 = vrot.slane %v646_v10, 1 }
  0x40   :  { %v369_v54 = vmul.f32 %v344_v32, %v331_v35  ;;  %v375_v57 = vrot.slane %v604_v1, %v374_v44  ;;  %v379_v30 = vrot.slane %v609_v2, %v374_v44  ;;  %v390_v46 = vrot.slane %v658_v14, 7 }
  0x41   :  { %v362_v12 = vsub.f32 %v335_v47, %v360_v43  ;;  %v366_v58 = vadd.f32 %v364_v40, %v308_v45  ;;  %v386_v59 = vsel %vm62_vm2, %v385_v36, %v384_v55  ;;  %v392_v38 = vrot.slane %v663_v15, 6 }
  0x42   :  { %v363_v42 = vsub.f32 %v336_v48, %v361_v50  ;;  %v367_v51 = vadd.f32 %v365_v52, %v309_v24  ;;  %v388_v63 = vsel %vm65_vm3, %v387_v39, %v386_v59  ;;  %v407_v0 = vrot.slane %v671_v19, 5 }
  0x43   :  { %v389_v11 = vsel %vm68_vm4, %v653_v13, %v388_v63  ;;  %v408_v17 = vrot.slane %v676_v20, 4  ;;  %v410_v18 = vrot.slane %v681_v21, 3  ;;  %v412_v22 = vrot.slane %v691_v26, 2 }
  0x44   :  { %v391_v62 = vsel %vm71_vm5, %v390_v46, %v389_v11  ;;  %v402_v25 = vrot.slane %v614_v3, %v374_v44  ;;  %v406_v61 = vrot.slane %v619_v4, %v374_v44  ;;  %v414_v35 = vrot.slane %v696_v27, 1 }
  0x45   :  { %v370_v32 = vadd.f32 %v368_v53, %v366_v58  ;;  %v393_v31 = vsel %vm74_vm6, %v392_v38, %v391_v62  ;;  %v409_v56 = vsel %vm56_vm0, %v408_v17, %v407_v0  ;;  %v436_v29 = vsub.s32 6, %v631_v7 }
  0x46   :  { %v395_v16 = vmul.f32 %v393_v31, %v375_v57  ;;  %v411_v23 = vsel %vm59_vm1, %v410_v18, %v409_v56  ;;  %v417_v41 = vrot.slane %v710_v33, 7  ;;  %v442_v45 = vrot.slane %v624_v5, 6 }
  0x47   :  { %v371_v24 = vadd.f32 %v369_v54, %v367_v51  ;;  %v396_v37 = vmul.f32 %v393_v31, %v379_v30  ;;  %v413_v44 = vsel %vm62_vm2, %v412_v22, %v411_v23  ;;  %v419_v47 = vrot.slane %v715_v34, 6 }
  0x48   :  { %v415_v48 = vsel %vm65_vm3, %v414_v35, %v413_v44  ;;  %v430_v60 = vmul.f32 %v402_v25, %v393_v31  ;;  %v431_v49 = vmul.f32 %v406_v61, %v393_v31  ;;  %v443_v43 = vrot.slane %v629_v6, 5 }
  0x49   :  { %v416_v50 = vsel %vm68_vm4, %v701_v28, %v415_v48  ;;  %v437_v40 = vrot.slane %v604_v1, %v436_v29  ;;  %v445_v52 = vrot.slane %v636_v8, 4  ;;  %v447_v53 = vrot.slane %v641_v9, 3 }
  0x4a   :  { %v397_v55 = vadd.f32 %v395_v16, %v362_v12  ;;  %v418_v36 = vsel %vm71_vm5, %v417_v41, %v416_v50  ;;  %v441_v39 = vrot.slane %v609_v2, %v436_v29  ;;  %v444_v54 = vsel %vm56_vm0, %v443_v43, %v442_v45 }
  0x4b   :  { %v398_v46 = vadd.f32 %v396_v37, %v363_v42  ;;  %v420_v58 = vsel %vm74_vm6, %v419_v47, %v418_v36  ;;  %v446_v59 = vsel %vm59_vm1, %v445_v52, %v444_v54  ;;  %v449_v38 = vrot.slane %v646_v10, 2 }
  0x4c   :  { %v426_v51 = vmul.f32 %v420_v58, %v375_v57  ;;  %v427_v63 = vmul.f32 %v420_v58, %v379_v30  ;;  %v451_v0 = vrot.slane %v653_v13, 1  ;;  %v454_v11 = vrot.slane %v663_v15, 7 }
  0x4d   :  { %v448_v12 = vsel %vm62_vm2, %v447_v53, %v446_v59  ;;  %v469_v17 = vrot.slane %v671_v19, 6  ;;  %v470_v18 = vrot.slane %v676_v20, 5  ;;  %v472_v42 = vrot.slane %v681_v21, 4 }
  0x4e   :  { %v422_v22 = vmul.f32 %v420_v58, %v402_v25  ;;  %v423_v62 = vmul.f32 %v420_v58, %v406_v61  ;;  %v464_v35 = vrot.slane %v614_v3, %v436_v29  ;;  %v468_v31 = vrot.slane %v619_v4, %v436_v29 }
  0x4f   :  { %v450_v57 = vsel %vm65_vm3, %v449_v38, %v448_v12  ;;  %v471_v30 = vsel %vm56_vm0, %v470_v18, %v469_v17  ;;  %v474_v56 = vrot.slane %v691_v26, 3  ;;  %v476_v16 = vrot.slane %v696_v27, 2 }
  0x50   :  { %v428_v23 = vadd.f32 %v426_v51, %v370_v32  ;;  %v429_v41 = vadd.f32 %v427_v63, %v371_v24  ;;  %v452_v45 = vsel %vm68_vm4, %v451_v0, %v450_v57  ;;  %v473_v37 = vsel %vm59_vm1, %v472_v42, %v471_v30 }
  0x51   :  { %v453_v25 = vsel %vm71_vm5, %v658_v14, %v452_v45  ;;  %v475_v61 = vsel %vm62_vm2, %v474_v56, %v473_v37  ;;  %v478_v29 = vrot.slane %v701_v28, 1  ;;  %v481_v44 = vrot.slane %v715_v34, 7 }
  0x52   :  { %v424_v47 = vsub.f32 %v397_v55, %v422_v22  ;;  %v425_v48 = vsub.f32 %v398_v46, %v423_v62  ;;  %v455_v43 = vsel %vm74_vm6, %v454_v11, %v453_v25  ;;  %v477_v32 = vsel %vm65_vm3, %v476_v16, %v475_v61 }
  0x53   :  { %v457_v24 = vmul.f32 %v455_v43, %v437_v40  ;;  %v458_v50 = vmul.f32 %v455_v43, %v441_v39  ;;  %v479_v52 = vsel %vm68_vm4, %v478_v29, %v477_v32  ;;  %v504_v53 = vrot.slane %v624_v5, 7 }
  0x54   :  { %v480_v36 = vsel %vm71_vm5, %v710_v33, %v479_v52  ;;  %v498_v54 = vsub.s32 7, %v631_v7  ;;  %v432_v58 = vadd.f32 %v430_v60, %v428_v23  ;;  %v433_v59 = vadd.f32 %v431_v49, %v429_v41 }
  0x55   :  { %v482_v55 = vsel %vm74_vm6, %v481_v44, %v480_v36  ;;  %v505_v46 = vrot.slane %v629_v6, 6  ;;  %v459_v38 = vadd.f32 %v457_v24, %v424_v47  ;;  %v460_v51 = vadd.f32 %v458_v50, %v425_v48 }
  0x56   :  { %v484_v63 = vmul.f32 %v482_v55, %v464_v35  ;;  %v485_v0 = vmul.f32 %v482_v55, %v468_v31  ;;  %v507_v12 = vrot.slane %v636_v8, 5  ;;  %v509_v5 = vrot.slane %v641_v9, 4 }
  0x57   :  { %v506_v11 = vsel %vm56_vm0, %v505_v46, %v504_v53  ;;  %v511_v17 = vrot.slane %v646_v10, 3  ;;  %v488_v18 = vmul.f32 %v482_v55, %v437_v40  ;;  %v492_v7 = vmul.f32 %v464_v35, %v455_v43 }
  0x58   :  { %v493_v60 = vmul.f32 %v468_v31, %v455_v43  ;;  %v499_v49 = vrot.slane %v604_v1, %v498_v54  ;;  %v489_v42 = vmul.f32 %v482_v55, %v441_v39  ;;  %v508_v6 = vsel %vm59_vm1, %v507_v12, %v506_v11 }
  0x59   :  { %v513_v22 = vrot.slane %v653_v13, 2  ;;  %v515_v62 = vrot.slane %v658_v14, 1  ;;  %v486_v57 = vsub.f32 %v459_v38, %v484_v63  ;;  %v487_v30 = vsub.f32 %v460_v51, %v485_v0 }
  0x5a   :  { %v503_v8 = vrot.slane %v609_v2, %v498_v54  ;;  %v510_v9 = vsel %vm62_vm2, %v509_v5, %v508_v6  ;;  %v531_v40 = vrot.slane %v671_v19, 7  ;;  %v532_v35 = vrot.slane %v676_v20, 6 }
  0x5b   :  { %v512_v10 = vsel %vm65_vm3, %v511_v17, %v510_v9  ;;  %v534_v1 = vrot.slane %v681_v21, 5  ;;  %v490_v39 = vadd.f32 %v488_v18, %v432_v58  ;;  %v536_v13 = vrot.slane %v691_v26, 4 }
  0x5c   :  { %v514_v31 = vsel %vm68_vm4, %v513_v22, %v512_v10  ;;  %v538_v14 = vrot.slane %v696_v27, 3  ;;  %v491_v56 = vadd.f32 %v489_v42, %v433_v59  ;;  %v533_v16 = vsel %vm56_vm0, %v532_v35, %v531_v40 }
  0x5d   :  { %v516_v2 = vsel %vm71_vm5, %v515_v62, %v514_v31  ;;  %v540_v23 = vrot.slane %v701_v28, 2  ;;  %v526_v20 = vrot.slane %v614_v3, %v498_v54  ;;  %v535_v21 = vsel %vm59_vm1, %v534_v1, %v533_v16 }
  0x5e   :  { %v517_v19 = vsel %vm74_vm6, %v663_v15, %v516_v2  ;;  %v542_v41 = vrot.slane %v710_v33, 1  ;;  %v530_v27 = vrot.slane %v619_v4, %v498_v54  ;;  %v537_v37 = vsel %vm62_vm2, %v536_v13, %v535_v21 }
  0x5f   :  { %v519_v45 = vmul.f32 %v517_v19, %v499_v49  ;;  %v520_v26 = vmul.f32 %v517_v19, %v503_v8  ;;  %v539_v25 = vsel %vm65_vm3, %v538_v14, %v537_v37  ;;  %v494_v61 = vadd.f32 %v492_v7, %v490_v39 }
  0x60   :  { %v541_v28 = vsel %vm68_vm4, %v540_v23, %v539_v25  ;;  %v495_v29 = vadd.f32 %v493_v60, %v491_v56  ;;  %v554_v33 = vmul.f32 %v526_v20, %v517_v19  ;;  %v555_v48 = vmul.f32 %v530_v27, %v517_v19 }
  0x61   :  { %v521_v44 = vadd.f32 %v519_v45, %v486_v57  ;;  %v522_v15 = vadd.f32 %v520_v26, %v487_v30  ;;  %v543_v3 = vsel %vm71_vm5, %v542_v41, %v541_v28  ;;  %vm558_vm7 = vcmask 97280  }
  0x62   :  { %v544_v47 = vsel %vm74_vm6, %v715_v34, %v543_v3 }
  0x63   :  { %v546_v43 = vmul.f32 %v544_v47, %v526_v20  ;;  %v547_v32 = vmul.f32 %v544_v47, %v530_v27  ;;  %v550_v4 = vmul.f32 %v544_v47, %v499_v49  ;;  %v551_v24 = vmul.f32 %v544_v47, %v503_v8 }
  0x65   :  { %v548_v50 = vsub.f32 %v521_v44, %v546_v43  ;;  %v549_v52 = vsub.f32 %v522_v15, %v547_v32  ;;  %v552_v53 = vadd.f32 %v550_v4, %v494_v61  ;;  %v553_v36 = vadd.f32 %v551_v24, %v495_v29 }
  0x67   :  { %v556_v54 = vadd.f32 %v554_v33, %v552_v53  ;;  %v557_v58 = vadd.f32 %v555_v48, %v553_v36  ;;  %559 = vst.msk [vmem:[%s999_s4] sm:$0xff] %vm558_vm7, %v548_v50  ;;  %560 = vst.msk [vmem:[%s999_s4 + $0x8] sm:$0xff] %vm558_vm7, %v549_v52 }
  0x69   :  { %561 = vst.msk [vmem:[%s1000_s5] sm:$0xff] %vm558_vm7, %v556_v54  ;;  %562 = vst.msk [vmem:[%s1000_s5 + $0x8] sm:$0xff] %vm558_vm7, %v557_v58 }

// kernel: reverse.15
= control target key start
LH: loop header
LB: loop body
LE: loop exit
PB: predicated region body
PF: predicated region fallthrough
CT: control target
= control target key end

     0   :  { %v103_v3 = vlaneseq  ;;  %v96_v18 = vld [vmem:[#allocation0 + $0x7] ss:$-1 sm:$0xff]  ;;  %v110_v19 = vld [vmem:[#allocation0 + $0x17] ss:$-1 sm:$0xff]  ;;  %s604_s0 = inlined_call_operand.vmem [shape: f32[2,8,16,7], index: 0, kind: input, shape index: {}]   ;;  %s605_s1 = inlined_call_operand.vmem [shape: f32[2,8,16,7], index: 1, kind: output, shape index: {}]  }
   0x1   :  { %v60_v0 = vld [vmem:[%s604_s0] sm:$0xff]  ;;  %v62_v1 = vld [vmem:[%s604_s0 + $0x8] sm:$0xff]  ;;  %v64_v2 = vld [vmem:[%s604_s0 + $0x10] sm:$0xff]  ;;  %v97_v20 = vrot.slane %v96_v18, 1  ;;  %v111_v21 = vrot.slane %v110_v19, 1 }
   0x2   :  { %61 = vst [vmem:[#allocation0 + $0x8] sm:$0xff] %v60_v0  ;;  %63 = vst [vmem:[#allocation0 + $0x18] sm:$0xff] %v62_v1  ;;  %v66_v4 = vld [vmem:[%s604_s0 + $0x18] sm:$0xff]  ;;  %v68_v5 = vld [vmem:[%s604_s0 + $0x20] sm:$0xff]  ;;  %v500_v10 = vshrl.u32 %v103_v3, 7 }
   0x3   :  { %65 = vst [vmem:[#allocation0 + $0x28] sm:$0xff] %v64_v2  ;;  %v70_v6 = vld [vmem:[%s604_s0 + $0x28] sm:$0xff]  ;;  %67 = vst [vmem:[#allocation0 + $0x38] sm:$0xff] %v66_v4  ;;  %v72_v7 = vld [vmem:[%s604_s0 + $0x30] sm:$0xff] }
   0x4   :  { %69 = vst [vmem:[#allocation0 + $0x48] sm:$0xff] %v68_v5  ;;  %71 = vst [vmem:[#allocation0 + $0x58] sm:$0xff] %v70_v6  ;;  %v74_v8 = vld [vmem:[%s604_s0 + $0x38] sm:$0xff]  ;;  %v76_v9 = vld [vmem:[%s604_s0 + $0x40] sm:$0xff]  ;;  %vm105_vm0 = vcmp.lt.s32.totalorder %v500_v10, 7 }
   0x5   :  { %73 = vst [vmem:[#allocation0 + $0x68] sm:$0xff] %v72_v7  ;;  %75 = vst [vmem:[#allocation0 + $0x78] sm:$0xff] %v74_v8  ;;  %v78_v11 = vld [vmem:[%s604_s0 + $0x48] sm:$0xff]  ;;  %v80_v12 = vld [vmem:[%s604_s0 + $0x50] sm:$0xff] }
   0x6   :  { %77 = vst [vmem:[#allocation0 + $0x88] sm:$0xff] %v76_v9  ;;  %v82_v13 = vld [vmem:[%s604_s0 + $0x58] sm:$0xff]  ;;  %79 = vst [vmem:[#allocation0 + $0x98] sm:$0xff] %v78_v11  ;;  %v84_v14 = vld [vmem:[%s604_s0 + $0x60] sm:$0xff] }
   0x7   :  { %81 = vst [vmem:[#allocation0 + $0xa8] sm:$0xff] %v80_v12  ;;  %83 = vst [vmem:[#allocation0 + $0xb8] sm:$0xff] %v82_v13  ;;  %v86_v15 = vld [vmem:[%s604_s0 + $0x68] sm:$0xff]  ;;  %v88_v16 = vld [vmem:[%s604_s0 + $0x70] sm:$0xff] }
   0x8   :  { %85 = vst [vmem:[#allocation0 + $0xc8] sm:$0xff] %v84_v14  ;;  %87 = vst [vmem:[#allocation0 + $0xd8] sm:$0xff] %v86_v15  ;;  %v90_v17 = vld [vmem:[%s604_s0 + $0x78] sm:$0xff]  ;;  %v124_v22 = vld [vmem:[#allocation0 + $0x27] ss:$-1 sm:$0xff] }
   0x9   :  { %89 = vst [vmem:[#allocation0 + $0xe8] sm:$0xff] %v88_v16  ;;  %91 = vst [vmem:[#allocation0 + $0xf8] sm:$0xff] %v90_v17  ;;  %v138_v23 = vld [vmem:[#allocation0 + $0x37] ss:$-1 sm:$0xff]  ;;  %v125_v24 = vrot.slane %v124_v22, 1 }
   0xa   :  { %v139_v25 = vrot.slane %v138_v23, 1  ;;  %v152_v26 = vld [vmem:[#allocation0 + $0x47] ss:$-1 sm:$0xff]  ;;  %v166_v27 = vld [vmem:[#allocation0 + $0x57] ss:$-1 sm:$0xff]  ;;  %98 = vst [vmem:[#allocation1] sm:$0xff] %v97_v20 }
   0xb   :  { %v101_v28 = vld [vmem:[#allocation0 + $0xf] ss:$-1 sm:$0xff]  ;;  %112 = vst [vmem:[#allocation1 + $0x8] sm:$0xff] %v111_v21  ;;  %v115_v29 = vld [vmem:[#allocation0 + $0x1f] ss:$-1 sm:$0xff]  ;;  %126 = vst [vmem:[#allocation1 + $0x10] sm:$0xff] %v125_v24 }
   0xc   :  { %v129_v30 = vld [vmem:[#allocation0 + $0x2f] ss:$-1 sm:$0xff]  ;;  %v102_v31 = vrot.slane %v101_v28, 1  ;;  %v116_v32 = vrot.slane %v115_v29, 1  ;;  %140 = vst [vmem:[#allocation1 + $0x18] sm:$0xff] %v139_v25  ;;  %v153_v35 = vrot.slane %v152_v26, 1 }
   0xd   :  { %v130_v33 = vrot.slane %v129_v30, 1  ;;  %v143_v34 = vld [vmem:[#allocation0 + $0x3f] ss:$-1 sm:$0xff]  ;;  %v157_v37 = vld [vmem:[#allocation0 + $0x4f] ss:$-1 sm:$0xff]  ;;  %v167_v38 = vrot.slane %v166_v27, 1 }
   0xe   :  { %v144_v36 = vrot.slane %v143_v34, 1  ;;  %v171_v39 = vld [vmem:[#allocation0 + $0x5f] ss:$-1 sm:$0xff]  ;;  %106 = vst.msk [vmem:[#allocation1] sm:$0xff] %vm105_vm0, %v102_v31  ;;  %120 = vst.msk [vmem:[#allocation1 + $0x8] sm:$0xff] %vm105_vm0, %v116_v32  ;;  %v158_v40 = vrot.slane %v157_v37, 1 }
   0xf   :  { %134 = vst.msk [vmem:[#allocation1 + $0x10] sm:$0xff] %vm105_vm0, %v130_v33  ;;  %154 = vst [vmem:[#allocation1 + $0x20] sm:$0xff] %v153_v35  ;;  %v172_v41 = vrot.slane %v171_v39, 1  ;;  %v180_v42 = vld [vmem:[#allocation0 + $0x67] ss:$-1 sm:$0xff] }
  0x10   :  { %v185_v43 = vld [vmem:[#allocation0 + $0x6f] ss:$-1 sm:$0xff]  ;;  %148 = vst.msk [vmem:[#allocation1 + $0x18] sm:$0xff] %vm105_vm0, %v144_v36  ;;  %168 = vst [vmem:[#allocation1 + $0x28] sm:$0xff] %v167_v38  ;;  %v181_v44 = vrot.slane %v180_v42, 1 }
  0x11   :  { %v186_v45 = vrot.slane %v185_v43, 1  ;;  %v194_v46 = vld [vmem:[#allocation0 + $0x77] ss:$-1 sm:$0xff]  ;;  %v199_v47 = vld [vmem:[#allocation0 + $0x7f] ss:$-1 sm:$0xff]  ;;  %162 = vst.msk [vmem:[#allocation1 + $0x20] sm:$0xff] %vm105_vm0, %v158_v40 }
  0x12   :  { %176 = vst.msk [vmem:[#allocation1 + $0x28] sm:$0xff] %vm105_vm0, %v172_v41  ;;  %v195_v48 = vrot.slane %v194_v46, 1  ;;  %v200_v49 = vrot.slane %v199_v47, 1  ;;  %v208_v50 = vld [vmem:[#allocation0 + $0x87] ss:$-1 sm:$0xff]  ;;  %182 = vst [vmem:[#allocation1 + $0x30] sm:$0xff] %v181_v44 }
  0x13   :  { %v213_v51 = vld [vmem:[#allocation0 + $0x8f] ss:$-1 sm:$0xff]  ;;  %v209_v52 = vrot.slane %v208_v50, 1  ;;  %v222_v54 = vld [vmem:[#allocation0 + $0x97] ss:$-1 sm:$0xff]  ;;  %190 = vst.msk [vmem:[#allocation1 + $0x30] sm:$0xff] %vm105_vm0, %v186_v45 }
  0x14   :  { %v214_v53 = vrot.slane %v213_v51, 1  ;;  %v227_v55 = vld [vmem:[#allocation0 + $0x9f] ss:$-1 sm:$0xff]  ;;  %196 = vst [vmem:[#allocation1 + $0x38] sm:$0xff] %v195_v48  ;;  %v223_v56 = vrot.slane %v222_v54, 1 }
  0x15   :  { %v228_v57 = vrot.slane %v227_v55, 1  ;;  %v236_v58 = vld [vmem:[#allocation0 + $0xa7] ss:$-1 sm:$0xff]  ;;  %v241_v59 = vld [vmem:[#allocation0 + $0xaf] ss:$-1 sm:$0xff]  ;;  %204 = vst.msk [vmem:[#allocation1 + $0x38] sm:$0xff] %vm105_vm0, %v200_v49 }
  0x16   :  { %210 = vst [vmem:[#allocation1 + $0x40] sm:$0xff] %v209_v52  ;;  %v237_v60 = vrot.slane %v236_v58, 1  ;;  %v242_v61 = vrot.slane %v241_v59, 1  ;;  %v250_v62 = vld [vmem:[#allocation0 + $0xb7] ss:$-1 sm:$0xff]  ;;  %224 = vst [vmem:[#allocation1 + $0x48] sm:$0xff] %v223_v56 }
  0x17   :  { %v255_v63 = vld [vmem:[#allocation0 + $0xbf] ss:$-1 sm:$0xff]  ;;  %218 = vst.msk [vmem:[#allocation1 + $0x40] sm:$0xff] %vm105_vm0, %v214_v53  ;;  %v251_v0 = vrot.slane %v250_v62, 1  ;;  %v264_v2 = vld [vmem:[#allocation0 + $0xc7] ss:$-1 sm:$0xff] }
  0x18   :  { %v256_v1 = vrot.slane %v255_v63, 1  ;;  %v269_v3 = vld [vmem:[#allocation0 + $0xcf] ss:$-1 sm:$0xff]  ;;  %232 = vst.msk [vmem:[#allocation1 + $0x48] sm:$0xff] %vm105_vm0, %v228_v57  ;;  %238 = vst [vmem:[#allocation1 + $0x50] sm:$0xff] %v237_v60  ;;  %v265_v4 = vrot.slane %v264_v2, 1 }
  0x19   :  { %v270_v5 = vrot.slane %v269_v3, 1  ;;  %v278_v6 = vld [vmem:[#allocation0 + $0xd7] ss:$-1 sm:$0xff]  ;;  %v283_v7 = vld [vmem:[#allocation0 + $0xdf] ss:$-1 sm:$0xff]  ;;  %246 = vst.msk [vmem:[#allocation1 + $0x50] sm:$0xff] %vm105_vm0, %v242_v61 }
  0x1a   :  { %252 = vst [vmem:[#allocation1 + $0x58] sm:$0xff] %v251_v0  ;;  %v279_v8 = vrot.slane %v278_v6, 1  ;;  %v284_v9 = vrot.slane %v283_v7, 1  ;;  %v292_v11 = vld [vmem:[#allocation0 + $0xe7] ss:$-1 sm:$0xff]  ;;  %266 = vst [vmem:[#allocation1 + $0x60] sm:$0xff] %v265_v4 }
  0x1b   :  { %v297_v12 = vld [vmem:[#allocation0 + $0xef] ss:$-1 sm:$0xff]  ;;  %260 = vst.msk [vmem:[#allocation1 + $0x58] sm:$0xff] %vm105_vm0, %v256_v1  ;;  %v293_v13 = vrot.slane %v292_v11, 1  ;;  %v306_v15 = vld [vmem:[#allocation0 + $0xf7] ss:$-1 sm:$0xff] }
  0x1c   :  { %v298_v14 = vrot.slane %v297_v12, 1  ;;  %v311_v16 = vld [vmem:[#allocation0 + $0xff] ss:$-1 sm:$0xff]  ;;  %274 = vst.msk [vmem:[#allocation1 + $0x60] sm:$0xff] %vm105_vm0, %v270_v5  ;;  %280 = vst [vmem:[#allocation1 + $0x68] sm:$0xff] %v279_v8  ;;  %v307_v17 = vrot.slane %v306_v15, 1 }
  0x1d   :  { %v312_v18 = vrot.slane %v311_v16, 1  ;;  %v374_v19 = vld [vmem:[#allocation1] sm:$0xff]  ;;  %v376_v20 = vld [vmem:[#allocation1 + $0x8] sm:$0xff]  ;;  %v378_v21 = vld [vmem:[#allocation1 + $0x10] sm:$0xff]  ;;  %288 = vst.msk [vmem:[#allocation1 + $0x68] sm:$0xff] %vm105_vm0, %v284_v9 }
  0x1e   :  { %294 = vst [vmem:[#allocation1 + $0x70] sm:$0xff] %v293_v13  ;;  %375 = vst [vmem:[%s605_s1] sm:$0xff] %v374_v19  ;;  %v380_v22 = vld [vmem:[#allocation1 + $0x18] sm:$0xff]  ;;  %v382_v23 = vld [vmem:[#allocation1 + $0x20] sm:$0xff] }
  0x1f   :  { %377 = vst [vmem:[%s605_s1 + $0x8] sm:$0xff] %v376_v20  ;;  %379 = vst [vmem:[%s605_s1 + $0x10] sm:$0xff] %v378_v21  ;;  %v384_v24 = vld [vmem:[#allocation1 + $0x28] sm:$0xff]  ;;  %v386_v25 = vld [vmem:[#allocation1 + $0x30] sm:$0xff] }
  0x20   :  { %302 = vst.msk [vmem:[#allocation1 + $0x70] sm:$0xff] %vm105_vm0, %v298_v14  ;;  %308 = vst [vmem:[#allocation1 + $0x78] sm:$0xff] %v307_v17  ;;  %v388_v26 = vld [vmem:[#allocation1 + $0x38] sm:$0xff]  ;;  %v390_v10 = vld [vmem:[#allocation1 + $0x40] sm:$0xff] }
  0x21   :  { %381 = vst [vmem:[%s605_s1 + $0x18] sm:$0xff] %v380_v22  ;;  %383 = vst [vmem:[%s605_s1 + $0x20] sm:$0xff] %v382_v23  ;;  %v392_v27 = vld [vmem:[#allocation1 + $0x48] sm:$0xff]  ;;  %v394_v28 = vld [vmem:[#allocation1 + $0x50] sm:$0xff] }
  0x22   :  { %385 = vst [vmem:[%s605_s1 + $0x28] sm:$0xff] %v384_v24  ;;  %316 = vst.msk [vmem:[#allocation1 + $0x78] sm:$0xff] %vm105_vm0, %v312_v18  ;;  %v396_v29 = vld [vmem:[#allocation1 + $0x58] sm:$0xff] }
  0x23   :  { %387 = vst [vmem:[%s605_s1 + $0x30] sm:$0xff] %v386_v25  ;;  %389 = vst [vmem:[%s605_s1 + $0x38] sm:$0xff] %v388_v26  ;;  %v398_v30 = vld [vmem:[#allocation1 + $0x60] sm:$0xff] }
  0x24   :  { %391 = vst [vmem:[%s605_s1 + $0x40] sm:$0xff] %v390_v10  ;;  %393 = vst [vmem:[%s605_s1 + $0x48] sm:$0xff] %v392_v27  ;;  %v400_v31 = vld [vmem:[#allocation1 + $0x68] sm:$0xff] }
  0x25   :  { %395 = vst [vmem:[%s605_s1 + $0x50] sm:$0xff] %v394_v28  ;;  %397 = vst [vmem:[%s605_s1 + $0x58] sm:$0xff] %v396_v29 }
  0x26   :  { %399 = vst [vmem:[%s605_s1 + $0x60] sm:$0xff] %v398_v30  ;;  %401 = vst [vmem:[%s605_s1 + $0x68] sm:$0xff] %v400_v31 }
  0x27   :  { %v402_v32 = vld [vmem:[#allocation1 + $0x70] sm:$0xff] }
  0x28   :  { %403 = vst [vmem:[%s605_s1 + $0x70] sm:$0xff] %v402_v32 }
  0x29   :  { %v404_v33 = vld [vmem:[#allocation1 + $0x78] sm:$0xff] }
  0x2a   :  { %405 = vst [vmem:[%s605_s1 + $0x78] sm:$0xff] %v404_v33 }

// kernel: uno_forward.23
= control target key start
LH: loop header
LB: loop body
LE: loop exit
PB: predicated region body
PF: predicated region fallthrough
CT: control target
= control target key end

     0   :  { %s425_s9 = smov 0   ;;  %s427_s10 = smov 0   ;;  %s461_s0 = inlined_call_operand.vmem [shape: bf16[2,8,256], index: 0, kind: input, shape index: {}]   ;;  %s462_s1 = inlined_call_operand.vmem [shape: bf16[8,8], index: 1, kind: input, shape index: {}]   ;;  %s463_s2 = inlined_call_operand.vmem [shape: bf16[2,8,256], index: 2, kind: output, shape index: {}]  }
   0x1   :  { %s429_s11 = smov 0  }
   0x2 LB: > { %s24_s12 = sadd.s32 1, %s403_s10  ;;  %p343_p0 = scmp.ge.s32.totalorder %s407_s11, 1  ;;  %s407_s11 = sphi %s429_s11, %s12_s11   ;;  %s403_s10 = sphi %s427_s10, %s465_s10   ;;  %s399_s9 = sphi %s425_s9, %s464_s9  }
   0x3   : > { %p26_p1 = scmp.ge.s32.totalorder %s24_s12, 2  ;;  %p133_p2 = scmp.lt.s32.totalorder %s407_s11, 3 }
   0x5   : > { %s467_s12 = smov (%p26_p1, %s24_s12), 0  ;;  %p134_p3 = pnand %p343_p0, %p133_p2 }
   0x6   : > { %p164_p4 = scmp.lt.s32.totalorder (!%p134_p3), %s399_s9, 1  ;;  %v409_v0 = vmov (!%p134_p3), 0   ;;  %vm195_vm0 = vcmask (!%p134_p3), 1043456   ;;  %v184_v5 = vld [vmem:[%s462_s1] sm:$0xf] (!%p134_p3)  ;;  %vm191_vm1 = vcmask (!%p134_p3), 64512  }
   0x7   : > { %137 = sbr.rel (%p134_p3) target bundleno = 240 (0xf0), region = 28  ;;  %234 = vmatprep.mubr.bf16.mxu0 (!%p134_p3), %v409_v0 }
   0xe   : > { %s469_s9 = smov (!%p164_p4, %s399_s9), 1 }
   0xf   : > { %s355_s13 = sshll.u32 %s469_s9, 3 }
  0x10   : > { %s171_s16 = scalar_lea.vmem %s461_s0, %s355_s13  ;;  %s181_s21 = scalar_lea.vmem %s463_s2, %s355_s13 }
  0x11   : > { %v185_v1 = vld [vmem:[%s171_s16] sm:$0xff] }
  0x12   : > { %v349_v2 = vcombine.high %v185_v1, %v185_v1  ;;  %v348_v3 = vcombine.low %v185_v1, %v185_v1 }
  0x14   : > { %350 = vmatprep.subr.msk.bf16.mxu0 %vm195_vm0, %v349_v2  ;;  %v197_v4 = vsel %vm195_vm0, %v348_v3, 0 }
  0x15   : > { %203 = vmatpush1.bf16.msra.mxu0 %v197_v4 }
  0x18   : > { %351 = vmatmul.mubr.msk.bf16.vlgmr.msra.gmra.mrb[0].mxu0 %vm191_vm1, %v184_v5 }
  0xeb   : > { %v236_v6 = vpop.f32.mrb[0].mxu0 }
  0xec   : > { %v238_v7 = vpop.f32.mrb[1].mxu0 }
  0xed   : > { %v357_v8 = vpack.c.bf16 %v238_v7, %v236_v6  ;;  %v240_v9 = vpop.f32.mrb[2].mxu0 }
  0xee   : > { %v241_v10 = vpop.f32.mrb[3].mxu0 }
  0xef   : > { %251 = vst [vmem:[%s181_s21] sm:$0xff] %v357_v8 }
  0xf0 PF: > { %s12_s11 = sadd.s32 1, %s407_s11   ;;  %s464_s9 = smov %s403_s10 }
  0xf1   : > { %p9_p5 = scmp.ge.s32.totalorder %s12_s11, 4   ;;  %s465_s10 = smov %s467_s12 }
  0xf3   :  { %11 = sbr.rel (!%p9_p5) target bundleno = 2 (0x2), region = 58 }

// kernel: uno_forward.16
= control target key start
LH: loop header
LB: loop body
LE: loop exit
PB: predicated region body
PF: predicated region fallthrough
CT: control target
= control target key end

     0   :  { %s1021_s30 = smov 0   ;;  %s1023_s10 = smov 0   ;;  %s1104_s0 = inlined_call_operand.vmem [shape: bf16[2,8,256], index: 0, kind: input, shape index: {}]   ;;  %s1105_s1 = inlined_call_operand.vmem [shape: f32[2,8,256], index: 1, kind: input, shape index: {}]   ;;  %s1106_s2 = inlined_call_operand.vmem [shape: bf16[8,8], index: 2, kind: input, shape index: {}]   ;;  %s1107_s3 = inlined_call_operand.vmem [shape: bf16[8,8], index: 3, kind: input, shape index: {}]   ;;  %s1108_s4 = inlined_call_operand.vmem [shape: f32[8,1], index: 4, kind: input, shape index: {}]   ;;  %s1109_s5 = inlined_call_operand.vmem [shape: bf16[4,8], index: 5, kind: input, shape index: {}]   ;;  %s1110_s6 = inlined_call_operand.vmem [shape: f32[4,1], index: 6, kind: input, shape index: {}]   ;;  %s1111_s7 = inlined_call_operand.vmem [shape: bf16[8,4], index: 7, kind: input, shape index: {}]   ;;  %s1112_s8 = inlined_call_operand.vmem [shape: f32[8,1], index: 8, kind: input, shape index: {}]   ;;  %s1113_s9 = inlined_call_operand.vmem [shape: bf16[2,8,256], index: 9, kind: output, shape index: {}]  }
   0x1   :  { %s1025_s11 = smov 0  }
   0x2 LB: > { %s31_s12 = sadd.s32 1, %s963_s10  ;;  %p869_p0 = scmp.ge.s32.totalorder %s967_s11, 1  ;;  %s967_s11 = sphi %s1025_s11, %s19_s11   ;;  %s963_s10 = sphi %s1023_s10, %s1115_s10   ;;  %s959_s30 = sphi %s1021_s30, %s1114_s30  }
   0x3   : > { %p33_p1 = scmp.ge.s32.totalorder %s31_s12, 2  ;;  %p325_p2 = scmp.lt.s32.totalorder %s967_s11, 3 }
   0x5   : > { %s1117_s12 = smov (%p33_p1, %s31_s12), 0  ;;  %p326_p3 = pnand %p869_p0, %p325_p2 }
   0x6   : > { %p379_p4 = scmp.lt.s32.totalorder (!%p326_p3), %s959_s30, 1  ;;  %v969_v0 = vmov (!%p326_p3), 0   ;;  %v515_v1 = vld [vmem:[%s1108_s4] sm:$0xff] (!%p326_p3)  ;;  %vm420_vm0 = vcmask (!%p326_p3), 1043456   ;;  %vm416_vm1 = vcmask (!%p326_p3), 64512   ;;  %v970_v58 = vmov (!%p326_p3), -1.0  }
   0x7   : > { %329 = sbr.rel (%p326_p3) target bundleno = 778 (0x30a), region = 56  ;;  %459 = vmatprep.mubr.bf16.mxu0 (!%p326_p3), %v969_v0  ;;  %925 = vset.pattern.permute.xlu0 (!%p326_p3), %v969_v0  ;;  %v580_v2 = vld [vmem:[%s1110_s6] sm:$0xf] (!%p326_p3)  ;;  %vm701_vm6 = vcmask (!%p326_p3), 1041408   ;;  %vm697_vm7 = vcmask (!%p326_p3), 31744  }
   0x8   : > { %518 = vperm.xlu0 (!%p326_p3), %925, %v515_v1   ;;  %504 = vmatprep.mubr.bf16.mxu1 (!%p326_p3), %v969_v0  ;;  %v410_v7 = vld [vmem:[%s1106_s2] sm:$0xf] (!%p326_p3) }
   0x9   : > { %926 = vset.pattern.permute.xlu1 (!%p326_p3), %v969_v0 }
   0xc   : > { %583 = vperm.xlu0 (!%p326_p3), %925, %v580_v2  }
   0xe   : > { %s1119_s30 = smov (!%p379_p4, %s959_s30), 1 }
   0xf   : > { %s889_s17 = sshll.u32 %s1119_s30, 3  ;;  %s890_s23 = sshll.u32 %s1119_s30, 4 }
  0x10   : > { %s386_s20 = scalar_lea.vmem %s1104_s0, %s889_s17  ;;  %s396_s26 = scalar_lea.vmem %s1105_s1, %s890_s23 }
  0x11   : > { %v409_v3 = vld [vmem:[%s386_s20] sm:$0xff]  ;;  %v514_v9 = vld [vmem:[%s396_s26 + $0x8] sm:$0xff]  ;;  %s406_s21 = scalar_lea.vmem %s1113_s9, %s889_s17 }
  0x12   : > { %v877_v4 = vcombine.high %v409_v3, %v409_v3  ;;  %v876_v5 = vcombine.low %v409_v3, %v409_v3  ;;  %v513_v8 = vld [vmem:[%s396_s26] sm:$0xff] }
  0x14   : > { %878 = vmatprep.subr.msk.bf16.mxu0 %vm420_vm0, %v877_v4  ;;  %v422_v6 = vsel %vm420_vm0, %v876_v5, 0  ;;  %880 = vmatprep.subr.msk.bf16.mxu1 %vm420_vm0, %v877_v4 }
  0x15   : > { %428 = vmatpush1.bf16.msra.mxu0 %v422_v6  ;;  %473 = vmatpush1.bf16.msra.mxu1 %v422_v6 }
  0x18   : > { %879 = vmatmul.mubr.msk.bf16.vlgmr.msra.gmra.mrb[0].mxu0 %vm416_vm1, %v410_v7 }
  0x19   : > { %627 = vmatprep.mubr.bf16.mxu0 %v969_v0 }
  0x87   : > { %v519_v10 = vpop.permute.xlu0 %518 }
  0x88   : > { %v521_v11 = vadd.f32 %v519_v10, %v513_v8  ;;  %v522_v12 = vadd.f32 %v519_v10, %v514_v9  ;;  %v577_v10 = vld [vmem:[%s1109_s5] sm:$0x3] }
  0xeb   : > { %v461_v13 = vpop.f32.mrb[0].mxu0 }
  0xec   : > { %v523_v14 = vadd.f32 %v521_v11, %v461_v13  ;;  %v463_v15 = vpop.f32.mrb[1].mxu0  ;;  %v468_v11 = vld [vmem:[%s1107_s3] sm:$0xf]  ;;  %v584_v13 = vpop.permute.xlu0 %583 }
  0xed   : > { %v524_v16 = vadd.f32 %v522_v12, %v463_v15  ;;  %v465_v17 = vpop.f32.mrb[2].mxu0  ;;  %881 = vmatmul.mubr.msk.bf16.vlgmr.msra.gmra.mrb[0].mxu1 %vm416_vm1, %v468_v11  ;;  %v691_v12 = vld [vmem:[%s1112_s8] sm:$0xff] }
  0xee   : > { %v527_v18 = vmul.f32 0.70710677, %v523_v14  ;;  %v466_v19 = vpop.f32.mrb[3].mxu0  ;;  %v525_v1 = vmul.f32 0.5, %v523_v14  ;;  %740 = vmatprep.mubr.bf16.mxu1 %v969_v0  ;;  %694 = vperm.xlu1 %926, %v691_v12  }
  0xef   : > { %v528_v20 = vmul.f32 0.70710677, %v524_v16  ;;  %v526_v3 = vmul.f32 0.5, %v524_v16 }
  0xf0   : > { %v533_v21 = vand.u32 2147483647, %v527_v18  ;;  %vm529_vm2 = vcmp.ge.f32.partialorder %v527_v18, 0.0 }
  0xf1   : > { %v534_v22 = vand.u32 2147483647, %v528_v20  ;;  %vm530_vm3 = vcmp.ge.f32.partialorder %v528_v20, 0.0  ;;  %v531_v59 = vsel %vm529_vm2, 1.0, %v970_v58 }
  0xf2   : > { %v535_v23 = vmul.f32 0.3275911, %v533_v21  ;;  %v559_v27 = vsub.f32 0.0, %v533_v21  ;;  %v532_v62 = vsel %vm530_vm3, 1.0, %v970_v58 }
  0xf3   : > { %v536_v24 = vmul.f32 0.3275911, %v534_v22  ;;  %v560_v28 = vsub.f32 0.0, %v534_v22 }
  0xf4   : > { %v537_v25 = vadd.f32 1.0, %v535_v23  ;;  %v561_v30 = vmul.f32 %v559_v27, %v533_v21 }
  0xf5   : > { %v538_v26 = vadd.f32 1.0, %v536_v24  ;;  %v562_v33 = vmul.f32 %v560_v28, %v534_v22 }
  0xf6   : > { %929 = vrcp.f32 %v537_v25  ;;  %v563_v36 = vmul.f32 1.442695, %v561_v30 }
  0xf7   : > { %931 = vrcp.f32 %v538_v26  ;;  %v565_v39 = vmul.f32 1.442695, %v562_v33 }
  0xf8   : > { %933 = vpow2.f32 %v563_v36 }
  0xf9   : > { %935 = vpow2.f32 %v565_v39 }
 0x100   : > { %v930_v29 = vpop.eup %929 }
 0x101   : > { %v932_v31 = vpop.eup %931  ;;  %v541_v32 = vmul.f32 1.0614054, %v930_v29 }
 0x102   : > { %v542_v34 = vmul.f32 1.0614054, %v932_v31  ;;  %v934_v52 = vpop.eup %933 }
 0x103   : > { %v543_v35 = vadd.f32 -1.4531521, %v541_v32  ;;  %v936_v54 = vpop.eup %935 }
 0x104   : > { %v544_v37 = vadd.f32 -1.4531521, %v542_v34 }
 0x105   : > { %v545_v38 = vmul.f32 %v930_v29, %v543_v35 }
 0x106   : > { %v546_v40 = vmul.f32 %v932_v31, %v544_v37 }
 0x107   : > { %v547_v41 = vadd.f32 1.4214138, %v545_v38 }
 0x108   : > { %v548_v42 = vadd.f32 1.4214138, %v546_v40 }
 0x109   : > { %v549_v43 = vmul.f32 %v930_v29, %v547_v41 }
 0x10a   : > { %v550_v44 = vmul.f32 %v932_v31, %v548_v42 }
 0x10b   : > { %v551_v45 = vadd.f32 -0.28449672, %v549_v43 }
 0x10c   : > { %v552_v46 = vadd.f32 -0.28449672, %v550_v44 }
 0x10d   : > { %v553_v47 = vmul.f32 %v930_v29, %v551_v45 }
 0x10e   : > { %v554_v48 = vmul.f32 %v932_v31, %v552_v46 }
 0x10f   : > { %v555_v49 = vadd.f32 0.2548296, %v553_v47 }
 0x110   : > { %v556_v50 = vadd.f32 0.2548296, %v554_v48 }
 0x111   : > { %v557_v51 = vmul.f32 %v930_v29, %v555_v49 }
 0x112   : > { %v558_v53 = vmul.f32 %v932_v31, %v556_v50 }
 0x113   : > { %v567_v55 = vmul.f32 %v934_v52, %v557_v51 }
 0x114   : > { %v568_v56 = vmul.f32 %v936_v54, %v558_v53 }
 0x115   : > { %v569_v57 = vsub.f32 1.0, %v567_v55 }
 0x116   : > { %v570_v60 = vsub.f32 1.0, %v568_v56 }
 0x117   : > { %v571_v61 = vmul.f32 %v569_v57, %v531_v59 }
 0x118   : > { %v572_v63 = vmul.f32 %v570_v60, %v532_v62 }
 0x119   : > { %v573_v2 = vadd.f32 1.0, %v571_v61 }
 0x11a   : > { %v574_v4 = vadd.f32 1.0, %v572_v63 }
 0x11b   : > { %v575_v5 = vmul.f32 %v573_v2, %v525_v1 }
 0x11c   : > { %v576_v6 = vmul.f32 %v574_v4, %v526_v3 }
 0x11d   : > { %v578_v7 = vpack.c.bf16 %v575_v5, %v575_v5 }
 0x11e   : > { %v579_v8 = vpack.c.bf16 %v576_v6, %v576_v6 }
 0x11f   : > { %v590_v9 = vsel %vm420_vm0, %v578_v7, 0 }
 0x120   : > { %882 = vmatprep.subr.msk.bf16.mxu0 %vm420_vm0, %v579_v8 }
 0x121   : > { %596 = vmatpush1.bf16.msra.mxu0 %v590_v9 }
 0x124   : > { %883 = vmatmul.mubr.msk.bf16.vlgmr.msra.gmra.mrb[4].mxu0 %vm416_vm1, %v577_v10  ;;  %v688_v10 = vld [vmem:[%s1111_s7] sm:$0xf] }
 0x1f7   : > { %v629_v14 = vpop.f32.mrb[4].mxu0 }
 0x1f8   : > { %v630_v15 = vadd.f32 %v629_v14, %v584_v13  ;;  %v631_v16 = vpop.f32.mrb[5].mxu0 }
 0x1f9   : > { %v632_v17 = vadd.f32 %v631_v16, %v584_v13  ;;  %v633_v18 = vpop.f32.mrb[6].mxu0 }
 0x1fa   : > { %v638_v19 = vmul.f32 0.70710677, %v630_v15  ;;  %v634_v20 = vpop.f32.mrb[7].mxu0  ;;  %v636_v1 = vmul.f32 0.5, %v630_v15 }
 0x1fb   : > { %v639_v21 = vmul.f32 0.70710677, %v632_v17  ;;  %v637_v3 = vmul.f32 0.5, %v632_v17 }
 0x1fc   : > { %v644_v22 = vand.u32 2147483647, %v638_v19  ;;  %vm640_vm4 = vcmp.ge.f32.partialorder %v638_v19, 0.0 }
 0x1fd   : > { %v645_v23 = vand.u32 2147483647, %v639_v21  ;;  %vm641_vm5 = vcmp.ge.f32.partialorder %v639_v21, 0.0  ;;  %v642_v59 = vsel %vm640_vm4, 1.0, %v970_v58 }
 0x1fe   : > { %v646_v24 = vmul.f32 0.3275911, %v644_v22  ;;  %v670_v27 = vsub.f32 0.0, %v644_v22  ;;  %v643_v62 = vsel %vm641_vm5, 1.0, %v970_v58  ;;  %v695_v58 = vpop.permute.xlu1 %694 }
 0x1ff   : > { %v647_v25 = vmul.f32 0.3275911, %v645_v23  ;;  %v671_v28 = vsub.f32 0.0, %v645_v23 }
 0x200   : > { %v648_v26 = vadd.f32 1.0, %v646_v24  ;;  %v672_v30 = vmul.f32 %v670_v27, %v644_v22 }
 0x201   : > { %v649_v0 = vadd.f32 1.0, %v647_v25  ;;  %v673_v33 = vmul.f32 %v671_v28, %v645_v23 }
 0x202   : > { %937 = vrcp.f32 %v648_v26  ;;  %v674_v36 = vmul.f32 1.442695, %v672_v30 }
 0x203   : > { %939 = vrcp.f32 %v649_v0  ;;  %v676_v39 = vmul.f32 1.442695, %v673_v33 }
 0x204   : > { %941 = vpow2.f32 %v674_v36 }
 0x205   : > { %943 = vpow2.f32 %v676_v39 }
 0x20c   : > { %v938_v29 = vpop.eup %937 }
 0x20d   : > { %v940_v31 = vpop.eup %939  ;;  %v652_v32 = vmul.f32 1.0614054, %v938_v29 }
 0x20e   : > { %v653_v34 = vmul.f32 1.0614054, %v940_v31  ;;  %v942_v52 = vpop.eup %941 }
 0x20f   : > { %v654_v35 = vadd.f32 -1.4531521, %v652_v32  ;;  %v944_v54 = vpop.eup %943 }
 0x210   : > { %v655_v37 = vadd.f32 -1.4531521, %v653_v34 }
 0x211   : > { %v656_v38 = vmul.f32 %v938_v29, %v654_v35 }
 0x212   : > { %v657_v40 = vmul.f32 %v940_v31, %v655_v37 }
 0x213   : > { %v658_v41 = vadd.f32 1.4214138, %v656_v38 }
 0x214   : > { %v659_v42 = vadd.f32 1.4214138, %v657_v40 }
 0x215   : > { %v660_v43 = vmul.f32 %v938_v29, %v658_v41 }
 0x216   : > { %v661_v44 = vmul.f32 %v940_v31, %v659_v42 }
 0x217   : > { %v662_v45 = vadd.f32 -0.28449672, %v660_v43 }
 0x218   : > { %v663_v46 = vadd.f32 -0.28449672, %v661_v44 }
 0x219   : > { %v664_v47 = vmul.f32 %v938_v29, %v662_v45 }
 0x21a   : > { %v665_v48 = vmul.f32 %v940_v31, %v663_v46 }
 0x21b   : > { %v666_v49 = vadd.f32 0.2548296, %v664_v47 }
 0x21c   : > { %v667_v50 = vadd.f32 0.2548296, %v665_v48 }
 0x21d   : > { %v668_v51 = vmul.f32 %v938_v29, %v666_v49 }
 0x21e   : > { %v669_v53 = vmul.f32 %v940_v31, %v667_v50 }
 0x21f   : > { %v678_v55 = vmul.f32 %v942_v52, %v668_v51 }
 0x220   : > { %v679_v56 = vmul.f32 %v944_v54, %v669_v53 }
 0x221   : > { %v680_v57 = vsub.f32 1.0, %v678_v55 }
 0x222   : > { %v681_v60 = vsub.f32 1.0, %v679_v56 }
 0x223   : > { %v682_v61 = vmul.f32 %v680_v57, %v642_v59 }
 0x224   : > { %v683_v63 = vmul.f32 %v681_v60, %v643_v62 }
 0x225   : > { %v684_v2 = vadd.f32 1.0, %v682_v61 }
 0x226   : > { %v685_v4 = vadd.f32 1.0, %v683_v63 }
 0x227   : > { %v686_v5 = vmul.f32 %v684_v2, %v636_v1 }
 0x228   : > { %v687_v6 = vmul.f32 %v685_v4, %v637_v3 }
 0x229   : > { %v689_v7 = vpack.c.bf16 %v686_v5, %v686_v5 }
 0x22a   : > { %v690_v8 = vpack.c.bf16 %v687_v6, %v687_v6 }
 0x22b   : > { %v703_v9 = vsel %vm701_vm6, %v689_v7, 0 }
 0x22c   : > { %884 = vmatprep.subr.msk.bf16.mxu1 %vm701_vm6, %v690_v8 }
 0x22d   : > { %709 = vmatpush1.bf16.msra.mxu1 %v703_v9 }
 0x230   : > { %885 = vmatmul.mubr.msk.bf16.vlgmr.msra.gmra.mrb[0].mxu1 %vm697_vm7, %v688_v10 }
 0x303   : > { %v742_v11 = vpop.f32.mrb[0].mxu1 }
 0x304   : > { %v743_v12 = vadd.f32 %v742_v11, %v695_v58  ;;  %v744_v13 = vpop.f32.mrb[1].mxu1 }
 0x305   : > { %v745_v14 = vadd.f32 %v744_v13, %v695_v58  ;;  %v746_v15 = vpop.f32.mrb[2].mxu1 }
 0x306   : > { %v747_v16 = vpop.f32.mrb[3].mxu1 }
 0x307   : > { %v892_v17 = vpack.c.bf16 %v745_v14, %v743_v12 }
 0x309   : > { %759 = vst [vmem:[%s406_s21] sm:$0xff] %v892_v17 }
 0x30a PF: > { %s19_s11 = sadd.s32 1, %s967_s11   ;;  %s1114_s30 = smov %s963_s10 }
 0x30b   : > { %p16_p5 = scmp.ge.s32.totalorder %s19_s11, 4   ;;  %s1115_s10 = smov %s1117_s12 }
 0x30d   :  { %18 = sbr.rel (!%p16_p5) target bundleno = 2 (0x2), region = 89 }

// kernel: reverse.20
= control target key start
LH: loop header
LB: loop body
LE: loop exit
PB: predicated region body
PF: predicated region fallthrough
CT: control target
= control target key end

     0   :  { %s80_s0 = inlined_call_operand.vmem [shape: f32[2,8,8,3], index: 0, kind: input, shape index: {}]   ;;  %s81_s1 = inlined_call_operand.vmem [shape: f32[2,8,8,3], index: 1, kind: output, shape index: {}]  }
   0x1   :  { %v24_v0 = vld [vmem:[%s80_s0 + $0x10] sm:$0xff]  ;;  %v25_v1 = vld [vmem:[%s80_s0 + $0x28] sm:$0xff]  ;;  %v29_v3 = vld [vmem:[%s80_s0 + $0x20] sm:$0xff] }
   0x2   :  { %v27_v2 = vld [vmem:[%s80_s0 + $0x8] sm:$0xff]  ;;  %4 = vst [vmem:[%s81_s1] sm:$0xff] %v24_v0  ;;  %26 = vst [vmem:[%s81_s1 + $0x18] sm:$0xff] %v25_v1  ;;  %v17_v4 = vld [vmem:[%s80_s0] sm:$0xff] }
   0x3   :  { %28 = vst [vmem:[%s81_s1 + $0x8] sm:$0xff] %v27_v2  ;;  %v32_v5 = vld [vmem:[%s80_s0 + $0x18] sm:$0xff]  ;;  %30 = vst [vmem:[%s81_s1 + $0x20] sm:$0xff] %v29_v3 }
   0x4   :  { %31 = vst [vmem:[%s81_s1 + $0x10] sm:$0xff] %v17_v4  ;;  %33 = vst [vmem:[%s81_s1 + $0x28] sm:$0xff] %v32_v5 }

// kernel: uno_forward.18
= control target key start
LH: loop header
LB: loop body
LE: loop exit
PB: predicated region body
PF: predicated region fallthrough
CT: control target
= control target key end

     0   :  { %s428_s9 = smov 0   ;;  %s430_s10 = smov 0   ;;  %s464_s0 = inlined_call_operand.vmem [shape: bf16[2,8,256], index: 0, kind: input, shape index: {}]   ;;  %s465_s1 = inlined_call_operand.vmem [shape: bf16[16,8], index: 1, kind: input, shape index: {}]   ;;  %s466_s2 = inlined_call_operand.vmem [shape: bf16[2,16,256], index: 2, kind: output, shape index: {}]  }
   0x1   :  { %s432_s11 = smov 0  }
   0x2 LB: > { %s24_s12 = sadd.s32 1, %s406_s10  ;;  %p346_p0 = scmp.ge.s32.totalorder %s410_s11, 1  ;;  %s410_s11 = sphi %s432_s11, %s12_s11   ;;  %s406_s10 = sphi %s430_s10, %s468_s10   ;;  %s402_s9 = sphi %s428_s9, %s467_s9  }
   0x3   : > { %p26_p1 = scmp.ge.s32.totalorder %s24_s12, 2  ;;  %p133_p2 = scmp.lt.s32.totalorder %s410_s11, 3 }
   0x5   : > { %s470_s12 = smov (%p26_p1, %s24_s12), 0  ;;  %p134_p3 = pnand %p346_p0, %p133_p2 }
   0x6   : > { %p164_p4 = scmp.lt.s32.totalorder (!%p134_p3), %s402_s9, 1  ;;  %v412_v0 = vmov (!%p134_p3), 0   ;;  %vm201_vm0 = vcmask (!%p134_p3), 1043456   ;;  %v387_v5 = vld [vmem:[%s465_s1] sm:$0xff] (!%p134_p3)   ;;  %vm197_vm1 = vcmask (!%p134_p3), 64512  }
   0x7   : > { %137 = sbr.rel (%p134_p3) target bundleno = 242 (0xf2), region = 28  ;;  %240 = vmatprep.mubr.bf16.mxu0 (!%p134_p3), %v412_v0 }
   0xe   : > { %s472_s9 = smov (!%p164_p4, %s402_s9), 1 }
   0xf   : > { %s358_s13 = sshll.u32 %s472_s9, 3  ;;  %s359_s19 = sshll.u32 %s472_s9, 4 }
  0x10   : > { %s171_s16 = scalar_lea.vmem %s464_s0, %s358_s13  ;;  %s181_s22 = scalar_lea.vmem %s466_s2, %s359_s19 }
  0x11   : > { %v186_v1 = vld [vmem:[%s171_s16] sm:$0xff] }
  0x12   : > { %v353_v2 = vcombine.high %v186_v1, %v186_v1  ;;  %v352_v3 = vcombine.low %v186_v1, %v186_v1 }
  0x14   : > { %354 = vmatprep.subr.msk.bf16.mxu0 %vm201_vm0, %v353_v2  ;;  %v203_v4 = vsel %vm201_vm0, %v352_v3, 0 }
  0x15   : > { %209 = vmatpush1.bf16.msra.mxu0 %v203_v4 }
  0x18   : > { %355 = vmatmul.mubr.msk.bf16.vlgmr.msra.gmra.mrb[0].mxu0 %vm197_vm1, %v387_v5 }
  0xeb   : > { %v242_v6 = vpop.f32.mrb[0].mxu0 }
  0xec   : > { %v244_v7 = vpop.f32.mrb[1].mxu0 }
  0xed   : > { %v246_v8 = vpop.f32.mrb[2].mxu0 }
  0xee   : > { %v251_v9 = vpack.c.bf16 %v246_v8, %v242_v6  ;;  %v248_v10 = vpop.f32.mrb[3].mxu0 }
  0xef   : > { %v252_v11 = vpack.c.bf16 %v248_v10, %v244_v7 }
  0xf0   : > { %253 = vst [vmem:[%s181_s22] sm:$0xff] %v251_v9 }
  0xf1   : > { %254 = vst [vmem:[%s181_s22 + $0x8] sm:$0xff] %v252_v11 }
  0xf2 PF: > { %s12_s11 = sadd.s32 1, %s410_s11   ;;  %s467_s9 = smov %s406_s10 }
  0xf3   : > { %p9_p5 = scmp.ge.s32.totalorder %s12_s11, 4   ;;  %s468_s10 = smov %s470_s12 }
  0xf5   :  { %11 = sbr.rel (!%p9_p5) target bundleno = 2 (0x2), region = 58 }

// kernel: reverse.4
= control target key start
LH: loop header
LB: loop body
LE: loop exit
PB: predicated region body
PF: predicated region fallthrough
CT: control target
= control target key end

     0   :  { %s80_s0 = inlined_call_operand.vmem [shape: f32[2,16,8,3], index: 0, kind: input, shape index: {}]   ;;  %s81_s1 = inlined_call_operand.vmem [shape: f32[2,16,8,3], index: 1, kind: output, shape index: {}]  }
   0x1   :  { %v24_v0 = vld [vmem:[%s80_s0 + $0x10] sm:$0xff]  ;;  %v25_v1 = vld [vmem:[%s80_s0 + $0x28] sm:$0xff]  ;;  %v29_v3 = vld [vmem:[%s80_s0 + $0x20] sm:$0xff] }
   0x2   :  { %v27_v2 = vld [vmem:[%s80_s0 + $0x8] sm:$0xff]  ;;  %4 = vst [vmem:[%s81_s1] sm:$0xff] %v24_v0  ;;  %26 = vst [vmem:[%s81_s1 + $0x18] sm:$0xff] %v25_v1  ;;  %v17_v4 = vld [vmem:[%s80_s0] sm:$0xff] }
   0x3   :  { %28 = vst [vmem:[%s81_s1 + $0x8] sm:$0xff] %v27_v2  ;;  %v32_v5 = vld [vmem:[%s80_s0 + $0x18] sm:$0xff]  ;;  %30 = vst [vmem:[%s81_s1 + $0x20] sm:$0xff] %v29_v3 }
   0x4   :  { %31 = vst [vmem:[%s81_s1 + $0x10] sm:$0xff] %v17_v4  ;;  %33 = vst [vmem:[%s81_s1 + $0x28] sm:$0xff] %v32_v5 }

// kernel: uno_forward.20
= control target key start
LH: loop header
LB: loop body
LE: loop exit
PB: predicated region body
PF: predicated region fallthrough
CT: control target
= control target key end

     0   :  { %s383_s9 = smov 0   ;;  %s385_s10 = smov 0   ;;  %s419_s0 = inlined_call_operand.vmem [shape: bf16[2,8,64], index: 0, kind: input, shape index: {}]   ;;  %s420_s1 = inlined_call_operand.vmem [shape: bf16[8,8], index: 1, kind: input, shape index: {}]   ;;  %s421_s2 = inlined_call_operand.vmem [shape: bf16[2,8,64], index: 2, kind: output, shape index: {}]  }
   0x1   :  { %s387_s11 = smov 0  }
   0x2 LB: > { %s24_s12 = sadd.s32 1, %s360_s10  ;;  %p302_p0 = scmp.ge.s32.totalorder %s364_s11, 1  ;;  %s364_s11 = sphi %s387_s11, %s12_s11   ;;  %s360_s10 = sphi %s385_s10, %s423_s10   ;;  %s356_s9 = sphi %s383_s9, %s422_s9  }
   0x3   : > { %p26_p1 = scmp.ge.s32.totalorder %s24_s12, 2  ;;  %p130_p2 = scmp.lt.s32.totalorder %s364_s11, 3 }
   0x5   : > { %s425_s12 = smov (%p26_p1, %s24_s12), 0  ;;  %p131_p3 = pnand %p302_p0, %p130_p2 }
   0x6   : > { %p156_p4 = scmp.lt.s32.totalorder (!%p131_p3), %s356_s9, 1  ;;  %v366_v0 = vmov (!%p131_p3), 0.0   ;;  %vm367_vm0 = vmmov (!%p131_p3), 0   ;;  %vm177_vm1 = vcmask (!%p131_p3), 1043456   ;;  %v171_v3 = vld [vmem:[%s420_s1] sm:$0xf] (!%p131_p3) }
   0x7   : > { %134 = sbr.rel (%p131_p3) target bundleno = 237 (0xed), region = 28  ;;  %310 = vmatprep.subr.bf16.mxu0 (!%p131_p3), %v366_v0  ;;  %312 = vmatprep.mubr.msk.bf16.mxu0 (!%p131_p3), %vm367_vm0, %v366_v0  ;;  %vm173_vm2 = vcmask (!%p131_p3), 64512   ;;  %vm222_vm3 = vcmask (!%p131_p3), 519168  }
   0xe   : > { %s427_s9 = smov (!%p156_p4, %s356_s9), 1 }
   0xf   : > { %s303_s13 = sshll.u32 %s427_s9, 2 }
  0x10   : > { %s162_s16 = scalar_lea.vmem %s419_s0, %s303_s13  ;;  %s169_s21 = scalar_lea.vmem %s421_s2, %s303_s13 }
  0x11   : > { %v172_v1 = vld [vmem:[%s162_s16] sm:$0xf] }
  0x12   : > { %v179_v2 = vsel %vm177_vm1, %v172_v1, 0 }
  0x13   : > { %311 = vmatpush3.bf16.msra.mxu0 %v179_v2 }
  0x16   : > { %313 = vmatmul.mubr.msk.bf16.vlgmr.msra.gmra.mrb[0].mxu0 %vm173_vm2, %v171_v3 }
  0xe9   : > { %v215_v4 = vpop.f32.mrb[0].mxu0 }
  0xea   : > { %v221_v5 = vpack.c.bf16 %v215_v4, %v215_v4  ;;  %v314_v6 = vpop.f32.mrb[1].mxu0 }
  0xeb   : > { %v218_v7 = vpop.f32.mrb[2].mxu0 }
  0xec   : > { %223 = vst.msk [vmem:[%s169_s21] sm:$0xf] %vm222_vm3, %v221_v5  ;;  %v315_v8 = vpop.f32.mrb[3].mxu0 }
  0xed PF: > { %s12_s11 = sadd.s32 1, %s364_s11   ;;  %s422_s9 = smov %s360_s10 }
  0xee   : > { %p9_p5 = scmp.ge.s32.totalorder %s12_s11, 4   ;;  %s423_s10 = smov %s425_s12 }
  0xf0   :  { %11 = sbr.rel (!%p9_p5) target bundleno = 2 (0x2), region = 58 }

// kernel: uno_forward.19
= control target key start
LH: loop header
LB: loop body
LE: loop exit
PB: predicated region body
PF: predicated region fallthrough
CT: control target
= control target key end

     0   :  { %s812_s27 = smov 0   ;;  %s814_s28 = smov 0   ;;  %s875_s0 = inlined_call_operand.vmem [shape: f32[2,8,64], index: 0, kind: input, shape index: {}]   ;;  %s876_s1 = inlined_call_operand.vmem [shape: f32[2,8,64], index: 1, kind: input, shape index: {}]   ;;  %s877_s2 = inlined_call_operand.vmem [shape: f32[2,8,64], index: 2, kind: input, shape index: {}]   ;;  %s878_s3 = inlined_call_operand.vmem [shape: f32[8,1], index: 3, kind: input, shape index: {}]   ;;  %s879_s4 = inlined_call_operand.vmem [shape: bf16[4,8], index: 4, kind: input, shape index: {}]   ;;  %s880_s5 = inlined_call_operand.vmem [shape: f32[4,1], index: 5, kind: input, shape index: {}]   ;;  %s881_s6 = inlined_call_operand.vmem [shape: bf16[8,4], index: 6, kind: input, shape index: {}]   ;;  %s882_s7 = inlined_call_operand.vmem [shape: f32[8,1], index: 7, kind: input, shape index: {}]   ;;  %s883_s8 = inlined_call_operand.vmem [shape: bf16[2,8,64], index: 8, kind: output, shape index: {}]  }
   0x1   :  { %s816_s29 = smov 0  }
   0x2 LB: > { %s30_s30 = sadd.s32 1, %s757_s28  ;;  %p676_p0 = scmp.ge.s32.totalorder %s761_s29, 1  ;;  %s761_s29 = sphi %s816_s29, %s18_s29   ;;  %s757_s28 = sphi %s814_s28, %s885_s28   ;;  %s753_s27 = sphi %s812_s27, %s884_s27  }
   0x3   : > { %p32_p1 = scmp.ge.s32.totalorder %s30_s30, 2  ;;  %p308_p2 = scmp.lt.s32.totalorder %s761_s29, 3 }
   0x5   : > { %s887_s30 = smov (%p32_p1, %s30_s30), 0  ;;  %p309_p3 = pnand %p676_p0, %p308_p2 }
   0x6   : > { %v390_v0 = vld [vmem:[%s878_s3] sm:$0xff] (!%p309_p3)  ;;  %v763_v1 = vmov (!%p309_p3), 0   ;;  %v764_v3 = vmov (!%p309_p3), 0.0   ;;  %vm765_vm0 = vmmov (!%p309_p3), 0   ;;  %p360_p4 = scmp.lt.s32.totalorder (!%p309_p3), %s753_s27, 1  ;;  %v766_v29 = vmov (!%p309_p3), -1.0  }
   0x7   : > { %312 = sbr.rel (%p309_p3) target bundleno = 679 (0x2a7), region = 52  ;;  %729 = vset.pattern.permute.xlu0 (!%p309_p3), %v763_v1  ;;  %730 = vset.pattern.permute.xlu1 (!%p309_p3), %v763_v1  ;;  %v427_v2 = vld [vmem:[%s880_s5] sm:$0xf] (!%p309_p3)  ;;  %vm437_vm2 = vcmask (!%p309_p3), 1043456   ;;  %vm433_vm3 = vcmask (!%p309_p3), 64512   ;;  %vm519_vm5 = vcmask (!%p309_p3), 1041408  }
   0x8   : > { %393 = vperm.xlu0 (!%p309_p3), %729, %v390_v0   ;;  %689 = vmatprep.subr.bf16.mxu0 (!%p309_p3), %v764_v3  ;;  %v425_v37 = vld [vmem:[%s879_s4] sm:$0x3] (!%p309_p3)  ;;  %vm515_vm6 = vcmask (!%p309_p3), 31744   ;;  %vm566_vm7 = vcmask (!%p309_p3), 519168  }
   0x9   : > { %695 = vmatprep.subr.bf16.mxu1 (!%p309_p3), %v764_v3  ;;  %691 = vmatprep.mubr.msk.bf16.mxu0 (!%p309_p3), %vm765_vm0, %v764_v3  ;;  %v509_v38 = vld [vmem:[%s882_s7] sm:$0xff] (!%p309_p3) }
   0xa   : > { %697 = vmatprep.mubr.msk.bf16.mxu1 (!%p309_p3), %vm765_vm0, %v764_v3  ;;  %512 = vperm.xlu1 (!%p309_p3), %730, %v509_v38  }
   0xc   : > { %430 = vperm.xlu0 (!%p309_p3), %729, %v427_v2  }
   0xe   : > { %s889_s27 = smov (!%p360_p4, %s753_s27), 1 }
   0xf   : > { %s839_s13 = sshll.u32 %s889_s27, 3  ;;  %s680_s11 = sshll.u32 %s889_s27, 2 }
  0x10   : > { %s366_s16 = scalar_lea.vmem %s875_s0, %s839_s13  ;;  %s373_s19 = scalar_lea.vmem %s876_s1, %s839_s13 }
  0x11   : > { %v389_v4 = vld [vmem:[%s366_s16] sm:$0xff]  ;;  %s380_s10 = scalar_lea.vmem %s877_s2, %s839_s13  ;;  %s387_s15 = scalar_lea.vmem %s883_s8, %s680_s11 }
  0x12   : > { %v397_v6 = vld [vmem:[%s373_s19] sm:$0xff] }
  0x87   : > { %v394_v5 = vpop.permute.xlu0 %393 }
  0x88   : > { %v396_v7 = vadd.f32 %v394_v5, %v389_v4 }
  0x8a   : > { %v398_v8 = vadd.f32 %v397_v6, %v396_v7 }
  0x8b   : > { %v431_v39 = vpop.permute.xlu0 %430 }
  0x8c   : > { %v400_v9 = vmul.f32 0.70710677, %v398_v8  ;;  %v399_v32 = vmul.f32 0.5, %v398_v8  ;;  %v507_v8 = vld [vmem:[%s881_s6] sm:$0xf] }
  0x8e   : > { %v403_v10 = vand.u32 2147483647, %v400_v9  ;;  %vm401_vm1 = vcmp.ge.f32.partialorder %v400_v9, 0.0  ;;  %v513_v9 = vpop.permute.xlu1 %512 }
  0x8f   : > { %v402_v30 = vsel %vm401_vm1, 1.0, %v766_v29 }
  0x90   : > { %v404_v11 = vmul.f32 0.3275911, %v403_v10  ;;  %v416_v13 = vsub.f32 0.0, %v403_v10 }
  0x92   : > { %v405_v12 = vadd.f32 1.0, %v404_v11  ;;  %v417_v15 = vmul.f32 %v416_v13, %v403_v10  ;;  %v563_v11 = vld [vmem:[%s380_s10] sm:$0xff] }
  0x94   : > { %731 = vrcp.f32 %v405_v12  ;;  %v418_v18 = vmul.f32 1.442695, %v417_v15 }
  0x96   : > { %733 = vpow2.f32 %v418_v18 }
  0x9e   : > { %v732_v14 = vpop.eup %731 }
  0x9f   : > { %v407_v16 = vmul.f32 1.0614054, %v732_v14 }
  0xa0   : > { %v734_v26 = vpop.eup %733 }
  0xa1   : > { %v408_v17 = vadd.f32 -1.4531521, %v407_v16 }
  0xa3   : > { %v409_v19 = vmul.f32 %v732_v14, %v408_v17 }
  0xa5   : > { %v410_v20 = vadd.f32 1.4214138, %v409_v19 }
  0xa7   : > { %v411_v21 = vmul.f32 %v732_v14, %v410_v20 }
  0xa9   : > { %v412_v22 = vadd.f32 -0.28449672, %v411_v21 }
  0xab   : > { %v413_v23 = vmul.f32 %v732_v14, %v412_v22 }
  0xad   : > { %v414_v24 = vadd.f32 0.2548296, %v413_v23 }
  0xaf   : > { %v415_v25 = vmul.f32 %v732_v14, %v414_v24 }
  0xb1   : > { %v420_v27 = vmul.f32 %v734_v26, %v415_v25 }
  0xb3   : > { %v421_v28 = vsub.f32 1.0, %v420_v27 }
  0xb5   : > { %v422_v31 = vmul.f32 %v421_v28, %v402_v30 }
  0xb7   : > { %v423_v33 = vadd.f32 1.0, %v422_v31 }
  0xb9   : > { %v424_v34 = vmul.f32 %v423_v33, %v399_v32 }
  0xbb   : > { %v426_v35 = vpack.c.bf16 %v424_v34, %v424_v34 }
  0xbd   : > { %v439_v36 = vsel %vm437_vm2, %v426_v35, 0 }
  0xbe   : > { %690 = vmatpush3.bf16.msra.mxu0 %v439_v36 }
  0xc1   : > { %692 = vmatmul.mubr.msk.bf16.vlgmr.msra.gmra.mrb[0].mxu0 %vm433_vm3, %v425_v37 }
 0x194   : > { %v475_v40 = vpop.f32.mrb[0].mxu0 }
 0x195   : > { %v476_v41 = vadd.f32 %v475_v40, %v431_v39  ;;  %v693_v42 = vpop.f32.mrb[1].mxu0 }
 0x196   : > { %v478_v43 = vpop.f32.mrb[2].mxu0 }
 0x197   : > { %v482_v44 = vmul.f32 0.70710677, %v476_v41  ;;  %v694_v45 = vpop.f32.mrb[3].mxu0  ;;  %v481_v3 = vmul.f32 0.5, %v476_v41 }
 0x199   : > { %v485_v46 = vand.u32 2147483647, %v482_v44  ;;  %vm483_vm4 = vcmp.ge.f32.partialorder %v482_v44, 0.0 }
 0x19a   : > { %v484_v1 = vsel %vm483_vm4, 1.0, %v766_v29 }
 0x19b   : > { %v486_v47 = vmul.f32 0.3275911, %v485_v46  ;;  %v498_v49 = vsub.f32 0.0, %v485_v46 }
 0x19d   : > { %v487_v48 = vadd.f32 1.0, %v486_v47  ;;  %v499_v51 = vmul.f32 %v498_v49, %v485_v46 }
 0x19f   : > { %735 = vrcp.f32 %v487_v48  ;;  %v500_v54 = vmul.f32 1.442695, %v499_v51 }
 0x1a1   : > { %737 = vpow2.f32 %v500_v54 }
 0x1a9   : > { %v736_v50 = vpop.eup %735 }
 0x1aa   : > { %v489_v52 = vmul.f32 1.0614054, %v736_v50 }
 0x1ab   : > { %v738_v62 = vpop.eup %737 }
 0x1ac   : > { %v490_v53 = vadd.f32 -1.4531521, %v489_v52 }
 0x1ae   : > { %v491_v55 = vmul.f32 %v736_v50, %v490_v53 }
 0x1b0   : > { %v492_v56 = vadd.f32 1.4214138, %v491_v55 }
 0x1b2   : > { %v493_v57 = vmul.f32 %v736_v50, %v492_v56 }
 0x1b4   : > { %v494_v58 = vadd.f32 -0.28449672, %v493_v57 }
 0x1b6   : > { %v495_v59 = vmul.f32 %v736_v50, %v494_v58 }
 0x1b8   : > { %v496_v60 = vadd.f32 0.2548296, %v495_v59 }
 0x1ba   : > { %v497_v61 = vmul.f32 %v736_v50, %v496_v60 }
 0x1bc   : > { %v502_v63 = vmul.f32 %v738_v62, %v497_v61 }
 0x1be   : > { %v503_v0 = vsub.f32 1.0, %v502_v63 }
 0x1c0   : > { %v504_v2 = vmul.f32 %v503_v0, %v484_v1 }
 0x1c2   : > { %v505_v4 = vadd.f32 1.0, %v504_v2 }
 0x1c4   : > { %v506_v5 = vmul.f32 %v505_v4, %v481_v3 }
 0x1c6   : > { %v508_v6 = vpack.c.bf16 %v506_v5, %v506_v5 }
 0x1c8   : > { %v521_v7 = vsel %vm519_vm5, %v508_v6, 0 }
 0x1c9   : > { %696 = vmatpush3.bf16.msra.mxu1 %v521_v7 }
 0x1cc   : > { %698 = vmatmul.mubr.msk.bf16.vlgmr.msra.gmra.mrb[0].mxu1 %vm515_vm6, %v507_v8 }
 0x29f   : > { %v557_v10 = vpop.f32.mrb[0].mxu1 }
 0x2a0   : > { %v558_v12 = vadd.f32 %v557_v10, %v513_v9  ;;  %v699_v13 = vpop.f32.mrb[1].mxu1 }
 0x2a1   : > { %v560_v14 = vpop.f32.mrb[2].mxu1 }
 0x2a2   : > { %v564_v15 = vadd.f32 %v563_v11, %v558_v12  ;;  %v700_v16 = vpop.f32.mrb[3].mxu1 }
 0x2a4   : > { %v565_v17 = vpack.c.bf16 %v564_v15, %v564_v15 }
 0x2a6   : > { %567 = vst.msk [vmem:[%s387_s15] sm:$0xf] %vm566_vm7, %v565_v17 }
 0x2a7 PF: > { %s18_s29 = sadd.s32 1, %s761_s29   ;;  %s884_s27 = smov %s757_s28 }
 0x2a8   : > { %p15_p5 = scmp.ge.s32.totalorder %s18_s29, 4   ;;  %s885_s28 = smov %s887_s30 }
 0x2aa   :  { %17 = sbr.rel (!%p15_p5) target bundleno = 2 (0x2), region = 88 }

// kernel: uno_forward.25
= control target key start
LH: loop header
LB: loop body
LE: loop exit
PB: predicated region body
PF: predicated region fallthrough
CT: control target
= control target key end

     0   :  { %s427_s9 = smov 0   ;;  %s429_s10 = smov 0   ;;  %s463_s0 = inlined_call_operand.vmem [shape: bf16[2,16,64], index: 0, kind: input, shape index: {}]   ;;  %s464_s1 = inlined_call_operand.vmem [shape: bf16[16,16], index: 1, kind: input, shape index: {}]   ;;  %s465_s2 = inlined_call_operand.vmem [shape: bf16[2,16,64], index: 2, kind: output, shape index: {}]  }
   0x1   :  { %s431_s11 = smov 0  }
   0x2 LB: > { %s24_s12 = sadd.s32 1, %s404_s10  ;;  %p334_p0 = scmp.ge.s32.totalorder %s408_s11, 1  ;;  %s408_s11 = sphi %s431_s11, %s12_s11   ;;  %s404_s10 = sphi %s429_s10, %s467_s10   ;;  %s400_s9 = sphi %s427_s9, %s466_s9  }
   0x3   : > { %p26_p1 = scmp.ge.s32.totalorder %s24_s12, 2  ;;  %p131_p2 = scmp.lt.s32.totalorder %s408_s11, 3 }
   0x5   : > { %s469_s12 = smov (%p26_p1, %s24_s12), 0  ;;  %p132_p3 = pnand %p334_p0, %p131_p2 }
   0x6   : > { %p159_p4 = scmp.lt.s32.totalorder (!%p132_p3), %s400_s9, 1  ;;  %v410_v0 = vmov (!%p132_p3), 0.0   ;;  %vm411_vm0 = vmmov (!%p132_p3), 0   ;;  %v385_v2 = vld [vmem:[%s464_s1] sm:$0xff] (!%p132_p3)   ;;  %vm191_vm1 = vcmask (!%p132_p3), 130048   ;;  %vm244_vm2 = vcmask (!%p132_p3), 519168  }
   0x7   : > { %135 = sbr.rel (%p132_p3) target bundleno = 238 (0xee), region = 28  ;;  %352 = vmatprep.subr.bf16.mxu0 (!%p132_p3), %v410_v0  ;;  %354 = vmatprep.mubr.msk.bf16.mxu0 (!%p132_p3), %vm411_vm0, %v410_v0 }
   0xe   : > { %s471_s9 = smov (!%p159_p4, %s400_s9), 1 }
   0xf   : > { %s346_s13 = sshll.u32 %s471_s9, 3 }
  0x10   : > { %s166_s16 = scalar_lea.vmem %s463_s0, %s346_s13  ;;  %s174_s21 = scalar_lea.vmem %s465_s2, %s346_s13 }
  0x11   : > { %v384_v1 = vld [vmem:[%s166_s16] sm:$0xff]  }
  0x12   : > { %353 = vmatpush3.bf16.msra.mxu0 %v384_v1 }
  0x15   : > { %355 = vmatmul.mubr.msk.bf16.vlgmr.msra.gmra.mrb[0].mxu0 %vm191_vm1, %v385_v2 }
  0xe8   : > { %v229_v3 = vpop.f32.mrb[0].mxu0 }
  0xe9   : > { %v348_v4 = vpack.c.bf16 %v229_v3, %v229_v3  ;;  %v356_v5 = vpop.f32.mrb[1].mxu0 }
  0xea   : > { %v232_v6 = vpop.f32.mrb[2].mxu0 }
  0xeb   : > { %245 = vst.msk [vmem:[%s174_s21] sm:$0xf] %vm244_vm2, %v348_v4  ;;  %v349_v7 = vpack.c.bf16 %v232_v6, %v232_v6  ;;  %v357_v8 = vpop.f32.mrb[3].mxu0 }
  0xed   : > { %246 = vst.msk [vmem:[%s174_s21 + $0x4] sm:$0xf] %vm244_vm2, %v349_v7 }
  0xee PF: > { %s12_s11 = sadd.s32 1, %s408_s11   ;;  %s466_s9 = smov %s404_s10 }
  0xef   : > { %p9_p5 = scmp.ge.s32.totalorder %s12_s11, 4   ;;  %s467_s10 = smov %s469_s12 }
  0xf1   :  { %11 = sbr.rel (!%p9_p5) target bundleno = 2 (0x2), region = 58 }

// kernel: uno_forward.22
= control target key start
LH: loop header
LB: loop body
LE: loop exit
PB: predicated region body
PF: predicated region fallthrough
CT: control target
= control target key end

     0   :  { %s928_s30 = smov 0   ;;  %s930_s10 = smov 0   ;;  %s1003_s0 = inlined_call_operand.vmem [shape: bf16[2,16,64], index: 0, kind: input, shape index: {}]   ;;  %s1004_s1 = inlined_call_operand.vmem [shape: f32[2,8,64], index: 1, kind: input, shape index: {}]   ;;  %s1005_s2 = inlined_call_operand.vmem [shape: bf16[8,16], index: 2, kind: input, shape index: {}]   ;;  %s1006_s3 = inlined_call_operand.vmem [shape: bf16[8,16], index: 3, kind: input, shape index: {}]   ;;  %s1007_s4 = inlined_call_operand.vmem [shape: f32[8,1], index: 4, kind: input, shape index: {}]   ;;  %s1008_s5 = inlined_call_operand.vmem [shape: bf16[4,8], index: 5, kind: input, shape index: {}]   ;;  %s1009_s6 = inlined_call_operand.vmem [shape: f32[4,1], index: 6, kind: input, shape index: {}]   ;;  %s1010_s7 = inlined_call_operand.vmem [shape: bf16[8,4], index: 7, kind: input, shape index: {}]   ;;  %s1011_s8 = inlined_call_operand.vmem [shape: f32[8,1], index: 8, kind: input, shape index: {}]   ;;  %s1012_s9 = inlined_call_operand.vmem [shape: bf16[2,8,64], index: 9, kind: output, shape index: {}]  }
   0x1   :  { %s932_s11 = smov 0  }
   0x2 LB: > { %s31_s12 = sadd.s32 1, %s868_s10  ;;  %p761_p0 = scmp.ge.s32.totalorder %s872_s11, 1  ;;  %s872_s11 = sphi %s932_s11, %s19_s11   ;;  %s868_s10 = sphi %s930_s10, %s1014_s10   ;;  %s864_s30 = sphi %s928_s30, %s1013_s30  }
   0x3   : > { %p33_p1 = scmp.ge.s32.totalorder %s31_s12, 2  ;;  %p320_p2 = scmp.lt.s32.totalorder %s872_s11, 3 }
   0x5   : > { %s1016_s12 = smov (%p33_p1, %s31_s12), 0  ;;  %p321_p3 = pnand %p761_p0, %p320_p2 }
   0x6   : > { %p368_p4 = scmp.lt.s32.totalorder (!%p321_p3), %s864_s30, 1  ;;  %v874_v0 = vmov (!%p321_p3), 0.0   ;;  %vm875_vm0 = vmmov (!%p321_p3), 0   ;;  %v489_v1 = vld [vmem:[%s1007_s4] sm:$0xff] (!%p321_p3)  ;;  %v876_v2 = vmov (!%p321_p3), 0   ;;  %vm400_vm1 = vcmask (!%p321_p3), 130048  }
   0x7   : > { %324 = sbr.rel (%p321_p3) target bundleno = 772 (0x304), region = 56  ;;  %782 = vmatprep.subr.bf16.mxu0 (!%p321_p3), %v874_v0  ;;  %784 = vmatprep.mubr.msk.bf16.mxu0 (!%p321_p3), %vm875_vm0, %v874_v0  ;;  %v525_v3 = vld [vmem:[%s1009_s6] sm:$0xf] (!%p321_p3)  ;;  %v877_v34 = vmov (!%p321_p3), -1.0   ;;  %vm535_vm3 = vcmask (!%p321_p3), 1043456   ;;  %vm531_vm4 = vcmask (!%p321_p3), 64512  }
   0x8   : > { %839 = vset.pattern.permute.xlu0 (!%p321_p3), %v876_v2  ;;  %788 = vmatprep.subr.bf16.mxu1 (!%p321_p3), %v874_v0  ;;  %v393_v5 = vld [vmem:[%s1005_s2] sm:$0xf] (!%p321_p3)  ;;  %vm617_vm6 = vcmask (!%p321_p3), 1041408   ;;  %vm613_vm7 = vcmask (!%p321_p3), 31744   ;;  %vm663_vm8 = vcmask (!%p321_p3), 519168  }
   0x9   : > { %492 = vperm.xlu0 (!%p321_p3), %839, %v489_v1   ;;  %790 = vmatprep.mubr.msk.bf16.mxu1 (!%p321_p3), %vm875_vm0, %v874_v0  ;;  %v523_v42 = vld [vmem:[%s1008_s5] sm:$0x3] (!%p321_p3) }
   0xa   : > { %840 = vset.pattern.permute.xlu1 (!%p321_p3), %v876_v2  ;;  %v444_v43 = vld [vmem:[%s1006_s3] sm:$0xf] (!%p321_p3) }
   0xb   : > { %v607_v44 = vld [vmem:[%s1011_s8] sm:$0xff] (!%p321_p3) }
   0xc   : > { %610 = vperm.xlu1 (!%p321_p3), %840, %v607_v44  }
   0xd   : > { %528 = vperm.xlu0 (!%p321_p3), %839, %v525_v3  }
   0xe   : > { %s1018_s30 = smov (!%p368_p4, %s864_s30), 1 }
   0xf   : > { %s773_s15 = sshll.u32 %s1018_s30, 3  ;;  %s765_s17 = sshll.u32 %s1018_s30, 2 }
  0x10   : > { %s375_s20 = scalar_lea.vmem %s1003_s0, %s773_s15  ;;  %s382_s25 = scalar_lea.vmem %s1004_s1, %s773_s15 }
  0x11   : > { %v841_v4 = vld [vmem:[%s375_s20] sm:$0xff]   ;;  %s389_s20 = scalar_lea.vmem %s1012_s9, %s765_s17 }
  0x12   : > { %783 = vmatpush3.bf16.msra.mxu0 %v841_v4  ;;  %789 = vmatpush3.bf16.msra.mxu1 %v841_v4  ;;  %v488_v6 = vld [vmem:[%s382_s25] sm:$0xff] }
  0x13   : > { %794 = vmatprep.subr.bf16.mxu0 %v874_v0  ;;  %800 = vmatprep.subr.bf16.mxu1 %v874_v0 }
  0x15   : > { %785 = vmatmul.mubr.msk.bf16.vlgmr.msra.gmra.mrb[0].mxu0 %vm400_vm1, %v393_v5  ;;  %791 = vmatmul.mubr.msk.bf16.vlgmr.msra.gmra.mrb[0].mxu1 %vm400_vm1, %v444_v43 }
  0x16   : > { %796 = vmatprep.mubr.msk.bf16.mxu0 %vm875_vm0, %v874_v0  ;;  %802 = vmatprep.mubr.msk.bf16.mxu1 %vm875_vm0, %v874_v0 }
  0x88   : > { %v493_v7 = vpop.permute.xlu0 %492 }
  0x89   : > { %v495_v8 = vadd.f32 %v493_v7, %v488_v6 }
  0x8c   : > { %v529_v45 = vpop.permute.xlu0 %528 }
  0xe8   : > { %v438_v9 = vpop.f32.mrb[0].mxu0 }
  0xe9   : > { %v496_v10 = vadd.f32 %v495_v8, %v438_v9  ;;  %v786_v11 = vpop.f32.mrb[1].mxu0 }
  0xea   : > { %v441_v12 = vpop.f32.mrb[2].mxu0 }
  0xeb   : > { %v498_v13 = vmul.f32 0.70710677, %v496_v10  ;;  %v787_v14 = vpop.f32.mrb[3].mxu0  ;;  %v497_v37 = vmul.f32 0.5, %v496_v10 }
  0xec   : > { %v605_v14 = vld [vmem:[%s1010_s7] sm:$0xf] }
  0xed   : > { %v501_v15 = vand.u32 2147483647, %v498_v13  ;;  %vm499_vm2 = vcmp.ge.f32.partialorder %v498_v13, 0.0 }
  0xee   : > { %v500_v35 = vsel %vm499_vm2, 1.0, %v877_v34 }
  0xef   : > { %v502_v16 = vmul.f32 0.3275911, %v501_v15  ;;  %v514_v18 = vsub.f32 0.0, %v501_v15 }
  0xf1   : > { %v503_v17 = vadd.f32 1.0, %v502_v16  ;;  %v515_v20 = vmul.f32 %v514_v18, %v501_v15  ;;  %v611_v15 = vpop.permute.xlu1 %610 }
  0xf3   : > { %842 = vrcp.f32 %v503_v17  ;;  %v516_v23 = vmul.f32 1.442695, %v515_v20 }
  0xf5   : > { %844 = vpow2.f32 %v516_v23 }
  0xfd   : > { %v843_v19 = vpop.eup %842 }
  0xfe   : > { %v505_v21 = vmul.f32 1.0614054, %v843_v19 }
  0xff   : > { %v845_v31 = vpop.eup %844 }
 0x100   : > { %v506_v22 = vadd.f32 -1.4531521, %v505_v21 }
 0x102   : > { %v507_v24 = vmul.f32 %v843_v19, %v506_v22 }
 0x104   : > { %v508_v25 = vadd.f32 1.4214138, %v507_v24 }
 0x106   : > { %v509_v26 = vmul.f32 %v843_v19, %v508_v25 }
 0x108   : > { %v510_v27 = vadd.f32 -0.28449672, %v509_v26 }
 0x10a   : > { %v511_v28 = vmul.f32 %v843_v19, %v510_v27 }
 0x10c   : > { %v512_v29 = vadd.f32 0.2548296, %v511_v28 }
 0x10e   : > { %v513_v30 = vmul.f32 %v843_v19, %v512_v29 }
 0x110   : > { %v518_v32 = vmul.f32 %v845_v31, %v513_v30 }
 0x112   : > { %v519_v33 = vsub.f32 1.0, %v518_v32 }
 0x114   : > { %v520_v36 = vmul.f32 %v519_v33, %v500_v35 }
 0x116   : > { %v521_v38 = vadd.f32 1.0, %v520_v36 }
 0x118   : > { %v522_v39 = vmul.f32 %v521_v38, %v497_v37 }
 0x11a   : > { %v524_v40 = vpack.c.bf16 %v522_v39, %v522_v39 }
 0x11c   : > { %v537_v41 = vsel %vm535_vm3, %v524_v40, 0 }
 0x11d   : > { %795 = vmatpush3.bf16.msra.mxu0 %v537_v41 }
 0x120   : > { %797 = vmatmul.mubr.msk.bf16.vlgmr.msra.gmra.mrb[4].mxu0 %vm531_vm4, %v523_v42 }
 0x1f3   : > { %v573_v46 = vpop.f32.mrb[4].mxu0 }
 0x1f4   : > { %v574_v47 = vadd.f32 %v573_v46, %v529_v45  ;;  %v798_v48 = vpop.f32.mrb[5].mxu0 }
 0x1f5   : > { %v576_v49 = vpop.f32.mrb[6].mxu0 }
 0x1f6   : > { %v580_v50 = vmul.f32 0.70710677, %v574_v47  ;;  %v799_v51 = vpop.f32.mrb[7].mxu0  ;;  %v579_v9 = vmul.f32 0.5, %v574_v47 }
 0x1f8   : > { %v583_v52 = vand.u32 2147483647, %v580_v50  ;;  %vm581_vm5 = vcmp.ge.f32.partialorder %v580_v50, 0.0 }
 0x1f9   : > { %v582_v7 = vsel %vm581_vm5, 1.0, %v877_v34 }
 0x1fa   : > { %v584_v53 = vmul.f32 0.3275911, %v583_v52  ;;  %v596_v55 = vsub.f32 0.0, %v583_v52 }
 0x1fc   : > { %v585_v54 = vadd.f32 1.0, %v584_v53  ;;  %v597_v57 = vmul.f32 %v596_v55, %v583_v52 }
 0x1fe   : > { %846 = vrcp.f32 %v585_v54  ;;  %v598_v60 = vmul.f32 1.442695, %v597_v57 }
 0x200   : > { %848 = vpow2.f32 %v598_v60 }
 0x208   : > { %v847_v56 = vpop.eup %846 }
 0x209   : > { %v587_v58 = vmul.f32 1.0614054, %v847_v56 }
 0x20a   : > { %v849_v4 = vpop.eup %848 }
 0x20b   : > { %v588_v59 = vadd.f32 -1.4531521, %v587_v58 }
 0x20d   : > { %v589_v61 = vmul.f32 %v847_v56, %v588_v59 }
 0x20f   : > { %v590_v62 = vadd.f32 1.4214138, %v589_v61 }
 0x211   : > { %v591_v63 = vmul.f32 %v847_v56, %v590_v62 }
 0x213   : > { %v592_v0 = vadd.f32 -0.28449672, %v591_v63 }
 0x215   : > { %v593_v1 = vmul.f32 %v847_v56, %v592_v0 }
 0x217   : > { %v594_v2 = vadd.f32 0.2548296, %v593_v1 }
 0x219   : > { %v595_v3 = vmul.f32 %v847_v56, %v594_v2 }
 0x21b   : > { %v600_v5 = vmul.f32 %v849_v4, %v595_v3 }
 0x21d   : > { %v601_v6 = vsub.f32 1.0, %v600_v5 }
 0x21f   : > { %v602_v8 = vmul.f32 %v601_v6, %v582_v7 }
 0x221   : > { %v603_v10 = vadd.f32 1.0, %v602_v8 }
 0x223   : > { %v604_v11 = vmul.f32 %v603_v10, %v579_v9 }
 0x225   : > { %v606_v12 = vpack.c.bf16 %v604_v11, %v604_v11 }
 0x227   : > { %v619_v13 = vsel %vm617_vm6, %v606_v12, 0 }
 0x228   : > { %801 = vmatpush3.bf16.msra.mxu1 %v619_v13 }
 0x22b   : > { %803 = vmatmul.mubr.msk.bf16.vlgmr.msra.gmra.mrb[0].mxu1 %vm613_vm7, %v605_v14 }
 0x2fe   : > { %v655_v16 = vpop.f32.mrb[0].mxu1 }
 0x2ff   : > { %v656_v17 = vadd.f32 %v655_v16, %v611_v15  ;;  %v804_v18 = vpop.f32.mrb[1].mxu1 }
 0x300   : > { %v658_v19 = vpop.f32.mrb[2].mxu1 }
 0x301   : > { %v662_v20 = vpack.c.bf16 %v656_v17, %v656_v17  ;;  %v805_v21 = vpop.f32.mrb[3].mxu1 }
 0x303   : > { %664 = vst.msk [vmem:[%s389_s20] sm:$0xf] %vm663_vm8, %v662_v20 }
 0x304 PF: > { %s19_s11 = sadd.s32 1, %s872_s11   ;;  %s1013_s30 = smov %s868_s10 }
 0x305   : > { %p16_p5 = scmp.ge.s32.totalorder %s19_s11, 4   ;;  %s1014_s10 = smov %s1016_s12 }
 0x307   :  { %18 = sbr.rel (!%p16_p5) target bundleno = 2 (0x2), region = 89 }

// kernel: uno_forward.21
= control target key start
LH: loop header
LB: loop body
LE: loop exit
PB: predicated region body
PF: predicated region fallthrough
CT: control target
= control target key end

     0   :  { %v59_v0 = vlaneseq  ;;  %vm76_vm0 = vcmask 1041409   ;;  %vm79_vm1 = vcmask 1042434   ;;  %vm82_vm2 = vcmask 1043459   ;;  %s1998_s0 = inlined_call_operand.vmem [shape: f32[2,16,12], index: 0, kind: input, shape index: {}]   ;;  %s1999_s2 = inlined_call_operand.vmem [shape: f32[8,16,12], index: 2, kind: input, shape index: {}]   ;;  %s2000_s1 = inlined_call_operand.vmem [shape: f32[2,16,12], index: 1, kind: input, shape index: {}]   ;;  %s2001_s3 = inlined_call_operand.vmem [shape: f32[8,16,12], index: 3, kind: input, shape index: {}]   ;;  %s2002_s4 = inlined_call_operand.vmem [shape: f32[2,8,12], index: 4, kind: output, shape index: {0}]   ;;  %s2003_s5 = inlined_call_operand.vmem [shape: f32[2,8,12], index: 5, kind: output, shape index: {1}]  }
   0x1   :  { %v1138_v2 = vld [vmem:[%s1998_s0] sm:$0xff]  ;;  %v1148_v4 = vld [vmem:[%s1998_s0 + $0x10] sm:$0xff]  ;;  %vm85_vm3 = vcmask 1044484   ;;  %vm88_vm4 = vcmask 1045509   ;;  %vm91_vm5 = vcmask 1046534   ;;  %vm94_vm6 = vcmask 1047559  }
   0x2   :  { %v1133_v1 = vshrl.u32 %v59_v0, 7  ;;  %v1143_v3 = vld [vmem:[%s1999_s2] sm:$0xff]  ;;  %v1153_v5 = vld [vmem:[%s1999_s2 + $0x10] sm:$0xff]  ;;  %vm1090_vm7 = vcmask 97280  }
   0x3   :  { %v1161_v7 = vld [vmem:[%s2000_s1] sm:$0xff]  ;;  %v1171_v9 = vld [vmem:[%s1999_s2 + $0x30] sm:$0xff]  ;;  %v75_v10 = vrot.slane %v1153_v5, 7  ;;  %v152_v16 = vrot.slane %v1143_v3, 1 }
   0x4   :  { %v1156_v6 = vsub.s32 0, %v1133_v1  ;;  %v1166_v8 = vld [vmem:[%s1999_s2 + $0x20] sm:$0xff]  ;;  %v1175_v11 = vsub.s32 1, %v1133_v1  ;;  %v1180_v12 = vld [vmem:[%s2000_s1 + $0x10] sm:$0xff]  ;;  %v81_v15 = vrot.slane %v1171_v9, 5  ;;  %v1191_v17 = vsub.s32 2, %v1133_v1 }
   0x5   :  { %v1185_v13 = vld [vmem:[%s1999_s2 + $0x40] sm:$0xff]  ;;  %v78_v14 = vrot.slane %v1166_v8, 6  ;;  %v1196_v18 = vld [vmem:[%s1999_s2 + $0x50] sm:$0xff]  ;;  %v77_v22 = vsel %vm76_vm0, %v75_v10, %v1143_v3  ;;  %v153_v38 = vsel %vm76_vm0, %v1153_v5, %v152_v16  ;;  %v154_v39 = vrot.slane %v1166_v8, 7 }
   0x6   :  { %v1201_v19 = vld [vmem:[%s1999_s2 + $0x60] sm:$0xff]  ;;  %v62_v20 = vrot.slane %v1138_v2, %v1156_v6  ;;  %v1207_v21 = vrot.slane %v1148_v4, %v1156_v6  ;;  %v84_v23 = vrot.slane %v1185_v13, 4  ;;  %v1215_v24 = vld [vmem:[%s1999_s2 + $0x70] sm:$0xff]  ;;  %v87_v26 = vrot.slane %v1196_v18, 3 }
   0x7   :  { %v80_v25 = vsel %vm79_vm1, %v78_v14, %v77_v22  ;;  %v90_v27 = vrot.slane %v1201_v19, 2  ;;  %v104_v28 = vrot.slane %v1161_v7, %v1156_v6  ;;  %v1225_v29 = vld [vmem:[%s2001_s3] sm:$0xff]  ;;  %v1230_v30 = vld [vmem:[%s2001_s3 + $0x10] sm:$0xff]  ;;  %v93_v32 = vrot.slane %v1215_v24, 1 }
   0x8   :  { %v83_v31 = vsel %vm82_vm2, %v81_v15, %v80_v25  ;;  %v108_v33 = vrot.slane %v1180_v12, %v1156_v6  ;;  %v1238_v34 = vrot.slane %v1138_v2, %v1175_v11  ;;  %v1243_v35 = vld [vmem:[%s2001_s3 + $0x20] sm:$0xff]  ;;  %v117_v37 = vrot.slane %v1230_v30, 7  ;;  %v1253_v40 = vld [vmem:[%s2001_s3 + $0x30] sm:$0xff] }
   0x9   :  { %v86_v36 = vsel %vm85_vm3, %v84_v23, %v83_v31  ;;  %v1258_v41 = vld [vmem:[%s2001_s3 + $0x40] sm:$0xff]  ;;  %v119_v43 = vrot.slane %v1243_v35, 6  ;;  %v156_v44 = vrot.slane %v1171_v9, 6  ;;  %v158_v45 = vrot.slane %v1185_v13, 5  ;;  %v1267_v46 = vld [vmem:[%s2001_s3 + $0x50] sm:$0xff] }
   0xa   :  { %v89_v42 = vsel %vm88_vm4, %v87_v26, %v86_v36  ;;  %v118_v48 = vsel %vm76_vm0, %v117_v37, %v1225_v29  ;;  %v121_v49 = vrot.slane %v1253_v40, 5  ;;  %v123_v50 = vrot.slane %v1258_v41, 4  ;;  %v1277_v51 = vld [vmem:[%s2001_s3 + $0x60] sm:$0xff]  ;;  %v1282_v52 = vld [vmem:[%s2001_s3 + $0x70] sm:$0xff] }
   0xb   :  { %v92_v47 = vsel %vm91_vm5, %v90_v27, %v89_v42  ;;  %v120_v54 = vsel %vm79_vm1, %v119_v43, %v118_v48  ;;  %v125_v55 = vrot.slane %v1267_v46, 3  ;;  %v155_v56 = vsel %vm79_vm1, %v154_v39, %v153_v38 }
   0xc   :  { %v95_v53 = vsel %vm94_vm6, %v93_v32, %v92_v47  ;;  %v122_v57 = vsel %vm82_vm2, %v121_v49, %v120_v54  ;;  %v127_v58 = vrot.slane %v1277_v51, 2  ;;  %v151_v59 = vrot.slane %v1148_v4, %v1175_v11 }
   0xd   :  { %v160_v60 = vrot.slane %v1196_v18, 4  ;;  %v97_v61 = vmul.f32 %v95_v53, %v62_v20  ;;  %v98_v62 = vmul.f32 %v95_v53, %v1207_v21  ;;  %v124_v63 = vsel %vm85_vm3, %v123_v50, %v122_v57 }
   0xe   :  { %v129_v0 = vrot.slane %v1282_v52, 1  ;;  %v126_v10 = vsel %vm88_vm4, %v125_v55, %v124_v63  ;;  %v140_v14 = vmul.f32 %v104_v28, %v95_v53  ;;  %v157_v15 = vsel %vm82_vm2, %v156_v44, %v155_v56 }
   0xf   :  { %v162_v16 = vrot.slane %v1201_v19, 3  ;;  %v128_v22 = vsel %vm91_vm5, %v127_v58, %v126_v10  ;;  %v141_v23 = vmul.f32 %v108_v33, %v95_v53  ;;  %v159_v25 = vsel %vm85_vm3, %v158_v45, %v157_v15 }
  0x10   :  { %v164_v26 = vrot.slane %v1215_v24, 2  ;;  %v130_v27 = vsel %vm94_vm6, %v129_v0, %v128_v22  ;;  %v161_v31 = vsel %vm88_vm4, %v160_v60, %v159_v25  ;;  %v179_v32 = vrot.slane %v1225_v29, 1 }
  0x11   :  { %v181_v36 = vrot.slane %v1243_v35, 7  ;;  %v132_v37 = vmul.f32 %v130_v27, %v104_v28  ;;  %v133_v38 = vmul.f32 %v130_v27, %v108_v33  ;;  %v136_v39 = vmul.f32 %v130_v27, %v62_v20 }
  0x12   :  { %v174_v42 = vrot.slane %v1161_v7, %v1175_v11  ;;  %v163_v43 = vsel %vm91_vm5, %v162_v16, %v161_v31  ;;  %v180_v44 = vsel %vm76_vm0, %v1230_v30, %v179_v32  ;;  %v183_v45 = vrot.slane %v1253_v40, 6 }
  0x13   :  { %v185_v47 = vrot.slane %v1258_v41, 5  ;;  %v134_v48 = vsub.f32 %v97_v61, %v132_v37  ;;  %v135_v49 = vsub.f32 %v98_v62, %v133_v38  ;;  %v137_v50 = vmul.f32 %v130_v27, %v1207_v21 }
  0x14   :  { %v178_v28 = vrot.slane %v1180_v12, %v1175_v11  ;;  %v165_v20 = vsel %vm94_vm6, %v164_v26, %v163_v43  ;;  %v182_v33 = vsel %vm79_vm1, %v181_v36, %v180_v44  ;;  %v187_v53 = vrot.slane %v1267_v46, 4 }
  0x15   :  { %v189_v54 = vrot.slane %v1277_v51, 3  ;;  %v167_v55 = vmul.f32 %v165_v20, %v1238_v34  ;;  %v168_v56 = vmul.f32 %v165_v20, %v151_v59  ;;  %v184_v57 = vsel %vm82_vm2, %v183_v45, %v182_v33 }
  0x16   :  { %v191_v58 = vrot.slane %v1282_v52, 2  ;;  %v142_v60 = vadd.f32 %v140_v14, %v136_v39  ;;  %v186_v21 = vsel %vm85_vm3, %v185_v47, %v184_v57  ;;  %v214_v61 = vrot.slane %v1143_v3, 2 }
  0x17   :  { %v143_v62 = vadd.f32 %v141_v23, %v137_v50  ;;  %v188_v63 = vsel %vm88_vm4, %v187_v53, %v186_v21  ;;  %v202_v0 = vmul.f32 %v174_v42, %v165_v20  ;;  %v203_v10 = vmul.f32 %v178_v28, %v165_v20 }
  0x18   :  { %v169_v15 = vadd.f32 %v167_v55, %v134_v48  ;;  %v190_v16 = vsel %vm91_vm5, %v189_v54, %v188_v63  ;;  %v209_v22 = vrot.slane %v1138_v2, %v1191_v17  ;;  %v215_v25 = vrot.slane %v1153_v5, 1 }
  0x19   :  { %v170_v26 = vadd.f32 %v168_v56, %v135_v49  ;;  %v192_v14 = vsel %vm94_vm6, %v191_v58, %v190_v16  ;;  %v213_v27 = vrot.slane %v1148_v4, %v1191_v17  ;;  %v218_v23 = vrot.slane %v1171_v9, 7 }
  0x1a   :  { %v194_v31 = vmul.f32 %v192_v14, %v174_v42  ;;  %v195_v32 = vmul.f32 %v192_v14, %v178_v28  ;;  %v198_v36 = vmul.f32 %v192_v14, %v1238_v34  ;;  %v199_v37 = vmul.f32 %v192_v14, %v151_v59 }
  0x1b   :  { %v216_v38 = vsel %vm76_vm0, %v215_v25, %v214_v61  ;;  %v220_v39 = vrot.slane %v1185_v13, 6  ;;  %v222_v43 = vrot.slane %v1196_v18, 5  ;;  %v241_v44 = vrot.slane %v1225_v29, 2 }
  0x1c   :  { %v196_v45 = vsub.f32 %v169_v15, %v194_v31  ;;  %v224_v47 = vrot.slane %v1201_v19, 4  ;;  %v226_v48 = vrot.slane %v1215_v24, 3  ;;  %v236_v42 = vrot.slane %v1161_v7, %v1191_v17 }
  0x1d   :  { %v197_v49 = vsub.f32 %v170_v26, %v195_v32  ;;  %v217_v34 = vsel %vm79_vm1, %v1166_v8, %v216_v38  ;;  %v242_v59 = vrot.slane %v1230_v30, 1  ;;  %v245_v50 = vrot.slane %v1253_v40, 7 }
  0x1e   :  { %v200_v28 = vadd.f32 %v198_v36, %v142_v60  ;;  %v201_v20 = vadd.f32 %v199_v37, %v143_v62  ;;  %v219_v33 = vsel %vm82_vm2, %v218_v23, %v217_v34  ;;  %v247_v53 = vrot.slane %v1258_v41, 6 }
  0x1f   :  { %v221_v54 = vsel %vm85_vm3, %v220_v39, %v219_v33  ;;  %v243_v55 = vsel %vm76_vm0, %v242_v59, %v241_v44  ;;  %v249_v56 = vrot.slane %v1267_v46, 5  ;;  %v251_v57 = vrot.slane %v1277_v51, 4 }
  0x20   :  { %v223_v58 = vsel %vm88_vm4, %v222_v43, %v221_v54  ;;  %v244_v21 = vsel %vm79_vm1, %v1243_v35, %v243_v55  ;;  %v253_v60 = vrot.slane %v1282_v52, 3  ;;  %v276_v61 = vrot.slane %v1143_v3, 3 }
  0x21   :  { %v225_v62 = vsel %vm91_vm5, %v224_v47, %v223_v58  ;;  %v246_v63 = vsel %vm82_vm2, %v245_v50, %v244_v21  ;;  %v277_v15 = vrot.slane %v1153_v5, 2  ;;  %v279_v16 = vrot.slane %v1166_v8, 1 }
  0x22   :  { %v204_v25 = vadd.f32 %v202_v0, %v200_v28  ;;  %v227_v26 = vsel %vm94_vm6, %v226_v48, %v225_v62  ;;  %v240_v14 = vrot.slane %v1180_v12, %v1191_v17  ;;  %v248_v23 = vsel %vm85_vm3, %v247_v53, %v246_v63 }
  0x23   :  { %v229_v31 = vmul.f32 %v227_v26, %v209_v22  ;;  %v230_v32 = vmul.f32 %v227_v26, %v213_v27  ;;  %v250_v36 = vsel %vm88_vm4, %v249_v56, %v248_v23  ;;  %v1368_v37 = vsub.s32 3, %v1133_v1 }
  0x24   :  { %v205_v38 = vadd.f32 %v203_v10, %v201_v20  ;;  %v252_v39 = vsel %vm91_vm5, %v251_v57, %v250_v36  ;;  %v278_v43 = vsel %vm76_vm0, %v277_v15, %v276_v61  ;;  %v282_v0 = vrot.slane %v1185_v13, 7 }
  0x25   :  { %v231_v44 = vadd.f32 %v229_v31, %v196_v45  ;;  %v232_v47 = vadd.f32 %v230_v32, %v197_v49  ;;  %v254_v48 = vsel %vm94_vm6, %v253_v60, %v252_v39  ;;  %v280_v34 = vsel %vm79_vm1, %v279_v16, %v278_v43 }
  0x26   :  { %v256_v59 = vmul.f32 %v254_v48, %v236_v42  ;;  %v257_v50 = vmul.f32 %v254_v48, %v240_v14  ;;  %v260_v28 = vmul.f32 %v254_v48, %v209_v22  ;;  %v261_v33 = vmul.f32 %v254_v48, %v213_v27 }
  0x27   :  { %v271_v53 = vrot.slane %v1138_v2, %v1368_v37  ;;  %v281_v10 = vsel %vm82_vm2, %v1171_v9, %v280_v34  ;;  %v284_v20 = vrot.slane %v1196_v18, 6  ;;  %v286_v54 = vrot.slane %v1201_v19, 5 }
  0x28   :  { %v264_v45 = vmul.f32 %v236_v42, %v227_v26  ;;  %v265_v49 = vmul.f32 %v240_v14, %v227_v26  ;;  %v275_v55 = vrot.slane %v1148_v4, %v1368_v37  ;;  %v288_v56 = vrot.slane %v1215_v24, 4 }
  0x29   :  { %v258_v57 = vsub.f32 %v231_v44, %v256_v59  ;;  %v259_v22 = vsub.f32 %v232_v47, %v257_v50  ;;  %v283_v27 = vsel %vm85_vm3, %v282_v0, %v281_v10  ;;  %v303_v58 = vrot.slane %v1225_v29, 3 }
  0x2a   :  { %v262_v21 = vadd.f32 %v260_v28, %v204_v25  ;;  %v263_v60 = vadd.f32 %v261_v33, %v205_v38  ;;  %v285_v61 = vsel %vm88_vm4, %v284_v20, %v283_v27  ;;  %v304_v62 = vrot.slane %v1230_v30, 2 }
  0x2b   :  { %v287_v42 = vsel %vm91_vm5, %v286_v54, %v285_v61  ;;  %v298_v63 = vrot.slane %v1161_v7, %v1368_v37  ;;  %v306_v15 = vrot.slane %v1243_v35, 1  ;;  %v309_v16 = vrot.slane %v1258_v41, 7 }
  0x2c   :  { %v289_v26 = vsel %vm94_vm6, %v288_v56, %v287_v42  ;;  %v302_v14 = vrot.slane %v1180_v12, %v1368_v37  ;;  %v305_v25 = vsel %vm76_vm0, %v304_v62, %v303_v58  ;;  %v311_v23 = vrot.slane %v1267_v46, 6 }
  0x2d   :  { %v291_v31 = vmul.f32 %v289_v26, %v271_v53  ;;  %v307_v32 = vsel %vm79_vm1, %v306_v15, %v305_v25  ;;  %v313_v36 = vrot.slane %v1277_v51, 5  ;;  %v315_v38 = vrot.slane %v1282_v52, 4 }
  0x2e   :  { %v292_v39 = vmul.f32 %v289_v26, %v275_v55  ;;  %v308_v43 = vsel %vm82_vm2, %v1253_v40, %v307_v32  ;;  %v1404_v0 = vsub.s32 4, %v1133_v1  ;;  %v338_v44 = vrot.slane %v1143_v3, 4 }
  0x2f   :  { %v266_v47 = vadd.f32 %v264_v45, %v262_v21  ;;  %v267_v48 = vadd.f32 %v265_v49, %v263_v60  ;;  %v310_v34 = vsel %vm85_vm3, %v309_v16, %v308_v43  ;;  %v339_v59 = vrot.slane %v1153_v5, 3 }
  0x30   :  { %v312_v50 = vsel %vm88_vm4, %v311_v23, %v310_v34  ;;  %v326_v28 = vmul.f32 %v298_v63, %v289_v26  ;;  %v327_v33 = vmul.f32 %v302_v14, %v289_v26  ;;  %v341_v10 = vrot.slane %v1166_v8, 2 }
  0x31   :  { %v293_v20 = vadd.f32 %v291_v31, %v258_v57  ;;  %v314_v54 = vsel %vm91_vm5, %v313_v36, %v312_v50  ;;  %v340_v56 = vsel %vm76_vm0, %v339_v59, %v338_v44  ;;  %v343_v27 = vrot.slane %v1171_v9, 1 }
  0x32   :  { %v294_v58 = vadd.f32 %v292_v39, %v259_v22  ;;  %v316_v45 = vsel %vm94_vm6, %v315_v38, %v314_v54  ;;  %v333_v49 = vrot.slane %v1138_v2, %v1404_v0  ;;  %v342_v21 = vsel %vm79_vm1, %v341_v10, %v340_v56 }
  0x33   :  { %v318_v60 = vmul.f32 %v316_v45, %v298_v63  ;;  %v322_v61 = vmul.f32 %v316_v45, %v271_v53  ;;  %v323_v62 = vmul.f32 %v316_v45, %v275_v55  ;;  %v346_v42 = vrot.slane %v1196_v18, 7 }
  0x34   :  { %v319_v57 = vmul.f32 %v316_v45, %v302_v14  ;;  %v344_v15 = vsel %vm82_vm2, %v343_v27, %v342_v21  ;;  %v348_v16 = vrot.slane %v1201_v19, 6  ;;  %v365_v26 = vrot.slane %v1225_v29, 4 }
  0x35   :  { %v337_v22 = vrot.slane %v1148_v4, %v1404_v0  ;;  %v350_v25 = vrot.slane %v1215_v24, 5  ;;  %v360_v23 = vrot.slane %v1161_v7, %v1404_v0  ;;  %v364_v53 = vrot.slane %v1180_v12, %v1404_v0 }
  0x36   :  { %v345_v55 = vsel %vm85_vm3, %v1185_v13, %v344_v15  ;;  %v366_v63 = vrot.slane %v1230_v30, 3  ;;  %v368_v14 = vrot.slane %v1243_v35, 2  ;;  %v370_v31 = vrot.slane %v1253_v40, 1 }
  0x37   :  { %v320_v32 = vsub.f32 %v293_v20, %v318_v60  ;;  %v324_v36 = vadd.f32 %v322_v61, %v266_v47  ;;  %v325_v38 = vadd.f32 %v323_v62, %v267_v48  ;;  %v347_v39 = vsel %vm88_vm4, %v346_v42, %v345_v55 }
  0x38   :  { %v321_v43 = vsub.f32 %v294_v58, %v319_v57  ;;  %v349_v44 = vsel %vm91_vm5, %v348_v16, %v347_v39  ;;  %v367_v34 = vsel %vm76_vm0, %v366_v63, %v365_v26  ;;  %v373_v59 = vrot.slane %v1267_v46, 7 }
  0x39   :  { %v351_v50 = vsel %vm94_vm6, %v350_v25, %v349_v44  ;;  %v369_v10 = vsel %vm79_vm1, %v368_v14, %v367_v34  ;;  %v375_v54 = vrot.slane %v1277_v51, 6  ;;  %v1442_v56 = vsub.s32 5, %v1133_v1 }
  0x3a   :  { %v353_v47 = vmul.f32 %v351_v50, %v333_v49  ;;  %v371_v48 = vsel %vm82_vm2, %v370_v31, %v369_v10  ;;  %v377_v20 = vrot.slane %v1282_v52, 5  ;;  %v400_v27 = vrot.slane %v1143_v3, 5 }
  0x3b   :  { %v328_v58 = vadd.f32 %v326_v28, %v324_v36  ;;  %v329_v45 = vadd.f32 %v327_v33, %v325_v38  ;;  %v354_v21 = vmul.f32 %v351_v50, %v337_v22  ;;  %v372_v60 = vsel %vm85_vm3, %v1258_v41, %v371_v48 }
  0x3c   :  { %v374_v61 = vsel %vm88_vm4, %v373_v59, %v372_v60  ;;  %v388_v62 = vmul.f32 %v360_v23, %v351_v50  ;;  %v389_v42 = vmul.f32 %v364_v53, %v351_v50  ;;  %v401_v57 = vrot.slane %v1153_v5, 4 }
  0x3d   :  { %v376_v15 = vsel %vm91_vm5, %v375_v54, %v374_v61  ;;  %v395_v16 = vrot.slane %v1138_v2, %v1442_v56  ;;  %v399_v26 = vrot.slane %v1148_v4, %v1442_v56  ;;  %v403_v28 = vrot.slane %v1166_v8, 3 }
  0x3e   :  { %v355_v33 = vadd.f32 %v353_v47, %v320_v32  ;;  %v378_v25 = vsel %vm94_vm6, %v377_v20, %v376_v15  ;;  %v402_v55 = vsel %vm76_vm0, %v401_v57, %v400_v27  ;;  %v405_v63 = vrot.slane %v1171_v9, 2 }
  0x3f   :  { %v356_v14 = vadd.f32 %v354_v21, %v321_v43  ;;  %v380_v31 = vmul.f32 %v378_v25, %v360_v23  ;;  %v384_v36 = vmul.f32 %v378_v25, %v333_v49  ;;  %v407_v38 = vrot.slane %v1185_v13, 1 }
  0x40   :  { %v385_v39 = vmul.f32 %v378_v25, %v337_v22  ;;  %v404_v44 = vsel %vm79_vm1, %v403_v28, %v402_v55  ;;  %v410_v34 = vrot.slane %v1201_v19, 7  ;;  %v427_v59 = vrot.slane %v1225_v29, 5 }
  0x41   :  { %v381_v50 = vmul.f32 %v378_v25, %v364_v53  ;;  %v412_v32 = vrot.slane %v1215_v24, 6  ;;  %v422_v10 = vrot.slane %v1161_v7, %v1442_v56  ;;  %v426_v43 = vrot.slane %v1180_v12, %v1442_v56 }
  0x42   :  { %v406_v49 = vsel %vm82_vm2, %v405_v63, %v404_v44  ;;  %v428_v23 = vrot.slane %v1230_v30, 4  ;;  %v430_v22 = vrot.slane %v1243_v35, 3  ;;  %v432_v54 = vrot.slane %v1253_v40, 2 }
  0x43   :  { %v382_v47 = vsub.f32 %v355_v33, %v380_v31  ;;  %v386_v48 = vadd.f32 %v384_v36, %v328_v58  ;;  %v408_v53 = vsel %vm85_vm3, %v407_v38, %v406_v49  ;;  %v434_v20 = vrot.slane %v1258_v41, 1 }
  0x44   :  { %v387_v27 = vadd.f32 %v385_v39, %v329_v45  ;;  %v409_v21 = vsel %vm88_vm4, %v1196_v18, %v408_v53  ;;  %v429_v60 = vsel %vm76_vm0, %v428_v23, %v427_v59  ;;  %v437_v61 = vrot.slane %v1277_v51, 7 }
  0x45   :  { %v411_v57 = vsel %vm91_vm5, %v410_v34, %v409_v21  ;;  %v431_v15 = vsel %vm79_vm1, %v430_v22, %v429_v60  ;;  %v439_v28 = vrot.slane %v1282_v52, 6  ;;  %v462_v58 = vrot.slane %v1143_v3, 6 }
  0x46   :  { %v413_v33 = vsel %vm94_vm6, %v412_v32, %v411_v57  ;;  %v433_v25 = vsel %vm82_vm2, %v432_v54, %v431_v15  ;;  %v463_v45 = vrot.slane %v1153_v5, 5  ;;  %v465_v55 = vrot.slane %v1166_v8, 4 }
  0x47   :  { %v383_v63 = vsub.f32 %v356_v14, %v381_v50  ;;  %v390_v31 = vadd.f32 %v388_v62, %v386_v48  ;;  %v415_v36 = vmul.f32 %v413_v33, %v395_v16  ;;  %v435_v38 = vsel %vm85_vm3, %v434_v20, %v433_v25 }
  0x48   :  { %v391_v39 = vadd.f32 %v389_v42, %v387_v27  ;;  %v416_v44 = vmul.f32 %v413_v33, %v399_v26  ;;  %v436_v34 = vsel %vm88_vm4, %v1267_v46, %v435_v38  ;;  %v1491_v59 = vsub.s32 6, %v1133_v1 }
  0x49   :  { %v417_v32 = vadd.f32 %v415_v36, %v382_v47  ;;  %v438_v49 = vsel %vm91_vm5, %v437_v61, %v436_v34  ;;  %v450_v23 = vmul.f32 %v422_v10, %v413_v33  ;;  %v464_v22 = vsel %vm76_vm0, %v463_v45, %v462_v58 }
  0x4a   :  { %v440_v14 = vsel %vm94_vm6, %v439_v28, %v438_v49  ;;  %v466_v62 = vsel %vm79_vm1, %v465_v55, %v464_v22  ;;  %v467_v50 = vrot.slane %v1171_v9, 3  ;;  %v469_v42 = vrot.slane %v1185_v13, 2 }
  0x4b   :  { %v442_v54 = vmul.f32 %v440_v14, %v422_v10  ;;  %v446_v48 = vmul.f32 %v440_v14, %v395_v16  ;;  %v447_v53 = vmul.f32 %v440_v14, %v399_v26  ;;  %v451_v20 = vmul.f32 %v426_v43, %v413_v33 }
  0x4c   :  { %v457_v47 = vrot.slane %v1138_v2, %v1491_v59  ;;  %v461_v27 = vrot.slane %v1148_v4, %v1491_v59  ;;  %v468_v21 = vsel %vm82_vm2, %v467_v50, %v466_v62  ;;  %v471_v60 = vrot.slane %v1196_v18, 1 }
  0x4d   :  { %v418_v61 = vadd.f32 %v416_v44, %v383_v63  ;;  %v443_v57 = vmul.f32 %v440_v14, %v426_v43  ;;  %v474_v15 = vrot.slane %v1215_v24, 7  ;;  %v484_v10 = vrot.slane %v1161_v7, %v1491_v59 }
  0x4e   :  { %v444_v16 = vsub.f32 %v417_v32, %v442_v54  ;;  %v470_v26 = vsel %vm85_vm3, %v469_v42, %v468_v21  ;;  %v489_v28 = vrot.slane %v1225_v29, 6  ;;  %v490_v58 = vrot.slane %v1230_v30, 5 }
  0x4f   :  { %v448_v33 = vadd.f32 %v446_v48, %v390_v31  ;;  %v449_v25 = vadd.f32 %v447_v53, %v391_v39  ;;  %v472_v45 = vsel %vm88_vm4, %v471_v60, %v470_v26  ;;  %v492_v55 = vrot.slane %v1243_v35, 4 }
  0x50   :  { %v473_v43 = vsel %vm91_vm5, %v1201_v19, %v472_v45  ;;  %v491_v63 = vsel %vm76_vm0, %v490_v58, %v489_v28  ;;  %v494_v36 = vrot.slane %v1253_v40, 3  ;;  %v496_v38 = vrot.slane %v1258_v41, 2 }
  0x51   :  { %v475_v44 = vsel %vm94_vm6, %v474_v15, %v473_v43  ;;  %v488_v34 = vrot.slane %v1180_v12, %v1491_v59  ;;  %v493_v31 = vsel %vm79_vm1, %v492_v55, %v491_v63  ;;  %v498_v39 = vrot.slane %v1267_v46, 1 }
  0x52   :  { %v445_v32 = vsub.f32 %v418_v61, %v443_v57  ;;  %v477_v49 = vmul.f32 %v475_v44, %v457_v47  ;;  %v495_v22 = vsel %vm82_vm2, %v494_v36, %v493_v31  ;;  %v501_v14 = vrot.slane %v1282_v52, 7 }
  0x53   :  { %v452_v62 = vadd.f32 %v450_v23, %v448_v33  ;;  %v453_v50 = vadd.f32 %v451_v20, %v449_v25  ;;  %v497_v42 = vsel %vm85_vm3, %v496_v38, %v495_v22  ;;  %v524_v54 = vrot.slane %v1143_v3, 7  ;;  %v1592_v22 = vld [vmem:[%s1999_s2 + $0x8] sm:$0xff] }
  0x54   :  { %v478_v48 = vmul.f32 %v475_v44, %v461_v27  ;;  %v499_v53 = vsel %vm88_vm4, %v498_v39, %v497_v42  ;;  %v1529_v21 = vsub.s32 7, %v1133_v1  ;;  %v525_v60 = vrot.slane %v1153_v5, 6  ;;  %v1581_v39 = vld [vmem:[%s1998_s0 + $0x18] sm:$0xff] }
  0x55   :  { %v500_v61 = vsel %vm91_vm5, %v1277_v51, %v499_v53  ;;  %v512_v57 = vmul.f32 %v484_v10, %v475_v44  ;;  %v513_v15 = vmul.f32 %v488_v34, %v475_v44  ;;  %v527_v23 = vrot.slane %v1166_v8, 5 }
  0x56   :  { %v479_v20 = vadd.f32 %v477_v49, %v444_v16  ;;  %v502_v26 = vsel %vm94_vm6, %v501_v14, %v500_v61  ;;  %v526_v3 = vsel %vm76_vm0, %v525_v60, %v524_v54  ;;  %v529_v28 = vrot.slane %v1171_v9, 4  ;;  %v1597_v14 = vld [vmem:[%s1999_s2 + $0x38] sm:$0xff] }
  0x57   :  { %v504_v58 = vmul.f32 %v502_v26, %v484_v10  ;;  %v508_v33 = vmul.f32 %v502_v26, %v457_v47  ;;  %v509_v1 = vmul.f32 %v502_v26, %v461_v27  ;;  %v531_v25 = vrot.slane %v1185_v13, 3  ;;  %v1611_v61 = vld [vmem:[%s1999_s2 + $0x58] sm:$0xff] }
  0x58   :  { %v1539_v5 = vadd.f32 %v478_v48, %v445_v32  ;;  %v519_v45 = vrot.slane %v1138_v2, %v1529_v21  ;;  %v528_v55 = vsel %vm79_vm1, %v527_v23, %v526_v3  ;;  %v533_v8 = vrot.slane %v1196_v18, 2  ;;  %v1630_v3 = vld [vmem:[%s1999_s2 + $0x68] sm:$0xff] }
  0x59   :  { %v505_v16 = vmul.f32 %v502_v26, %v488_v34  ;;  %v523_v43 = vrot.slane %v1148_v4, %v1529_v21  ;;  %v535_v9 = vrot.slane %v1201_v19, 1  ;;  %v546_v47 = vrot.slane %v1161_v7, %v1529_v21  ;;  %v1625_v26 = vld [vmem:[%s2000_s1 + $0x8] sm:$0xff] }
  0x5a   :  { %v506_v27 = vsub.f32 %v479_v20, %v504_v58  ;;  %v530_v13 = vsel %vm82_vm2, %v529_v28, %v528_v55  ;;  %v551_v10 = vrot.slane %v1225_v29, 7  ;;  %v552_v2 = vrot.slane %v1230_v30, 6  ;;  %v1562_v29 = vld [vmem:[%s1999_s2 + $0x18] sm:$0xff]  ;;  %v1567_v30 = vld [vmem:[%s1999_s2 + $0x28] sm:$0xff] }
  0x5b   :  { %v510_v63 = vadd.f32 %v508_v33, %v452_v62  ;;  %v511_v36 = vadd.f32 %v509_v1, %v453_v50  ;;  %v532_v18 = vsel %vm85_vm3, %v531_v25, %v530_v13  ;;  %v554_v38 = vrot.slane %v1243_v35, 5  ;;  %v1635_v28 = vld [vmem:[%s1999_s2 + $0x78] sm:$0xff]  ;;  %v1650_v55 = vld [vmem:[%s2001_s3 + $0x28] sm:$0xff] }
  0x5c   :  { %v534_v4 = vsel %vm88_vm4, %v533_v8, %v532_v18  ;;  %v553_v19 = vsel %vm76_vm0, %v552_v2, %v551_v10  ;;  %v556_v44 = vrot.slane %v1253_v40, 4  ;;  %v558_v7 = vrot.slane %v1258_v41, 3  ;;  %v1576_v41 = vld [vmem:[%s1998_s0 + $0x8] sm:$0xff] }
  0x5d   :  { %v536_v35 = vsel %vm91_vm5, %v535_v9, %v534_v4  ;;  %v555_v34 = vsel %vm79_vm1, %v554_v38, %v553_v19  ;;  %v560_v31 = vrot.slane %v1267_v46, 2  ;;  %v562_v40 = vrot.slane %v1277_v51, 1  ;;  %v1682_v19 = vld [vmem:[%s2001_s3 + $0x68] sm:$0xff] }
  0x5e   :  { %v507_v32 = vsub.f32 %v1539_v5, %v505_v16  ;;  %v537_v49 = vsel %vm94_vm6, %v1215_v24, %v536_v35  ;;  %v550_v46 = vrot.slane %v1180_v12, %v1529_v21  ;;  %v557_v51 = vsel %vm82_vm2, %v556_v44, %v555_v34  ;;  %v1603_v12 = vld [vmem:[%s1999_s2 + $0x48] sm:$0xff]  ;;  %v1645_v5 = vld [vmem:[%s2001_s3 + $0x18] sm:$0xff] }
  0x5f   :  { %v514_v62 = vadd.f32 %v512_v57, %v510_v63  ;;  %v515_v50 = vadd.f32 %v513_v15, %v511_v36  ;;  %v539_v42 = vmul.f32 %v537_v49, %v519_v45  ;;  %v559_v24 = vsel %vm85_vm3, %v558_v7, %v557_v51  ;;  %v1663_v36 = vld [vmem:[%s2001_s3 + $0x8] sm:$0xff] }
  0x60   :  { %v540_v54 = vmul.f32 %v537_v49, %v523_v43  ;;  %v561_v48 = vsel %vm88_vm4, %v560_v31, %v559_v24  ;;  %v594_v53 = vrot.slane %v1562_v29, 7  ;;  %v596_v60 = vrot.slane %v1567_v30, 6  ;;  %v1690_v31 = vld [vmem:[%s2000_s1 + $0x18] sm:$0xff] }
  0x61   :  { %v563_v57 = vsel %vm91_vm5, %v562_v40, %v561_v48  ;;  %v574_v15 = vmul.f32 %v546_v47, %v537_v49  ;;  %v1616_v23 = vrot.slane %v1576_v41, %v1156_v6  ;;  %v1620_v20 = vrot.slane %v1581_v39, %v1156_v6  ;;  %v1695_v40 = vld [vmem:[%s2001_s3 + $0x78] sm:$0xff] }
  0x62   :  { %v541_v58 = vadd.f32 %v539_v42, %v506_v27  ;;  %v564_v33 = vsel %vm94_vm6, %v1282_v52, %v563_v57  ;;  %v595_v1 = vsel %vm76_vm0, %v594_v53, %v1592_v22  ;;  %v598_v25 = vrot.slane %v1597_v14, 5  ;;  %v1656_v27 = vld [vmem:[%s2001_s3 + $0x38] sm:$0xff] }
  0x63   :  { %v566_v8 = vmul.f32 %v564_v33, %v546_v47  ;;  %v570_v16 = vmul.f32 %v564_v33, %v519_v45  ;;  %v571_v9 = vmul.f32 %v564_v33, %v523_v43  ;;  %v600_v52 = vrot.slane %v1603_v12, 4  ;;  %v1668_v45 = vld [vmem:[%s2001_s3 + $0x48] sm:$0xff]  ;;  %v1673_v43 = vld [vmem:[%s2001_s3 + $0x58] sm:$0xff] }
  0x64   :  { %v542_v13 = vadd.f32 %v540_v54, %v507_v32  ;;  %v575_v10 = vmul.f32 %v550_v46, %v537_v49  ;;  %v597_v2 = vsel %vm79_vm1, %v596_v60, %v595_v1  ;;  %v602_v63 = vrot.slane %v1611_v61, 3 }
  0x65   :  { %v567_v47 = vmul.f32 %v564_v33, %v550_v46  ;;  %v604_v18 = vrot.slane %v1630_v3, 2  ;;  %v606_v38 = vrot.slane %v1635_v28, 1  ;;  %v616_v4 = vrot.slane %v1625_v26, %v1156_v6 }
  0x66   :  { %v568_v44 = vsub.f32 %v541_v58, %v566_v8  ;;  %v599_v7 = vsel %vm82_vm2, %v598_v25, %v597_v2  ;;  %v629_v35 = vrot.slane %v1645_v5, 7  ;;  %v631_v34 = vrot.slane %v1650_v55, 6 }
  0x67   :  { %v572_v32 = vadd.f32 %v570_v16, %v514_v62  ;;  %v573_v49 = vadd.f32 %v571_v9, %v515_v50  ;;  %v601_v46 = vsel %vm85_vm3, %v600_v52, %v599_v7  ;;  %v633_v51 = vrot.slane %v1656_v27, 5 }
  0x68   :  { %v603_v42 = vsel %vm88_vm4, %v602_v63, %v601_v46  ;;  %v630_v24 = vsel %vm76_vm0, %v629_v35, %v1663_v36  ;;  %v635_v54 = vrot.slane %v1668_v45, 4  ;;  %v637_v48 = vrot.slane %v1673_v43, 3 }
  0x69   :  { %v569_v53 = vsub.f32 %v542_v13, %v567_v47  ;;  %v605_v60 = vsel %vm91_vm5, %v604_v18, %v603_v42  ;;  %v632_v57 = vsel %vm79_vm1, %v631_v34, %v630_v24  ;;  %v639_v62 = vrot.slane %v1682_v19, 2 }
  0x6a   :  { %v607_v50 = vsel %vm94_vm6, %v606_v38, %v605_v60  ;;  %v620_v58 = vrot.slane %v1690_v31, %v1156_v6  ;;  %v634_v33 = vsel %vm82_vm2, %v633_v51, %v632_v57  ;;  %v641_v1 = vrot.slane %v1695_v40, 1 }
  0x6b   :  { %v576_v25 = vadd.f32 %v574_v15, %v572_v32  ;;  %v577_v8 = vadd.f32 %v575_v10, %v573_v49  ;;  %v609_v16 = vmul.f32 %v607_v50, %v1616_v23  ;;  %v636_v9 = vsel %vm85_vm3, %v635_v54, %v634_v33 }
  0x6c   :  { %v610_v52 = vmul.f32 %v607_v50, %v1620_v20  ;;  %v638_v13 = vsel %vm88_vm4, %v637_v48, %v636_v9  ;;  %v664_v2 = vrot.slane %v1592_v22, 1  ;;  %v666_v63 = vrot.slane %v1567_v30, 7 }
  0x6d   :  { %v640_v6 = vsel %vm91_vm5, %v639_v62, %v638_v13  ;;  %v652_v47 = vmul.f32 %v616_v4, %v607_v50  ;;  %v659_v18 = vrot.slane %v1576_v41, %v1175_v11  ;;  %v663_v15 = vrot.slane %v1581_v39, %v1175_v11 }
  0x6e   :  { %v611_v10 = vadd.f32 %v609_v16, %v568_v44  ;;  %v642_v38 = vsel %vm94_vm6, %v641_v1, %v640_v6  ;;  %v665_v7 = vsel %vm76_vm0, %v1562_v29, %v664_v2  ;;  %v668_v35 = vrot.slane %v1597_v14, 6 }
  0x6f   :  { %v644_v34 = vmul.f32 %v642_v38, %v616_v4  ;;  %v648_v32 = vmul.f32 %v642_v38, %v1616_v23  ;;  %v649_v49 = vmul.f32 %v642_v38, %v1620_v20  ;;  %v670_v46 = vrot.slane %v1603_v12, 5 }
  0x70   :  { %v612_v51 = vadd.f32 %v610_v52, %v569_v53  ;;  %v653_v42 = vmul.f32 %v620_v58, %v607_v50  ;;  %v667_v24 = vsel %vm79_vm1, %v666_v63, %v665_v7  ;;  %v672_v44 = vrot.slane %v1611_v61, 4 }
  0x71   :  { %v645_v54 = vmul.f32 %v642_v38, %v620_v58  ;;  %v674_v48 = vrot.slane %v1630_v3, 3  ;;  %v676_v60 = vrot.slane %v1635_v28, 2  ;;  %v686_v4 = vrot.slane %v1625_v26, %v1175_v11 }
  0x72   :  { %v646_v57 = vsub.f32 %v611_v10, %v644_v34  ;;  %v669_v23 = vsel %vm82_vm2, %v668_v35, %v667_v24  ;;  %v691_v20 = vrot.slane %v1663_v36, 1  ;;  %v693_v53 = vrot.slane %v1650_v55, 7 }
  0x73   :  { %v650_v62 = vadd.f32 %v648_v32, %v576_v25  ;;  %v651_v50 = vadd.f32 %v649_v49, %v577_v8  ;;  %v671_v33 = vsel %vm85_vm3, %v670_v46, %v669_v23  ;;  %v695_v58 = vrot.slane %v1656_v27, 6 }
  0x74   :  { %v673_v1 = vsel %vm88_vm4, %v672_v44, %v671_v33  ;;  %v692_v16 = vsel %vm76_vm0, %v1645_v5, %v691_v20  ;;  %v697_v9 = vrot.slane %v1668_v45, 5  ;;  %v699_v52 = vrot.slane %v1673_v43, 4 }
  0x75   :  { %v647_v13 = vsub.f32 %v612_v51, %v645_v54  ;;  %v675_v2 = vsel %vm91_vm5, %v674_v48, %v673_v1  ;;  %v694_v63 = vsel %vm79_vm1, %v693_v53, %v692_v16  ;;  %v701_v25 = vrot.slane %v1682_v19, 3 }
  0x76   :  { %v677_v8 = vsel %vm94_vm6, %v676_v60, %v675_v2  ;;  %v690_v6 = vrot.slane %v1690_v31, %v1175_v11  ;;  %v696_v10 = vsel %vm82_vm2, %v695_v58, %v694_v63  ;;  %v703_v38 = vrot.slane %v1695_v40, 2 }
  0x77   :  { %v654_v7 = vadd.f32 %v652_v47, %v650_v62  ;;  %v655_v35 = vadd.f32 %v653_v42, %v651_v50  ;;  %v679_v34 = vmul.f32 %v677_v8, %v659_v18  ;;  %v698_v32 = vsel %vm85_vm3, %v697_v9, %v696_v10 }
  0x78   :  { %v680_v49 = vmul.f32 %v677_v8, %v663_v15  ;;  %v700_v46 = vsel %vm88_vm4, %v699_v52, %v698_v32  ;;  %v726_v51 = vrot.slane %v1592_v22, 2  ;;  %v727_v24 = vrot.slane %v1562_v29, 1 }
  0x79   :  { %v702_v44 = vsel %vm91_vm5, %v701_v25, %v700_v46  ;;  %v714_v54 = vmul.f32 %v686_v4, %v677_v8  ;;  %v721_v11 = vrot.slane %v1576_v41, %v1191_v17  ;;  %v725_v47 = vrot.slane %v1581_v39, %v1191_v17 }
  0x7a   :  { %v681_v42 = vadd.f32 %v679_v34, %v646_v57  ;;  %v704_v48 = vsel %vm94_vm6, %v703_v38, %v702_v44  ;;  %v728_v60 = vsel %vm76_vm0, %v727_v24, %v726_v51  ;;  %v730_v23 = vrot.slane %v1597_v14, 7 }
  0x7b   :  { %v706_v20 = vmul.f32 %v704_v48, %v686_v4  ;;  %v710_v53 = vmul.f32 %v704_v48, %v659_v18  ;;  %v711_v62 = vmul.f32 %v704_v48, %v663_v15  ;;  %v732_v50 = vrot.slane %v1603_v12, 6 }
  0x7c   :  { %v682_v33 = vadd.f32 %v680_v49, %v647_v13  ;;  %v715_v58 = vmul.f32 %v690_v6, %v677_v8  ;;  %v729_v1 = vsel %vm79_vm1, %v1567_v30, %v728_v60  ;;  %v734_v16 = vrot.slane %v1611_v61, 5 }
  0x7d   :  { %v707_v9 = vmul.f32 %v704_v48, %v690_v6  ;;  %v736_v57 = vrot.slane %v1630_v3, 4  ;;  %v738_v52 = vrot.slane %v1635_v28, 3  ;;  %v748_v2 = vrot.slane %v1625_v26, %v1191_v17 }
  0x7e   :  { %v708_v4 = vsub.f32 %v681_v42, %v706_v20  ;;  %v731_v18 = vsel %vm82_vm2, %v730_v23, %v729_v1  ;;  %v753_v15 = vrot.slane %v1663_v36, 2  ;;  %v754_v13 = vrot.slane %v1645_v5, 1 }
  0x7f   :  { %v712_v63 = vadd.f32 %v710_v53, %v654_v7  ;;  %v713_v25 = vadd.f32 %v711_v62, %v655_v35  ;;  %v733_v8 = vsel %vm85_vm3, %v732_v50, %v731_v18  ;;  %v757_v6 = vrot.slane %v1656_v27, 7 }
  0x80   :  { %v735_v10 = vsel %vm88_vm4, %v734_v16, %v733_v8  ;;  %v755_v38 = vsel %vm76_vm0, %v754_v13, %v753_v15  ;;  %v759_v34 = vrot.slane %v1668_v45, 6  ;;  %v761_v32 = vrot.slane %v1673_v43, 5 }
  0x81   :  { %v709_v49 = vsub.f32 %v682_v33, %v707_v9  ;;  %v737_v46 = vsel %vm91_vm5, %v736_v57, %v735_v10  ;;  %v756_v51 = vsel %vm79_vm1, %v1650_v55, %v755_v38  ;;  %v763_v7 = vrot.slane %v1682_v19, 4 }
  0x82   :  { %v739_v35 = vsel %vm94_vm6, %v738_v52, %v737_v46  ;;  %v752_v24 = vrot.slane %v1690_v31, %v1191_v17  ;;  %v758_v44 = vsel %vm82_vm2, %v757_v6, %v756_v51  ;;  %v765_v42 = vrot.slane %v1695_v40, 3 }
  0x83   :  { %v716_v48 = vadd.f32 %v714_v54, %v712_v63  ;;  %v717_v60 = vadd.f32 %v715_v58, %v713_v25  ;;  %v741_v23 = vmul.f32 %v739_v35, %v721_v11  ;;  %v760_v20 = vsel %vm85_vm3, %v759_v34, %v758_v44 }
  0x84   :  { %v742_v53 = vmul.f32 %v739_v35, %v725_v47  ;;  %v762_v62 = vsel %vm88_vm4, %v761_v32, %v760_v20  ;;  %v788_v50 = vrot.slane %v1592_v22, 3  ;;  %v789_v33 = vrot.slane %v1562_v29, 2 }
  0x85   :  { %v764_v1 = vsel %vm91_vm5, %v763_v7, %v762_v62  ;;  %v783_v17 = vrot.slane %v1576_v41, %v1368_v37  ;;  %v787_v16 = vrot.slane %v1581_v39, %v1368_v37  ;;  %v791_v54 = vrot.slane %v1567_v30, 1 }
  0x86   :  { %v743_v58 = vadd.f32 %v741_v23, %v708_v4  ;;  %v766_v9 = vsel %vm94_vm6, %v765_v42, %v764_v1  ;;  %v776_v57 = vmul.f32 %v748_v2, %v739_v35  ;;  %v790_v52 = vsel %vm76_vm0, %v789_v33, %v788_v50 }
  0x87   :  { %v768_v18 = vmul.f32 %v766_v9, %v748_v2  ;;  %v772_v15 = vmul.f32 %v766_v9, %v721_v11  ;;  %v773_v13 = vmul.f32 %v766_v9, %v725_v47  ;;  %v794_v63 = vrot.slane %v1603_v12, 7 }
  0x88   :  { %v744_v25 = vadd.f32 %v742_v53, %v709_v49  ;;  %v777_v8 = vmul.f32 %v752_v24, %v739_v35  ;;  %v792_v6 = vsel %vm79_vm1, %v791_v54, %v790_v52  ;;  %v796_v10 = vrot.slane %v1611_v61, 6 }
  0x89   :  { %v769_v38 = vmul.f32 %v766_v9, %v752_v24  ;;  %v798_v34 = vrot.slane %v1630_v3, 5  ;;  %v800_v4 = vrot.slane %v1635_v28, 4  ;;  %v810_v32 = vrot.slane %v1625_v26, %v1368_v37 }
  0x8a   :  { %v770_v46 = vsub.f32 %v743_v58, %v768_v18  ;;  %v793_v11 = vsel %vm82_vm2, %v1597_v14, %v792_v6  ;;  %v815_v47 = vrot.slane %v1663_v36, 3  ;;  %v816_v2 = vrot.slane %v1645_v5, 2 }
  0x8b   :  { %v774_v49 = vadd.f32 %v772_v15, %v716_v48  ;;  %v775_v51 = vadd.f32 %v773_v13, %v717_v60  ;;  %v795_v7 = vsel %vm85_vm3, %v794_v63, %v793_v11  ;;  %v818_v35 = vrot.slane %v1650_v55, 1 }
  0x8c   :  { %v797_v24 = vsel %vm88_vm4, %v796_v10, %v795_v7  ;;  %v817_v44 = vsel %vm76_vm0, %v816_v2, %v815_v47  ;;  %v821_v42 = vrot.slane %v1668_v45, 7  ;;  %v823_v23 = vrot.slane %v1673_v43, 6 }
  0x8d   :  { %v771_v20 = vsub.f32 %v744_v25, %v769_v38  ;;  %v799_v53 = vsel %vm91_vm5, %v798_v34, %v797_v24  ;;  %v819_v62 = vsel %vm79_vm1, %v818_v35, %v817_v44  ;;  %v825_v48 = vrot.slane %v1682_v19, 5 }
  0x8e   :  { %v801_v60 = vsel %vm94_vm6, %v800_v4, %v799_v53  ;;  %v814_v50 = vrot.slane %v1690_v31, %v1368_v37  ;;  %v820_v33 = vsel %vm82_vm2, %v1656_v27, %v819_v62  ;;  %v827_v1 = vrot.slane %v1695_v40, 4 }
  0x8f   :  { %v778_v54 = vadd.f32 %v776_v57, %v774_v49  ;;  %v779_v58 = vadd.f32 %v777_v8, %v775_v51  ;;  %v803_v9 = vmul.f32 %v801_v60, %v783_v17  ;;  %v822_v52 = vsel %vm85_vm3, %v821_v42, %v820_v33 }
  0x90   :  { %v804_v18 = vmul.f32 %v801_v60, %v787_v16  ;;  %v824_v15 = vsel %vm88_vm4, %v823_v23, %v822_v52  ;;  %v850_v13 = vrot.slane %v1592_v22, 4  ;;  %v851_v63 = vrot.slane %v1562_v29, 3 }
  0x91   :  { %v826_v25 = vsel %vm91_vm5, %v825_v48, %v824_v15  ;;  %v845_v37 = vrot.slane %v1576_v41, %v1404_v0  ;;  %v849_v6 = vrot.slane %v1581_v39, %v1404_v0  ;;  %v853_v57 = vrot.slane %v1567_v30, 2 }
  0x92   :  { %v805_v8 = vadd.f32 %v803_v9, %v770_v46  ;;  %v828_v10 = vsel %vm94_vm6, %v827_v1, %v826_v25  ;;  %v852_v38 = vsel %vm76_vm0, %v851_v63, %v850_v13  ;;  %v855_v34 = vrot.slane %v1597_v14, 1 }
  0x93   :  { %v830_v4 = vmul.f32 %v828_v10, %v810_v32  ;;  %v834_v11 = vmul.f32 %v828_v10, %v783_v17  ;;  %v835_v47 = vmul.f32 %v828_v10, %v787_v16  ;;  %v838_v2 = vmul.f32 %v810_v32, %v801_v60 }
  0x94   :  { %v806_v49 = vadd.f32 %v804_v18, %v771_v20  ;;  %v839_v51 = vmul.f32 %v814_v50, %v801_v60  ;;  %v854_v7 = vsel %vm79_vm1, %v853_v57, %v852_v38  ;;  %v858_v35 = vrot.slane %v1611_v61, 7 }
  0x95   :  { %v831_v24 = vmul.f32 %v828_v10, %v814_v50  ;;  %v860_v44 = vrot.slane %v1630_v3, 6  ;;  %v862_v46 = vrot.slane %v1635_v28, 5  ;;  %v872_v42 = vrot.slane %v1625_v26, %v1404_v0 }
  0x96   :  { %v832_v23 = vsub.f32 %v805_v8, %v830_v4  ;;  %v856_v53 = vsel %vm82_vm2, %v855_v34, %v854_v7  ;;  %v877_v17 = vrot.slane %v1663_v36, 4  ;;  %v878_v16 = vrot.slane %v1645_v5, 3 }
  0x97   :  { %v836_v32 = vadd.f32 %v834_v11, %v778_v54  ;;  %v837_v20 = vadd.f32 %v835_v47, %v779_v58  ;;  %v857_v62 = vsel %vm85_vm3, %v1603_v12, %v856_v53  ;;  %v880_v48 = vrot.slane %v1650_v55, 2 }
  0x98   :  { %v859_v60 = vsel %vm88_vm4, %v858_v35, %v857_v62  ;;  %v879_v50 = vsel %vm76_vm0, %v878_v16, %v877_v17  ;;  %v882_v33 = vrot.slane %v1656_v27, 1  ;;  %v885_v1 = vrot.slane %v1673_v43, 7 }
  0x99   :  { %v833_v9 = vsub.f32 %v806_v49, %v831_v24  ;;  %v861_v52 = vsel %vm91_vm5, %v860_v44, %v859_v60  ;;  %v881_v18 = vsel %vm79_vm1, %v880_v48, %v879_v50  ;;  %v887_v54 = vrot.slane %v1682_v19, 6 }
  0x9a   :  { %v863_v58 = vsel %vm94_vm6, %v862_v46, %v861_v52  ;;  %v876_v15 = vrot.slane %v1690_v31, %v1404_v0  ;;  %v883_v13 = vsel %vm82_vm2, %v882_v33, %v881_v18  ;;  %v889_v63 = vrot.slane %v1695_v40, 5 }
  0x9b   :  { %v840_v25 = vadd.f32 %v838_v2, %v836_v32  ;;  %v841_v57 = vadd.f32 %v839_v51, %v837_v20  ;;  %v865_v8 = vmul.f32 %v863_v58, %v845_v37  ;;  %v884_v10 = vsel %vm85_vm3, %v1668_v45, %v883_v13 }
  0x9c   :  { %v866_v38 = vmul.f32 %v863_v58, %v849_v6  ;;  %v886_v34 = vsel %vm88_vm4, %v885_v1, %v884_v10  ;;  %v912_v4 = vrot.slane %v1592_v22, 5  ;;  %v913_v11 = vrot.slane %v1562_v29, 4 }
  0x9d   :  { %v888_v47 = vsel %vm91_vm5, %v887_v54, %v886_v34  ;;  %v907_v0 = vrot.slane %v1576_v41, %v1442_v56  ;;  %v911_v2 = vrot.slane %v1581_v39, %v1442_v56  ;;  %v915_v49 = vrot.slane %v1567_v30, 3 }
  0x9e   :  { %v867_v51 = vadd.f32 %v865_v8, %v832_v23  ;;  %v890_v7 = vsel %vm94_vm6, %v889_v63, %v888_v47  ;;  %v914_v35 = vsel %vm76_vm0, %v913_v11, %v912_v4  ;;  %v917_v24 = vrot.slane %v1597_v14, 2 }
  0x9f   :  { %v892_v44 = vmul.f32 %v890_v7, %v872_v42  ;;  %v896_v46 = vmul.f32 %v890_v7, %v845_v37  ;;  %v897_v53 = vmul.f32 %v890_v7, %v849_v6  ;;  %v919_v17 = vrot.slane %v1603_v12, 1 }
  0xa0   :  { %v868_v16 = vadd.f32 %v866_v38, %v833_v9  ;;  %v900_v32 = vmul.f32 %v872_v42, %v863_v58  ;;  %v901_v20 = vmul.f32 %v876_v15, %v863_v58  ;;  %v916_v62 = vsel %vm79_vm1, %v915_v49, %v914_v35 }
  0xa1   :  { %v893_v48 = vmul.f32 %v890_v7, %v876_v15  ;;  %v922_v60 = vrot.slane %v1630_v3, 7  ;;  %v924_v23 = vrot.slane %v1635_v28, 6  ;;  %v934_v50 = vrot.slane %v1625_v26, %v1442_v56 }
  0xa2   :  { %v894_v33 = vsub.f32 %v867_v51, %v892_v44  ;;  %v918_v1 = vsel %vm82_vm2, %v917_v24, %v916_v62  ;;  %v939_v37 = vrot.slane %v1663_v36, 5  ;;  %v940_v6 = vrot.slane %v1645_v5, 4 }
  0xa3   :  { %v898_v9 = vadd.f32 %v896_v46, %v840_v25  ;;  %v899_v42 = vadd.f32 %v897_v53, %v841_v57  ;;  %v920_v52 = vsel %vm85_vm3, %v919_v17, %v918_v1  ;;  %v942_v18 = vrot.slane %v1650_v55, 3 }
  0xa4   :  { %v921_v54 = vsel %vm88_vm4, %v1611_v61, %v920_v52  ;;  %v941_v58 = vsel %vm76_vm0, %v940_v6, %v939_v37  ;;  %v944_v15 = vrot.slane %v1656_v27, 2  ;;  %v946_v13 = vrot.slane %v1668_v45, 1 }
  0xa5   :  { %v895_v63 = vsub.f32 %v868_v16, %v893_v48  ;;  %v923_v8 = vsel %vm91_vm5, %v922_v60, %v921_v54  ;;  %v943_v10 = vsel %vm79_vm1, %v942_v18, %v941_v58  ;;  %v949_v25 = vrot.slane %v1682_v19, 7 }
  0xa6   :  { %v925_v57 = vsel %vm94_vm6, %v924_v23, %v923_v8  ;;  %v938_v38 = vrot.slane %v1690_v31, %v1442_v56  ;;  %v945_v34 = vsel %vm82_vm2, %v944_v15, %v943_v10  ;;  %v951_v4 = vrot.slane %v1695_v40, 6 }
  0xa7   :  { %v902_v11 = vadd.f32 %v900_v32, %v898_v9  ;;  %v903_v47 = vadd.f32 %v901_v20, %v899_v42  ;;  %v927_v49 = vmul.f32 %v925_v57, %v907_v0  ;;  %v947_v51 = vsel %vm85_vm3, %v946_v13, %v945_v34 }
  0xa8   :  { %v948_v7 = vsel %vm88_vm4, %v1673_v43, %v947_v51  ;;  %v969_v35 = vrot.slane %v1576_v41, %v1491_v59  ;;  %v974_v24 = vrot.slane %v1592_v22, 6  ;;  %v975_v44 = vrot.slane %v1562_v29, 5 }
  0xa9   :  { %v928_v56 = vmul.f32 %v925_v57, %v911_v2  ;;  %v950_v46 = vsel %vm91_vm5, %v949_v25, %v948_v7  ;;  %v973_v53 = vrot.slane %v1581_v39, %v1491_v59  ;;  %v977_v17 = vrot.slane %v1567_v30, 4 }
  0xaa   :  { %v929_v16 = vadd.f32 %v927_v49, %v894_v33  ;;  %v952_v32 = vsel %vm94_vm6, %v951_v4, %v950_v46  ;;  %v976_v20 = vsel %vm76_vm0, %v975_v44, %v974_v24  ;;  %v979_v62 = vrot.slane %v1597_v14, 3 }
  0xab   :  { %v954_v48 = vmul.f32 %v952_v32, %v934_v50  ;;  %v958_v60 = vmul.f32 %v952_v32, %v907_v0  ;;  %v959_v23 = vmul.f32 %v952_v32, %v911_v2  ;;  %v981_v1 = vrot.slane %v1603_v12, 2 }
  0xac   :  { %v962_v37 = vmul.f32 %v934_v50, %v925_v57  ;;  %v963_v6 = vmul.f32 %v938_v38, %v925_v57  ;;  %v978_v9 = vsel %vm79_vm1, %v977_v17, %v976_v20  ;;  %v983_v42 = vrot.slane %v1611_v61, 1 }
  0xad   :  { %v930_v52 = vadd.f32 %v928_v56, %v895_v63  ;;  %v955_v18 = vmul.f32 %v952_v32, %v938_v38  ;;  %v986_v33 = vrot.slane %v1635_v28, 7  ;;  %v996_v54 = vrot.slane %v1625_v26, %v1491_v59 }
  0xae   :  { %v956_v58 = vsub.f32 %v929_v16, %v954_v48  ;;  %v980_v15 = vsel %vm82_vm2, %v979_v62, %v978_v9  ;;  %v1001_v0 = vrot.slane %v1663_v36, 6  ;;  %v1002_v2 = vrot.slane %v1645_v5, 5 }
  0xaf   :  { %v960_v50 = vadd.f32 %v958_v60, %v902_v11  ;;  %v961_v13 = vadd.f32 %v959_v23, %v903_v47  ;;  %v982_v8 = vsel %vm85_vm3, %v981_v1, %v980_v15  ;;  %v1004_v10 = vrot.slane %v1650_v55, 4 }
  0xb0   :  { %v984_v63 = vsel %vm88_vm4, %v983_v42, %v982_v8  ;;  %v1003_v25 = vsel %vm76_vm0, %v1002_v2, %v1001_v0  ;;  %v1006_v57 = vrot.slane %v1656_v27, 3  ;;  %v1008_v38 = vrot.slane %v1668_v45, 2 }
  0xb1   :  { %v957_v34 = vsub.f32 %v930_v52, %v955_v18  ;;  %v985_v4 = vsel %vm91_vm5, %v1630_v3, %v984_v63  ;;  %v1005_v49 = vsel %vm79_vm1, %v1004_v10, %v1003_v25  ;;  %v1010_v11 = vrot.slane %v1673_v43, 1 }
  0xb2   :  { %v987_v47 = vsel %vm94_vm6, %v986_v33, %v985_v4  ;;  %v1000_v51 = vrot.slane %v1690_v31, %v1491_v59  ;;  %v1007_v7 = vsel %vm82_vm2, %v1006_v57, %v1005_v49  ;;  %v1013_v24 = vrot.slane %v1695_v40, 7 }
  0xb3   :  { %v964_v44 = vadd.f32 %v962_v37, %v960_v50  ;;  %v989_v56 = vmul.f32 %v987_v47, %v969_v35  ;;  %v990_v46 = vmul.f32 %v987_v47, %v973_v53  ;;  %v1009_v17 = vsel %vm85_vm3, %v1008_v38, %v1007_v7 }
  0xb4   :  { %v965_v16 = vadd.f32 %v963_v6, %v961_v13  ;;  %v1011_v32 = vsel %vm88_vm4, %v1010_v11, %v1009_v17  ;;  %v1036_v20 = vrot.slane %v1592_v22, 7  ;;  %v1037_v62 = vrot.slane %v1562_v29, 6 }
  0xb5   :  { %v991_v48 = vadd.f32 %v989_v56, %v956_v58  ;;  %v992_v60 = vadd.f32 %v990_v46, %v957_v34  ;;  %v1012_v59 = vsel %vm91_vm5, %v1682_v19, %v1011_v32  ;;  %v1039_v23 = vrot.slane %v1567_v30, 5 }
  0xb6   :  { %v1014_v1 = vsel %vm94_vm6, %v1013_v24, %v1012_v59  ;;  %v1038_v37 = vsel %vm76_vm0, %v1037_v62, %v1036_v20  ;;  %v1041_v9 = vrot.slane %v1597_v14, 4  ;;  %v1043_v6 = vrot.slane %v1603_v12, 3 }
  0xb7   :  { %v1016_v42 = vmul.f32 %v1014_v1, %v996_v54  ;;  %v1017_v52 = vmul.f32 %v1014_v1, %v1000_v51  ;;  %v1020_v22 = vmul.f32 %v1014_v1, %v969_v35  ;;  %v1021_v18 = vmul.f32 %v1014_v1, %v973_v53 }
  0xb8   :  { %v1031_v29 = vrot.slane %v1576_v41, %v1529_v21  ;;  %v1035_v33 = vrot.slane %v1581_v39, %v1529_v21  ;;  %v1040_v30 = vsel %vm79_vm1, %v1039_v23, %v1038_v37  ;;  %v1045_v58 = vrot.slane %v1611_v61, 2 }
  0xb9   :  { %v1018_v15 = vsub.f32 %v991_v48, %v1016_v42  ;;  %v1024_v0 = vmul.f32 %v996_v54, %v987_v47  ;;  %v1025_v2 = vmul.f32 %v1000_v51, %v987_v47  ;;  %v1047_v14 = vrot.slane %v1630_v3, 1 }
  0xba   :  { %v1019_v12 = vsub.f32 %v992_v60, %v1017_v52  ;;  %v1042_v50 = vsel %vm82_vm2, %v1041_v9, %v1040_v30  ;;  %v1063_v35 = vrot.slane %v1663_v36, 7  ;;  %v1064_v53 = vrot.slane %v1645_v5, 6 }
  0xbb   :  { %v1022_v41 = vadd.f32 %v1020_v22, %v964_v44  ;;  %v1023_v13 = vadd.f32 %v1021_v18, %v965_v16  ;;  %v1044_v39 = vsel %vm85_vm3, %v1043_v6, %v1042_v50  ;;  %v1066_v8 = vrot.slane %v1650_v55, 5 }
  0xbc   :  { %v1046_v61 = vsel %vm88_vm4, %v1045_v58, %v1044_v39  ;;  %v1065_v54 = vsel %vm76_vm0, %v1064_v53, %v1063_v35  ;;  %v1068_v10 = vrot.slane %v1656_v27, 4  ;;  %v1070_v3 = vrot.slane %v1668_v45, 3 }
  0xbd   :  { %v1048_v63 = vsel %vm91_vm5, %v1047_v14, %v1046_v61  ;;  %v1067_v36 = vsel %vm79_vm1, %v1066_v8, %v1065_v54  ;;  %v1072_v5 = vrot.slane %v1673_v43, 2  ;;  %v1074_v25 = vrot.slane %v1682_v19, 1 }
  0xbe   :  { %v1049_v57 = vsel %vm94_vm6, %v1635_v28, %v1048_v63  ;;  %v1058_v55 = vrot.slane %v1625_v26, %v1529_v21  ;;  %v1062_v38 = vrot.slane %v1690_v31, %v1529_v21  ;;  %v1069_v27 = vsel %vm82_vm2, %v1068_v10, %v1067_v36 }
  0xbf   :  { %v1051_v45 = vmul.f32 %v1049_v57, %v1031_v29  ;;  %v1052_v34 = vmul.f32 %v1049_v57, %v1035_v33  ;;  %v1071_v4 = vsel %vm85_vm3, %v1070_v3, %v1069_v27  ;;  %v1026_v49 = vadd.f32 %v1024_v0, %v1022_v41 }
  0xc0   :  { %v1073_v43 = vsel %vm88_vm4, %v1072_v5, %v1071_v4  ;;  %v1027_v11 = vadd.f32 %v1025_v2, %v1023_v13  ;;  %v1086_v51 = vmul.f32 %v1058_v55, %v1049_v57  ;;  %v1087_v7 = vmul.f32 %v1062_v38, %v1049_v57 }
  0xc1   :  { %v1053_v19 = vadd.f32 %v1051_v45, %v1018_v15  ;;  %v1054_v47 = vadd.f32 %v1052_v34, %v1019_v12  ;;  %v1075_v28 = vsel %vm91_vm5, %v1074_v25, %v1073_v43 }
  0xc2   :  { %v1076_v26 = vsel %vm94_vm6, %v1695_v40, %v1075_v28 }
  0xc3   :  { %v1078_v21 = vmul.f32 %v1076_v26, %v1058_v55  ;;  %v1079_v31 = vmul.f32 %v1076_v26, %v1062_v38  ;;  %v1082_v24 = vmul.f32 %v1076_v26, %v1031_v29  ;;  %v1083_v44 = vmul.f32 %v1076_v26, %v1035_v33 }
  0xc5   :  { %v1080_v56 = vsub.f32 %v1053_v19, %v1078_v21  ;;  %v1081_v46 = vsub.f32 %v1054_v47, %v1079_v31  ;;  %v1084_v17 = vadd.f32 %v1082_v24, %v1026_v49  ;;  %v1085_v16 = vadd.f32 %v1083_v44, %v1027_v11 }
  0xc7   :  { %v1088_v32 = vadd.f32 %v1086_v51, %v1084_v17  ;;  %v1089_v20 = vadd.f32 %v1087_v7, %v1085_v16  ;;  %1091 = vst.msk [vmem:[%s2002_s4] sm:$0xff] %vm1090_vm7, %v1080_v56  ;;  %1092 = vst.msk [vmem:[%s2002_s4 + $0x8] sm:$0xff] %vm1090_vm7, %v1081_v46 }
  0xc9   :  { %1093 = vst.msk [vmem:[%s2003_s5] sm:$0xff] %vm1090_vm7, %v1088_v32  ;;  %1094 = vst.msk [vmem:[%s2003_s5 + $0x8] sm:$0xff] %vm1090_vm7, %v1089_v20 }

// kernel: reverse.6
= control target key start
LH: loop header
LB: loop body
LE: loop exit
PB: predicated region body
PF: predicated region fallthrough
CT: control target
= control target key end

     0   :  { %s344_s0 = inlined_call_operand.vmem [shape: f32[2,16,16,7], index: 0, kind: input, shape index: {}]   ;;  %s345_s1 = inlined_call_operand.vmem [shape: f32[2,16,16,7], index: 1, kind: output, shape index: {}]  }
   0x1   :  { %v112_v0 = vld [vmem:[%s344_s0 + $0x60] sm:$0xff]  ;;  %v113_v1 = vld [vmem:[%s344_s0 + $0xd0] sm:$0xff]  ;;  %v138_v14 = vld [vmem:[%s344_s0 + $0x68] sm:$0xff] }
   0x2   :  { %v115_v2 = vld [vmem:[%s344_s0 + $0x50] sm:$0xff]  ;;  %4 = vst [vmem:[%s345_s1] sm:$0xff] %v112_v0  ;;  %114 = vst [vmem:[%s345_s1 + $0x70] sm:$0xff] %v113_v1  ;;  %v117_v3 = vld [vmem:[%s344_s0 + $0xc0] sm:$0xff] }
   0x3   :  { %116 = vst [vmem:[%s345_s1 + $0x10] sm:$0xff] %v115_v2  ;;  %v119_v4 = vld [vmem:[%s344_s0 + $0x40] sm:$0xff]  ;;  %v121_v5 = vld [vmem:[%s344_s0 + $0xb0] sm:$0xff]  ;;  %118 = vst [vmem:[%s345_s1 + $0x80] sm:$0xff] %v117_v3 }
   0x4   :  { %120 = vst [vmem:[%s345_s1 + $0x20] sm:$0xff] %v119_v4  ;;  %122 = vst [vmem:[%s345_s1 + $0x90] sm:$0xff] %v121_v5  ;;  %v123_v6 = vld [vmem:[%s344_s0 + $0x30] sm:$0xff]  ;;  %v125_v7 = vld [vmem:[%s344_s0 + $0xa0] sm:$0xff] }
   0x5   :  { %v127_v8 = vld [vmem:[%s344_s0 + $0x20] sm:$0xff]  ;;  %124 = vst [vmem:[%s345_s1 + $0x30] sm:$0xff] %v123_v6  ;;  %126 = vst [vmem:[%s345_s1 + $0xa0] sm:$0xff] %v125_v7  ;;  %v129_v9 = vld [vmem:[%s344_s0 + $0x90] sm:$0xff] }
   0x6   :  { %128 = vst [vmem:[%s345_s1 + $0x40] sm:$0xff] %v127_v8  ;;  %v131_v10 = vld [vmem:[%s344_s0 + $0x10] sm:$0xff]  ;;  %v133_v11 = vld [vmem:[%s344_s0 + $0x80] sm:$0xff]  ;;  %130 = vst [vmem:[%s345_s1 + $0xb0] sm:$0xff] %v129_v9 }
   0x7   :  { %132 = vst [vmem:[%s345_s1 + $0x50] sm:$0xff] %v131_v10  ;;  %134 = vst [vmem:[%s345_s1 + $0xc0] sm:$0xff] %v133_v11  ;;  %v49_v12 = vld [vmem:[%s344_s0] sm:$0xff]  ;;  %v136_v13 = vld [vmem:[%s344_s0 + $0x70] sm:$0xff] }
   0x8   :  { %135 = vst [vmem:[%s345_s1 + $0x60] sm:$0xff] %v49_v12  ;;  %137 = vst [vmem:[%s345_s1 + $0xd0] sm:$0xff] %v136_v13  ;;  %v140_v15 = vld [vmem:[%s344_s0 + $0xd8] sm:$0xff]  ;;  %v144_v17 = vld [vmem:[%s344_s0 + $0xc8] sm:$0xff] }
   0x9   :  { %139 = vst [vmem:[%s345_s1 + $0x8] sm:$0xff] %v138_v14  ;;  %v142_v16 = vld [vmem:[%s344_s0 + $0x58] sm:$0xff]  ;;  %141 = vst [vmem:[%s345_s1 + $0x78] sm:$0xff] %v140_v15  ;;  %v146_v18 = vld [vmem:[%s344_s0 + $0x48] sm:$0xff] }
   0xa   :  { %143 = vst [vmem:[%s345_s1 + $0x18] sm:$0xff] %v142_v16  ;;  %145 = vst [vmem:[%s345_s1 + $0x88] sm:$0xff] %v144_v17  ;;  %v148_v19 = vld [vmem:[%s344_s0 + $0xb8] sm:$0xff]  ;;  %v152_v21 = vld [vmem:[%s344_s0 + $0xa8] sm:$0xff] }
   0xb   :  { %v150_v20 = vld [vmem:[%s344_s0 + $0x38] sm:$0xff]  ;;  %147 = vst [vmem:[%s345_s1 + $0x28] sm:$0xff] %v146_v18  ;;  %149 = vst [vmem:[%s345_s1 + $0x98] sm:$0xff] %v148_v19  ;;  %v154_v22 = vld [vmem:[%s344_s0 + $0x28] sm:$0xff] }
   0xc   :  { %151 = vst [vmem:[%s345_s1 + $0x38] sm:$0xff] %v150_v20  ;;  %v156_v23 = vld [vmem:[%s344_s0 + $0x98] sm:$0xff]  ;;  %153 = vst [vmem:[%s345_s1 + $0xa8] sm:$0xff] %v152_v21  ;;  %v160_v25 = vld [vmem:[%s344_s0 + $0x88] sm:$0xff] }
   0xd   :  { %155 = vst [vmem:[%s345_s1 + $0x48] sm:$0xff] %v154_v22  ;;  %157 = vst [vmem:[%s345_s1 + $0xb8] sm:$0xff] %v156_v23  ;;  %v158_v24 = vld [vmem:[%s344_s0 + $0x18] sm:$0xff]  ;;  %v162_v26 = vld [vmem:[%s344_s0 + $0x8] sm:$0xff] }
   0xe   :  { %159 = vst [vmem:[%s345_s1 + $0x58] sm:$0xff] %v158_v24  ;;  %161 = vst [vmem:[%s345_s1 + $0xc8] sm:$0xff] %v160_v25  ;;  %v164_v27 = vld [vmem:[%s344_s0 + $0x78] sm:$0xff] }
   0xf   :  { %163 = vst [vmem:[%s345_s1 + $0x68] sm:$0xff] %v162_v26  ;;  %165 = vst [vmem:[%s345_s1 + $0xd8] sm:$0xff] %v164_v27 }

// kernel: uno_forward.26
= control target key start
LH: loop header
LB: loop body
LE: loop exit
PB: predicated region body
PF: predicated region fallthrough
CT: control target
= control target key end

     0   :  { %s934_s27 = smov 0   ;;  %s936_s28 = smov 0   ;;  %s1001_s0 = inlined_call_operand.vmem [shape: f32[2,8,256], index: 0, kind: input, shape index: {}]   ;;  %s1002_s1 = inlined_call_operand.vmem [shape: f32[2,8,256], index: 1, kind: input, shape index: {}]   ;;  %s1003_s2 = inlined_call_operand.vmem [shape: f32[2,8,256], index: 2, kind: input, shape index: {}]   ;;  %s1004_s3 = inlined_call_operand.vmem [shape: f32[8,1], index: 3, kind: input, shape index: {}]   ;;  %s1005_s4 = inlined_call_operand.vmem [shape: bf16[4,8], index: 4, kind: input, shape index: {}]   ;;  %s1006_s5 = inlined_call_operand.vmem [shape: f32[4,1], index: 5, kind: input, shape index: {}]   ;;  %s1007_s6 = inlined_call_operand.vmem [shape: bf16[8,4], index: 6, kind: input, shape index: {}]   ;;  %s1008_s7 = inlined_call_operand.vmem [shape: f32[8,1], index: 7, kind: input, shape index: {}]   ;;  %s1009_s8 = inlined_call_operand.vmem [shape: bf16[2,8,256], index: 8, kind: output, shape index: {}]  }
   0x1   :  { %s938_s29 = smov 0  }
   0x2 LB: > { %s30_s30 = sadd.s32 1, %s881_s28  ;;  %p798_p0 = scmp.ge.s32.totalorder %s885_s29, 1  ;;  %s885_s29 = sphi %s938_s29, %s18_s29   ;;  %s881_s28 = sphi %s936_s28, %s1011_s28   ;;  %s877_s27 = sphi %s934_s27, %s1010_s27  }
   0x3   : > { %p32_p1 = scmp.ge.s32.totalorder %s30_s30, 2  ;;  %p317_p2 = scmp.lt.s32.totalorder %s885_s29, 3 }
   0x5   : > { %s1013_s30 = smov (%p32_p1, %s30_s30), 0  ;;  %p318_p3 = pnand %p798_p0, %p317_p2 }
   0x6   : > { %v420_v0 = vld [vmem:[%s1004_s3] sm:$0xff] (!%p318_p3)  ;;  %v887_v1 = vmov (!%p318_p3), 0   ;;  %p378_p4 = scmp.lt.s32.totalorder (!%p318_p3), %s877_s27, 1  ;;  %v888_v52 = vmov (!%p318_p3), -1.0   ;;  %vm497_vm2 = vcmask (!%p318_p3), 1043456   ;;  %vm493_vm3 = vcmask (!%p318_p3), 64512  }
   0x7   : > { %321 = sbr.rel (%p318_p3) target bundleno = 682 (0x2aa), region = 52  ;;  %845 = vset.pattern.permute.xlu0 (!%p318_p3), %v887_v1  ;;  %536 = vmatprep.mubr.bf16.mxu0 (!%p318_p3), %v887_v1  ;;  %v487_v2 = vld [vmem:[%s1006_s5] sm:$0xf] (!%p318_p3)  ;;  %vm610_vm6 = vcmask (!%p318_p3), 1041408   ;;  %vm606_vm7 = vcmask (!%p318_p3), 31744  }
   0x8   : > { %423 = vperm.xlu0 (!%p318_p3), %845, %v420_v0   ;;  %649 = vmatprep.mubr.bf16.mxu1 (!%p318_p3), %v887_v1 }
   0x9   : > { %846 = vset.pattern.permute.xlu1 (!%p318_p3), %v887_v1 }
   0xc   : > { %490 = vperm.xlu0 (!%p318_p3), %845, %v487_v2   ;;  %v484_v2 = vld [vmem:[%s1005_s4] sm:$0x3] (!%p318_p3) }
   0xe   : > { %s1015_s27 = smov (!%p378_p4, %s877_s27), 1 }
   0xf   : > { %s961_s13 = sshll.u32 %s1015_s27, 4  ;;  %s817_s11 = sshll.u32 %s1015_s27, 3 }
  0x10   : > { %s385_s16 = scalar_lea.vmem %s1001_s0, %s961_s13  ;;  %s395_s19 = scalar_lea.vmem %s1002_s1, %s961_s13 }
  0x11   : > { %v418_v3 = vld [vmem:[%s385_s16] sm:$0xff]  ;;  %v419_v4 = vld [vmem:[%s385_s16 + $0x8] sm:$0xff]  ;;  %s405_s10 = scalar_lea.vmem %s1003_s2, %s961_s13  ;;  %s415_s15 = scalar_lea.vmem %s1009_s8, %s817_s11 }
  0x12   : > { %v428_v6 = vld [vmem:[%s395_s19] sm:$0xff]  ;;  %v429_v7 = vld [vmem:[%s395_s19 + $0x8] sm:$0xff] }
  0x87   : > { %v424_v5 = vpop.permute.xlu0 %423 }
  0x88   : > { %v426_v8 = vadd.f32 %v424_v5, %v418_v3  ;;  %v427_v9 = vadd.f32 %v424_v5, %v419_v4  ;;  %v600_v3 = vld [vmem:[%s1008_s7] sm:$0xff] }
  0x89   : > { %603 = vperm.xlu1 %846, %v600_v3   ;;  %v658_v3 = vld [vmem:[%s405_s10] sm:$0xff] }
  0x8a   : > { %v430_v10 = vadd.f32 %v428_v6, %v426_v8  ;;  %v431_v11 = vadd.f32 %v429_v7, %v427_v9 }
  0x8b   : > { %v491_v4 = vpop.permute.xlu0 %490 }
  0x8c   : > { %v434_v12 = vmul.f32 0.70710677, %v430_v10  ;;  %v435_v13 = vmul.f32 0.70710677, %v431_v11  ;;  %v432_v57 = vmul.f32 0.5, %v430_v10  ;;  %v433_v59 = vmul.f32 0.5, %v431_v11 }
  0x8e   : > { %v440_v14 = vand.u32 2147483647, %v434_v12  ;;  %v441_v15 = vand.u32 2147483647, %v435_v13  ;;  %vm436_vm0 = vcmp.ge.f32.partialorder %v434_v12, 0.0  ;;  %vm437_vm1 = vcmp.ge.f32.partialorder %v435_v13, 0.0 }
  0x8f   : > { %v438_v53 = vsel %vm436_vm0, 1.0, %v888_v52  ;;  %v439_v54 = vsel %vm437_vm1, 1.0, %v888_v52 }
  0x90   : > { %v442_v16 = vmul.f32 0.3275911, %v440_v14  ;;  %v443_v17 = vmul.f32 0.3275911, %v441_v15  ;;  %v466_v20 = vsub.f32 0.0, %v440_v14  ;;  %v467_v21 = vsub.f32 0.0, %v441_v15 }
  0x92   : > { %v444_v18 = vadd.f32 1.0, %v442_v16  ;;  %v445_v19 = vadd.f32 1.0, %v443_v17  ;;  %v468_v23 = vmul.f32 %v466_v20, %v440_v14  ;;  %v469_v25 = vmul.f32 %v467_v21, %v441_v15 }
  0x94   : > { %847 = vrcp.f32 %v444_v18  ;;  %v470_v29 = vmul.f32 1.442695, %v468_v23  ;;  %v472_v31 = vmul.f32 1.442695, %v469_v25 }
  0x95   : > { %849 = vrcp.f32 %v445_v19 }
  0x96   : > { %851 = vpow2.f32 %v470_v29 }
  0x97   : > { %853 = vpow2.f32 %v472_v31 }
  0x9e   : > { %v848_v22 = vpop.eup %847 }
  0x9f   : > { %v850_v24 = vpop.eup %849  ;;  %v448_v26 = vmul.f32 1.0614054, %v848_v22 }
  0xa0   : > { %v449_v27 = vmul.f32 1.0614054, %v850_v24  ;;  %v852_v45 = vpop.eup %851 }
  0xa1   : > { %v450_v28 = vadd.f32 -1.4531521, %v448_v26  ;;  %v854_v47 = vpop.eup %853 }
  0xa2   : > { %v451_v30 = vadd.f32 -1.4531521, %v449_v27 }
  0xa3   : > { %v452_v32 = vmul.f32 %v848_v22, %v450_v28 }
  0xa4   : > { %v453_v33 = vmul.f32 %v850_v24, %v451_v30 }
  0xa5   : > { %v454_v34 = vadd.f32 1.4214138, %v452_v32 }
  0xa6   : > { %v455_v35 = vadd.f32 1.4214138, %v453_v33 }
  0xa7   : > { %v456_v36 = vmul.f32 %v848_v22, %v454_v34 }
  0xa8   : > { %v457_v37 = vmul.f32 %v850_v24, %v455_v35 }
  0xa9   : > { %v458_v38 = vadd.f32 -0.28449672, %v456_v36 }
  0xaa   : > { %v459_v39 = vadd.f32 -0.28449672, %v457_v37 }
  0xab   : > { %v460_v40 = vmul.f32 %v848_v22, %v458_v38 }
  0xac   : > { %v461_v41 = vmul.f32 %v850_v24, %v459_v39 }
  0xad   : > { %v462_v42 = vadd.f32 0.2548296, %v460_v40 }
  0xae   : > { %v463_v43 = vadd.f32 0.2548296, %v461_v41 }
  0xaf   : > { %v464_v44 = vmul.f32 %v848_v22, %v462_v42 }
  0xb0   : > { %v465_v46 = vmul.f32 %v850_v24, %v463_v43 }
  0xb1   : > { %v474_v48 = vmul.f32 %v852_v45, %v464_v44 }
  0xb2   : > { %v475_v49 = vmul.f32 %v854_v47, %v465_v46 }
  0xb3   : > { %v476_v50 = vsub.f32 1.0, %v474_v48 }
  0xb4   : > { %v477_v51 = vsub.f32 1.0, %v475_v49 }
  0xb5   : > { %v478_v55 = vmul.f32 %v476_v50, %v438_v53 }
  0xb6   : > { %v479_v56 = vmul.f32 %v477_v51, %v439_v54 }
  0xb7   : > { %v480_v58 = vadd.f32 1.0, %v478_v55 }
  0xb8   : > { %v481_v60 = vadd.f32 1.0, %v479_v56 }
  0xb9   : > { %v482_v61 = vmul.f32 %v480_v58, %v432_v57 }
  0xba   : > { %v483_v62 = vmul.f32 %v481_v60, %v433_v59 }
  0xbb   : > { %v485_v63 = vpack.c.bf16 %v482_v61, %v482_v61 }
  0xbc   : > { %v486_v0 = vpack.c.bf16 %v483_v62, %v483_v62 }
  0xbd   : > { %v499_v1 = vsel %vm497_vm2, %v485_v63, 0 }
  0xbe   : > { %807 = vmatprep.subr.msk.bf16.mxu0 %vm497_vm2, %v486_v0 }
  0xbf   : > { %505 = vmatpush1.bf16.msra.mxu0 %v499_v1 }
  0xc2   : > { %808 = vmatmul.mubr.msk.bf16.vlgmr.msra.gmra.mrb[0].mxu0 %vm493_vm3, %v484_v2 }
 0x108   : > { %v604_v1 = vpop.permute.xlu1 %603 }
 0x195   : > { %v538_v5 = vpop.f32.mrb[0].mxu0 }
 0x196   : > { %v539_v6 = vadd.f32 %v538_v5, %v491_v4  ;;  %v540_v7 = vpop.f32.mrb[1].mxu0 }
 0x197   : > { %v541_v8 = vadd.f32 %v540_v7, %v491_v4  ;;  %v542_v9 = vpop.f32.mrb[2].mxu0 }
 0x198   : > { %v547_v10 = vmul.f32 0.70710677, %v539_v6  ;;  %v543_v11 = vpop.f32.mrb[3].mxu0  ;;  %v545_v56 = vmul.f32 0.5, %v539_v6  ;;  %v659_v6 = vld [vmem:[%s405_s10 + $0x8] sm:$0xff] }
 0x199   : > { %v548_v12 = vmul.f32 0.70710677, %v541_v8  ;;  %v546_v58 = vmul.f32 0.5, %v541_v8 }
 0x19a   : > { %v553_v13 = vand.u32 2147483647, %v547_v10  ;;  %vm549_vm4 = vcmp.ge.f32.partialorder %v547_v10, 0.0 }
 0x19b   : > { %v554_v14 = vand.u32 2147483647, %v548_v12  ;;  %vm550_vm5 = vcmp.ge.f32.partialorder %v548_v12, 0.0  ;;  %v551_v50 = vsel %vm549_vm4, 1.0, %v888_v52 }
 0x19c   : > { %v555_v15 = vmul.f32 0.3275911, %v553_v13  ;;  %v579_v19 = vsub.f32 0.0, %v553_v13  ;;  %v552_v53 = vsel %vm550_vm5, 1.0, %v888_v52  ;;  %v597_v52 = vld [vmem:[%s1007_s6] sm:$0xf] }
 0x19d   : > { %v556_v16 = vmul.f32 0.3275911, %v554_v14  ;;  %v580_v20 = vsub.f32 0.0, %v554_v14 }
 0x19e   : > { %v557_v17 = vadd.f32 1.0, %v555_v15  ;;  %v581_v22 = vmul.f32 %v579_v19, %v553_v13 }
 0x19f   : > { %v558_v18 = vadd.f32 1.0, %v556_v16  ;;  %v582_v24 = vmul.f32 %v580_v20, %v554_v14 }
 0x1a0   : > { %855 = vrcp.f32 %v557_v17  ;;  %v583_v28 = vmul.f32 1.442695, %v581_v22 }
 0x1a1   : > { %857 = vrcp.f32 %v558_v18  ;;  %v585_v30 = vmul.f32 1.442695, %v582_v24 }
 0x1a2   : > { %859 = vpow2.f32 %v583_v28 }
 0x1a3   : > { %861 = vpow2.f32 %v585_v30 }
 0x1aa   : > { %v856_v21 = vpop.eup %855 }
 0x1ab   : > { %v858_v23 = vpop.eup %857  ;;  %v561_v25 = vmul.f32 1.0614054, %v856_v21 }
 0x1ac   : > { %v562_v26 = vmul.f32 1.0614054, %v858_v23  ;;  %v860_v44 = vpop.eup %859 }
 0x1ad   : > { %v563_v27 = vadd.f32 -1.4531521, %v561_v25  ;;  %v862_v46 = vpop.eup %861 }
 0x1ae   : > { %v564_v29 = vadd.f32 -1.4531521, %v562_v26 }
 0x1af   : > { %v565_v31 = vmul.f32 %v856_v21, %v563_v27 }
 0x1b0   : > { %v566_v32 = vmul.f32 %v858_v23, %v564_v29 }
 0x1b1   : > { %v567_v33 = vadd.f32 1.4214138, %v565_v31 }
 0x1b2   : > { %v568_v34 = vadd.f32 1.4214138, %v566_v32 }
 0x1b3   : > { %v569_v35 = vmul.f32 %v856_v21, %v567_v33 }
 0x1b4   : > { %v570_v36 = vmul.f32 %v858_v23, %v568_v34 }
 0x1b5   : > { %v571_v37 = vadd.f32 -0.28449672, %v569_v35 }
 0x1b6   : > { %v572_v38 = vadd.f32 -0.28449672, %v570_v36 }
 0x1b7   : > { %v573_v39 = vmul.f32 %v856_v21, %v571_v37 }
 0x1b8   : > { %v574_v40 = vmul.f32 %v858_v23, %v572_v38 }
 0x1b9   : > { %v575_v41 = vadd.f32 0.2548296, %v573_v39 }
 0x1ba   : > { %v576_v42 = vadd.f32 0.2548296, %v574_v40 }
 0x1bb   : > { %v577_v43 = vmul.f32 %v856_v21, %v575_v41 }
 0x1bc   : > { %v578_v45 = vmul.f32 %v858_v23, %v576_v42 }
 0x1bd   : > { %v587_v47 = vmul.f32 %v860_v44, %v577_v43 }
 0x1be   : > { %v588_v48 = vmul.f32 %v862_v46, %v578_v45 }
 0x1bf   : > { %v589_v49 = vsub.f32 1.0, %v587_v47 }
 0x1c0   : > { %v590_v51 = vsub.f32 1.0, %v588_v48 }
 0x1c1   : > { %v591_v54 = vmul.f32 %v589_v49, %v551_v50 }
 0x1c2   : > { %v592_v55 = vmul.f32 %v590_v51, %v552_v53 }
 0x1c3   : > { %v593_v57 = vadd.f32 1.0, %v591_v54 }
 0x1c4   : > { %v594_v59 = vadd.f32 1.0, %v592_v55 }
 0x1c5   : > { %v595_v60 = vmul.f32 %v593_v57, %v545_v56 }
 0x1c6   : > { %v596_v61 = vmul.f32 %v594_v59, %v546_v58 }
 0x1c7   : > { %v598_v62 = vpack.c.bf16 %v595_v60, %v595_v60 }
 0x1c8   : > { %v599_v63 = vpack.c.bf16 %v596_v61, %v596_v61 }
 0x1c9   : > { %v612_v0 = vsel %vm610_vm6, %v598_v62, 0 }
 0x1ca   : > { %809 = vmatprep.subr.msk.bf16.mxu1 %vm610_vm6, %v599_v63 }
 0x1cb   : > { %618 = vmatpush1.bf16.msra.mxu1 %v612_v0 }
 0x1ce   : > { %810 = vmatmul.mubr.msk.bf16.vlgmr.msra.gmra.mrb[0].mxu1 %vm606_vm7, %v597_v52 }
 0x2a1   : > { %v651_v2 = vpop.f32.mrb[0].mxu1 }
 0x2a2   : > { %v652_v4 = vadd.f32 %v651_v2, %v604_v1  ;;  %v653_v5 = vpop.f32.mrb[1].mxu1 }
 0x2a3   : > { %v654_v7 = vadd.f32 %v653_v5, %v604_v1  ;;  %v655_v8 = vpop.f32.mrb[2].mxu1 }
 0x2a4   : > { %v660_v9 = vadd.f32 %v658_v3, %v652_v4  ;;  %v656_v10 = vpop.f32.mrb[3].mxu1 }
 0x2a5   : > { %v661_v11 = vadd.f32 %v659_v6, %v654_v7 }
 0x2a7   : > { %v818_v12 = vpack.c.bf16 %v661_v11, %v660_v9 }
 0x2a9   : > { %670 = vst [vmem:[%s415_s15] sm:$0xff] %v818_v12 }
 0x2aa PF: > { %s18_s29 = sadd.s32 1, %s885_s29   ;;  %s1010_s27 = smov %s881_s28 }
 0x2ab   : > { %p15_p5 = scmp.ge.s32.totalorder %s18_s29, 4   ;;  %s1011_s28 = smov %s1013_s30 }
 0x2ad   :  { %17 = sbr.rel (!%p15_p5) target bundleno = 2 (0x2), region = 88 }

// kernel: uno_forward.27
= control target key start
LH: loop header
LB: loop body
LE: loop exit
PB: predicated region body
PF: predicated region fallthrough
CT: control target
= control target key end

     0   :  { %s735_s20 = smov 0   ;;  %s737_s21 = smov 0   ;;  %s816_s0 = inlined_call_operand.vmem [shape: bf16[2,8,256], index: 0, kind: input, shape index: {}]   ;;  %s817_s1 = inlined_call_operand.vmem [shape: bf16[16,8], index: 1, kind: input, shape index: {}]   ;;  %s818_s2 = inlined_call_operand.vmem [shape: f32[16,1], index: 2, kind: input, shape index: {}]   ;;  %s819_s3 = inlined_call_operand.vmem [shape: bf16[1,16], index: 3, kind: input, shape index: {}]   ;;  %s820_s4 = inlined_call_operand.<no memory space> [shape: f32[1,1], index: 4, kind: input, shape index: {}]   ;;  %s821_s5 = inlined_call_operand.vmem [shape: f32[2,1,256], index: 5, kind: output, shape index: {}]  }
   0x1   :  { %v10_v0 = vstv %s820_s4  ;;  %s739_s22 = smov 0  }
   0x2   :  { %11 = vst [vmem:[#allocation2] sm:$0x1] %v10_v0 }
   0x3 LB: > { %s29_s4 = sadd.s32 1, %s693_s21  ;;  %p614_p0 = scmp.ge.s32.totalorder %s697_s22, 1  ;;  %s697_s22 = sphi %s739_s22, %s17_s22   ;;  %s693_s21 = sphi %s737_s21, %s823_s21   ;;  %s689_s20 = sphi %s735_s20, %s822_s20  }
   0x4   : > { %p31_p1 = scmp.ge.s32.totalorder %s29_s4, 2  ;;  %p210_p2 = scmp.lt.s32.totalorder %s697_s22, 3 }
   0x6   : > { %s825_s4 = smov (%p31_p1, %s29_s4), 0  ;;  %p211_p3 = pnand %p614_p0, %p210_p2 }
   0x7   : > { %p246_p4 = scmp.lt.s32.totalorder (!%p211_p3), %s689_s20, 1  ;;  %v699_v1 = vmov (!%p211_p3), 0   ;;  %v268_v2 = vld [vmem:[%s818_s2] sm:$0xff] (!%p211_p3)  ;;  %v269_v3 = vld [vmem:[%s818_s2 + $0x8] sm:$0xff] (!%p211_p3)  ;;  %vm294_vm0 = vcmask (!%p211_p3), 1043456   ;;  %vm290_vm1 = vcmask (!%p211_p3), 64512  }
   0x8   : > { %214 = sbr.rel (%p211_p3) target bundleno = 517 (0x205), region = 40  ;;  %333 = vmatprep.mubr.bf16.mxu0 (!%p211_p3), %v699_v1  ;;  %654 = vset.pattern.permute.xlu0 (!%p211_p3), %v699_v1  ;;  %v658_v8 = vld [vmem:[%s817_s1] sm:$0xff] (!%p211_p3)   ;;  %vm461_vm6 = vcmask (!%p211_p3), 130048  }
   0x9   : > { %272 = vperm.xlu0 (!%p211_p3), %654, %v268_v2   ;;  %497 = vmatprep.mubr.bf16.mxu1 (!%p211_p3), %v699_v1  ;;  %v451_v9 = vld [vmem:[#allocation2] sm:$0x1] (!%p211_p3) }
   0xa   : > { %655 = vset.pattern.permute.xlu1 (!%p211_p3), %v699_v1 }
   0xb   : > { %454 = vperm.xlu1 (!%p211_p3), %655, %v451_v9  }
   0xd   : > { %277 = vperm.xlu0 (!%p211_p3), %654, %v269_v3  }
   0xf   : > { %s827_s20 = smov (!%p246_p4, %s689_s20), 1 }
  0x10   : > { %s626_s27 = sshll.u32 %s827_s20, 3  ;;  %s617_s10 = sshll.u32 %s827_s20, 1 }
  0x11   : > { %s253_s30 = scalar_lea.vmem %s816_s0, %s626_s27  ;;  %s262_s13 = scalar_lea.vmem %s821_s5, %s617_s10 }
  0x12   : > { %v265_v4 = vld [vmem:[%s253_s30] sm:$0xff] }
  0x13   : > { %v620_v5 = vcombine.high %v265_v4, %v265_v4  ;;  %v619_v6 = vcombine.low %v265_v4, %v265_v4 }
  0x15   : > { %621 = vmatprep.subr.msk.bf16.mxu0 %vm294_vm0, %v620_v5  ;;  %v296_v7 = vsel %vm294_vm0, %v619_v6, 0 }
  0x16   : > { %302 = vmatpush1.bf16.msra.mxu0 %v296_v7 }
  0x19   : > { %622 = vmatmul.mubr.msk.bf16.vlgmr.msra.gmra.mrb[0].mxu0 %vm290_vm1, %v658_v8 }
  0x88   : > { %v273_v10 = vpop.permute.xlu0 %272 }
  0x8c   : > { %v278_v14 = vpop.permute.xlu0 %277 }
  0xec   : > { %v335_v11 = vpop.f32.mrb[0].mxu0 }
  0xed   : > { %v768_v12 = vadd.f32 %v335_v11, %v273_v10  ;;  %v337_v13 = vpop.f32.mrb[1].mxu0 }
  0xee   : > { %v770_v15 = vadd.f32 %v337_v13, %v273_v10  ;;  %v339_v16 = vpop.f32.mrb[2].mxu0 }
  0xef   : > { %v773_v17 = vmul.f32 0.70710677, %v768_v12  ;;  %v775_v18 = vadd.f32 %v339_v16, %v278_v14  ;;  %v341_v19 = vpop.f32.mrb[3].mxu0 }
  0xf0   : > { %v778_v20 = vmul.f32 0.70710677, %v770_v15  ;;  %v780_v21 = vadd.f32 %v341_v19, %v278_v14 }
  0xf1   : > { %v360_v22 = vand.u32 2147483647, %v773_v17  ;;  %v784_v23 = vmul.f32 0.70710677, %v775_v18  ;;  %vm352_vm2 = vcmp.ge.f32.partialorder %v773_v17, 0.0 }
  0xf2   : > { %v361_v24 = vand.u32 2147483647, %v778_v20  ;;  %v789_v28 = vmul.f32 0.70710677, %v780_v21  ;;  %vm353_vm3 = vcmp.ge.f32.partialorder %v778_v20, 0.0 }
  0xf3   : > { %v364_v25 = vmul.f32 0.3275911, %v360_v22  ;;  %v362_v26 = vand.u32 2147483647, %v784_v23  ;;  %v412_v36 = vsub.f32 0.0, %v360_v22  ;;  %vm354_vm4 = vcmp.ge.f32.partialorder %v784_v23, 0.0 }
  0xf4   : > { %v365_v27 = vmul.f32 0.3275911, %v361_v24  ;;  %v363_v32 = vand.u32 2147483647, %v789_v28  ;;  %v413_v37 = vsub.f32 0.0, %v361_v24  ;;  %vm355_vm5 = vcmp.ge.f32.partialorder %v789_v28, 0.0 }
  0xf5   : > { %v368_v29 = vadd.f32 1.0, %v364_v25  ;;  %v366_v30 = vmul.f32 0.3275911, %v362_v26  ;;  %v416_v39 = vmul.f32 %v412_v36, %v360_v22  ;;  %v414_v40 = vsub.f32 0.0, %v362_v26 }
  0xf6   : > { %v369_v31 = vadd.f32 1.0, %v365_v27  ;;  %v367_v34 = vmul.f32 0.3275911, %v363_v32  ;;  %v417_v42 = vmul.f32 %v413_v37, %v361_v24  ;;  %v415_v44 = vsub.f32 0.0, %v363_v32 }
  0xf7   : > { %659 = vrcp.f32 %v368_v29  ;;  %v370_v33 = vadd.f32 1.0, %v366_v30  ;;  %v420_v48 = vmul.f32 1.442695, %v416_v39  ;;  %v418_v49 = vmul.f32 %v414_v40, %v362_v26 }
  0xf8   : > { %661 = vrcp.f32 %v369_v31  ;;  %v371_v35 = vadd.f32 1.0, %v367_v34  ;;  %v422_v51 = vmul.f32 1.442695, %v417_v42  ;;  %v419_v55 = vmul.f32 %v415_v44, %v363_v32 }
  0xf9   : > { %663 = vrcp.f32 %v370_v33  ;;  %v424_v60 = vmul.f32 1.442695, %v418_v49  ;;  %v700_v37 = vmov -1.0  }
  0xfa   : > { %665 = vrcp.f32 %v371_v35  ;;  %v426_v1 = vmul.f32 1.442695, %v419_v55  ;;  %v356_v39 = vsel %vm352_vm2, 1.0, %v700_v37  ;;  %v357_v17 = vsel %vm353_vm3, 1.0, %v700_v37 }
  0xfb   : > { %667 = vpow2.f32 %v420_v48  ;;  %v358_v20 = vsel %vm354_vm4, 1.0, %v700_v37  ;;  %v345_v55 = vmul.f32 0.5, %v770_v15 }
  0xfc   : > { %669 = vpow2.f32 %v422_v51  ;;  %v359_v51 = vsel %vm355_vm5, 1.0, %v700_v37 }
  0xfd   : > { %671 = vpow2.f32 %v424_v60 }
  0xfe   : > { %673 = vpow2.f32 %v426_v1 }
 0x101   : > { %v660_v38 = vpop.eup %659 }
 0x102   : > { %v662_v41 = vpop.eup %661  ;;  %v376_v43 = vmul.f32 1.0614054, %v660_v38 }
 0x103   : > { %v377_v45 = vmul.f32 1.0614054, %v662_v41  ;;  %v664_v47 = vpop.eup %663 }
 0x104   : > { %v380_v46 = vadd.f32 -1.4531521, %v376_v43  ;;  %v378_v52 = vmul.f32 1.0614054, %v664_v47  ;;  %v666_v54 = vpop.eup %665 }
 0x105   : > { %v381_v50 = vadd.f32 -1.4531521, %v377_v45  ;;  %v379_v57 = vmul.f32 1.0614054, %v666_v54  ;;  %v668_v25 = vpop.eup %667 }
 0x106   : > { %v384_v53 = vmul.f32 %v660_v38, %v380_v46  ;;  %v382_v58 = vadd.f32 -1.4531521, %v378_v52  ;;  %v670_v27 = vpop.eup %669  ;;  %v346_v52 = vmul.f32 0.5, %v775_v18  ;;  %v457_v18 = vlaneseq }
 0x107   : > { %v385_v56 = vmul.f32 %v662_v41, %v381_v50  ;;  %v383_v62 = vadd.f32 -1.4531521, %v379_v57  ;;  %v672_v36 = vpop.eup %671  ;;  %v344_v50 = vmul.f32 0.5, %v768_v12  ;;  %v448_v12 = vld [vmem:[%s819_s3] sm:$0x1] }
 0x108   : > { %v388_v59 = vadd.f32 1.4214138, %v384_v53  ;;  %v386_v63 = vmul.f32 %v664_v47, %v382_v58  ;;  %v674_v43 = vpop.eup %673  ;;  %v458_v15 = vshrl.u32 %v457_v18, 7  ;;  %vm526_vm7 = vcmp.lt.s32.totalorder %v457_v18, 256 }
 0x109   : > { %v389_v61 = vadd.f32 1.4214138, %v385_v56  ;;  %v387_v3 = vmul.f32 %v666_v54, %v383_v62  ;;  %v347_v56 = vmul.f32 0.5, %v780_v21  ;;  %v455_v21 = vpop.permute.xlu1 %454 }
 0x10a   : > { %v392_v0 = vmul.f32 %v660_v38, %v388_v59  ;;  %v390_v4 = vadd.f32 1.4214138, %v386_v63  ;;  %v459_v63 = vsub.s32 0, %v458_v15 }
 0x10b   : > { %v393_v2 = vmul.f32 %v662_v41, %v389_v61  ;;  %v391_v7 = vadd.f32 1.4214138, %v387_v3 }
 0x10c   : > { %v396_v5 = vadd.f32 -0.28449672, %v392_v0  ;;  %v394_v8 = vmul.f32 %v664_v47, %v390_v4  ;;  %v701_v0 = vmov 1966171168  }
 0x10d   : > { %v397_v6 = vadd.f32 -0.28449672, %v393_v2  ;;  %v395_v11 = vmul.f32 %v666_v54, %v391_v7  ;;  %v510_v1 = vunpack.c.l.s4 %v701_v0  ;;  %v460_v2 = vrot.slane %v455_v21, %v459_v63 }
 0x10e   : > { %v400_v9 = vmul.f32 %v660_v38, %v396_v5  ;;  %v398_v13 = vadd.f32 -0.28449672, %v394_v8 }
 0x10f   : > { %v401_v10 = vmul.f32 %v662_v41, %v397_v6  ;;  %v399_v19 = vadd.f32 -0.28449672, %v395_v11  ;;  %v511_v3 = vunpack.c.0.s8 %v510_v1 }
 0x110   : > { %v404_v14 = vadd.f32 0.2548296, %v400_v9  ;;  %v402_v22 = vmul.f32 %v664_v47, %v398_v13 }
 0x111   : > { %v405_v16 = vadd.f32 0.2548296, %v401_v10  ;;  %v403_v29 = vmul.f32 %v666_v54, %v399_v19  ;;  %v514_v8 = vsub.s32 %v511_v3, %v458_v15 }
 0x112   : > { %v408_v24 = vmul.f32 %v660_v38, %v404_v14  ;;  %v406_v30 = vadd.f32 0.2548296, %v402_v22 }
 0x113   : > { %v409_v26 = vmul.f32 %v662_v41, %v405_v16  ;;  %v407_v33 = vadd.f32 0.2548296, %v403_v29 }
 0x114   : > { %v428_v31 = vmul.f32 %v668_v25, %v408_v24  ;;  %v410_v34 = vmul.f32 %v664_v47, %v406_v30 }
 0x115   : > { %v429_v32 = vmul.f32 %v670_v27, %v409_v26  ;;  %v411_v38 = vmul.f32 %v666_v54, %v407_v33 }
 0x116   : > { %v432_v35 = vsub.f32 1.0, %v428_v31  ;;  %v430_v41 = vmul.f32 %v672_v36, %v410_v34 }
 0x117   : > { %v433_v40 = vsub.f32 1.0, %v429_v32  ;;  %v431_v44 = vmul.f32 %v674_v43, %v411_v38 }
 0x118   : > { %v436_v42 = vmul.f32 %v432_v35, %v356_v39  ;;  %v434_v46 = vsub.f32 1.0, %v430_v41 }
 0x119   : > { %v437_v45 = vmul.f32 %v433_v40, %v357_v17  ;;  %v435_v48 = vsub.f32 1.0, %v431_v44 }
 0x11a   : > { %v438_v47 = vmul.f32 %v434_v46, %v358_v20  ;;  %v440_v49 = vadd.f32 1.0, %v436_v42 }
 0x11b   : > { %v439_v23 = vmul.f32 %v435_v48, %v359_v51  ;;  %v441_v53 = vadd.f32 1.0, %v437_v45 }
 0x11c   : > { %v442_v54 = vadd.f32 1.0, %v438_v47  ;;  %v444_v57 = vmul.f32 %v440_v49, %v344_v50 }
 0x11d   : > { %v443_v28 = vadd.f32 1.0, %v439_v23  ;;  %v445_v59 = vmul.f32 %v441_v53, %v345_v55 }
 0x11e   : > { %v446_v58 = vmul.f32 %v442_v54, %v346_v52 }
 0x11f   : > { %v447_v60 = vmul.f32 %v443_v28, %v347_v56 }
 0x120   : > { %v449_v61 = vpack.c.bf16 %v446_v58, %v444_v57 }
 0x121   : > { %v450_v62 = vpack.c.bf16 %v447_v60, %v445_v59 }
 0x123   : > { %465 = vmatprep.subr.bf16.mxu1 %v450_v62 }
 0x124   : > { %466 = vmatpush1.bf16.msra.mxu1 %v449_v61 }
 0x127   : > { %623 = vmatmul.mubr.msk.bf16.vlgmr.msra.gmra.mrb[0].mxu1 %vm461_vm6, %v448_v12 }
 0x1fa   : > { %v499_v4 = vpop.f32.mrb[0].mxu1 }
 0x1fb   : > { %v500_v5 = vadd.f32 %v499_v4, %v460_v2  ;;  %v501_v6 = vpop.f32.mrb[1].mxu1 }
 0x1fc   : > { %v502_v7 = vadd.f32 %v501_v6, %v460_v2  ;;  %v503_v9 = vpop.f32.mrb[2].mxu1 }
 0x1fd   : > { %v504_v10 = vpop.f32.mrb[3].mxu1 }
 0x1fe   : > { %v508_v11 = vcombine.low %v500_v5, %v502_v7 }
 0x200   : > { %v515_v13 = vrot.slane %v508_v11, %v514_v8 }
 0x202   : > { %v522_v14 = vrot.slane %v515_v13, %v514_v8 }
 0x204   : > { %528 = vst.msk [vmem:[%s262_s13] sm:$0x3] %vm526_vm7, %v522_v14 }
 0x205 PF: > { %s17_s22 = sadd.s32 1, %s697_s22   ;;  %s822_s20 = smov %s693_s21 }
 0x206   : > { %p14_p5 = scmp.ge.s32.totalorder %s17_s22, 4   ;;  %s823_s21 = smov %s825_s4 }
 0x208   :  { %16 = sbr.rel (!%p14_p5) target bundleno = 3 (0x3), region = 70 }

</bundles_post_ra>
